<compile_context>
chip_gen: v5e
topology: v5e:2x2
jax: 0.10.0
libtpu: 0.0.40
codegen_flags: <defaults>
</compile_context>

<pallas_src>
import jax
import jax.numpy as jnp
from jax.experimental import pallas as pl
from jax.experimental.pallas import tpu as pltpu

BN_EPS = 1e-5
OUT_DIM = 784          # fc4 output width (28*28)


def _generator_kernel(
    z_ref, lab_ref,
    w1z_ref, w1l_ref, g1_ref, be1_ref,
    w2_ref, g2_ref, be2_ref,
    w3_ref, g3_ref, be3_ref,
    w4_ref, b4_ref,
    out_ref,
):
    def mm(a_bf16, w_ref):
        # bf16 x bf16 on the MXU, f32 accumulation.
        return jnp.dot(a_bf16, w_ref[...], preferred_element_type=jnp.float32)

    def bn_relu(h, g_ref, be_ref):
        # BatchNorm1d, training mode, single statistics pass:
        #   mu = E[h], var = max(E[h^2] - mu^2, 0)  (biased batch variance).
        n = h.shape[0]
        inv_n = 1.0 / n
        mu = jnp.sum(h, axis=0, keepdims=True) * inv_n
        ex2 = jnp.sum(h * h, axis=0, keepdims=True) * inv_n
        var = jnp.maximum(ex2 - mu * mu, 0.0)
        hn = (h - mu) * jax.lax.rsqrt(var + BN_EPS)
        # Emit bf16 straight out of the ReLU so the next matmul needs no cast.
        return jnp.maximum(hn * g_ref[...] + be_ref[...], 0.0).astype(jnp.bfloat16)

    z = z_ref[...].astype(jnp.bfloat16)       # [B, latent]
    lab = lab_ref[...].astype(jnp.bfloat16)   # [B, 10]

    # fc1_1 + fc1_2 merged block-diagonally (zero blocks contribute nothing);
    # BN-layer linear biases are exactly cancelled by the BN mean subtraction.
    h = bn_relu(mm(z, w1z_ref) + mm(lab, w1l_ref), g1_ref, be1_ref)   # [B, 512]
    h = bn_relu(mm(h, w2_ref), g2_ref, be2_ref)                       # [B, 512]
    h = bn_relu(mm(h, w3_ref), g3_ref, be3_ref)                       # [B, 1024]
    out_ref[...] = jnp.tanh(mm(h, w4_ref) + b4_ref[...]).astype(out_ref.dtype)


def generator_forward(z, label, params):
    """z: [B, latent] f32, label: [B, 10] f32 (one-hot). Returns [B, 784] bf16."""
    B = z.shape[0]
    return pl.pallas_call(
        _generator_kernel,
        out_shape=jax.ShapeDtypeStruct((B, OUT_DIM), jnp.bfloat16),
        compiler_params=pltpu.CompilerParams(vmem_limit_bytes=32 << 20),
    )(
        z, label,
        params["w1z"], params["w1l"], params["g1"], params["be1"],
        params["w2"], params["g2"], params["be2"],
        params["w3"], params["g3"], params["be3"],
        params["w4"], params["b4"],
    )


def init_params(key, latent_size):
    """Deterministic init mirroring normal_init: Linear W ~ N(0, 0.02), bias 0;
    BN gamma=1, beta=0.  Weights stored as [in, out] in bf16.  fc1_1/fc1_2 are
    pre-merged block-diagonally; BN-layer biases are omitted (exactly cancelled
    by training-mode BN); only the fc4 bias is kept."""
    def lin_w(k, fan_in, fan_out):
        return (0.02 * jax.random.normal(k, (fan_in, fan_out), dtype=jnp.float32)
                ).astype(jnp.bfloat16)

    ks = jax.random.split(key, 5)
    p = {}
    w11 = lin_w(ks[0], latent_size, 256)                # fc1_1.weight.T
    w12 = lin_w(ks[1], 10, 256)                         # fc1_2.weight.T
    p["w1z"] = jnp.concatenate(
        [w11, jnp.zeros((latent_size, 256), jnp.bfloat16)], axis=1)   # [latent, 512]
    p["w1l"] = jnp.concatenate(
        [jnp.zeros((10, 256), jnp.bfloat16), w12], axis=1)            # [10, 512]
    p["w2"] = lin_w(ks[2], 512, 512)
    p["w3"] = lin_w(ks[3], 512, 1024)
    p["w4"] = lin_w(ks[4], 1024, OUT_DIM)               # [1024, 784], no padding
    p["b4"] = jnp.zeros((1, OUT_DIM), dtype=jnp.float32)
    for name, dim in (("1", 512), ("2", 512), ("3", 1024)):
        p[f"g{name}"] = jnp.ones((1, dim), dtype=jnp.float32)
        p[f"be{name}"] = jnp.zeros((1, dim), dtype=jnp.float32)
    return p


def _reference_forward(z, label, params):
    """Pure-JAX reference with the same bf16 weight / activation handling."""
    def mm(a, w):
        return jnp.dot(a.astype(jnp.bfloat16), w, preferred_element_type=jnp.float32)

    def bn_relu(h, g, be):
        mu = jnp.mean(h, axis=0, keepdims=True)
        var = jnp.mean((h - mu) ** 2, axis=0, keepdims=True)
        hn = (h - mu) * jax.lax.rsqrt(var + BN_EPS)
        return jnp.maximum(hn * g + be, 0.0).astype(jnp.bfloat16)

    h = bn_relu(mm(z, params["w1z"]) + mm(label, params["w1l"]),
                params["g1"], params["be1"])
    h = bn_relu(mm(h, params["w2"]), params["g2"], params["be2"])
    h = bn_relu(mm(h, params["w3"]), params["g3"], params["be3"])
    return jnp.tanh(mm(h, params["w4"]) + params["b4"]).astype(jnp.bfloat16)


if __name__ == "__main__":
    latent_size = 32
    batch = 64   # training-mode BN needs full-batch stats; weight DMA is batch-independent

    key = jax.random.PRNGKey(0)
    k_param, k_z, k_lab = jax.random.split(key, 3)

    params = init_params(k_param, latent_size)
    z = jax.random.normal(k_z, (batch, latent_size), dtype=jnp.float32)
    labels_idx = jax.random.randint(k_lab, (batch,), 0, 10)
    label = jax.nn.one_hot(labels_idx, 10, dtype=jnp.float32)

    out = generator_forward(z, label, params)
    out = jax.block_until_ready(out)

    ref = _reference_forward(z, label, params)
    assert out.shape == (batch, OUT_DIM)
    err = float(jnp.max(jnp.abs(out.astype(jnp.float32) - ref.astype(jnp.float32))))
    assert err < 1e-2, err

    print("KERNEL_OK")
</pallas_src>

<mosaic_0001>
module attributes {stable_mosaic.version = 11 : i64} {
  func.func @_generator_kernel(%arg0: memref<64x32xf32, #tpu.memory_space<vmem>>, %arg1: memref<64x10xf32, #tpu.memory_space<vmem>>, %arg2: memref<32x512xbf16, #tpu.memory_space<vmem>>, %arg3: memref<10x512xbf16, #tpu.memory_space<vmem>>, %arg4: memref<1x512xf32, #tpu.memory_space<vmem>>, %arg5: memref<1x512xf32, #tpu.memory_space<vmem>>, %arg6: memref<512x512xbf16, #tpu.memory_space<vmem>>, %arg7: memref<1x512xf32, #tpu.memory_space<vmem>>, %arg8: memref<1x512xf32, #tpu.memory_space<vmem>>, %arg9: memref<512x1024xbf16, #tpu.memory_space<vmem>>, %arg10: memref<1x1024xf32, #tpu.memory_space<vmem>>, %arg11: memref<1x1024xf32, #tpu.memory_space<vmem>>, %arg12: memref<1024x784xbf16, #tpu.memory_space<vmem>>, %arg13: memref<1x784xf32, #tpu.memory_space<vmem>>, %arg14: memref<64x784xbf16, #tpu.memory_space<vmem>>) attributes {dimension_semantics = [], scalar_prefetch = 0 : i64, scratch_operands = 0 : i64, tpu.core_type = #tpu.core_type<tc>} {
    %c0 = arith.constant 0 : index
    %c0_0 = arith.constant 0 : index
    %0 = vector.load %arg0[%c0, %c0_0] : memref<64x32xf32, #tpu.memory_space<vmem>>, vector<64x32xf32>
    %1 = arith.truncf %0 : vector<64x32xf32> to vector<64x32xbf16>
    %c0_1 = arith.constant 0 : index
    %c0_2 = arith.constant 0 : index
    %2 = vector.load %arg1[%c0_1, %c0_2] : memref<64x10xf32, #tpu.memory_space<vmem>>, vector<64x10xf32>
    %3 = arith.truncf %2 : vector<64x10xf32> to vector<64x10xbf16>
    %c0_3 = arith.constant 0 : index
    %c0_4 = arith.constant 0 : index
    %4 = vector.load %arg2[%c0_3, %c0_4] : memref<32x512xbf16, #tpu.memory_space<vmem>>, vector<32x512xbf16>
    %cst = arith.constant dense<0.000000e+00> : vector<64x512xf32>
    %5 = tpu.matmul %1, %4, %cst {dimension_numbers = #tpu.dot_dimension_numbers<[1], [0], [0], [1], [0, 0, 1, 1], [], []>} : vector<64x32xbf16>, vector<32x512xbf16>, vector<64x512xf32> -> vector<64x512xf32>
    %c0_5 = arith.constant 0 : index
    %c0_6 = arith.constant 0 : index
    %6 = vector.load %arg3[%c0_5, %c0_6] : memref<10x512xbf16, #tpu.memory_space<vmem>>, vector<10x512xbf16>
    %cst_7 = arith.constant dense<0.000000e+00> : vector<64x512xf32>
    %7 = tpu.matmul %3, %6, %cst_7 {dimension_numbers = #tpu.dot_dimension_numbers<[1], [0], [0], [1], [0, 0, 1, 1], [], []>} : vector<64x10xbf16>, vector<10x512xbf16>, vector<64x512xf32> -> vector<64x512xf32>
    %8 = arith.addf %5, %7 : vector<64x512xf32>
    %cst_8 = arith.constant dense<0.000000e+00> : vector<512xf32>
    %9 = vector.multi_reduction <add>, %8, %cst_8 [0] : vector<64x512xf32> to vector<512xf32>
    %10 = vector.shape_cast %9 : vector<512xf32> to vector<1x512xf32>
    %cst_9 = arith.constant 1.562500e-02 : f32
    %11 = vector.broadcast %cst_9 : f32 to vector<1x512xf32>
    %12 = arith.mulf %10, %11 : vector<1x512xf32>
    %13 = arith.mulf %8, %8 : vector<64x512xf32>
    %cst_10 = arith.constant dense<0.000000e+00> : vector<512xf32>
    %14 = vector.multi_reduction <add>, %13, %cst_10 [0] : vector<64x512xf32> to vector<512xf32>
    %15 = vector.shape_cast %14 : vector<512xf32> to vector<1x512xf32>
    %cst_11 = arith.constant 1.562500e-02 : f32
    %16 = vector.broadcast %cst_11 : f32 to vector<1x512xf32>
    %17 = arith.mulf %15, %16 : vector<1x512xf32>
    %18 = arith.mulf %12, %12 : vector<1x512xf32>
    %19 = arith.subf %17, %18 : vector<1x512xf32>
    %cst_12 = arith.constant 0.000000e+00 : f32
    %20 = vector.broadcast %cst_12 : f32 to vector<1x512xf32>
    %21 = arith.maximumf %19, %20 : vector<1x512xf32>
    %22 = vector.broadcast %12 : vector<1x512xf32> to vector<64x512xf32>
    %23 = arith.subf %8, %22 : vector<64x512xf32>
    %cst_13 = arith.constant 9.99999974E-6 : f32
    %24 = vector.broadcast %cst_13 : f32 to vector<1x512xf32>
    %25 = arith.addf %21, %24 : vector<1x512xf32>
    %26 = math.rsqrt %25 : vector<1x512xf32>
    %27 = vector.broadcast %26 : vector<1x512xf32> to vector<64x512xf32>
    %28 = arith.mulf %23, %27 : vector<64x512xf32>
    %c0_14 = arith.constant 0 : index
    %c0_15 = arith.constant 0 : index
    %29 = vector.load %arg4[%c0_14, %c0_15] : memref<1x512xf32, #tpu.memory_space<vmem>>, vector<1x512xf32>
    %30 = vector.broadcast %29 : vector<1x512xf32> to vector<64x512xf32>
    %31 = arith.mulf %28, %30 : vector<64x512xf32>
    %c0_16 = arith.constant 0 : index
    %c0_17 = arith.constant 0 : index
    %32 = vector.load %arg5[%c0_16, %c0_17] : memref<1x512xf32, #tpu.memory_space<vmem>>, vector<1x512xf32>
    %33 = vector.broadcast %32 : vector<1x512xf32> to vector<64x512xf32>
    %34 = arith.addf %31, %33 : vector<64x512xf32>
    %cst_18 = arith.constant 0.000000e+00 : f32
    %35 = vector.broadcast %cst_18 : f32 to vector<64x512xf32>
    %36 = arith.maximumf %34, %35 : vector<64x512xf32>
    %37 = arith.truncf %36 : vector<64x512xf32> to vector<64x512xbf16>
    %c0_19 = arith.constant 0 : index
    %c0_20 = arith.constant 0 : index
    %38 = vector.load %arg6[%c0_19, %c0_20] : memref<512x512xbf16, #tpu.memory_space<vmem>>, vector<512x512xbf16>
    %cst_21 = arith.constant dense<0.000000e+00> : vector<64x512xf32>
    %39 = tpu.matmul %37, %38, %cst_21 {dimension_numbers = #tpu.dot_dimension_numbers<[1], [0], [0], [1], [0, 0, 1, 1], [], []>} : vector<64x512xbf16>, vector<512x512xbf16>, vector<64x512xf32> -> vector<64x512xf32>
    %cst_22 = arith.constant dense<0.000000e+00> : vector<512xf32>
    %40 = vector.multi_reduction <add>, %39, %cst_22 [0] : vector<64x512xf32> to vector<512xf32>
    %41 = vector.shape_cast %40 : vector<512xf32> to vector<1x512xf32>
    %cst_23 = arith.constant 1.562500e-02 : f32
    %42 = vector.broadcast %cst_23 : f32 to vector<1x512xf32>
    %43 = arith.mulf %41, %42 : vector<1x512xf32>
    %44 = arith.mulf %39, %39 : vector<64x512xf32>
    %cst_24 = arith.constant dense<0.000000e+00> : vector<512xf32>
    %45 = vector.multi_reduction <add>, %44, %cst_24 [0] : vector<64x512xf32> to vector<512xf32>
    %46 = vector.shape_cast %45 : vector<512xf32> to vector<1x512xf32>
    %cst_25 = arith.constant 1.562500e-02 : f32
    %47 = vector.broadcast %cst_25 : f32 to vector<1x512xf32>
    %48 = arith.mulf %46, %47 : vector<1x512xf32>
    %49 = arith.mulf %43, %43 : vector<1x512xf32>
    %50 = arith.subf %48, %49 : vector<1x512xf32>
    %cst_26 = arith.constant 0.000000e+00 : f32
    %51 = vector.broadcast %cst_26 : f32 to vector<1x512xf32>
    %52 = arith.maximumf %50, %51 : vector<1x512xf32>
    %53 = vector.broadcast %43 : vector<1x512xf32> to vector<64x512xf32>
    %54 = arith.subf %39, %53 : vector<64x512xf32>
    %cst_27 = arith.constant 9.99999974E-6 : f32
    %55 = vector.broadcast %cst_27 : f32 to vector<1x512xf32>
    %56 = arith.addf %52, %55 : vector<1x512xf32>
    %57 = math.rsqrt %56 : vector<1x512xf32>
    %58 = vector.broadcast %57 : vector<1x512xf32> to vector<64x512xf32>
    %59 = arith.mulf %54, %58 : vector<64x512xf32>
    %c0_28 = arith.constant 0 : index
    %c0_29 = arith.constant 0 : index
    %60 = vector.load %arg7[%c0_28, %c0_29] : memref<1x512xf32, #tpu.memory_space<vmem>>, vector<1x512xf32>
    %61 = vector.broadcast %60 : vector<1x512xf32> to vector<64x512xf32>
    %62 = arith.mulf %59, %61 : vector<64x512xf32>
    %c0_30 = arith.constant 0 : index
    %c0_31 = arith.constant 0 : index
    %63 = vector.load %arg8[%c0_30, %c0_31] : memref<1x512xf32, #tpu.memory_space<vmem>>, vector<1x512xf32>
    %64 = vector.broadcast %63 : vector<1x512xf32> to vector<64x512xf32>
    %65 = arith.addf %62, %64 : vector<64x512xf32>
    %cst_32 = arith.constant 0.000000e+00 : f32
    %66 = vector.broadcast %cst_32 : f32 to vector<64x512xf32>
    %67 = arith.maximumf %65, %66 : vector<64x512xf32>
    %68 = arith.truncf %67 : vector<64x512xf32> to vector<64x512xbf16>
    %c0_33 = arith.constant 0 : index
    %c0_34 = arith.constant 0 : index
    %69 = vector.load %arg9[%c0_33, %c0_34] : memref<512x1024xbf16, #tpu.memory_space<vmem>>, vector<512x1024xbf16>
    %cst_35 = arith.constant dense<0.000000e+00> : vector<64x1024xf32>
    %70 = tpu.matmul %68, %69, %cst_35 {dimension_numbers = #tpu.dot_dimension_numbers<[1], [0], [0], [1], [0, 0, 1, 1], [], []>} : vector<64x512xbf16>, vector<512x1024xbf16>, vector<64x1024xf32> -> vector<64x1024xf32>
    %cst_36 = arith.constant dense<0.000000e+00> : vector<1024xf32>
    %71 = vector.multi_reduction <add>, %70, %cst_36 [0] : vector<64x1024xf32> to vector<1024xf32>
    %72 = vector.shape_cast %71 : vector<1024xf32> to vector<1x1024xf32>
    %cst_37 = arith.constant 1.562500e-02 : f32
    %73 = vector.broadcast %cst_37 : f32 to vector<1x1024xf32>
    %74 = arith.mulf %72, %73 : vector<1x1024xf32>
    %75 = arith.mulf %70, %70 : vector<64x1024xf32>
    %cst_38 = arith.constant dense<0.000000e+00> : vector<1024xf32>
    %76 = vector.multi_reduction <add>, %75, %cst_38 [0] : vector<64x1024xf32> to vector<1024xf32>
    %77 = vector.shape_cast %76 : vector<1024xf32> to vector<1x1024xf32>
    %cst_39 = arith.constant 1.562500e-02 : f32
    %78 = vector.broadcast %cst_39 : f32 to vector<1x1024xf32>
    %79 = arith.mulf %77, %78 : vector<1x1024xf32>
    %80 = arith.mulf %74, %74 : vector<1x1024xf32>
    %81 = arith.subf %79, %80 : vector<1x1024xf32>
    %cst_40 = arith.constant 0.000000e+00 : f32
    %82 = vector.broadcast %cst_40 : f32 to vector<1x1024xf32>
    %83 = arith.maximumf %81, %82 : vector<1x1024xf32>
    %84 = vector.broadcast %74 : vector<1x1024xf32> to vector<64x1024xf32>
    %85 = arith.subf %70, %84 : vector<64x1024xf32>
    %cst_41 = arith.constant 9.99999974E-6 : f32
    %86 = vector.broadcast %cst_41 : f32 to vector<1x1024xf32>
    %87 = arith.addf %83, %86 : vector<1x1024xf32>
    %88 = math.rsqrt %87 : vector<1x1024xf32>
    %89 = vector.broadcast %88 : vector<1x1024xf32> to vector<64x1024xf32>
    %90 = arith.mulf %85, %89 : vector<64x1024xf32>
    %c0_42 = arith.constant 0 : index
    %c0_43 = arith.constant 0 : index
    %91 = vector.load %arg10[%c0_42, %c0_43] : memref<1x1024xf32, #tpu.memory_space<vmem>>, vector<1x1024xf32>
    %92 = vector.broadcast %91 : vector<1x1024xf32> to vector<64x1024xf32>
    %93 = arith.mulf %90, %92 : vector<64x1024xf32>
    %c0_44 = arith.constant 0 : index
    %c0_45 = arith.constant 0 : index
    %94 = vector.load %arg11[%c0_44, %c0_45] : memref<1x1024xf32, #tpu.memory_space<vmem>>, vector<1x1024xf32>
    %95 = vector.broadcast %94 : vector<1x1024xf32> to vector<64x1024xf32>
    %96 = arith.addf %93, %95 : vector<64x1024xf32>
    %cst_46 = arith.constant 0.000000e+00 : f32
    %97 = vector.broadcast %cst_46 : f32 to vector<64x1024xf32>
    %98 = arith.maximumf %96, %97 : vector<64x1024xf32>
    %99 = arith.truncf %98 : vector<64x1024xf32> to vector<64x1024xbf16>
    %c0_47 = arith.constant 0 : index
    %c0_48 = arith.constant 0 : index
    %100 = vector.load %arg12[%c0_47, %c0_48] : memref<1024x784xbf16, #tpu.memory_space<vmem>>, vector<1024x784xbf16>
    %cst_49 = arith.constant dense<0.000000e+00> : vector<64x784xf32>
    %101 = tpu.matmul %99, %100, %cst_49 {dimension_numbers = #tpu.dot_dimension_numbers<[1], [0], [0], [1], [0, 0, 1, 1], [], []>} : vector<64x1024xbf16>, vector<1024x784xbf16>, vector<64x784xf32> -> vector<64x784xf32>
    %c0_50 = arith.constant 0 : index
    %c0_51 = arith.constant 0 : index
    %102 = vector.load %arg13[%c0_50, %c0_51] : memref<1x784xf32, #tpu.memory_space<vmem>>, vector<1x784xf32>
    %103 = vector.broadcast %102 : vector<1x784xf32> to vector<64x784xf32>
    %104 = arith.addf %101, %103 : vector<64x784xf32>
    %105 = math.tanh %104 : vector<64x784xf32>
    %106 = arith.truncf %105 : vector<64x784xf32> to vector<64x784xbf16>
    %c0_52 = arith.constant 0 : index
    %c0_53 = arith.constant 0 : index
    %107 = vector.load %arg14[%c0_52, %c0_53] : memref<64x784xbf16, #tpu.memory_space<vmem>>, vector<64x784xbf16>
    tpu.vector_store %arg14[%c0_52, %c0_53], %106 {strides = array<i32>} : memref<64x784xbf16, #tpu.memory_space<vmem>>, vector<64x784xbf16>,
    return
  }
}

</mosaic_0001>

<bundles_post_ra>
// kernel: tpu_custom_call.1
= control target key start
LH: loop header
LB: loop body
LE: loop exit
PB: predicated region body
PF: predicated region fallthrough
CT: control target
= control target key end

     0   :  { %vm114_vm0 = vcmask 1044480   ;;  %vm101_vm1 = vcmask 80896   ;;  %s24608_s0 = inlined_call_operand.vmem [shape: f32[64,32], index: 0, kind: input, shape index: {}]   ;;  %s24609_s1 = inlined_call_operand.vmem [shape: f32[64,10], index: 1, kind: input, shape index: {}]   ;;  %s24610_s2 = inlined_call_operand.vmem [shape: bf16[32,512], index: 2, kind: input, shape index: {}]   ;;  %s24611_s3 = inlined_call_operand.vmem [shape: bf16[10,512], index: 3, kind: input, shape index: {}]   ;;  %s24612_s4 = inlined_call_operand.vmem [shape: f32[1,512], index: 4, kind: input, shape index: {}]   ;;  %s24613_s5 = inlined_call_operand.vmem [shape: f32[1,512], index: 5, kind: input, shape index: {}]   ;;  %s24614_s6 = inlined_call_operand.vmem [shape: bf16[512,512], index: 6, kind: input, shape index: {}]   ;;  %s24615_s7 = inlined_call_operand.vmem [shape: f32[1,512], index: 7, kind: input, shape index: {}]   ;;  %s24616_s8 = inlined_call_operand.vmem [shape: f32[1,512], index: 8, kind: input, shape index: {}]   ;;  %s24617_s9 = inlined_call_operand.vmem [shape: bf16[512,1024], index: 9, kind: input, shape index: {}]   ;;  %s24618_s10 = inlined_call_operand.vmem [shape: f32[1,1024], index: 10, kind: input, shape index: {}]   ;;  %s24619_s11 = inlined_call_operand.vmem [shape: f32[1,1024], index: 11, kind: input, shape index: {}]   ;;  %s24620_s12 = inlined_call_operand.vmem [shape: bf16[1024,784], index: 12, kind: input, shape index: {}]   ;;  %s24621_s13 = inlined_call_operand.vmem [shape: f32[1,784], index: 13, kind: input, shape index: {}]   ;;  %s24622_s14 = inlined_call_operand.hbm [shape: bf16[64,784], index: 14, kind: output, shape index: {}]  }
   0x1   :  { %v10285_v0 = vld [vmem:[%s24611_s3] sm:$0xf]  ;;  %v13701_v1 = vld [vmem:[%s24611_s3 + $0xc] sm:$0x10]  ;;  %v13699_v4 = vld [vmem:[%s24611_s3 + $0x4] sm:$0xf] }
   0x2   :  { %v61_v2 = vld [vmem:[%s24609_s1] sm:$0xff]  ;;  %v10286_v3 = vor.u32 %v13701_v1, %v10285_v0  ;;  %v10287_v5 = vld [vmem:[%s24611_s3 + $0x10] sm:$0x10]  ;;  %v10293_v6 = vld [vmem:[%s24611_s3 + $0x8] sm:$0xf] }
   0x3   :  { %v10290_v7 = vor.u32 %v13699_v4, %v10287_v5  ;;  %v13702_v8 = vld [vmem:[%s24611_s3 + $0x14] sm:$0x10]  ;;  %v13700_v9 = vld [vmem:[%s24611_s3 + $0xc] sm:$0xf]  ;;  %v10295_v10 = vld [vmem:[%s24611_s3 + $0x18] sm:$0x10] }
   0x4   :  { %v116_v11 = vsel %vm114_vm0, %v10286_v3, 0  ;;  %v10294_v12 = vor.u32 %v13702_v8, %v10293_v6  ;;  %v10298_v13 = vor.u32 %v13700_v9, %v10295_v10  ;;  %v62_v14 = vld [vmem:[%s24609_s1 + $0x8] sm:$0xff]  ;;  %v13698_v18 = vld [vmem:[%s24610_s2 + $0x34] sm:$0xf0]  ;;  %v10343_v23 = vld [vmem:[%s24610_s2 + $0x38] sm:$0xf0] }
   0x5   :  { %v10341_v15 = vld [vmem:[%s24610_s2 + $0x28] sm:$0xf]  ;;  %134 = vmatpush.bf16.msra.mxu0 %v116_v11  ;;  %v119_v16 = vsel %vm114_vm0, %v10290_v7, 0  ;;  %v69_v17 = vpack.c.bf16 %v62_v14, %v61_v2  ;;  %v13696_v19 = vld [vmem:[%s24610_s2 + $0x2c] sm:$0xf] }
   0x6   :  { %163 = vmatpush.bf16.msra.mxu1 %v119_v16  ;;  %v122_v20 = vsel %vm114_vm0, %v10294_v12, 0  ;;  %v125_v21 = vsel %vm114_vm0, %v10298_v13, 0  ;;  %v10342_v22 = vor.u32 %v13698_v18, %v10341_v15  ;;  %v10333_v24 = vld [vmem:[%s24610_s2 + $0x20] sm:$0xf]  ;;  %v10346_v25 = vor.u32 %v13696_v19, %v10343_v23  ;;  %v13697_v26 = vld [vmem:[%s24610_s2 + $0x2c] sm:$0xf0] }
   0x7   :  { %192 = vmatpush.bf16.msra.mxu2 %v122_v20  ;;  %221 = vmatpush.bf16.msra.mxu3 %v125_v21  ;;  %v13695_v27 = vld [vmem:[%s24610_s2 + $0x24] sm:$0xf]  ;;  %v10335_v28 = vld [vmem:[%s24610_s2 + $0x30] sm:$0xf0]  ;;  %v10334_v29 = vor.u32 %v13697_v26, %v10333_v24 }
   0x8   :  { %10299 = vmatmul.msk.bf16.vlgmr.msra.gmra.mxu0 %vm101_vm1, %v69_v17  ;;  %v10338_v30 = vor.u32 %v13695_v27, %v10335_v28 }
   0xb   :  { %360 = vmatpush.bf16.msrb.mxu2 %v10342_v22 }
   0xc   :  { %19 = vsyncpa [#allocation3], 0  ;;  %10303 = vmatmul.msk.bf16.vlgmr.msra.gmra.mxu1 %vm101_vm1, %v69_v17  ;;  %389 = vmatpush.bf16.msrb.mxu3 %v10346_v25  ;;  %v10325_v31 = vld [vmem:[%s24610_s2 + $0x8] sm:$0xf]  ;;  %v13694_v32 = vld [vmem:[%s24610_s2 + $0x14] sm:$0xf0] }
   0xd   :  { %10307 = vmatmul.msk.bf16.vlgmr.msra.gmra.mxu2 %vm101_vm1, %v69_v17  ;;  %10311 = vmatmul.msk.bf16.vlgmr.msra.gmra.mxu3 %vm101_vm1, %v69_v17  ;;  %v13692_v33 = vld [vmem:[%s24610_s2 + $0xc] sm:$0xf]  ;;  %v10326_v34 = vor.u32 %v13694_v32, %v10325_v31  ;;  %v10327_v35 = vld [vmem:[%s24610_s2 + $0x18] sm:$0xf0]  ;;  %v10317_v36 = vld [vmem:[%s24610_s2] sm:$0xf] }
   0xe   :  { %302 = vmatpush.bf16.msrb.mxu0 %v10334_v29  ;;  %331 = vmatpush.bf16.msrb.mxu1 %v10338_v30  ;;  %v13693_v37 = vld [vmem:[%s24610_s2 + $0xc] sm:$0xf0]  ;;  %v10330_v38 = vor.u32 %v13692_v33, %v10327_v35  ;;  %v13691_v40 = vld [vmem:[%s24610_s2 + $0x4] sm:$0xf]  ;;  %v10319_v41 = vld [vmem:[%s24610_s2 + $0x10] sm:$0xf0] }
   0xf   :  { %v10318_v39 = vor.u32 %v13693_v37, %v10317_v36  ;;  %361 = vmatpush.bf16.msrb.mxu2 %v10326_v34  ;;  %v10322_v42 = vor.u32 %v13691_v40, %v10319_v41  ;;  %v63_v43 = vld [vmem:[%s24609_s1 + $0x10] sm:$0xff]  ;;  %v64_v44 = vld [vmem:[%s24609_s1 + $0x18] sm:$0xff]  ;;  %v65_v46 = vld [vmem:[%s24609_s1 + $0x20] sm:$0xff]  ;;  %vm283_vm2 = vcmask 261120   ;;  %s10271_s20 = sshll.u32 %s24622_s14, 4  ;;  %s14719_s3 = smov 448   ;;  %s10272_s20 = int_to_ptr.hbm [resolvable:$true] %s10271_s20 }
  0x10   :  { %390 = vmatpush.bf16.msrb.mxu3 %v10330_v38  ;;  %v70_v45 = vpack.c.bf16 %v64_v44, %v63_v43  ;;  %v66_v47 = vld [vmem:[%s24609_s1 + $0x28] sm:$0xff]  ;;  %v67_v49 = vld [vmem:[%s24609_s1 + $0x30] sm:$0xff]  ;;  %v68_v50 = vld [vmem:[%s24609_s1 + $0x38] sm:$0xff] }
  0x11   :  { %v71_v48 = vpack.c.bf16 %v66_v47, %v65_v46  ;;  %v72_v51 = vpack.c.bf16 %v68_v50, %v67_v49  ;;  %v49_v52 = vld [vmem:[%s24608_s0] sm:$0xff]  ;;  %v50_v53 = vld [vmem:[%s24608_s0 + $0x8] sm:$0xff]  ;;  %v51_v55 = vld [vmem:[%s24608_s0 + $0x10] sm:$0xff] }
  0x12   :  { %303 = vmatpush.bf16.msrb.mxu0 %v10318_v39  ;;  %332 = vmatpush.bf16.msrb.mxu1 %v10322_v42  ;;  %v57_v54 = vpack.c.bf16 %v50_v53, %v49_v52  ;;  %v52_v56 = vld [vmem:[%s24608_s0 + $0x18] sm:$0xff]  ;;  %v53_v58 = vld [vmem:[%s24608_s0 + $0x20] sm:$0xff]  ;;  %v54_v59 = vld [vmem:[%s24608_s0 + $0x28] sm:$0xff] }
  0x13   :  { %v58_v57 = vpack.c.bf16 %v52_v56, %v51_v55  ;;  %v59_v60 = vpack.c.bf16 %v54_v59, %v53_v58  ;;  %v55_v61 = vld [vmem:[%s24608_s0 + $0x30] sm:$0xff]  ;;  %v56_v62 = vld [vmem:[%s24608_s0 + $0x38] sm:$0xff]  ;;  %v10733_v42 = vld [vmem:[%s24614_s6 + $0x2e0] sm:$0xf] }
  0x14   :  { %v60_v63 = vpack.c.bf16 %v56_v62, %v55_v61  ;;  %v13797_v43 = vld [vmem:[%s24614_s6 + $0x2ec] sm:$0xf0]  ;;  %v10861_v49 = vld [vmem:[%s24614_s6 + $0x3e0] sm:$0xf] }
  0x15   :  { %v10734_v44 = vor.u32 %v13797_v43, %v10733_v42  ;;  %v13829_v50 = vld [vmem:[%s24614_s6 + $0x3ec] sm:$0xf0] }
  0x17   :  { %1634 = vmatpush.bf16.msra.mxu2 %v10734_v44 }
  0x18   :  { %10300 = vmatmul.msk.bf16.gmra.mxu0 %vm101_vm1, %v70_v45 }
  0x1c   :  { %10304 = vmatmul.msk.bf16.gmra.mxu1 %vm101_vm1, %v70_v45 }
  0x1d   :  { %10308 = vmatmul.msk.bf16.gmra.mxu2 %vm101_vm1, %v70_v45  ;;  %10312 = vmatmul.msk.bf16.gmra.mxu3 %vm101_vm1, %v70_v45 }
  0x28   :  { %10301 = vmatmul.msk.bf16.gmra.mxu0 %vm101_vm1, %v71_v48 }
  0x2c   :  { %10305 = vmatmul.msk.bf16.gmra.mxu1 %vm101_vm1, %v71_v48 }
  0x2d   :  { %10309 = vmatmul.msk.bf16.gmra.mxu2 %vm101_vm1, %v71_v48  ;;  %10313 = vmatmul.msk.bf16.gmra.mxu3 %vm101_vm1, %v71_v48 }
  0x38   :  { %10302 = vmatmul.msk.bf16.gmra.mxu0 %vm101_vm1, %v72_v51 }
  0x3c   :  { %10306 = vmatmul.msk.bf16.gmra.mxu1 %vm101_vm1, %v72_v51 }
  0x3d   :  { %10310 = vmatmul.msk.bf16.gmra.mxu2 %vm101_vm1, %v72_v51  ;;  %10314 = vmatmul.msk.bf16.gmra.mxu3 %vm101_vm1, %v72_v51  ;;  %v10862_v51 = vor.u32 %v13829_v50, %v10861_v49 }
  0x3f   :  { %1663 = vmatpush.bf16.msra.mxu3 %v10862_v51 }
  0x48   :  { %10347 = vmatmul.msk.bf16.vlgmr.msrb.gmra.mxu0 %vm283_vm2, %v57_v54 }
  0x4c   :  { %10351 = vmatmul.msk.bf16.vlgmr.msrb.gmra.mxu1 %vm283_vm2, %v57_v54 }
  0x4d   :  { %10355 = vmatmul.msk.bf16.vlgmr.msrb.gmra.mxu2 %vm283_vm2, %v57_v54  ;;  %10359 = vmatmul.msk.bf16.vlgmr.msrb.gmra.mxu3 %vm283_vm2, %v57_v54 }
  0x58   :  { %10348 = vmatmul.msk.bf16.gmra.mxu0 %vm283_vm2, %v58_v57 }
  0x5c   :  { %10352 = vmatmul.msk.bf16.gmra.mxu1 %vm283_vm2, %v58_v57 }
  0x5d   :  { %10356 = vmatmul.msk.bf16.gmra.mxu2 %vm283_vm2, %v58_v57  ;;  %10360 = vmatmul.msk.bf16.gmra.mxu3 %vm283_vm2, %v58_v57 }
  0x68   :  { %10349 = vmatmul.msk.bf16.gmra.mxu0 %vm283_vm2, %v59_v60 }
  0x6c   :  { %10353 = vmatmul.msk.bf16.gmra.mxu1 %vm283_vm2, %v59_v60 }
  0x6d   :  { %10357 = vmatmul.msk.bf16.gmra.mxu2 %vm283_vm2, %v59_v60  ;;  %10361 = vmatmul.msk.bf16.gmra.mxu3 %vm283_vm2, %v59_v60 }
  0x78   :  { %10350 = vmatmul.msk.bf16.gmra.mxu0 %vm283_vm2, %v60_v63 }
  0x7c   :  { %10354 = vmatmul.msk.bf16.gmra.mxu1 %vm283_vm2, %v60_v63 }
  0x7d   :  { %10358 = vmatmul.msk.bf16.gmra.mxu2 %vm283_vm2, %v60_v63  ;;  %10362 = vmatmul.msk.bf16.gmra.mxu3 %vm283_vm2, %v60_v63 }
  0x85   :  { %v136_v0 = vpop.f32.mrf.mxu0 }
  0x89   :  { %v165_v1 = vpop.f32.mrf.mxu1 }
  0x8d   :  { %v138_v4 = vpop.f32.mrf.mxu0 }
  0x90   :  { %v194_v2 = vpop.f32.mrf.mxu2  ;;  %v14952_v3 = vpop.f32.mrf.mxu3 }
  0x91   :  { %v167_v5 = vpop.f32.mrf.mxu1 }
  0x95   :  { %v141_v8 = vpop.f32.mrf.mxu0 }
  0x98   :  { %v196_v6 = vpop.f32.mrf.mxu2  ;;  %v225_v7 = vpop.f32.mrf.mxu3 }
  0x99   :  { %v170_v9 = vpop.f32.mrf.mxu1 }
  0x9d   :  { %v14958_v12 = vpop.f32.mrf.mxu0 }
  0xa0   :  { %v14954_v10 = vpop.f32.mrf.mxu2  ;;  %v14956_v11 = vpop.f32.mrf.mxu3 }
  0xa1   :  { %v14960_v13 = vpop.f32.mrf.mxu1 }
  0xa5   :  { %v14966_v16 = vpop.f32.mrf.mxu0 }
  0xa8   :  { %v14962_v14 = vpop.f32.mrf.mxu2  ;;  %v14964_v15 = vpop.f32.mrf.mxu3 }
  0xa9   :  { %v14968_v17 = vpop.f32.mrf.mxu1 }
  0xad   :  { %v14974_v20 = vpop.f32.mrf.mxu0 }
  0xb0   :  { %v14970_v18 = vpop.f32.mrf.mxu2  ;;  %v14972_v19 = vpop.f32.mrf.mxu3 }
  0xb1   :  { %v14976_v21 = vpop.f32.mrf.mxu1 }
  0xb5   :  { %v14982_v24 = vpop.f32.mrf.mxu0 }
  0xb8   :  { %v14978_v22 = vpop.f32.mrf.mxu2  ;;  %v14980_v23 = vpop.f32.mrf.mxu3 }
  0xb9   :  { %v14984_v25 = vpop.f32.mrf.mxu1 }
  0xbd   :  { %v14990_v28 = vpop.f32.mrf.mxu0 }
  0xc0   :  { %v14986_v26 = vpop.f32.mrf.mxu2  ;;  %v14988_v27 = vpop.f32.mrf.mxu3 }
  0xc1   :  { %v14992_v29 = vpop.f32.mrf.mxu1 }
  0xc5   :  { %v305_v32 = vpop.f32.mrf.mxu0 }
  0xc6   :  { %v15014_v54 = vadd.f32 %v305_v32, %v136_v0 }
  0xc8   :  { %v14994_v30 = vpop.f32.mrf.mxu2  ;;  %v14996_v31 = vpop.f32.mrf.mxu3 }
  0xc9   :  { %v334_v33 = vpop.f32.mrf.mxu1 }
  0xca   :  { %v15016_v55 = vadd.f32 %v334_v33, %v165_v1 }
  0xcd   :  { %v307_v36 = vpop.f32.mrf.mxu0 }
  0xce   :  { %v15010_v52 = vadd.f32 %v307_v36, %v138_v4 }
  0xd0   :  { %v363_v34 = vpop.f32.mrf.mxu2  ;;  %v392_v35 = vpop.f32.mrf.mxu3  ;;  %v472_v0 = vmul.f32 %v15010_v52, %v15010_v52 }
  0xd1   :  { %v336_v37 = vpop.f32.mrf.mxu1  ;;  %v15018_v56 = vadd.f32 %v363_v34, %v194_v2  ;;  %v15027_v4 = vadd.f32 %v392_v35, %v14952_v3  ;;  %v412_v3 = vadd.f32 %v15010_v52, %v15014_v54 }
  0xd2   :  { %v15012_v53 = vadd.f32 %v336_v37, %v167_v5  ;;  %v468_v5 = vmul.f32 %v15014_v54, %v15014_v54 }
  0xd4   :  { %v473_v1 = vmul.f32 %v15012_v53, %v15012_v53  ;;  %v425_v34 = vadd.f32 %v15012_v53, %v15016_v55 }
  0xd5   :  { %v310_v40 = vpop.f32.mrf.mxu0 }
  0xd6   :  { %v15024_v63 = vadd.f32 %v310_v40, %v141_v8 }
  0xd8   :  { %v365_v38 = vpop.f32.mrf.mxu2  ;;  %v394_v39 = vpop.f32.mrf.mxu3  ;;  %24757 = vst [vmem:[#allocation6_spill] sm:$0xff] %v15024_v63  ;;  %v413_v40 = vadd.f32 %v412_v3, %v15024_v63 }
  0xd9   :  { %v339_v41 = vpop.f32.mrf.mxu1  ;;  %v15020_v61 = vadd.f32 %v365_v38, %v196_v6  ;;  %v15022_v62 = vadd.f32 %v394_v39, %v225_v7  ;;  %v469_v6 = vmul.f32 %v15016_v55, %v15016_v55  ;;  %v470_v7 = vmul.f32 %v15018_v56, %v15018_v56 }
  0xda   :  { %v15033_v2 = vadd.f32 %v339_v41, %v170_v9 }
  0xdb   :  { %24756 = vst [vmem:[#allocation5_spill] sm:$0xff] %v15022_v62  ;;  %v474_v35 = vmul.f32 %v15020_v61, %v15020_v61  ;;  %v475_v36 = vmul.f32 %v15022_v62, %v15022_v62  ;;  %v513_v37 = vadd.f32 %v473_v1, %v469_v6  ;;  %v438_v38 = vadd.f32 %v15020_v61, %v15018_v56 }
  0xdc   :  { %24758 = vst [vmem:[#allocation7_spill] sm:$0xff] %v15033_v2  ;;  %v451_v39 = vadd.f32 %v15022_v62, %v15027_v4  ;;  %v426_v41 = vadd.f32 %v425_v34, %v15033_v2 }
  0xdd   :  { %v312_v47 = vpop.f32.mrf.mxu0  ;;  %v526_v50 = vadd.f32 %v474_v35, %v470_v7 }
  0xde   :  { %v15050_v9 = vadd.f32 %v312_v47, %v14958_v12  ;;  %v500_v12 = vadd.f32 %v472_v0, %v468_v5 }
  0xe0   :  { %v368_v45 = vpop.f32.mrf.mxu2  ;;  %v397_v46 = vpop.f32.mrf.mxu3 }
  0xe1   :  { %v341_v48 = vpop.f32.mrf.mxu1  ;;  %v15044_v8 = vadd.f32 %v368_v45, %v14954_v10  ;;  %v15047_v32 = vadd.f32 %v397_v46, %v14956_v11  ;;  %v476_v10 = vmul.f32 %v15024_v63, %v15024_v63  ;;  %v471_v11 = vmul.f32 %v15027_v4, %v15027_v4 }
  0xe2   :  { %v15053_v33 = vadd.f32 %v341_v48, %v14960_v13  ;;  %v477_v13 = vmul.f32 %v15033_v2, %v15033_v2  ;;  %v480_v46 = vmul.f32 %v15050_v9, %v15050_v9  ;;  %v414_v2 = vadd.f32 %v413_v40, %v15050_v9  ;;  %v13765_v40 = vld [vmem:[%s24614_s6 + $0x1ec] sm:$0xf0] }
  0xe3   :  { %v478_v44 = vmul.f32 %v15044_v8, %v15044_v8  ;;  %v479_v45 = vmul.f32 %v15047_v32, %v15047_v32  ;;  %v539_v51 = vadd.f32 %v475_v36, %v471_v11  ;;  %v501_v0 = vadd.f32 %v500_v12, %v476_v10 }
  0xe4   :  { %v481_v47 = vmul.f32 %v15053_v33, %v15053_v33  ;;  %v514_v5 = vadd.f32 %v513_v37, %v477_v13  ;;  %v439_v6 = vadd.f32 %v438_v38, %v15044_v8  ;;  %v452_v3 = vadd.f32 %v451_v39, %v15047_v32 }
  0xe5   :  { %v315_v59 = vpop.f32.mrf.mxu0  ;;  %v427_v63 = vadd.f32 %v426_v41, %v15053_v33  ;;  %v502_v35 = vadd.f32 %v501_v0, %v480_v46 }
  0xe6   :  { %v15092_v62 = vadd.f32 %v315_v59, %v14966_v16  ;;  %v515_v36 = vadd.f32 %v514_v5, %v481_v47 }
  0xe8   :  { %v370_v57 = vpop.f32.mrf.mxu2  ;;  %v399_v58 = vpop.f32.mrf.mxu3  ;;  %24760 = vst [vmem:[#allocation9_spill] sm:$0xff] %v15092_v62  ;;  %v415_v12 = vadd.f32 %v414_v2, %v15092_v62  ;;  %v484_v37 = vmul.f32 %v15092_v62, %v15092_v62 }
  0xe9   :  { %v344_v60 = vpop.f32.mrf.mxu1  ;;  %v15082_v1 = vadd.f32 %v370_v57, %v14962_v14  ;;  %v15087_v34 = vadd.f32 %v399_v58, %v14964_v15  ;;  %v527_v14 = vadd.f32 %v526_v50, %v478_v44  ;;  %v540_v57 = vadd.f32 %v539_v51, %v479_v45 }
  0xea   :  { %v15095_v7 = vadd.f32 %v344_v60, %v14968_v17  ;;  %v503_v51 = vadd.f32 %v502_v35, %v484_v37  ;;  %v13761_v37 = vld [vmem:[%s24614_s6 + $0x1cc] sm:$0xf0] }
  0xeb   :  { %24759 = vst [vmem:[#allocation8_spill] sm:$0xff] %v15087_v34  ;;  %v440_v10 = vadd.f32 %v439_v6, %v15082_v1  ;;  %v482_v16 = vmul.f32 %v15082_v1, %v15082_v1  ;;  %v453_v17 = vadd.f32 %v452_v3, %v15087_v34  ;;  %v483_v59 = vmul.f32 %v15087_v34, %v15087_v34 }
  0xec   :  { %24761 = vst [vmem:[#allocation10_spill] sm:$0xff] %v15095_v7  ;;  %v428_v41 = vadd.f32 %v427_v63, %v15095_v7 }
  0xed   :  { %v317_v48 = vpop.f32.mrf.mxu0 }
  0xee   :  { %v15105_v58 = vadd.f32 %v317_v48, %v14974_v20  ;;  %v10605_v20 = vld [vmem:[%s24614_s6 + $0x1e0] sm:$0xf] }
  0xef   :  { %v10606_v45 = vor.u32 %v13765_v40, %v10605_v20 }
  0xf0   :  { %v373_v42 = vpop.f32.mrf.mxu2  ;;  %v402_v43 = vpop.f32.mrf.mxu3  ;;  %24764 = vst [vmem:[#allocation13_spill] sm:$0xff] %v15105_v58  ;;  %v488_v48 = vmul.f32 %v15105_v58, %v15105_v58  ;;  %v416_v3 = vadd.f32 %v415_v12, %v15105_v58 }
  0xf1   :  { %v346_v49 = vpop.f32.mrf.mxu1  ;;  %v15099_v11 = vadd.f32 %v373_v42, %v14970_v18  ;;  %v15102_v15 = vadd.f32 %v402_v43, %v14972_v19  ;;  %v10477_v18 = vld [vmem:[%s24614_s6 + $0xe0] sm:$0xf]  ;;  %v13733_v19 = vld [vmem:[%s24614_s6 + $0xec] sm:$0xf0]  ;;  %1605 = vmatpush.bf16.msra.mxu1 %v10606_v45 }
  0xf2   :  { %v15113_v60 = vadd.f32 %v346_v49, %v14976_v21  ;;  %v485_v21 = vmul.f32 %v15095_v7, %v15095_v7  ;;  %v10478_v39 = vor.u32 %v13733_v19, %v10477_v18  ;;  %v541_v49 = vadd.f32 %v540_v57, %v483_v59 }
  0xf3   :  { %24762 = vst [vmem:[#allocation11_spill] sm:$0xff] %v15099_v11  ;;  %v486_v46 = vmul.f32 %v15099_v11, %v15099_v11  ;;  %v487_v47 = vmul.f32 %v15102_v15, %v15102_v15  ;;  %v441_v5 = vadd.f32 %v440_v10, %v15099_v11  ;;  %v454_v6 = vadd.f32 %v453_v17, %v15102_v15  ;;  %v13729_v10 = vld [vmem:[%s24614_s6 + $0xcc] sm:$0xf0]  ;;  %v10589_v17 = vld [vmem:[%s24614_s6 + $0x1c0] sm:$0xf] }
  0xf4   :  { %24763 = vst [vmem:[#allocation12_spill] sm:$0xff] %v15102_v15  ;;  %1576 = vmatpush.bf16.msra.mxu0 %v10478_v39  ;;  %v516_v0 = vadd.f32 %v515_v36, %v485_v21  ;;  %v504_v59 = vadd.f32 %v503_v51, %v488_v48  ;;  %v10461_v36 = vld [vmem:[%s24614_s6 + $0xc0] sm:$0xf]  ;;  %v10719_v11 = vld [vmem:[%s24614_s6 + $0x2d0] sm:$0xf0] }
  0xf5   :  { %24765 = vst [vmem:[#allocation14_spill] sm:$0xff] %v15113_v60  ;;  %v320_v43 = vpop.f32.mrf.mxu0  ;;  %v10462_v12 = vor.u32 %v13729_v10, %v10461_v36  ;;  %v13757_v36 = vld [vmem:[%s24614_s6 + $0x1ac] sm:$0xf0] }
  0xf6   :  { %v15146_v63 = vadd.f32 %v320_v43, %v14982_v24  ;;  %v429_v24 = vadd.f32 %v428_v41, %v15113_v60  ;;  %v10590_v41 = vor.u32 %v13761_v37, %v10589_v17 }
  0xf8   :  { %v375_v13 = vpop.f32.mrf.mxu2  ;;  %v404_v38 = vpop.f32.mrf.mxu3  ;;  %24768 = vst [vmem:[#allocation17_spill] sm:$0xff] %v15146_v63  ;;  %v492_v35 = vmul.f32 %v15146_v63, %v15146_v63  ;;  %1577 = vmatpush.bf16.msra.mxu0 %v10462_v12  ;;  %1606 = vmatpush.bf16.msra.mxu1 %v10590_v41 }
  0xf9   :  { %v15134_v42 = vadd.f32 %v375_v13, %v14978_v22  ;;  %v15137_v2 = vadd.f32 %v404_v38, %v14980_v23  ;;  %v349_v44 = vpop.f32.mrf.mxu1  ;;  %v528_v22 = vadd.f32 %v527_v14, %v482_v16  ;;  %v489_v23 = vmul.f32 %v15113_v60, %v15113_v60 }
  0xfa   :  { %v15151_v50 = vadd.f32 %v349_v44, %v14984_v25  ;;  %v542_v25 = vadd.f32 %v541_v49, %v487_v47  ;;  %v417_v13 = vadd.f32 %v416_v3, %v15146_v63  ;;  %v13793_v49 = vld [vmem:[%s24614_s6 + $0x2cc] sm:$0xf0] }
  0xfb   :  { %24766 = vst [vmem:[#allocation15_spill] sm:$0xff] %v15134_v42  ;;  %v490_v14 = vmul.f32 %v15134_v42, %v15134_v42  ;;  %v491_v57 = vmul.f32 %v15137_v2, %v15137_v2  ;;  %v529_v16 = vadd.f32 %v528_v22, %v486_v46  ;;  %v517_v18 = vadd.f32 %v516_v0, %v489_v23  ;;  %v10717_v22 = vld [vmem:[%s24614_s6 + $0x2c0] sm:$0xf] }
  0xfc   :  { %24767 = vst [vmem:[#allocation16_spill] sm:$0xff] %v15137_v2  ;;  %v442_v19 = vadd.f32 %v441_v5, %v15134_v42  ;;  %v493_v20 = vmul.f32 %v15151_v50, %v15151_v50  ;;  %v455_v21 = vadd.f32 %v454_v6, %v15137_v2  ;;  %v430_v38 = vadd.f32 %v429_v24, %v15151_v50  ;;  %v10445_v0 = vld [vmem:[%s24614_s6 + $0xa0] sm:$0xf]  ;;  %v13725_v5 = vld [vmem:[%s24614_s6 + $0xac] sm:$0xf0] }
  0xfd   :  { %24769 = vst [vmem:[#allocation18_spill] sm:$0xff] %v15151_v50  ;;  %v530_v43 = vadd.f32 %v529_v16, %v490_v14  ;;  %v543_v44 = vadd.f32 %v542_v25, %v491_v57  ;;  %v322_v47 = vpop.f32.mrf.mxu0  ;;  %v505_v23 = vadd.f32 %v504_v59, %v492_v35  ;;  %v10573_v24 = vld [vmem:[%s24614_s6 + $0x1a0] sm:$0xf]  ;;  %v13825_v35 = vld [vmem:[%s24614_s6 + $0x3cc] sm:$0xf0] }
  0xfe   :  { %v15194_v51 = vadd.f32 %v322_v47, %v14990_v28  ;;  %v518_v6 = vadd.f32 %v517_v18, %v493_v20  ;;  %v10845_v59 = vld [vmem:[%s24614_s6 + $0x3c0] sm:$0xf]  ;;  %v10574_v41 = vor.u32 %v13757_v36, %v10573_v24  ;;  %v13753_v47 = vld [vmem:[%s24614_s6 + $0x18c] sm:$0xf0] }
  0xff   :  { %v10846_v18 = vor.u32 %v13825_v35, %v10845_v59  ;;  %v15410_v50 = vld [vmem:[%s24614_s6 + $0x32c] sm:$0xf0] }
 0x100   :  { %v378_v39 = vpop.f32.mrf.mxu2  ;;  %v407_v40 = vpop.f32.mrf.mxu3  ;;  %v418_v14 = vadd.f32 %v417_v13, %v15194_v51  ;;  %v496_v57 = vmul.f32 %v15194_v51, %v15194_v51  ;;  %1607 = vmatpush.bf16.msra.mxu1 %v10574_v41 }
 0x101   :  { %v15182_v45 = vadd.f32 %v378_v39, %v14986_v26  ;;  %v15185_v46 = vadd.f32 %v407_v40, %v14988_v27  ;;  %v351_v48 = vpop.f32.mrf.mxu1  ;;  %v10718_v27 = vor.u32 %v13793_v49, %v10717_v22  ;;  %v13721_v39 = vld [vmem:[%s24614_s6 + $0x8c] sm:$0xf0]  ;;  %1664 = vmatpush.bf16.msra.mxu3 %v10846_v18 }
 0x102   :  { %v15197_v26 = vadd.f32 %v351_v48, %v14992_v29  ;;  %v419_v20 = vrot.slane %v418_v14, 4  ;;  %v506_v12 = vadd.f32 %v505_v23, %v496_v57 }
 0x103   :  { %24770 = vst [vmem:[#allocation19_spill] sm:$0xff] %v15182_v45  ;;  %v443_v3 = vadd.f32 %v442_v19, %v15182_v45  ;;  %v494_v28 = vmul.f32 %v15182_v45, %v15182_v45  ;;  %v495_v29 = vmul.f32 %v15185_v46, %v15185_v46  ;;  %1635 = vmatpush.bf16.msra.mxu2 %v10718_v27  ;;  %v15405_v45 = vld [vmem:[%s24614_s6 + $0x320] sm:$0xf] }
 0x104   :  { %24771 = vst [vmem:[#allocation20_spill] sm:$0xff] %v15185_v46  ;;  %v431_v16 = vadd.f32 %v430_v38, %v15197_v26  ;;  %v497_v25 = vmul.f32 %v15197_v26, %v15197_v26  ;;  %v456_v17 = vadd.f32 %v455_v21, %v15185_v46  ;;  %v10446_v19 = vor.u32 %v13725_v5, %v10445_v0  ;;  %v10429_v38 = vld [vmem:[%s24614_s6 + $0x80] sm:$0xf]  ;;  %v13789_v5 = vld [vmem:[%s24614_s6 + $0x2ac] sm:$0xf0] }
 0x105   :  { %v531_v10 = vadd.f32 %v530_v43, %v494_v28  ;;  %v544_v40 = vadd.f32 %v543_v44, %v495_v29  ;;  %v10430_v43 = vor.u32 %v13721_v39, %v10429_v38  ;;  %v10557_v21 = vld [vmem:[%s24614_s6 + $0x180] sm:$0xf]  ;;  %v420_v48 = vadd.f32 %v419_v20, %v418_v14 }
 0x106   :  { %v432_v37 = vrot.slane %v431_v16, 4  ;;  %v519_v13 = vadd.f32 %v518_v6, %v497_v25  ;;  %1578 = vmatpush.bf16.msra.mxu0 %v10446_v19  ;;  %v507_v22 = vrot.slane %v506_v12, 4  ;;  %v10701_v44 = vld [vmem:[%s24614_s6 + $0x2a0] sm:$0xf]  ;;  %v10558_v24 = vor.u32 %v13753_v47, %v10557_v21 }
 0x107   :  { %v10702_v29 = vor.u32 %v13789_v5, %v10701_v44  ;;  %v421_v14 = vrot.slane %v420_v48, 2 }
 0x108   :  { %v433_v49 = vadd.f32 %v432_v37, %v431_v16  ;;  %v520_v23 = vrot.slane %v519_v13, 4  ;;  %v380_v27 = vpop.f32.mrf.mxu2  ;;  %v409_v0 = vpop.f32.mrf.mxu3  ;;  %v508_v57 = vadd.f32 %v507_v22, %v506_v12  ;;  %1608 = vmatpush.bf16.msra.mxu1 %v10558_v24 }
 0x109   :  { %v15248_v6 = vadd.f32 %v380_v27, %v14994_v30  ;;  %v15251_v28 = vadd.f32 %v409_v0, %v14996_v31  ;;  %1636 = vmatpush.bf16.msra.mxu2 %v10702_v29  ;;  %v422_v31 = vadd.f32 %v421_v14, %v420_v48 }
 0x10a   :  { %v434_v16 = vrot.slane %v433_v49, 2  ;;  %v521_v25 = vadd.f32 %v520_v23, %v519_v13  ;;  %v509_v18 = vrot.slane %v508_v57, 2  ;;  %1579 = vmatpush.bf16.msra.mxu0 %v10430_v43 }
 0x10b   :  { %v444_v59 = vadd.f32 %v443_v3, %v15248_v6  ;;  %v498_v35 = vmul.f32 %v15248_v6, %v15248_v6  ;;  %v457_v36 = vadd.f32 %v456_v17, %v15251_v28  ;;  %v499_v30 = vmul.f32 %v15251_v28, %v15251_v28 }
 0x10c   :  { %v435_v19 = vadd.f32 %v434_v16, %v433_v49  ;;  %v522_v20 = vrot.slane %v521_v25, 2  ;;  %v423_v3 = vrot.slane %v422_v31, 1  ;;  %v510_v39 = vadd.f32 %v509_v18, %v508_v57  ;;  %v15276_v18 = vld [vmem:[%s24612_s4] sm:$0xf] }
 0x10d   :  { %v445_v37 = vrot.slane %v444_v59, 4  ;;  %v532_v12 = vadd.f32 %v531_v10, %v498_v35  ;;  %v458_v38 = vrot.slane %v457_v36, 4  ;;  %v545_v13 = vadd.f32 %v544_v40, %v499_v30 }
 0x10e   :  { %v436_v41 = vrot.slane %v435_v19, 1  ;;  %v523_v21 = vadd.f32 %v522_v20, %v521_v25  ;;  %v424_v22 = vadd.f32 %v423_v3, %v422_v31  ;;  %v511_v23 = vrot.slane %v510_v39, 1  ;;  %v13821_v31 = vld [vmem:[%s24614_s6 + $0x3ac] sm:$0xf0] }
 0x10f   :  { %v446_v47 = vadd.f32 %v445_v37, %v444_v59  ;;  %v533_v17 = vrot.slane %v532_v12, 4  ;;  %v459_v49 = vadd.f32 %v458_v38, %v457_v36  ;;  %v546_v5 = vrot.slane %v545_v13, 4  ;;  %v10829_v36 = vld [vmem:[%s24614_s6 + $0x3a0] sm:$0xf] }
 0x110   :  { %v437_v27 = vadd.f32 %v436_v41, %v435_v19  ;;  %v524_v0 = vrot.slane %v523_v21, 1  ;;  %v15259_v43 = vmul.f32 0.015625, %v424_v22  ;;  %v512_v10 = vadd.f32 %v511_v23, %v510_v39  ;;  %v10685_v39 = vld [vmem:[%s24614_s6 + $0x280] sm:$0xf]  ;;  %v13785_v41 = vld [vmem:[%s24614_s6 + $0x28c] sm:$0xf0] }
 0x111   :  { %v447_v48 = vrot.slane %v446_v47, 2  ;;  %v534_v44 = vadd.f32 %v533_v17, %v532_v12  ;;  %v460_v57 = vrot.slane %v459_v49, 2  ;;  %v547_v16 = vadd.f32 %v546_v5, %v545_v13  ;;  %v10813_v23 = vld [vmem:[%s24614_s6 + $0x380] sm:$0xf] }
 0x112   :  { %v15261_v29 = vmul.f32 0.015625, %v437_v27  ;;  %v525_v40 = vadd.f32 %v524_v0, %v523_v21  ;;  %v552_v25 = vmul.f32 0.015625, %v512_v10  ;;  %v556_v59 = vmul.f32 %v15259_v43, %v15259_v43  ;;  %v13817_v27 = vld [vmem:[%s24614_s6 + $0x38c] sm:$0xf0] }
 0x113   :  { %v448_v24 = vadd.f32 %v447_v48, %v446_v47  ;;  %v535_v14 = vrot.slane %v534_v44, 2  ;;  %v461_v13 = vadd.f32 %v460_v57, %v459_v49  ;;  %v548_v3 = vrot.slane %v547_v16, 2  ;;  %v13781_v57 = vld [vmem:[%s24614_s6 + $0x26c] sm:$0xf0] }
 0x114   :  { %v553_v30 = vmul.f32 0.015625, %v525_v40  ;;  %v557_v19 = vmul.f32 %v15261_v29, %v15261_v29  ;;  %v560_v38 = vsub.f32 %v552_v25, %v556_v59  ;;  %v10830_v22 = vor.u32 %v13821_v31, %v10829_v36  ;;  %v10413_v31 = vld [vmem:[%s24614_s6 + $0x60] sm:$0xf] }
 0x115   :  { %v449_v37 = vrot.slane %v448_v24, 1  ;;  %v536_v12 = vadd.f32 %v535_v14, %v534_v44  ;;  %v15295_v48 = vperm.slane %v15276_v18, 0  ;;  %v462_v44 = vrot.slane %v461_v13, 1  ;;  %v10669_v14 = vld [vmem:[%s24614_s6 + $0x260] sm:$0xf] }
 0x116   :  { %v561_v21 = vsub.f32 %v553_v30, %v557_v19  ;;  %v564_v0 = vmax.f32 %v560_v38, 0.0  ;;  %v549_v49 = vadd.f32 %v548_v3, %v547_v16  ;;  %1665 = vmatpush.bf16.msra.mxu3 %v10830_v22  ;;  %v10814_v36 = vor.u32 %v13817_v27, %v10813_v23  ;;  %v10797_v16 = vld [vmem:[%s24614_s6 + $0x360] sm:$0xf]  ;;  %v13717_v19 = vld [vmem:[%s24614_s6 + $0x6c] sm:$0xf0] }
 0x117   :  { %v450_v47 = vadd.f32 %v449_v37, %v448_v24  ;;  %v537_v17 = vrot.slane %v536_v12, 1  ;;  %v10686_v24 = vor.u32 %v13785_v41, %v10685_v39  ;;  %v463_v59 = vadd.f32 %v462_v44, %v461_v13  ;;  %v10541_v37 = vld [vmem:[%s24614_s6 + $0x160] sm:$0xf]  ;;  %v13813_v41 = vld [vmem:[%s24614_s6 + $0x36c] sm:$0xf0] }
 0x118   :  { %v565_v5 = vmax.f32 %v561_v21, 0.0  ;;  %v15305_v25 = vadd.f32 1e-05, %v564_v0  ;;  %v550_v30 = vrot.slane %v549_v49, 1  ;;  %v15333_v21 = vperm.slane %v15276_v18, 1 }
 0x119   :  { %v15297_v10 = vmul.f32 0.015625, %v450_v47  ;;  %v538_v40 = vadd.f32 %v537_v17, %v536_v12  ;;  %v13749_v12 = vld [vmem:[%s24614_s6 + $0x16c] sm:$0xf0]  ;;  %1637 = vmatpush.bf16.msra.mxu2 %v10686_v24  ;;  %v15335_v47 = vmul.f32 0.015625, %v463_v59  ;;  %v10653_v22 = vld [vmem:[%s24614_s6 + $0x240] sm:$0xf]  ;;  %v10414_v20 = vor.u32 %v13717_v19, %v10413_v31 }
 0x11a   :  { %v15322_v38 = vadd.f32 1e-05, %v565_v5  ;;  %14538 = vrsqrt.f32 %v15305_v25  ;;  %v551_v17 = vadd.f32 %v550_v30, %v549_v49  ;;  %v13777_v23 = vld [vmem:[%s24614_s6 + $0x24c] sm:$0xf0]  ;;  %v15346_v27 = vld [vmem:[%s24614_s6 + $0x40] sm:$0xf]  ;;  %1666 = vmatpush.bf16.msra.mxu3 %v10814_v36  ;;  %v10670_v49 = vor.u32 %v13781_v57, %v10669_v14 }
 0x11b   :  { %v554_v13 = vmul.f32 0.015625, %v538_v40  ;;  %v558_v3 = vmul.f32 %v15297_v10, %v15297_v10  ;;  %v15351_v0 = vld [vmem:[%s24614_s6 + $0x4c] sm:$0xf0]  ;;  %v10781_v5 = vld [vmem:[%s24614_s6 + $0x340] sm:$0xf]  ;;  %v559_v14 = vmul.f32 %v15335_v47, %v15335_v47  ;;  %v10798_v36 = vor.u32 %v13813_v41, %v10797_v16  ;;  %1580 = vmatpush.bf16.msra.mxu0 %v10414_v20 }
 0x11c   :  { %14540 = vrsqrt.f32 %v15322_v38  ;;  %v13809_v40 = vld [vmem:[%s24614_s6 + $0x34c] sm:$0xf0]  ;;  %v15363_v24 = vld [vmem:[%s24614_s6 + $0x140] sm:$0xf]  ;;  %v555_v30 = vmul.f32 0.015625, %v551_v17  ;;  %v10542_v35 = vor.u32 %v13749_v12, %v10541_v37  ;;  %v10654_v46 = vor.u32 %v13777_v23, %v10653_v22 }
 0x11d   :  { %v562_v44 = vsub.f32 %v554_v13, %v558_v3  ;;  %v13745_v59 = vld [vmem:[%s24614_s6 + $0x14c] sm:$0xf0]  ;;  %v15375_v13 = vld [vmem:[%s24614_s6 + $0x220] sm:$0xf]  ;;  %1638 = vmatpush.bf16.msra.mxu2 %v10670_v49  ;;  %v15413_v63 = vperm.slane %v15276_v18, 2  ;;  %v10782_v12 = vor.u32 %v13809_v40, %v10781_v5  ;;  %v10398_v22 = vor.u32 %v15351_v0, %v15346_v27 }
 0x11e   :  { %v15380_v3 = vld [vmem:[%s24614_s6 + $0x22c] sm:$0xf0]  ;;  %v15385_v17 = vld [vmem:[%s24614_s6 + $0x20] sm:$0xf]  ;;  %v563_v2 = vsub.f32 %v555_v30, %v559_v14  ;;  %1667 = vmatpush.bf16.msra.mxu3 %v10798_v36  ;;  %1609 = vmatpush.bf16.msra.mxu1 %v10542_v35  ;;  %v10526_v20 = vor.u32 %v13745_v59, %v15363_v24  ;;  %v10766_v27 = vor.u32 %v15410_v50, %v15405_v45  ;;  %vm610_vm3 = vweird.f32 %v15305_v25 }
 0x11f   :  { %v15390_v57 = vld [vmem:[%s24614_s6 + $0x2c] sm:$0xf0]  ;;  %v15395_v16 = vld [vmem:[%s24614_s6 + $0x120] sm:$0xf]  ;;  %v566_v39 = vmax.f32 %v562_v44, 0.0  ;;  %v15416_v44 = vperm.slane %v15276_v18, 3  ;;  %v10638_v5 = vor.u32 %v15380_v3, %v15375_v13  ;;  %vm620_vm4 = vweird.f32 %v15322_v38  ;;  %1581 = vmatpush.bf16.msra.mxu0 %v10398_v22 }
 0x120   :  { %v15400_v41 = vld [vmem:[%s24614_s6 + $0x12c] sm:$0xf0]  ;;  %v15421_v31 = vld [vmem:[%s24614_s6] sm:$0xf]  ;;  %v15442_v49 = vpop.eup %14538  ;;  %v10382_v50 = vor.u32 %v15390_v57, %v15385_v17  ;;  %v13795_v17 = vld [vmem:[%s24614_s6 + $0x2e4] sm:$0xf] }
 0x121   :  { %v15426_v19 = vld [vmem:[%s24614_s6 + $0xc] sm:$0xf0]  ;;  %v15428_v37 = vadd.f32 1e-05, %v566_v39  ;;  %v15435_v18 = vld [vmem:[%s24614_s6 + $0x100] sm:$0xf]  ;;  %1639 = vmatpush.bf16.msra.mxu2 %v10654_v46  ;;  %v10510_v45 = vor.u32 %v15400_v41, %v15395_v16  ;;  %vm611_vm5 = vweird.f32 %v15442_v49  ;;  %v568_v41 = vsub.f32 %v15014_v54, %v15259_v43 }
 0x122   :  { %v15440_v23 = vld [vmem:[%s24614_s6 + $0x10c] sm:$0xf0]  ;;  %v567_v39 = vmax.f32 %v563_v2, 0.0  ;;  %v10621_v0 = vld [vmem:[%s24614_s6 + $0x200] sm:$0xf]  ;;  %v15455_v30 = vpop.eup %14540  ;;  %v605_v2 = vmul.f32 %v15442_v49, %v15305_v25  ;;  %1668 = vmatpush.bf16.msra.mxu3 %v10782_v12  ;;  %1610 = vmatpush.bf16.msra.mxu1 %v10526_v20  ;;  %v572_v12 = vsub.f32 %v15010_v52, %v15259_v43  ;;  %v569_v54 = vsub.f32 %v15016_v55, %v15261_v29  ;;  %vm612_vm8 = vmor %vm610_vm3, %vm611_vm5 }
 0x123   :  { %v13769_v40 = vld [vmem:[%s24614_s6 + $0x20c] sm:$0xf0]  ;;  %14542 = vrsqrt.f32 %v15428_v37  ;;  %v615_v35 = vmul.f32 %v15455_v30, %v15322_v38  ;;  %v718_v46 = vld [vmem:[%s24613_s5] sm:$0xf]  ;;  %vm621_vm6 = vweird.f32 %v15455_v30  ;;  %v10735_v22 = vld [vmem:[%s24614_s6 + $0x2f0] sm:$0xf0]  ;;  %v573_v52 = vsub.f32 %v15012_v53, %v15261_v29  ;;  %1582 = vmatpush.bf16.msra.mxu0 %v10382_v50 }
 0x124   :  { %v15468_v24 = vadd.f32 1e-05, %v567_v39  ;;  %v606_v57 = vmul.f32 %v15442_v49, %v605_v2  ;;  %v10622_v36 = vor.u32 %v13769_v40, %v10621_v0  ;;  %v10749_v13 = vld [vmem:[%s24614_s6 + $0x300] sm:$0xf]  ;;  %v13801_v3 = vld [vmem:[%s24614_s6 + $0x30c] sm:$0xf0]  ;;  %vm630_vm7 = vweird.f32 %v15428_v37  ;;  %vm622_vm9 = vmor %vm620_vm4, %vm621_vm6 }
 0x125   :  { %v616_v16 = vmul.f32 %v15455_v30, %v615_v35  ;;  %v13827_v39 = vld [vmem:[%s24614_s6 + $0x3e4] sm:$0xf]  ;;  %v10863_v0 = vld [vmem:[%s24614_s6 + $0x3f0] sm:$0xf0]  ;;  %1640 = vmatpush.bf16.msra.mxu2 %v10638_v5  ;;  %v15504_v20 = vperm.slane %v718_v46, 0  ;;  %v15516_v59 = vperm.slane %v718_v46, 1  ;;  %v10750_v5 = vor.u32 %v13801_v3, %v10749_v13 }
 0x126   :  { %14544 = vrsqrt.f32 %v15468_v24  ;;  %v607_v40 = vmul.f32 0.5, %v606_v57  ;;  %v13731_v2 = vld [vmem:[%s24614_s6 + $0xe4] sm:$0xf]  ;;  %v10479_v35 = vld [vmem:[%s24614_s6 + $0xf0] sm:$0xf0]  ;;  %1669 = vmatpush.bf16.msra.mxu3 %v10766_v27  ;;  %v15530_v13 = vperm.slane %v718_v46, 2  ;;  %1611 = vmatpush.bf16.msra.mxu1 %v10510_v45  ;;  %v10866_v58 = vor.u32 %v13827_v39, %v10863_v0 }
 0x127   :  { %v617_v14 = vmul.f32 0.5, %v616_v16  ;;  %v13763_v55 = vld [vmem:[%s24614_s6 + $0x1e4] sm:$0xf]  ;;  %v10607_v53 = vld [vmem:[%s24614_s6 + $0x1f0] sm:$0xf0]  ;;  %v10738_v16 = vor.u32 %v13795_v17, %v10735_v22  ;;  %v15546_v7 = vperm.slane %v718_v46, 3  ;;  %v10482_v62 = vor.u32 %v13731_v2, %v10479_v35 }
 0x128   :  { %v608_v42 = vsub.f32 1.5, %v607_v40  ;;  %v13791_v57 = vld [vmem:[%s24614_s6 + $0x2c4] sm:$0xf]  ;;  %v10610_v40 = vor.u32 %v13763_v55, %v10607_v53  ;;  %vm640_vm11 = vweird.f32 %v15468_v24  ;;  %v24775_v22 = vor.u32 %v15440_v23, %v15435_v18 }
 0x129   :  { %v15526_v15 = vpop.eup %14542  ;;  %v618_v60 = vsub.f32 1.5, %v617_v14  ;;  %v24772_v50 = vld [vmem:[#allocation5_spill] sm:$0xff]  ;;  %1641 = vmatpush.bf16.msra.mxu2 %v10622_v36  ;;  %v10722_v17 = vor.u32 %v13791_v57, %v10719_v11  ;;  %v580_v11 = vsub.f32 %v15050_v9, %v15259_v43 }
 0x12a   :  { %v625_v27 = vmul.f32 %v15526_v15, %v15428_v37  ;;  %v609_v3 = vmul.f32 %v15442_v49, %v608_v42  ;;  %vm631_vm10 = vweird.f32 %v15526_v15  ;;  %1670 = vmatpush.bf16.msra.mxu3 %v10750_v5  ;;  %1612 = vmatpush.bf16.msra.mxu1 %v24775_v22 }
 0x12b   :  { %v619_v14 = vmul.f32 %v15455_v30, %v618_v60  ;;  %v24773_v60 = vor.u32 %v15426_v19, %v15421_v31  ;;  %v24776_v19 = vsub.f32 %v15197_v26, %v15261_v29  ;;  %vm632_vm13 = vmor %vm630_vm7, %vm631_vm10 }
 0x12c   :  { %v14545_v34 = vpop.eup %14544  ;;  %v626_v45 = vmul.f32 %v15526_v15, %v625_v27  ;;  %v15555_v42 = vsel %vm612_vm8, %v15442_v49, %v609_v3  ;;  %v24774_v49 = vsub.f32 %v15194_v51, %v15259_v43 }
 0x12d   :  { %1750 = vmatpush.bf16.msrb.mxu2 %v10738_v16  ;;  %v635_v25 = vmul.f32 %v14545_v34, %v15468_v24  ;;  %1583 = vmatpush.bf16.msra.mxu0 %v24773_v60  ;;  %v15574_v46 = vsel %vm622_vm9, %v15455_v30, %v619_v14  ;;  %v644_v31 = vmul.f32 %v15555_v42, %v568_v41  ;;  %vm641_vm12 = vweird.f32 %v14545_v34 }
 0x12e   :  { %v672_v38 = vmul.f32 %v15555_v42, %v24774_v49  ;;  %v627_v36 = vmul.f32 0.5, %v626_v45  ;;  %1779 = vmatpush.bf16.msrb.mxu3 %v10866_v58  ;;  %v673_v9 = vmul.f32 %v15574_v46, %v24776_v19  ;;  %v648_v51 = vmul.f32 %v15555_v42, %v572_v12  ;;  %1721 = vmatpush.bf16.msrb.mxu1 %v10610_v40  ;;  %v24777_v58 = vld [vmem:[#allocation6_spill] sm:$0xff]  ;;  %vm642_vm14 = vmor %vm640_vm11, %vm641_vm12 }
 0x12f   :  { %v636_v39 = vmul.f32 %v14545_v34, %v635_v25  ;;  %v645_v0 = vmul.f32 %v15574_v46, %v569_v54  ;;  %v686_v2 = vmul.f32 %v15295_v48, %v644_v31  ;;  %v649_v18 = vmul.f32 %v15574_v46, %v573_v52 }
 0x130   :  { %v628_v30 = vsub.f32 1.5, %v627_v36  ;;  %v576_v23 = vsub.f32 %v24777_v58, %v15259_v43  ;;  %v690_v26 = vmul.f32 %v15295_v48, %v648_v51  ;;  %v656_v53 = vmul.f32 %v15555_v42, %v580_v11  ;;  %v13823_v58 = vld [vmem:[%s24614_s6 + $0x3c4] sm:$0xf] }
 0x131   :  { %1692 = vmatpush.bf16.msrb.mxu0 %v10482_v62  ;;  %1751 = vmatpush.bf16.msrb.mxu2 %v10722_v17  ;;  %v637_v41 = vmul.f32 0.5, %v636_v39  ;;  %v687_v35 = vmul.f32 %v15333_v21, %v645_v0  ;;  %v728_v62 = vadd.f32 %v15504_v20, %v686_v2  ;;  %v691_v54 = vmul.f32 %v15333_v21, %v649_v18 }
 0x132   :  { %v629_v12 = vmul.f32 %v15526_v15, %v628_v30  ;;  %v652_v5 = vmul.f32 %v15555_v42, %v576_v23  ;;  %v732_v57 = vadd.f32 %v15504_v20, %v690_v26  ;;  %v24778_v14 = vsub.f32 %v15248_v6, %v15297_v10  ;;  %v10847_v23 = vld [vmem:[%s24614_s6 + $0x3d0] sm:$0xf0] }
 0x133   :  { %v638_v52 = vsub.f32 1.5, %v637_v41  ;;  %v729_v55 = vadd.f32 %v15516_v59, %v687_v35  ;;  %v760_v3 = vmax.f32 %v728_v62, 0.0  ;;  %v733_v27 = vadd.f32 %v15516_v59, %v691_v54  ;;  %v24784_v26 = vld [vmem:[#allocation7_spill] sm:$0xff] }
 0x134   :  { %v15604_v16 = vsel %vm632_vm13, %v15526_v15, %v629_v12  ;;  %v694_v40 = vmul.f32 %v15295_v48, %v652_v5  ;;  %v764_v17 = vmax.f32 %v732_v57, 0.0  ;;  %v24779_v60 = vsub.f32 %v15018_v56, %v15297_v10  ;;  %v13727_v12 = vld [vmem:[%s24614_s6 + $0xc4] sm:$0xf]  ;;  %v10463_v62 = vld [vmem:[%s24614_s6 + $0xd0] sm:$0xf0] }
 0x135   :  { %v15612_v37 = vmul.f32 %v15604_v16, %v24778_v14  ;;  %v639_v45 = vmul.f32 %v14545_v34, %v638_v52  ;;  %v761_v25 = vmax.f32 %v729_v55, 0.0  ;;  %v765_v15 = vmax.f32 %v733_v27, 0.0  ;;  %v13759_v57 = vld [vmem:[%s24614_s6 + $0x1c4] sm:$0xf]  ;;  %v10591_v55 = vld [vmem:[%s24614_s6 + $0x1d0] sm:$0xf0] }
 0x136   :  { %v646_v11 = vmul.f32 %v15604_v16, %v24779_v60  ;;  %v24780_v49 = vsub.f32 %v15020_v61, %v15297_v10  ;;  %v698_v36 = vmul.f32 %v15295_v48, %v656_v53  ;;  %v15627_v22 = vmul.f32 %v15295_v48, %v672_v38 }
 0x137   :  { %v15629_v31 = vsel %vm642_vm14, %v14545_v34, %v639_v45  ;;  %v15631_v24 = vpack.c.bf16 %v764_v17, %v760_v3  ;;  %v736_v19 = vadd.f32 %v15504_v20, %v694_v40  ;;  %v24781_v56 = vsub.f32 %v15251_v28, %v15335_v47 }
 0x138   :  { %v650_v6 = vmul.f32 %v15604_v16, %v24780_v49  ;;  %v15640_v61 = vpack.c.bf16 %v765_v15, %v761_v25  ;;  %v688_v51 = vmul.f32 %v15413_v63, %v646_v11  ;;  %v24782_v34 = vsub.f32 %v15027_v4, %v15335_v47 }
 0x139   :  { %v15638_v39 = vmul.f32 %v15629_v31, %v24781_v56  ;;  %1584 = vmatmul.bf16.vlgmr.msra.gmra.mxu0 %v15631_v24  ;;  %v24783_v30 = vsub.f32 %v24772_v50, %v15335_v47  ;;  %v740_v2 = vadd.f32 %v15504_v20, %v698_v36  ;;  %v768_v18 = vmax.f32 %v736_v19, 0.0  ;;  %v13787_v56 = vld [vmem:[%s24614_s6 + $0x2a4] sm:$0xf] }
 0x13a   :  { %v692_v0 = vmul.f32 %v15413_v63, %v650_v6  ;;  %v647_v38 = vmul.f32 %v15629_v31, %v24782_v34  ;;  %v15661_v4 = vmul.f32 %v15333_v21, %v673_v9  ;;  %1613 = vmatmul.bf16.vlgmr.msra.gmra.mxu1 %v15640_v61  ;;  %v730_v50 = vadd.f32 %v15530_v13, %v688_v51  ;;  %v10703_v51 = vld [vmem:[%s24614_s6 + $0x2b0] sm:$0xf0] }
 0x13b   :  { %v651_v28 = vmul.f32 %v15629_v31, %v24783_v30  ;;  %v577_v35 = vsub.f32 %v24784_v26, %v15261_v29  ;;  %v772_v5 = vmax.f32 %v740_v2, 0.0  ;;  %v581_v52 = vsub.f32 %v15053_v33, %v15261_v29  ;;  %v10831_v30 = vld [vmem:[%s24614_s6 + $0x3b0] sm:$0xf0] }
 0x13c   :  { %v734_v41 = vadd.f32 %v15530_v13, %v692_v0  ;;  %v689_v9 = vmul.f32 %v15416_v44, %v647_v38  ;;  %v762_v53 = vmax.f32 %v730_v50, 0.0  ;;  %v10850_v40 = vor.u32 %v13823_v58, %v10847_v23  ;;  %v10447_v23 = vld [vmem:[%s24614_s6 + $0xb0] sm:$0xf0]  ;;  %v13755_v50 = vld [vmem:[%s24614_s6 + $0x1a4] sm:$0xf] }
 0x13d   :  { %v693_v54 = vmul.f32 %v15416_v44, %v651_v28  ;;  %v653_v27 = vmul.f32 %v15574_v46, %v577_v35  ;;  %v15687_v17 = vpack.c.bf16 %v772_v5, %v768_v18  ;;  %v657_v33 = vmul.f32 %v15574_v46, %v581_v52  ;;  %v13723_v28 = vld [vmem:[%s24614_s6 + $0xa4] sm:$0xf] }
 0x13e   :  { %v766_v3 = vmax.f32 %v734_v41, 0.0  ;;  %v731_v14 = vadd.f32 %v15546_v7, %v689_v9  ;;  %1780 = vmatpush.bf16.msrb.mxu3 %v10850_v40  ;;  %v10466_v60 = vor.u32 %v13727_v12, %v10463_v62  ;;  %v10594_v11 = vor.u32 %v13759_v57, %v10591_v55  ;;  %v10575_v41 = vld [vmem:[%s24614_s6 + $0x1b0] sm:$0xf0]  ;;  %v13783_v9 = vld [vmem:[%s24614_s6 + $0x284] sm:$0xf] }
 0x13f   :  { %v735_v45 = vadd.f32 %v15546_v7, %v693_v54  ;;  %v695_v15 = vmul.f32 %v15333_v21, %v653_v27  ;;  %v699_v36 = vmul.f32 %v15333_v21, %v657_v33  ;;  %v578_v19 = vsub.f32 %v15044_v8, %v15297_v10  ;;  %v13819_v8 = vld [vmem:[%s24614_s6 + $0x3a4] sm:$0xf]  ;;  %v10687_v54 = vld [vmem:[%s24614_s6 + $0x290] sm:$0xf0] }
 0x140   :  { %v15690_v25 = vpack.c.bf16 %v766_v3, %v762_v53  ;;  %v763_v49 = vmax.f32 %v731_v14, 0.0  ;;  %1693 = vmatpush.bf16.msrb.mxu0 %v10466_v60  ;;  %v582_v34 = vsub.f32 %v15082_v1, %v15297_v10  ;;  %v579_v38 = vsub.f32 %v15047_v32, %v15335_v47  ;;  %1722 = vmatpush.bf16.msrb.mxu1 %v10594_v11  ;;  %v24785_v32 = vld [vmem:[#allocation8_spill] sm:$0xff] }
 0x141   :  { %v767_v6 = vmax.f32 %v735_v45, 0.0  ;;  %v737_v0 = vadd.f32 %v15516_v59, %v695_v15  ;;  %v741_v18 = vadd.f32 %v15516_v59, %v699_v36  ;;  %v654_v1 = vmul.f32 %v15604_v16, %v578_v19  ;;  %v13815_v36 = vld [vmem:[%s24614_s6 + $0x384] sm:$0xf]  ;;  %v10815_v19 = vld [vmem:[%s24614_s6 + $0x390] sm:$0xf0] }
 0x142   :  { %1642 = vmatmul.bf16.vlgmr.msra.gmra.mxu2 %v15690_v25  ;;  %v583_v58 = vsub.f32 %v24785_v32, %v15335_v47  ;;  %v658_v35 = vmul.f32 %v15604_v16, %v582_v34  ;;  %v655_v12 = vmul.f32 %v15629_v31, %v579_v38  ;;  %v10706_v62 = vor.u32 %v13787_v56, %v10703_v51  ;;  %v24788_v38 = vld [vmem:[#allocation10_spill] sm:$0xff] }
 0x143   :  { %v15717_v2 = vpack.c.bf16 %v767_v6, %v763_v49  ;;  %v769_v26 = vmax.f32 %v737_v0, 0.0  ;;  %v773_v5 = vmax.f32 %v741_v18, 0.0  ;;  %v696_v52 = vmul.f32 %v15413_v63, %v654_v1  ;;  %v24786_v49 = vld [vmem:[#allocation9_spill] sm:$0xff] }
 0x144   :  { %v659_v57 = vmul.f32 %v15629_v31, %v583_v58  ;;  %v10834_v55 = vor.u32 %v13819_v8, %v10831_v30  ;;  %v700_v53 = vmul.f32 %v15413_v63, %v658_v35  ;;  %v697_v3 = vmul.f32 %v15416_v44, %v655_v12  ;;  %1752 = vmatpush.bf16.msrb.mxu2 %v10706_v62  ;;  %v24787_v0 = vld [vmem:[#allocation13_spill] sm:$0xff]  ;;  %v24789_v58 = vld [vmem:[#allocation14_spill] sm:$0xff] }
 0x145   :  { %1671 = vmatmul.bf16.vlgmr.msra.gmra.mxu3 %v15717_v2  ;;  %v10450_v27 = vor.u32 %v13723_v28, %v10447_v23  ;;  %v10578_v40 = vor.u32 %v13755_v50, %v10575_v41  ;;  %v15745_v14 = vpack.c.bf16 %v773_v5, %v769_v26  ;;  %v738_v45 = vadd.f32 %v15530_v13, %v696_v52  ;;  %v13719_v30 = vld [vmem:[%s24614_s6 + $0x84] sm:$0xf]  ;;  %v10431_v28 = vld [vmem:[%s24614_s6 + $0x90] sm:$0xf0] }
 0x146   :  { %v701_v33 = vmul.f32 %v15416_v44, %v659_v57  ;;  %1781 = vmatpush.bf16.msrb.mxu3 %v10834_v55  ;;  %v10690_v15 = vor.u32 %v13783_v9, %v10687_v54  ;;  %v742_v60 = vadd.f32 %v15530_v13, %v700_v53  ;;  %v739_v11 = vadd.f32 %v15546_v7, %v697_v3  ;;  %v13751_v50 = vld [vmem:[%s24614_s6 + $0x184] sm:$0xf]  ;;  %v10559_v41 = vld [vmem:[%s24614_s6 + $0x190] sm:$0xf0] }
 0x147   :  { %1694 = vmatpush.bf16.msrb.mxu0 %v10450_v27  ;;  %1723 = vmatpush.bf16.msrb.mxu1 %v10578_v40  ;;  %v584_v6 = vsub.f32 %v24786_v49, %v15259_v43  ;;  %v770_v56 = vmax.f32 %v738_v45, 0.0  ;;  %v588_v34 = vsub.f32 %v24787_v0, %v15259_v43  ;;  %v585_v8 = vsub.f32 %v24788_v38, %v15261_v29  ;;  %v24790_v45 = vld [vmem:[#allocation11_spill] sm:$0xff] }
 0x148   :  { %v743_v51 = vadd.f32 %v15546_v7, %v701_v33  ;;  %v774_v18 = vmax.f32 %v742_v60, 0.0  ;;  %v771_v1 = vmax.f32 %v739_v11, 0.0  ;;  %1753 = vmatpush.bf16.msrb.mxu2 %v10690_v15  ;;  %v589_v23 = vsub.f32 %v24789_v58, %v15261_v29  ;;  %v24791_v15 = vld [vmem:[#allocation15_spill] sm:$0xff] }
 0x149   :  { %v660_v32 = vmul.f32 %v15555_v42, %v584_v6  ;;  %1589 = vmatmul.bf16.gmra.mxu0 %v15687_v17  ;;  %v664_v35 = vmul.f32 %v15555_v42, %v588_v34  ;;  %v661_v12 = vmul.f32 %v15574_v46, %v585_v8  ;;  %v10818_v62 = vor.u32 %v13815_v36, %v10815_v19  ;;  %v24792_v6 = vld [vmem:[#allocation12_spill] sm:$0xff]  ;;  %v10671_v0 = vld [vmem:[%s24614_s6 + $0x270] sm:$0xf0]  ;;  %v13811_v34 = vld [vmem:[%s24614_s6 + $0x364] sm:$0xf] }
 0x14a   :  { %v775_v26 = vmax.f32 %v743_v51, 0.0  ;;  %1618 = vmatmul.bf16.gmra.mxu1 %v15745_v14  ;;  %v15783_v9 = vpack.c.bf16 %v774_v18, %v770_v56  ;;  %v665_v5 = vmul.f32 %v15574_v46, %v589_v23  ;;  %v10434_v52 = vor.u32 %v13719_v30, %v10431_v28  ;;  %v24793_v19 = vld [vmem:[#allocation16_spill] sm:$0xff]  ;;  %v13779_v51 = vld [vmem:[%s24614_s6 + $0x264] sm:$0xf]  ;;  %v10799_v18 = vld [vmem:[%s24614_s6 + $0x370] sm:$0xf0] }
 0x14b   :  { %v702_v54 = vmul.f32 %v15295_v48, %v660_v32  ;;  %v706_v55 = vmul.f32 %v15295_v48, %v664_v35  ;;  %v703_v53 = vmul.f32 %v15333_v21, %v661_v12  ;;  %1782 = vmatpush.bf16.msrb.mxu3 %v10818_v62  ;;  %v10562_v3 = vor.u32 %v13751_v50, %v10559_v41  ;;  %v10415_v32 = vld [vmem:[%s24614_s6 + $0x70] sm:$0xf0]  ;;  %v13747_v41 = vld [vmem:[%s24614_s6 + $0x164] sm:$0xf] }
 0x14c   :  { %v15787_v57 = vpack.c.bf16 %v775_v26, %v771_v1  ;;  %v707_v40 = vmul.f32 %v15333_v21, %v665_v5  ;;  %1695 = vmatpush.bf16.msrb.mxu0 %v10434_v52  ;;  %v586_v33 = vsub.f32 %v24790_v45, %v15297_v10  ;;  %v590_v60 = vsub.f32 %v24791_v15, %v15297_v10  ;;  %v13715_v1 = vld [vmem:[%s24614_s6 + $0x64] sm:$0xf]  ;;  %v10543_v26 = vld [vmem:[%s24614_s6 + $0x170] sm:$0xf0] }
 0x14d   :  { %v744_v27 = vadd.f32 %v15504_v20, %v702_v54  ;;  %v748_v11 = vadd.f32 %v15504_v20, %v706_v55  ;;  %v745_v49 = vadd.f32 %v15516_v59, %v703_v53  ;;  %1724 = vmatpush.bf16.msrb.mxu1 %v10562_v3  ;;  %v587_v36 = vsub.f32 %v24792_v6, %v15335_v47  ;;  %v13775_v5 = vld [vmem:[%s24614_s6 + $0x244] sm:$0xf]  ;;  %v10655_v52 = vld [vmem:[%s24614_s6 + $0x250] sm:$0xf0] }
 0x14e   :  { %v591_v56 = vsub.f32 %v24793_v19, %v15335_v47  ;;  %v15814_v38 = vmul.f32 %v15413_v63, %v15612_v37  ;;  %v749_v8 = vadd.f32 %v15516_v59, %v707_v40  ;;  %v662_v30 = vmul.f32 %v15604_v16, %v586_v33 }
 0x14f   :  { %v666_v28 = vmul.f32 %v15604_v16, %v590_v60  ;;  %v776_v37 = vmax.f32 %v744_v27, 0.0  ;;  %v780_v58 = vmax.f32 %v748_v11, 0.0  ;;  %v663_v23 = vmul.f32 %v15629_v31, %v587_v36  ;;  %v10783_v36 = vld [vmem:[%s24614_s6 + $0x350] sm:$0xf0] }
 0x150   :  { %v667_v50 = vmul.f32 %v15629_v31, %v591_v56  ;;  %v777_v35 = vmax.f32 %v745_v49, 0.0  ;;  %v704_v12 = vmul.f32 %v15413_v63, %v662_v30  ;;  %v10674_v54 = vor.u32 %v13779_v51, %v10671_v0  ;;  %v24794_v56 = vld [vmem:[#allocation17_spill] sm:$0xff] }
 0x151   :  { %v708_v62 = vmul.f32 %v15413_v63, %v666_v28  ;;  %v781_v55 = vmax.f32 %v749_v8, 0.0  ;;  %v705_v53 = vmul.f32 %v15416_v44, %v663_v23  ;;  %v10802_v27 = vor.u32 %v13811_v34, %v10799_v18  ;;  %v13711_v34 = vld [vmem:[%s24614_s6 + $0x44] sm:$0xf]  ;;  %v10399_v8 = vld [vmem:[%s24614_s6 + $0x50] sm:$0xf0] }
 0x152   :  { %1647 = vmatmul.bf16.gmra.mxu2 %v15783_v9  ;;  %v709_v3 = vmul.f32 %v15416_v44, %v667_v50  ;;  %v717_v40 = vmul.f32 %v15416_v44, %v15638_v39  ;;  %v15850_v45 = vadd.f32 %v15530_v13, %v704_v12  ;;  %v10418_v15 = vor.u32 %v13715_v1, %v10415_v32  ;;  %v13807_v39 = vld [vmem:[%s24614_s6 + $0x344] sm:$0xf]  ;;  %v10527_v32 = vld [vmem:[%s24614_s6 + $0x150] sm:$0xf0] }
 0x153   :  { %v15853_v33 = vadd.f32 %v15530_v13, %v708_v62  ;;  %1754 = vmatpush.bf16.msrb.mxu2 %v10674_v54  ;;  %v15857_v60 = vadd.f32 %v15546_v7, %v705_v53  ;;  %v10546_v49 = vor.u32 %v13747_v41, %v10543_v26  ;;  %v10658_v6 = vor.u32 %v13775_v5, %v10655_v52  ;;  %v10639_v41 = vld [vmem:[%s24614_s6 + $0x230] sm:$0xf0] }
 0x154   :  { %v15860_v11 = vadd.f32 %v15546_v7, %v709_v3  ;;  %v15868_v19 = vpack.c.bf16 %v780_v58, %v776_v37  ;;  %1783 = vmatpush.bf16.msrb.mxu3 %v10802_v27  ;;  %1696 = vmatpush.bf16.msrb.mxu0 %v10418_v15  ;;  %v592_v51 = vsub.f32 %v24794_v56, %v15259_v43  ;;  %v778_v28 = vmax.f32 %v15850_v45, 0.0  ;;  %v24795_v43 = vld [vmem:[#allocation18_spill] sm:$0xff]  ;;  %v24796_v52 = vld [vmem:[#allocation19_spill] sm:$0xff]  ;;  %v24797_v27 = vld [vmem:[#allocation20_spill] sm:$0xff] }
 0x155   :  { %1676 = vmatmul.bf16.gmra.mxu3 %v15787_v57  ;;  %v15874_v0 = vadd.f32 %v15504_v20, %v15627_v22  ;;  %v15882_v30 = vpack.c.bf16 %v781_v55, %v777_v35  ;;  %v782_v18 = vmax.f32 %v15853_v33, 0.0  ;;  %1725 = vmatpush.bf16.msrb.mxu1 %v10546_v49  ;;  %v593_v1 = vsub.f32 %v24795_v43, %v15261_v29  ;;  %v13743_v22 = vld [vmem:[%s24614_s6 + $0x144] sm:$0xf]  ;;  %v10383_v3 = vld [vmem:[%s24614_s6 + $0x30] sm:$0xf0] }
 0x156   :  { %v779_v37 = vmax.f32 %v15857_v60, 0.0  ;;  %v668_v58 = vmul.f32 %v15555_v42, %v592_v51  ;;  %v757_v23 = vadd.f32 %v15516_v59, %v15661_v4  ;;  %v10786_v50 = vor.u32 %v13807_v39, %v10783_v36  ;;  %v13771_v29 = vld [vmem:[%s24614_s6 + $0x224] sm:$0xf]  ;;  %v10767_v4 = vld [vmem:[%s24614_s6 + $0x330] sm:$0xf0] }
 0x157   :  { %1755 = vmatpush.bf16.msrb.mxu2 %v10658_v6  ;;  %v783_v26 = vmax.f32 %v15860_v11, 0.0  ;;  %v788_v35 = vmax.f32 %v15874_v0, 0.0  ;;  %v669_v12 = vmul.f32 %v15574_v46, %v593_v1  ;;  %v10402_v62 = vor.u32 %v13711_v34, %v10399_v8  ;;  %v13803_v42 = vld [vmem:[%s24614_s6 + $0x324] sm:$0xf]  ;;  %v10511_v15 = vld [vmem:[%s24614_s6 + $0x130] sm:$0xf0] }
 0x158   :  { %v710_v54 = vmul.f32 %v15295_v48, %v668_v58  ;;  %1784 = vmatpush.bf16.msrb.mxu3 %v10786_v50  ;;  %v10530_v5 = vor.u32 %v13743_v22, %v10527_v32  ;;  %v594_v55 = vsub.f32 %v24796_v52, %v15297_v10  ;;  %v758_v53 = vadd.f32 %v15530_v13, %v15814_v38  ;;  %v13707_v46 = vld [vmem:[%s24614_s6 + $0x24] sm:$0xf]  ;;  %v10623_v39 = vld [vmem:[%s24614_s6 + $0x210] sm:$0xf0]  ;;  %v10869_v60 = vld [vmem:[%s24614_s6 + $0x3e8] sm:$0xf] }
 0x159   :  { %1594 = vmatmul.bf16.gmra.mxu0 %v15868_v19  ;;  %v711_v48 = vmul.f32 %v15333_v21, %v669_v12  ;;  %v595_v45 = vsub.f32 %v24797_v27, %v15335_v47  ;;  %v759_v10 = vadd.f32 %v15546_v7, %v717_v40  ;;  %v10642_v33 = vor.u32 %v13771_v29, %v10639_v41  ;;  %v13739_v38 = vld [vmem:[%s24614_s6 + $0x124] sm:$0xf]  ;;  %v10751_v0 = vld [vmem:[%s24614_s6 + $0x310] sm:$0xf0]  ;;  %v13734_v52 = vld [vmem:[%s24614_s6 + $0xf4] sm:$0xf0] }
 0x15a   :  { %v13703_v11 = vld [vmem:[%s24614_s6 + $0x4] sm:$0xf]  ;;  %1623 = vmatmul.bf16.gmra.mxu1 %v15882_v30  ;;  %v752_v21 = vadd.f32 %v15504_v20, %v710_v54  ;;  %v789_v47 = vmax.f32 %v757_v23, 0.0  ;;  %1697 = vmatpush.bf16.msrb.mxu0 %v10402_v62  ;;  %v670_v40 = vmul.f32 %v15604_v16, %v594_v55  ;;  %v10770_v49 = vor.u32 %v13803_v42, %v10767_v4  ;;  %v10367_v16 = vld [vmem:[%s24614_s6 + $0x10] sm:$0xf0] }
 0x15b   :  { %v13767_v6 = vld [vmem:[%s24614_s6 + $0x204] sm:$0xf]  ;;  %v753_v36 = vadd.f32 %v15516_v59, %v711_v48  ;;  %1726 = vmatpush.bf16.msrb.mxu1 %v10530_v5  ;;  %v671_v56 = vmul.f32 %v15629_v31, %v595_v45  ;;  %1756 = vmatpush.bf16.msrb.mxu2 %v10642_v33  ;;  %v10386_v20 = vor.u32 %v13707_v46, %v10383_v3  ;;  %v10495_v1 = vld [vmem:[%s24614_s6 + $0x110] sm:$0xf0]  ;;  %v790_v32 = vmax.f32 %v758_v53, 0.0 }
 0x15c   :  { %v13799_v51 = vld [vmem:[%s24614_s6 + $0x304] sm:$0xf]  ;;  %v15958_v34 = vpack.c.bf16 %v782_v18, %v778_v28  ;;  %v784_v59 = vmax.f32 %v752_v21, 0.0  ;;  %v712_v8 = vmul.f32 %v15413_v63, %v670_v40  ;;  %1785 = vmatpush.bf16.msrb.mxu3 %v10770_v49  ;;  %v10514_v31 = vor.u32 %v13739_v38, %v10511_v15  ;;  %v13798_v54 = vld [vmem:[%s24614_s6 + $0x2f4] sm:$0xf0] }
 0x15d   :  { %v13735_v43 = vld [vmem:[%s24614_s6 + $0x104] sm:$0xf]  ;;  %v785_v22 = vmax.f32 %v753_v36, 0.0  ;;  %v713_v58 = vmul.f32 %v15416_v44, %v671_v56  ;;  %v10626_v23 = vor.u32 %v13767_v6, %v10623_v39  ;;  %v10370_v63 = vor.u32 %v13703_v11, %v10367_v16  ;;  %v10485_v5 = vld [vmem:[%s24614_s6 + $0xe8] sm:$0xf] }
 0x15e   :  { %v15968_v28 = vpack.c.bf16 %v788_v35, %v784_v59  ;;  %v754_v18 = vadd.f32 %v15530_v13, %v712_v8  ;;  %1698 = vmatpush.bf16.msrb.mxu0 %v10386_v20  ;;  %v10754_v50 = vor.u32 %v13799_v51, %v10751_v0  ;;  %v791_v12 = vmax.f32 %v759_v10, 0.0  ;;  %v10613_v46 = vld [vmem:[%s24614_s6 + $0x1e8] sm:$0xf]  ;;  %v13766_v3 = vld [vmem:[%s24614_s6 + $0x1f4] sm:$0xf0] }
 0x15f   :  { %v15971_v29 = vpack.c.bf16 %v789_v47, %v785_v22  ;;  %v755_v41 = vadd.f32 %v15546_v7, %v713_v58  ;;  %1727 = vmatpush.bf16.msrb.mxu1 %v10514_v31  ;;  %v10498_v62 = vor.u32 %v13735_v43, %v10495_v1  ;;  %1757 = vmatpush.bf16.msrb.mxu2 %v10626_v23  ;;  %v10741_v7 = vld [vmem:[%s24614_s6 + $0x2e8] sm:$0xf]  ;;  %v13794_v45 = vld [vmem:[%s24614_s6 + $0x2d4] sm:$0xf0] }
 0x160   :  { %v786_v42 = vmax.f32 %v754_v18, 0.0  ;;  %1786 = vmatpush.bf16.msrb.mxu3 %v10754_v50  ;;  %v15977_v44 = vpack.c.bf16 %v783_v26, %v779_v37  ;;  %v10742_v37 = vor.u32 %v13798_v54, %v10741_v7  ;;  %v13830_v26 = vld [vmem:[%s24614_s6 + $0x3f4] sm:$0xf0]  ;;  %v10486_v53 = vor.u32 %v13734_v52, %v10485_v5  ;;  %v10725_v48 = vld [vmem:[%s24614_s6 + $0x2c8] sm:$0xf] }
 0x161   :  { %v787_v13 = vmax.f32 %v755_v41, 0.0  ;;  %v10870_v55 = vor.u32 %v13830_v26, %v10869_v60  ;;  %v10614_v27 = vor.u32 %v13766_v3, %v10613_v46  ;;  %v10726_v10 = vor.u32 %v13794_v45, %v10725_v48  ;;  %v10853_v33 = vld [vmem:[%s24614_s6 + $0x3c8] sm:$0xf]  ;;  %v13826_v38 = vld [vmem:[%s24614_s6 + $0x3d4] sm:$0xf0] }
 0x162   :  { %1652 = vmatmul.bf16.gmra.mxu2 %v15958_v34  ;;  %v15979_v35 = vpack.c.bf16 %v790_v32, %v786_v42  ;;  %1699 = vmatpush.bf16.msrb.mxu0 %v10370_v63  ;;  %v10469_v15 = vld [vmem:[%s24614_s6 + $0xc8] sm:$0xf]  ;;  %v10854_v11 = vor.u32 %v13826_v38, %v10853_v33  ;;  %v13730_v21 = vld [vmem:[%s24614_s6 + $0xd4] sm:$0xf0] }
 0x163   :  { %v15982_v4 = vpack.c.bf16 %v791_v12, %v787_v13  ;;  %1728 = vmatpush.bf16.msrb.mxu1 %v10498_v62  ;;  %1866 = vmatpush.bf16.msra.mxu2 %v10742_v37  ;;  %v10597_v47 = vld [vmem:[%s24614_s6 + $0x1c8] sm:$0xf]  ;;  %v13762_v40 = vld [vmem:[%s24614_s6 + $0x1d4] sm:$0xf0]  ;;  %v10470_v49 = vor.u32 %v13730_v21, %v10469_v15 }
 0x164   :  { %1895 = vmatpush.bf16.msra.mxu3 %v10870_v55  ;;  %v10598_v6 = vor.u32 %v13762_v40, %v10597_v47  ;;  %v10709_v39 = vld [vmem:[%s24614_s6 + $0x2a8] sm:$0xf]  ;;  %v13790_v36 = vld [vmem:[%s24614_s6 + $0x2b4] sm:$0xf0] }
 0x165   :  { %1681 = vmatmul.bf16.gmra.mxu3 %v15977_v44  ;;  %v10837_v56 = vld [vmem:[%s24614_s6 + $0x3a8] sm:$0xf]  ;;  %v10710_v20 = vor.u32 %v13790_v36, %v10709_v39  ;;  %v13822_v16 = vld [vmem:[%s24614_s6 + $0x3b4] sm:$0xf0] }
 0x166   :  { %1808 = vmatpush.bf16.msra.mxu0 %v10486_v53  ;;  %v10453_v51 = vld [vmem:[%s24614_s6 + $0xa8] sm:$0xf]  ;;  %v13726_v0 = vld [vmem:[%s24614_s6 + $0xb4] sm:$0xf0]  ;;  %v10838_v59 = vor.u32 %v13822_v16, %v10837_v56 }
 0x167   :  { %1837 = vmatpush.bf16.msra.mxu1 %v10614_v27  ;;  %1867 = vmatpush.bf16.msra.mxu2 %v10726_v10  ;;  %v10454_v8 = vor.u32 %v13726_v0, %v10453_v51  ;;  %v10581_v31 = vld [vmem:[%s24614_s6 + $0x1a8] sm:$0xf]  ;;  %v13758_v43 = vld [vmem:[%s24614_s6 + $0x1b4] sm:$0xf0] }
 0x168   :  { %1896 = vmatpush.bf16.msra.mxu3 %v10854_v11  ;;  %v10693_v1 = vld [vmem:[%s24614_s6 + $0x288] sm:$0xf]  ;;  %v10582_v22 = vor.u32 %v13758_v43, %v10581_v31  ;;  %v13786_v32 = vld [vmem:[%s24614_s6 + $0x294] sm:$0xf0] }
 0x169   :  { %1599 = vmatmul.bf16.gmra.mxu0 %v15968_v28  ;;  %v10694_v58 = vor.u32 %v13786_v32, %v10693_v1  ;;  %v10821_v23 = vld [vmem:[%s24614_s6 + $0x388] sm:$0xf]  ;;  %v13818_v18 = vld [vmem:[%s24614_s6 + $0x394] sm:$0xf0] }
 0x16a   :  { %1628 = vmatmul.bf16.gmra.mxu1 %v15971_v29  ;;  %1809 = vmatpush.bf16.msra.mxu0 %v10470_v49  ;;  %v10437_v63 = vld [vmem:[%s24614_s6 + $0x88] sm:$0xf]  ;;  %v10822_v50 = vor.u32 %v13818_v18, %v10821_v23  ;;  %v13722_v41 = vld [vmem:[%s24614_s6 + $0x94] sm:$0xf0] }
 0x16b   :  { %1838 = vmatpush.bf16.msra.mxu1 %v10598_v6  ;;  %1868 = vmatpush.bf16.msra.mxu2 %v10710_v20  ;;  %v10565_v12 = vld [vmem:[%s24614_s6 + $0x188] sm:$0xf]  ;;  %v13754_v62 = vld [vmem:[%s24614_s6 + $0x194] sm:$0xf0]  ;;  %v10438_v42 = vor.u32 %v13722_v41, %v10437_v63 }
 0x16c   :  { %1897 = vmatpush.bf16.msra.mxu3 %v10838_v59  ;;  %v10566_v13 = vor.u32 %v13754_v62, %v10565_v12  ;;  %v10677_v7 = vld [vmem:[%s24614_s6 + $0x268] sm:$0xf]  ;;  %v13782_v54 = vld [vmem:[%s24614_s6 + $0x274] sm:$0xf0] }
 0x16d   :  { %v10805_v60 = vld [vmem:[%s24614_s6 + $0x368] sm:$0xf]  ;;  %v10678_v37 = vor.u32 %v13782_v54, %v10677_v7  ;;  %v13814_v26 = vld [vmem:[%s24614_s6 + $0x374] sm:$0xf0]  ;;  %v13796_v7 = vld [vmem:[%s24614_s6 + $0x2ec] sm:$0xf] }
 0x16e   :  { %1810 = vmatpush.bf16.msra.mxu0 %v10454_v8  ;;  %v10421_v5 = vld [vmem:[%s24614_s6 + $0x68] sm:$0xf]  ;;  %v13718_v52 = vld [vmem:[%s24614_s6 + $0x74] sm:$0xf0]  ;;  %v10806_v55 = vor.u32 %v13814_v26, %v10805_v60  ;;  %v10743_v54 = vld [vmem:[%s24614_s6 + $0x2f8] sm:$0xf0] }
 0x16f   :  { %1839 = vmatpush.bf16.msra.mxu1 %v10582_v22  ;;  %1869 = vmatpush.bf16.msra.mxu2 %v10694_v58  ;;  %v10422_v53 = vor.u32 %v13718_v52, %v10421_v5  ;;  %v10549_v46 = vld [vmem:[%s24614_s6 + $0x168] sm:$0xf]  ;;  %v13750_v3 = vld [vmem:[%s24614_s6 + $0x174] sm:$0xf0]  ;;  %v13828_v60 = vld [vmem:[%s24614_s6 + $0x3ec] sm:$0xf] }
 0x170   :  { %1898 = vmatpush.bf16.msra.mxu3 %v10822_v50  ;;  %v10661_v48 = vld [vmem:[%s24614_s6 + $0x248] sm:$0xf]  ;;  %v10550_v27 = vor.u32 %v13750_v3, %v10549_v46  ;;  %v13778_v45 = vld [vmem:[%s24614_s6 + $0x254] sm:$0xf0]  ;;  %v10871_v26 = vld [vmem:[%s24614_s6 + $0x3f8] sm:$0xf0] }
 0x171   :  { %v10662_v10 = vor.u32 %v13778_v45, %v10661_v48  ;;  %v10789_v33 = vld [vmem:[%s24614_s6 + $0x348] sm:$0xf]  ;;  %v13810_v38 = vld [vmem:[%s24614_s6 + $0x354] sm:$0xf0]  ;;  %v10874_v5 = vor.u32 %v13828_v60, %v10871_v26  ;;  %v13732_v52 = vld [vmem:[%s24614_s6 + $0xec] sm:$0xf] }
 0x172   :  { %1657 = vmatmul.bf16.gmra.mxu2 %v15979_v35  ;;  %1811 = vmatpush.bf16.msra.mxu0 %v10438_v42  ;;  %v10405_v15 = vld [vmem:[%s24614_s6 + $0x48] sm:$0xf]  ;;  %v10790_v11 = vor.u32 %v13810_v38, %v10789_v33  ;;  %v13714_v21 = vld [vmem:[%s24614_s6 + $0x54] sm:$0xf0]  ;;  %v10615_v3 = vld [vmem:[%s24614_s6 + $0x1f8] sm:$0xf0] }
 0x173   :  { %1840 = vmatpush.bf16.msra.mxu1 %v10566_v13  ;;  %1870 = vmatpush.bf16.msra.mxu2 %v10678_v37  ;;  %v10533_v47 = vld [vmem:[%s24614_s6 + $0x148] sm:$0xf]  ;;  %v13746_v40 = vld [vmem:[%s24614_s6 + $0x154] sm:$0xf0]  ;;  %v10406_v49 = vor.u32 %v13714_v21, %v10405_v15  ;;  %v10746_v37 = vor.u32 %v13796_v7, %v10743_v54  ;;  %v13792_v48 = vld [vmem:[%s24614_s6 + $0x2cc] sm:$0xf] }
 0x174   :  { %1899 = vmatpush.bf16.msra.mxu3 %v10806_v55  ;;  %v10534_v6 = vor.u32 %v13746_v40, %v10533_v47  ;;  %v10645_v39 = vld [vmem:[%s24614_s6 + $0x228] sm:$0xf]  ;;  %v13774_v36 = vld [vmem:[%s24614_s6 + $0x234] sm:$0xf0]  ;;  %v10487_v55 = vld [vmem:[%s24614_s6 + $0xf8] sm:$0xf0] }
 0x175   :  { %1686 = vmatmul.bf16.gmra.mxu3 %v15982_v4  ;;  %v10773_v56 = vld [vmem:[%s24614_s6 + $0x328] sm:$0xf]  ;;  %v10646_v20 = vor.u32 %v13774_v36, %v10645_v39  ;;  %v13806_v16 = vld [vmem:[%s24614_s6 + $0x334] sm:$0xf0]  ;;  %v10490_v46 = vor.u32 %v13732_v52, %v10487_v55  ;;  %v13824_v33 = vld [vmem:[%s24614_s6 + $0x3cc] sm:$0xf] }
 0x176   :  { %1812 = vmatpush.bf16.msra.mxu0 %v10422_v53  ;;  %v10389_v51 = vld [vmem:[%s24614_s6 + $0x28] sm:$0xf]  ;;  %v13710_v0 = vld [vmem:[%s24614_s6 + $0x34] sm:$0xf0]  ;;  %v10774_v59 = vor.u32 %v13806_v16, %v10773_v56  ;;  %v13764_v53 = vld [vmem:[%s24614_s6 + $0x1ec] sm:$0xf] }
 0x177   :  { %1841 = vmatpush.bf16.msra.mxu1 %v10550_v27  ;;  %1871 = vmatpush.bf16.msra.mxu2 %v10662_v10  ;;  %v10390_v8 = vor.u32 %v13710_v0, %v10389_v51  ;;  %v10517_v31 = vld [vmem:[%s24614_s6 + $0x128] sm:$0xf]  ;;  %v13742_v43 = vld [vmem:[%s24614_s6 + $0x134] sm:$0xf0]  ;;  %v10727_v27 = vld [vmem:[%s24614_s6 + $0x2d8] sm:$0xf0]  ;;  %v10618_v45 = vor.u32 %v13764_v53, %v10615_v3 }
 0x178   :  { %1900 = vmatpush.bf16.msra.mxu3 %v10790_v11  ;;  %v10518_v1 = vor.u32 %v13742_v43, %v10517_v31  ;;  %v10373_v22 = vld [vmem:[%s24614_s6 + $0x8] sm:$0xf]  ;;  %v13706_v32 = vld [vmem:[%s24614_s6 + $0x14] sm:$0xf0]  ;;  %v10730_v10 = vor.u32 %v13792_v48, %v10727_v27  ;;  %v10855_v38 = vld [vmem:[%s24614_s6 + $0x3d8] sm:$0xf0] }
 0x179   :  { %1700 = vmatmul.bf16.vlgmr.msrb.gmra.mxu0 %v15631_v24  ;;  %v10501_v58 = vld [vmem:[%s24614_s6 + $0x108] sm:$0xf]  ;;  %v10374_v23 = vor.u32 %v13706_v32, %v10373_v22  ;;  %v13738_v18 = vld [vmem:[%s24614_s6 + $0x114] sm:$0xf0]  ;;  %v10858_v15 = vor.u32 %v13824_v33, %v10855_v38  ;;  %v13728_v11 = vld [vmem:[%s24614_s6 + $0xcc] sm:$0xf] }
 0x17a   :  { %1729 = vmatmul.bf16.vlgmr.msrb.gmra.mxu1 %v15640_v61  ;;  %1813 = vmatpush.bf16.msra.mxu0 %v10406_v49  ;;  %v10629_v63 = vld [vmem:[%s24614_s6 + $0x208] sm:$0xf]  ;;  %v13770_v50 = vld [vmem:[%s24614_s6 + $0x214] sm:$0xf0]  ;;  %v10502_v41 = vor.u32 %v13738_v18, %v10501_v58  ;;  %v10471_v21 = vld [vmem:[%s24614_s6 + $0xd8] sm:$0xf0] }
 0x17b   :  { %1842 = vmatpush.bf16.msra.mxu1 %v10534_v6  ;;  %1872 = vmatpush.bf16.msra.mxu2 %v10646_v20  ;;  %v10630_v12 = vor.u32 %v13770_v50, %v10629_v63  ;;  %v10757_v62 = vld [vmem:[%s24614_s6 + $0x308] sm:$0xf]  ;;  %v13802_v42 = vld [vmem:[%s24614_s6 + $0x314] sm:$0xf0]  ;;  %v13760_v47 = vld [vmem:[%s24614_s6 + $0x1cc] sm:$0xf]  ;;  %v10474_v40 = vor.u32 %v13728_v11, %v10471_v21 }
 0x17c   :  { %1901 = vmatpush.bf16.msra.mxu3 %v10774_v59  ;;  %v10758_v13 = vor.u32 %v13802_v42, %v10757_v62  ;;  %v10599_v49 = vld [vmem:[%s24614_s6 + $0x1d8] sm:$0xf0]  ;;  %v13788_v6 = vld [vmem:[%s24614_s6 + $0x2ac] sm:$0xf] }
 0x17d   :  { %v10711_v39 = vld [vmem:[%s24614_s6 + $0x2b8] sm:$0xf0]  ;;  %v10602_v36 = vor.u32 %v13760_v47, %v10599_v49  ;;  %v13820_v20 = vld [vmem:[%s24614_s6 + $0x3ac] sm:$0xf] }
 0x17e   :  { %1814 = vmatpush.bf16.msra.mxu0 %v10390_v8  ;;  %v10714_v56 = vor.u32 %v13788_v6, %v10711_v39  ;;  %v10839_v16 = vld [vmem:[%s24614_s6 + $0x3b8] sm:$0xf0]  ;;  %v13724_v8 = vld [vmem:[%s24614_s6 + $0xac] sm:$0xf] }
 0x17f   :  { %1843 = vmatpush.bf16.msra.mxu1 %v10518_v1  ;;  %1873 = vmatpush.bf16.msra.mxu2 %v10630_v12  ;;  %v10842_v0 = vor.u32 %v13820_v20, %v10839_v16  ;;  %v10455_v31 = vld [vmem:[%s24614_s6 + $0xb8] sm:$0xf0]  ;;  %v13756_v43 = vld [vmem:[%s24614_s6 + $0x1ac] sm:$0xf] }
 0x180   :  { %1902 = vmatpush.bf16.msra.mxu3 %v10758_v13  ;;  %v10458_v1 = vor.u32 %v13724_v8, %v10455_v31  ;;  %v10583_v22 = vld [vmem:[%s24614_s6 + $0x1b8] sm:$0xf0]  ;;  %v13784_v32 = vld [vmem:[%s24614_s6 + $0x28c] sm:$0xf] }
 0x181   :  { %v10695_v58 = vld [vmem:[%s24614_s6 + $0x298] sm:$0xf0]  ;;  %v13816_v63 = vld [vmem:[%s24614_s6 + $0x38c] sm:$0xf] }
 0x182   :  { %1758 = vmatmul.bf16.vlgmr.msrb.gmra.mxu2 %v15690_v25  ;;  %1815 = vmatpush.bf16.msra.mxu0 %v10374_v23  ;;  %v10586_v23 = vor.u32 %v13756_v43, %v10583_v22  ;;  %v10698_v18 = vor.u32 %v13784_v32, %v10695_v58  ;;  %v10823_v50 = vld [vmem:[%s24614_s6 + $0x398] sm:$0xf0]  ;;  %v13720_v13 = vld [vmem:[%s24614_s6 + $0x8c] sm:$0xf] }
 0x183   :  { %1844 = vmatpush.bf16.msra.mxu1 %v10502_v41  ;;  %1982 = vmatpush.bf16.msrb.mxu2 %v10746_v37  ;;  %v10826_v12 = vor.u32 %v13816_v63, %v10823_v50  ;;  %v10439_v7 = vld [vmem:[%s24614_s6 + $0x98] sm:$0xf0]  ;;  %v13752_v54 = vld [vmem:[%s24614_s6 + $0x18c] sm:$0xf] }
 0x184   :  { %v10442_v60 = vor.u32 %v13720_v13, %v10439_v7  ;;  %v10567_v37 = vld [vmem:[%s24614_s6 + $0x198] sm:$0xf0]  ;;  %v13780_v26 = vld [vmem:[%s24614_s6 + $0x26c] sm:$0xf] }
 0x185   :  { %1787 = vmatmul.bf16.vlgmr.msrb.gmra.mxu3 %v15717_v2  ;;  %v10570_v52 = vor.u32 %v13752_v54, %v10567_v37  ;;  %v13812_v53 = vld [vmem:[%s24614_s6 + $0x36c] sm:$0xf]  ;;  %v10423_v38 = vld [vmem:[%s24614_s6 + $0x78] sm:$0xf0] }
 0x186   :  { %2011 = vmatpush.bf16.msrb.mxu3 %v10874_v5  ;;  %1924 = vmatpush.bf16.msrb.mxu0 %v10490_v46  ;;  %v10679_v5 = vld [vmem:[%s24614_s6 + $0x278] sm:$0xf0]  ;;  %v13716_v33 = vld [vmem:[%s24614_s6 + $0x6c] sm:$0xf] }
 0x187   :  { %1953 = vmatpush.bf16.msrb.mxu1 %v10618_v45  ;;  %1983 = vmatpush.bf16.msrb.mxu2 %v10730_v10  ;;  %v10682_v55 = vor.u32 %v13780_v26, %v10679_v5  ;;  %v10807_v46 = vld [vmem:[%s24614_s6 + $0x378] sm:$0xf0]  ;;  %v10426_v11 = vor.u32 %v13716_v33, %v10423_v38  ;;  %v13776_v47 = vld [vmem:[%s24614_s6 + $0x24c] sm:$0xf] }
 0x188   :  { %v10810_v27 = vor.u32 %v13812_v53, %v10807_v46  ;;  %v10551_v21 = vld [vmem:[%s24614_s6 + $0x178] sm:$0xf0]  ;;  %v13808_v39 = vld [vmem:[%s24614_s6 + $0x34c] sm:$0xf] }
 0x189   :  { %1705 = vmatmul.bf16.gmra.mxu0 %v15687_v17  ;;  %v13712_v31 = vld [vmem:[%s24614_s6 + $0x4c] sm:$0xf]  ;;  %v10407_v43 = vld [vmem:[%s24614_s6 + $0x58] sm:$0xf0] }
 0x18a   :  { %1734 = vmatmul.bf16.gmra.mxu1 %v15745_v14  ;;  %2012 = vmatpush.bf16.msrb.mxu3 %v10858_v15  ;;  %v13748_v15 = vld [vmem:[%s24614_s6 + $0x16c] sm:$0xf]  ;;  %v10410_v22 = vor.u32 %v13712_v31, %v10407_v43  ;;  %v10535_v32 = vld [vmem:[%s24614_s6 + $0x158] sm:$0xf0] }
 0x18b   :  { %1925 = vmatpush.bf16.msrb.mxu0 %v10474_v40  ;;  %1954 = vmatpush.bf16.msrb.mxu1 %v10602_v36  ;;  %v10663_v40 = vld [vmem:[%s24614_s6 + $0x258] sm:$0xf0]  ;;  %v10554_v49 = vor.u32 %v13748_v15, %v10551_v21  ;;  %v13772_v58 = vld [vmem:[%s24614_s6 + $0x22c] sm:$0xf] }
 0x18c   :  { %1984 = vmatpush.bf16.msrb.mxu2 %v10714_v56  ;;  %v10666_v6 = vor.u32 %v13776_v47, %v10663_v40  ;;  %v10791_v36 = vld [vmem:[%s24614_s6 + $0x358] sm:$0xf0]  ;;  %v13804_v50 = vld [vmem:[%s24614_s6 + $0x32c] sm:$0xf] }
 0x18d   :  { %v10794_v16 = vor.u32 %v13808_v39, %v10791_v36  ;;  %v13708_v26 = vld [vmem:[%s24614_s6 + $0x2c] sm:$0xf]  ;;  %v10391_v5 = vld [vmem:[%s24614_s6 + $0x38] sm:$0xf0] }
 0x18e   :  { %2013 = vmatpush.bf16.msrb.mxu3 %v10842_v0  ;;  %v10519_v53 = vld [vmem:[%s24614_s6 + $0x138] sm:$0xf0]  ;;  %v13704_v46 = vld [vmem:[%s24614_s6 + $0xc] sm:$0xf] }
 0x18f   :  { %1926 = vmatpush.bf16.msrb.mxu0 %v10458_v1  ;;  %1955 = vmatpush.bf16.msrb.mxu1 %v10586_v23  ;;  %v13744_v1 = vld [vmem:[%s24614_s6 + $0x14c] sm:$0xf]  ;;  %v10647_v23 = vld [vmem:[%s24614_s6 + $0x238] sm:$0xf0] }
 0x190   :  { %1985 = vmatpush.bf16.msrb.mxu2 %v10698_v18  ;;  %v10538_v18 = vor.u32 %v13744_v1, %v10535_v32  ;;  %v10650_v63 = vor.u32 %v13772_v58, %v10647_v23  ;;  %v13736_v38 = vld [vmem:[%s24614_s6 + $0x10c] sm:$0xf]  ;;  %v10503_v15 = vld [vmem:[%s24614_s6 + $0x118] sm:$0xf0] }
 0x191   :  { %v10631_v40 = vld [vmem:[%s24614_s6 + $0x218] sm:$0xf0]  ;;  %v10506_v39 = vor.u32 %v13736_v38, %v10503_v15 }
 0x192   :  { %1763 = vmatmul.bf16.gmra.mxu2 %v15783_v9  ;;  %2014 = vmatpush.bf16.msrb.mxu3 %v10826_v12  ;;  %v10775_v12 = vld [vmem:[%s24614_s6 + $0x338] sm:$0xf0] }
 0x193   :  { %1927 = vmatpush.bf16.msrb.mxu0 %v10442_v60  ;;  %1956 = vmatpush.bf16.msrb.mxu1 %v10570_v52  ;;  %v10778_v7 = vor.u32 %v13804_v50, %v10775_v12  ;;  %v13740_v52 = vld [vmem:[%s24614_s6 + $0x12c] sm:$0xf] }
 0x194   :  { %1986 = vmatpush.bf16.msrb.mxu2 %v10682_v55  ;;  %v10394_v55 = vor.u32 %v13708_v26, %v10391_v5  ;;  %v10522_v33 = vor.u32 %v13740_v52, %v10519_v53 }
 0x195   :  { %1792 = vmatmul.bf16.gmra.mxu3 %v15787_v57 }
 0x196   :  { %2015 = vmatpush.bf16.msrb.mxu3 %v10810_v27  ;;  %v10375_v27 = vld [vmem:[%s24614_s6 + $0x18] sm:$0xf0] }
 0x197   :  { %1928 = vmatpush.bf16.msrb.mxu0 %v10426_v11  ;;  %1957 = vmatpush.bf16.msrb.mxu1 %v10554_v49  ;;  %v13768_v11 = vld [vmem:[%s24614_s6 + $0x20c] sm:$0xf]  ;;  %v10378_v47 = vor.u32 %v13704_v46, %v10375_v27 }
 0x198   :  { %1987 = vmatpush.bf16.msrb.mxu2 %v10666_v6  ;;  %v13800_v49 = vld [vmem:[%s24614_s6 + $0x30c] sm:$0xf]  ;;  %v10759_v6 = vld [vmem:[%s24614_s6 + $0x318] sm:$0xf0]  ;;  %v10634_v36 = vor.u32 %v13768_v11, %v10631_v40 }
 0x199   :  { %1710 = vmatmul.bf16.gmra.mxu0 %v15868_v19 }
 0x19a   :  { %1739 = vmatmul.bf16.gmra.mxu1 %v15882_v30  ;;  %2016 = vmatpush.bf16.msrb.mxu3 %v10794_v16  ;;  %v10762_v16 = vor.u32 %v13800_v49, %v10759_v6 }
 0x19b   :  { %1929 = vmatpush.bf16.msrb.mxu0 %v10410_v22  ;;  %1958 = vmatpush.bf16.msrb.mxu1 %v10538_v18 }
 0x19c   :  { %1988 = vmatpush.bf16.msrb.mxu2 %v10650_v63 }
 0x19e   :  { %2017 = vmatpush.bf16.msrb.mxu3 %v10778_v7 }
 0x19f   :  { %1930 = vmatpush.bf16.msrb.mxu0 %v10394_v55  ;;  %1959 = vmatpush.bf16.msrb.mxu1 %v10522_v33 }
 0x1a0   :  { %1989 = vmatpush.bf16.msrb.mxu2 %v10634_v36 }
 0x1a2   :  { %1768 = vmatmul.bf16.gmra.mxu2 %v15958_v34  ;;  %2018 = vmatpush.bf16.msrb.mxu3 %v10762_v16 }
 0x1a3   :  { %1931 = vmatpush.bf16.msrb.mxu0 %v10378_v47  ;;  %1960 = vmatpush.bf16.msrb.mxu1 %v10506_v39 }
 0x1a5   :  { %1797 = vmatmul.bf16.gmra.mxu3 %v15977_v44 }
 0x1a9   :  { %1715 = vmatmul.bf16.gmra.mxu0 %v15968_v28 }
 0x1aa   :  { %1744 = vmatmul.bf16.gmra.mxu1 %v15971_v29 }
 0x1b2   :  { %1773 = vmatmul.bf16.gmra.mxu2 %v15979_v35 }
 0x1b5   :  { %1802 = vmatmul.bf16.gmra.mxu3 %v15982_v4 }
 0x1b6   :  { %v16256_v51 = vpop.f32.mrf.mxu0 }
 0x1b7   :  { %v16258_v59 = vpop.f32.mrf.mxu1 }
 0x1b8   :  { %v1615_v58 = vadd.f32 %v16258_v59, %v16256_v51 }
 0x1b9   :  { %1816 = vmatmul.bf16.vlgmr.msra.gmra.mxu0 %v15631_v24 }
 0x1ba   :  { %1845 = vmatmul.bf16.vlgmr.msra.gmra.mxu1 %v15640_v61 }
 0x1be   :  { %v16286_v41 = vpop.f32.mrf.mxu0 }
 0x1bf   :  { %v16288_v62 = vpop.f32.mrf.mxu1 }
 0x1c0   :  { %v1617_v32 = vadd.f32 %v16288_v62, %v16286_v41 }
 0x1c2   :  { %1874 = vmatmul.bf16.vlgmr.msra.gmra.mxu2 %v15690_v25 }
 0x1c5   :  { %1903 = vmatmul.bf16.vlgmr.msra.gmra.mxu3 %v15717_v2  ;;  %v16292_v42 = vpop.f32.mrf.mxu2 }
 0x1c6   :  { %v16320_v48 = vpop.f32.mrf.mxu0  ;;  %v1644_v50 = vadd.f32 %v16292_v42, %v1615_v58 }
 0x1c7   :  { %v16322_v45 = vpop.f32.mrf.mxu1 }
 0x1c8   :  { %v16318_v3 = vpop.f32.mrf.mxu3  ;;  %v1620_v23 = vadd.f32 %v16322_v45, %v16320_v48 }
 0x1c9   :  { %1821 = vmatmul.bf16.gmra.mxu0 %v15687_v17  ;;  %v16443_v48 = vadd.f32 %v16318_v3, %v1644_v50 }
 0x1ca   :  { %1850 = vmatmul.bf16.gmra.mxu1 %v15745_v14 }
 0x1cb   :  { %v2096_v3 = vmul.f32 %v16443_v48, %v16443_v48 }
 0x1cd   :  { %v16326_v10 = vpop.f32.mrf.mxu2 }
 0x1ce   :  { %v16354_v20 = vpop.f32.mrf.mxu0  ;;  %v1646_v18 = vadd.f32 %v16326_v10, %v1617_v32 }
 0x1cf   :  { %v16356_v0 = vpop.f32.mrf.mxu1 }
 0x1d0   :  { %v16352_v56 = vpop.f32.mrf.mxu3  ;;  %v1622_v12 = vadd.f32 %v16356_v0, %v16354_v20 }
 0x1d1   :  { %v16440_v51 = vadd.f32 %v16352_v56, %v1646_v18 }
 0x1d2   :  { %1879 = vmatmul.bf16.gmra.mxu2 %v15783_v9 }
 0x1d3   :  { %v2100_v20 = vmul.f32 %v16440_v51, %v16440_v51 }
 0x1d5   :  { %1908 = vmatmul.bf16.gmra.mxu3 %v15787_v57  ;;  %v16360_v8 = vpop.f32.mrf.mxu2  ;;  %v2128_v53 = vadd.f32 %v2100_v20, %v2096_v3 }
 0x1d6   :  { %v1595_v54 = vpop.f32.mrf.mxu0  ;;  %v1649_v41 = vadd.f32 %v16360_v8, %v1620_v23 }
 0x1d7   :  { %v1624_v60 = vpop.f32.mrf.mxu1 }
 0x1d8   :  { %v1677_v13 = vpop.f32.mrf.mxu3  ;;  %v1625_v59 = vadd.f32 %v1624_v60, %v1595_v54  ;;  %v2040_v54 = vadd.f32 %v16440_v51, %v16443_v48 }
 0x1d9   :  { %1826 = vmatmul.bf16.gmra.mxu0 %v15868_v19  ;;  %v16446_v45 = vadd.f32 %v1677_v13, %v1649_v41 }
 0x1da   :  { %1855 = vmatmul.bf16.gmra.mxu1 %v15882_v30 }
 0x1db   :  { %v2104_v13 = vmul.f32 %v16446_v45, %v16446_v45  ;;  %v2041_v46 = vadd.f32 %v2040_v54, %v16446_v45 }
 0x1dd   :  { %v1650_v37 = vpop.f32.mrf.mxu2  ;;  %v2129_v11 = vadd.f32 %v2128_v53, %v2104_v13  ;;  %v13891_v53 = vld [vmem:[%s24617_s9 + $0x1dc] sm:$0xf0] }
 0x1de   :  { %v1597_v31 = vpop.f32.mrf.mxu0  ;;  %v1651_v5 = vadd.f32 %v1650_v37, %v1622_v12 }
 0x1df   :  { %v1626_v43 = vpop.f32.mrf.mxu1 }
 0x1e0   :  { %v1679_v21 = vpop.f32.mrf.mxu3  ;;  %v1627_v42 = vadd.f32 %v1626_v43, %v1597_v31 }
 0x1e1   :  { %v16450_v0 = vadd.f32 %v1679_v21, %v1651_v5 }
 0x1e2   :  { %1884 = vmatmul.bf16.gmra.mxu2 %v15958_v34 }
 0x1e3   :  { %v2108_v27 = vmul.f32 %v16450_v0, %v16450_v0  ;;  %v2042_v21 = vadd.f32 %v2041_v46, %v16450_v0 }
 0x1e5   :  { %1913 = vmatmul.bf16.gmra.mxu3 %v15977_v44  ;;  %v1653_v1 = vpop.f32.mrf.mxu2  ;;  %v2130_v6 = vadd.f32 %v2129_v11, %v2108_v27 }
 0x1e6   :  { %v1600_v62 = vpop.f32.mrf.mxu0  ;;  %v1654_v10 = vadd.f32 %v1653_v1, %v1625_v59 }
 0x1e7   :  { %v1629_v7 = vpop.f32.mrf.mxu1 }
 0x1e8   :  { %v1682_v22 = vpop.f32.mrf.mxu3  ;;  %v1630_v8 = vadd.f32 %v1629_v7, %v1600_v62 }
 0x1e9   :  { %1831 = vmatmul.bf16.gmra.mxu0 %v15968_v28  ;;  %v16459_v60 = vadd.f32 %v1682_v22, %v1654_v10 }
 0x1ea   :  { %1860 = vmatmul.bf16.gmra.mxu1 %v15971_v29 }
 0x1eb   :  { %v2112_v47 = vmul.f32 %v16459_v60, %v16459_v60  ;;  %v2043_v39 = vadd.f32 %v2042_v21, %v16459_v60 }
 0x1ed   :  { %v1655_v63 = vpop.f32.mrf.mxu2  ;;  %v2131_v43 = vadd.f32 %v2130_v6, %v2112_v47  ;;  %v11037_v6 = vld [vmem:[%s24617_s9 + $0x140] sm:$0xf] }
 0x1ee   :  { %v1656_v52 = vadd.f32 %v1655_v63, %v1627_v42  ;;  %v1602_v38 = vpop.f32.mrf.mxu0 }
 0x1ef   :  { %v1631_v15 = vpop.f32.mrf.mxu1 }
 0x1f0   :  { %v1684_v26 = vpop.f32.mrf.mxu3  ;;  %v1632_v49 = vadd.f32 %v1631_v15, %v1602_v38  ;;  %v11069_v15 = vld [vmem:[%s24617_s9 + $0x180] sm:$0xf] }
 0x1f1   :  { %v16464_v33 = vadd.f32 %v1684_v26, %v1656_v52 }
 0x1f2   :  { %1889 = vmatmul.bf16.gmra.mxu2 %v15979_v35 }
 0x1f3   :  { %v2116_v36 = vmul.f32 %v16464_v33, %v16464_v33  ;;  %v2044_v1 = vadd.f32 %v2043_v39, %v16464_v33  ;;  %v13875_v39 = vld [vmem:[%s24617_s9 + $0x15c] sm:$0xf0] }
 0x1f5   :  { %1918 = vmatmul.bf16.gmra.mxu3 %v15982_v4  ;;  %v1658_v56 = vpop.f32.mrf.mxu2  ;;  %v2132_v58 = vadd.f32 %v2131_v43, %v2116_v36 }
 0x1f6   :  { %v1659_v37 = vadd.f32 %v1658_v56, %v1630_v8  ;;  %v16487_v59 = vpop.f32.mrf.mxu0 }
 0x1f7   :  { %v16489_v5 = vpop.f32.mrf.mxu1 }
 0x1f8   :  { %v1687_v55 = vpop.f32.mrf.mxu3 }
 0x1f9   :  { %v16469_v40 = vadd.f32 %v1687_v55, %v1659_v37  ;;  %1932 = vmatmul.bf16.vlgmr.msrb.gmra.mxu0 %v15631_v24 }
 0x1fa   :  { %1961 = vmatmul.bf16.vlgmr.msrb.gmra.mxu1 %v15640_v61 }
 0x1fb   :  { %v2120_v22 = vmul.f32 %v16469_v40, %v16469_v40  ;;  %v2045_v24 = vadd.f32 %v2044_v1, %v16469_v40 }
 0x1fd   :  { %v1660_v16 = vpop.f32.mrf.mxu2  ;;  %v2133_v61 = vadd.f32 %v2132_v58, %v2120_v22 }
 0x1fe   :  { %v1661_v31 = vadd.f32 %v1660_v16, %v1632_v49  ;;  %v16502_v37 = vpop.f32.mrf.mxu0 }
 0x1ff   :  { %v16504_v55 = vpop.f32.mrf.mxu1 }
 0x200   :  { %v1689_v32 = vpop.f32.mrf.mxu3 }
 0x201   :  { %v16480_v23 = vadd.f32 %v1689_v32, %v1661_v31  ;;  %v13867_v31 = vld [vmem:[%s24617_s9 + $0x11c] sm:$0xf0] }
 0x202   :  { %1990 = vmatmul.bf16.vlgmr.msrb.gmra.mxu2 %v15690_v25 }
 0x203   :  { %v2046_v18 = vadd.f32 %v2045_v24, %v16480_v23  ;;  %v2124_v63 = vmul.f32 %v16480_v23, %v16480_v23 }
 0x205   :  { %v2047_v50 = vrot.slane %v2046_v18, 4  ;;  %v2134_v12 = vadd.f32 %v2133_v61, %v2124_v63  ;;  %2019 = vmatmul.bf16.vlgmr.msrb.gmra.mxu3 %v15717_v2  ;;  %v16513_v46 = vpop.f32.mrf.mxu2  ;;  %v13859_v61 = vld [vmem:[%s24617_s9 + $0xdc] sm:$0xf0] }
 0x207   :  { %v2048_v41 = vadd.f32 %v2047_v50, %v2046_v18  ;;  %v2135_v62 = vrot.slane %v2134_v12, 4  ;;  %v16527_v49 = vpop.f32.mrf.mxu1 }
 0x208   :  { %v16515_v27 = vpop.f32.mrf.mxu3 }
 0x209   :  { %v2049_v7 = vrot.slane %v2048_v41, 2  ;;  %v2136_v26 = vadd.f32 %v2135_v62, %v2134_v12  ;;  %1937 = vmatmul.bf16.gmra.mxu0 %v15687_v17  ;;  %v10941_v12 = vld [vmem:[%s24617_s9 + $0x80] sm:$0xf] }
 0x20a   :  { %1966 = vmatmul.bf16.gmra.mxu1 %v15745_v14  ;;  %v16570_v62 = vld [vmem:[%s24615_s7] sm:$0xf] }
 0x20b   :  { %v2050_v42 = vadd.f32 %v2049_v7, %v2048_v41  ;;  %v2137_v25 = vrot.slane %v2136_v26, 2 }
 0x20d   :  { %v2051_v10 = vrot.slane %v2050_v42, 1  ;;  %v2138_v20 = vadd.f32 %v2137_v25, %v2136_v26  ;;  %v16535_v36 = vpop.f32.mrf.mxu2  ;;  %v16578_v25 = vperm.slane %v16570_v62, 0 }
 0x20f   :  { %v2052_v8 = vadd.f32 %v2051_v10, %v2050_v42  ;;  %v2139_v52 = vrot.slane %v2138_v20, 1  ;;  %v16548_v24 = vpop.f32.mrf.mxu1  ;;  %v16575_v42 = vld [vmem:[%s24616_s8] sm:$0xf] }
 0x210   :  { %v16537_v16 = vpop.f32.mrf.mxu3 }
 0x211   :  { %v16493_v56 = vmul.f32 0.015625, %v2052_v8  ;;  %v2140_v2 = vadd.f32 %v2139_v52, %v2138_v20  ;;  %v16587_v52 = vperm.slane %v16575_v42, 0 }
 0x212   :  { %1995 = vmatmul.bf16.gmra.mxu2 %v15783_v9  ;;  %v11101_v9 = vld [vmem:[%s24617_s9 + $0x1c0] sm:$0xf] }
 0x213   :  { %v2180_v3 = vmul.f32 0.015625, %v2140_v2  ;;  %v2184_v54 = vmul.f32 %v16493_v56, %v16493_v56  ;;  %v2220_v13 = vsub.f32 %v16469_v40, %v16493_v56  ;;  %v2224_v17 = vsub.f32 %v16480_v23, %v16493_v56  ;;  %v16525_v40 = vpop.f32.mrf.mxu0  ;;  %v10973_v23 = vld [vmem:[%s24617_s9 + $0xc0] sm:$0xf] }
 0x214   :  { %v11102_v38 = vor.u32 %v13891_v53, %v11101_v9  ;;  %v10974_v50 = vor.u32 %v13859_v61, %v10973_v23  ;;  %v2196_v53 = vsub.f32 %v16443_v48, %v16493_v56 }
 0x215   :  { %v2188_v14 = vsub.f32 %v2180_v3, %v2184_v54  ;;  %2024 = vmatmul.bf16.gmra.mxu3 %v15787_v57  ;;  %v13883_v57 = vld [vmem:[%s24617_s9 + $0x19c] sm:$0xf0]  ;;  %v16557_v63 = vpop.f32.mrf.mxu2 }
 0x216   :  { %3972 = vmatpush.bf16.msra.mxu0 %v11102_v38  ;;  %v11070_v21 = vor.u32 %v13883_v57, %v11069_v15  ;;  %v10909_v54 = vld [vmem:[%s24617_s9 + $0x40] sm:$0xf]  ;;  %v2200_v38 = vsub.f32 %v16440_v51, %v16493_v56 }
 0x217   :  { %v2192_v11 = vmax.f32 %v2188_v14, 0.0  ;;  %v1740_v3 = vpop.f32.mrf.mxu1 }
 0x219   :  { %v2228_v47 = vadd.f32 1e-05, %v2192_v11  ;;  %1942 = vmatmul.bf16.gmra.mxu0 %v15868_v19  ;;  %v11038_v19 = vor.u32 %v13875_v39, %v11037_v6 }
 0x21a   :  { %1971 = vmatmul.bf16.gmra.mxu1 %v15882_v30  ;;  %3973 = vmatpush.bf16.msra.mxu0 %v11070_v21  ;;  %v11005_v30 = vld [vmem:[%s24617_s9 + $0x100] sm:$0xf] }
 0x21b   :  { %14546 = vrsqrt.f32 %v2228_v47  ;;  %v11006_v43 = vor.u32 %v13867_v31, %v11005_v30  ;;  %v16546_v58 = vpop.f32.mrf.mxu0  ;;  %vm2238_vm0 = vweird.f32 %v2228_v47 }
 0x21d   :  { %v1766_v14 = vpop.f32.mrf.mxu2 }
 0x21e   :  { %3974 = vmatpush.bf16.msra.mxu0 %v11038_v19 }
 0x221   :  { %v14547_v1 = vpop.eup %14546 }
 0x222   :  { %v2233_v22 = vmul.f32 %v14547_v1, %v2228_v47  ;;  %2000 = vmatmul.bf16.gmra.mxu2 %v15958_v34  ;;  %3975 = vmatpush.bf16.msra.mxu0 %v11006_v43  ;;  %v16559_v34 = vpop.f32.mrf.mxu3  ;;  %vm2239_vm15 = vweird.f32 %v14547_v1 }
 0x223   :  { %vm2240_vm1 = vmor %vm2238_vm0, %vm2239_vm15  ;;  %v1711_v2 = vpop.f32.mrf.mxu0 }
 0x224   :  { %v2234_v32 = vmul.f32 %v14547_v1, %v2233_v22 }
 0x225   :  { %2029 = vmatmul.bf16.gmra.mxu3 %v15977_v44  ;;  %v13851_v44 = vld [vmem:[%s24617_s9 + $0x9c] sm:$0xf0]  ;;  %v1769_v23 = vpop.f32.mrf.mxu2 }
 0x226   :  { %v2235_v18 = vmul.f32 0.5, %v2234_v32  ;;  %3976 = vmatpush.bf16.msra.mxu0 %v10974_v50  ;;  %v10942_v7 = vor.u32 %v13851_v44, %v10941_v12  ;;  %v1742_v32 = vpop.f32.mrf.mxu1  ;;  %v1733_v12 = vadd.f32 %v16504_v55, %v16502_v37  ;;  %v1731_v44 = vadd.f32 %v16489_v5, %v16487_v59 }
 0x227   :  { %v1741_v55 = vadd.f32 %v1740_v3, %v1711_v2 }
 0x228   :  { %v2236_v41 = vsub.f32 1.5, %v2235_v18 }
 0x229   :  { %1947 = vmatmul.bf16.gmra.mxu0 %v15968_v28  ;;  %v13843_v28 = vld [vmem:[%s24617_s9 + $0x5c] sm:$0xf0] }
 0x22a   :  { %v2237_v26 = vmul.f32 %v14547_v1, %v2236_v41  ;;  %1976 = vmatmul.bf16.gmra.mxu1 %v15971_v29  ;;  %3977 = vmatpush.bf16.msra.mxu0 %v10942_v7  ;;  %v1795_v29 = vpop.f32.mrf.mxu3  ;;  %v10910_v9 = vor.u32 %v13843_v28, %v10909_v54  ;;  %v1736_v41 = vadd.f32 %v16527_v49, %v16525_v40 }
 0x22b   :  { %v1713_v22 = vpop.f32.mrf.mxu0  ;;  %v1762_v7 = vadd.f32 %v16535_v36, %v1733_v12  ;;  %v1770_v36 = vadd.f32 %v1769_v23, %v1741_v55 }
 0x22c   :  { %v16581_v10 = vsel %vm2240_vm1, %v14547_v1, %v2237_v26  ;;  %v1738_v26 = vadd.f32 %v16548_v24, %v16546_v58 }
 0x22d   :  { %v2296_v20 = vmul.f32 %v16581_v10, %v2220_v13  ;;  %v2300_v8 = vmul.f32 %v16581_v10, %v2224_v17  ;;  %v10877_v13 = vld [vmem:[%s24617_s9] sm:$0xf]  ;;  %v2272_v21 = vmul.f32 %v16581_v10, %v2196_v53  ;;  %v2276_v47 = vmul.f32 %v16581_v10, %v2200_v38 }
 0x22e   :  { %v13835_v17 = vld [vmem:[%s24617_s9 + $0x1c] sm:$0xf0]  ;;  %3978 = vmatpush.bf16.msra.mxu0 %v10910_v9  ;;  %v16634_v37 = vadd.f32 %v16537_v16, %v1762_v7  ;;  %v1767_v28 = vadd.f32 %v1766_v14, %v1738_v26  ;;  %v1745_v5 = vpop.f32.mrf.mxu1  ;;  %v2216_v26 = vsub.f32 %v16464_v33, %v16493_v56 }
 0x22f   :  { %v2338_v15 = vmul.f32 %v16578_v25, %v2296_v20  ;;  %v2342_v57 = vmul.f32 %v16578_v25, %v2300_v8  ;;  %v10878_v11 = vor.u32 %v13835_v17, %v10877_v13  ;;  %v2314_v48 = vmul.f32 %v16578_v25, %v2272_v21  ;;  %v1771_v8 = vpop.f32.mrf.mxu2 }
 0x230   :  { %v2318_v51 = vmul.f32 %v16578_v25, %v2276_v47  ;;  %v1765_v20 = vadd.f32 %v16557_v63, %v1736_v41  ;;  %v2101_v58 = vmul.f32 %v16634_v37, %v16634_v37  ;;  %v16644_v24 = vadd.f32 %v1795_v29, %v1767_v28 }
 0x231   :  { %v2380_v6 = vadd.f32 %v16587_v52, %v2338_v15  ;;  %v2384_v39 = vadd.f32 %v16587_v52, %v2342_v57  ;;  %v2356_v31 = vadd.f32 %v16587_v52, %v2314_v48  ;;  %v2204_v15 = vsub.f32 %v16446_v45, %v16493_v56 }
 0x232   :  { %2005 = vmatmul.bf16.gmra.mxu2 %v15979_v35  ;;  %3979 = vmatpush.bf16.msra.mxu0 %v10878_v11  ;;  %v2360_v43 = vadd.f32 %v16587_v52, %v2318_v51  ;;  %v1798_v61 = vpop.f32.mrf.mxu3  ;;  %v16640_v49 = vadd.f32 %v16559_v34, %v1765_v20  ;;  %v2109_v53 = vmul.f32 %v16644_v24, %v16644_v24 }
 0x233   :  { %v2412_v19 = vmax.f32 %v2380_v6, 0.0  ;;  %v2416_v30 = vmax.f32 %v2384_v39, 0.0  ;;  %v2388_v35 = vmax.f32 %v2356_v31, 0.0  ;;  %v1716_v59 = vpop.f32.mrf.mxu0  ;;  %v16652_v34 = vadd.f32 %v1798_v61, %v1770_v36 }
 0x234   :  { %v2392_v18 = vmax.f32 %v2360_v43, 0.0  ;;  %v1746_v16 = vadd.f32 %v1745_v5, %v1716_v59  ;;  %v2208_v57 = vsub.f32 %v16450_v0, %v16493_v56  ;;  %v2280_v51 = vmul.f32 %v16581_v10, %v2204_v15 }
 0x235   :  { %v16616_v1 = vpack.c.bf16 %v2416_v30, %v2412_v19  ;;  %2034 = vmatmul.bf16.gmra.mxu3 %v15982_v4  ;;  %v1760_v4 = vadd.f32 %v16513_v46, %v1731_v44  ;;  %v1743_v46 = vadd.f32 %v1742_v32, %v1713_v22  ;;  %v2113_v47 = vmul.f32 %v16652_v34, %v16652_v34 }
 0x236   :  { %v16619_v50 = vpack.c.bf16 %v2392_v18, %v2388_v35  ;;  %v1747_v39 = vpop.f32.mrf.mxu1  ;;  %v2284_v19 = vmul.f32 %v16581_v10, %v2208_v57  ;;  %v2322_v43 = vmul.f32 %v16578_v25, %v2280_v51  ;;  %v2292_v59 = vmul.f32 %v16581_v10, %v2216_v26 }
 0x237   :  { %v16637_v40 = vadd.f32 %v16515_v27, %v1760_v4  ;;  %v1772_v63 = vadd.f32 %v1771_v8, %v1743_v46  ;;  %v2105_v27 = vmul.f32 %v16640_v49, %v16640_v49  ;;  %v1774_v14 = vpop.f32.mrf.mxu2  ;;  %v2212_v4 = vsub.f32 %v16459_v60, %v16493_v56 }
 0x238   :  { %24798 = vst [vmem:[#allocation5_spill] sm:$0xff] %v16619_v50  ;;  %v1775_v13 = vadd.f32 %v1774_v14, %v1746_v16  ;;  %v2326_v22 = vmul.f32 %v16578_v25, %v2284_v19  ;;  %v2364_v12 = vadd.f32 %v16587_v52, %v2322_v43 }
 0x239   :  { %3980 = vmatmul.bf16.vlgmr.msra.gmra.mxu0 %v16619_v50  ;;  %v2097_v2 = vmul.f32 %v16637_v40, %v16637_v40  ;;  %v2053_v3 = vadd.f32 %v16634_v37, %v16637_v40  ;;  %v2288_v28 = vmul.f32 %v16581_v10, %v2212_v4  ;;  %v2334_v10 = vmul.f32 %v16578_v25, %v2292_v59  ;;  %v11293_v59 = vld [vmem:[%s24617_s9 + $0x340] sm:$0xf] }
 0x23a   :  { %v1800_v54 = vpop.f32.mrf.mxu3  ;;  %v2368_v44 = vadd.f32 %v16587_v52, %v2326_v22 }
 0x23b   :  { %v2141_v17 = vadd.f32 %v2101_v58, %v2097_v2  ;;  %v2054_v29 = vadd.f32 %v2053_v3, %v16640_v49  ;;  %v16657_v38 = vadd.f32 %v1800_v54, %v1772_v63  ;;  %v1718_v6 = vpop.f32.mrf.mxu0  ;;  %v2396_v54 = vmax.f32 %v2364_v12, 0.0  ;;  %v13887_v12 = vld [vmem:[%s24617_s9 + $0x1c4] sm:$0xf] }
 0x23c   :  { %v1748_v31 = vadd.f32 %v1747_v39, %v1718_v6  ;;  %v2400_v55 = vmax.f32 %v2368_v44, 0.0  ;;  %v2330_v16 = vmul.f32 %v16578_v25, %v2288_v28  ;;  %v11103_v44 = vld [vmem:[%s24617_s9 + $0x1e0] sm:$0xf0] }
 0x23d   :  { %v2142_v11 = vadd.f32 %v2141_v17, %v2105_v27  ;;  %v2055_v21 = vadd.f32 %v2054_v29, %v16644_v24  ;;  %v2117_v0 = vmul.f32 %v16657_v38, %v16657_v38 }
 0x23e   :  { %v16692_v60 = vpack.c.bf16 %v2400_v55, %v2396_v54  ;;  %v16697_v63 = vpop.f32.mrf.mxu1  ;;  %v13879_v54 = vld [vmem:[%s24617_s9 + $0x184] sm:$0xf] }
 0x23f   :  { %v2143_v30 = vadd.f32 %v2142_v11, %v2109_v53  ;;  %v2056_v45 = vadd.f32 %v2055_v21, %v16652_v34  ;;  %v1776_v61 = vpop.f32.mrf.mxu2  ;;  %v11071_v55 = vld [vmem:[%s24617_s9 + $0x1a0] sm:$0xf0] }
 0x240   :  { %v1777_v18 = vadd.f32 %v1776_v61, %v1748_v31  ;;  %24799 = vst [vmem:[#allocation6_spill] sm:$0xff] %v16692_v60  ;;  %v11325_v61 = vld [vmem:[%s24617_s9 + $0x380] sm:$0xf] }
 0x241   :  { %v2144_v32 = vadd.f32 %v2143_v30, %v2113_v47  ;;  %v2057_v23 = vadd.f32 %v2056_v45, %v16657_v38 }
 0x242   :  { %v1803_v9 = vpop.f32.mrf.mxu3 }
 0x243   :  { %v16666_v48 = vadd.f32 %v1803_v9, %v1775_v13  ;;  %v2145_v41 = vadd.f32 %v2144_v32, %v2117_v0  ;;  %v16695_v56 = vpop.f32.mrf.mxu0  ;;  %v2372_v9 = vadd.f32 %v16587_v52, %v2330_v16  ;;  %v2376_v13 = vadd.f32 %v16587_v52, %v2334_v10  ;;  %v11357_v32 = vld [vmem:[%s24617_s9 + $0x3c0] sm:$0xf] }
 0x245   :  { %v2121_v35 = vmul.f32 %v16666_v48, %v16666_v48  ;;  %v2058_v20 = vadd.f32 %v2057_v23, %v16666_v48  ;;  %v2404_v57 = vmax.f32 %v2372_v9, 0.0  ;;  %v2408_v11 = vmax.f32 %v2376_v13, 0.0  ;;  %v13955_v23 = vld [vmem:[%s24617_s9 + $0x3dc] sm:$0xf0]  ;;  %v11007_v9 = vld [vmem:[%s24617_s9 + $0x120] sm:$0xf0] }
 0x246   :  { %v16705_v39 = vpop.f32.mrf.mxu1 }
 0x247   :  { %v2146_v5 = vadd.f32 %v2145_v41, %v2121_v35  ;;  %v16709_v19 = vpack.c.bf16 %v2408_v11, %v2404_v57  ;;  %v16717_v31 = vpop.f32.mrf.mxu2  ;;  %v11358_v35 = vor.u32 %v13955_v23, %v11357_v32  ;;  %v13923_v57 = vld [vmem:[%s24617_s9 + $0x2dc] sm:$0xf0] }
 0x248   :  { %v11197_v23 = vld [vmem:[%s24617_s9 + $0x280] sm:$0xf] }
 0x249   :  { %3985 = vmatmul.bf16.gmra.mxu0 %v16692_v60  ;;  %4001 = vmatpush.bf16.msra.mxu1 %v11358_v35 }
 0x24a   :  { %v1805_v7 = vpop.f32.mrf.mxu3 }
 0x24b   :  { %v16685_v8 = vadd.f32 %v1805_v7, %v1777_v18  ;;  %v16703_v6 = vpop.f32.mrf.mxu0  ;;  %v13947_v18 = vld [vmem:[%s24617_s9 + $0x39c] sm:$0xf0]  ;;  %v11106_v7 = vor.u32 %v13887_v12, %v11103_v44  ;;  %v13847_v12 = vld [vmem:[%s24617_s9 + $0x84] sm:$0xf] }
 0x24c   :  { %v10943_v44 = vld [vmem:[%s24617_s9 + $0xa0] sm:$0xf0] }
 0x24d   :  { %v2059_v46 = vadd.f32 %v2058_v20, %v16685_v8  ;;  %v2125_v36 = vmul.f32 %v16685_v8, %v16685_v8  ;;  %v11326_v20 = vor.u32 %v13947_v18, %v11325_v61  ;;  %4088 = vmatpush.bf16.msrb.mxu0 %v11106_v7  ;;  %v13915_v61 = vld [vmem:[%s24617_s9 + $0x29c] sm:$0xf0] }
 0x24e   :  { %v16742_v26 = vpop.f32.mrf.mxu1 }
 0x24f   :  { %v2060_v58 = vrot.slane %v2059_v46, 4  ;;  %v2147_v33 = vadd.f32 %v2146_v5, %v2125_v36  ;;  %v13939_v5 = vld [vmem:[%s24617_s9 + $0x35c] sm:$0xf0]  ;;  %v13871_v36 = vld [vmem:[%s24617_s9 + $0x144] sm:$0xf]  ;;  %4002 = vmatpush.bf16.msra.mxu1 %v11326_v20 }
 0x250   :  { %v11294_v10 = vor.u32 %v13939_v5, %v11293_v59  ;;  %v13907_v59 = vld [vmem:[%s24617_s9 + $0x25c] sm:$0xf0]  ;;  %v10946_v5 = vor.u32 %v13847_v12, %v10943_v44 }
 0x251   :  { %v2061_v2 = vadd.f32 %v2060_v58, %v2059_v46  ;;  %v2148_v3 = vrot.slane %v2147_v33, 4  ;;  %v11074_v46 = vor.u32 %v13879_v54, %v11071_v55  ;;  %v11039_v58 = vld [vmem:[%s24617_s9 + $0x160] sm:$0xf0]  ;;  %v11198_v54 = vor.u32 %v13915_v61, %v11197_v23  ;;  %v11165_v55 = vld [vmem:[%s24617_s9 + $0x240] sm:$0xf] }
 0x252   :  { %v16719_v43 = vpop.f32.mrf.mxu3 }
 0x253   :  { %v2062_v27 = vrot.slane %v2061_v2, 2  ;;  %v2149_v14 = vadd.f32 %v2148_v3, %v2147_v33  ;;  %v16740_v4 = vpop.f32.mrf.mxu0  ;;  %v16762_v33 = vpop.f32.mrf.mxu2  ;;  %4089 = vmatpush.bf16.msrb.mxu0 %v11074_v46  ;;  %v13931_v3 = vld [vmem:[%s24617_s9 + $0x31c] sm:$0xf0]  ;;  %4003 = vmatpush.bf16.msra.mxu1 %v11294_v10  ;;  %v10911_v10 = vld [vmem:[%s24617_s9 + $0x60] sm:$0xf0] }
 0x255   :  { %v2063_v17 = vadd.f32 %v2062_v27, %v2061_v2  ;;  %v2150_v29 = vrot.slane %v2149_v14, 2  ;;  %v11261_v2 = vld [vmem:[%s24617_s9 + $0x300] sm:$0xf]  ;;  %v11042_v27 = vor.u32 %v13871_v36, %v11039_v58  ;;  %v16822_v36 = vperm.slane %v16570_v62, 1  ;;  %v13839_v58 = vld [vmem:[%s24617_s9 + $0x44] sm:$0xf] }
 0x257   :  { %v2064_v53 = vrot.slane %v2063_v17, 1  ;;  %v2151_v15 = vadd.f32 %v2150_v29, %v2149_v14  ;;  %v13863_v14 = vld [vmem:[%s24617_s9 + $0x104] sm:$0xf]  ;;  %v11262_v29 = vor.u32 %v13931_v3, %v11261_v2  ;;  %4090 = vmatpush.bf16.msrb.mxu0 %v11042_v27  ;;  %v16833_v27 = vperm.slane %v16575_v42, 1 }
 0x258   :  { %v11010_v11 = vor.u32 %v13863_v14, %v11007_v9  ;;  %v11166_v9 = vor.u32 %v13907_v59, %v11165_v55 }
 0x259   :  { %v2065_v21 = vadd.f32 %v2064_v53, %v2063_v17  ;;  %v2152_v47 = vrot.slane %v2151_v15, 1  ;;  %3990 = vmatmul.bf16.gmra.mxu0 %v16709_v19  ;;  %v16780_v17 = vpop.f32.mrf.mxu1  ;;  %4004 = vmatpush.bf16.msra.mxu1 %v11262_v29 }
 0x25a   :  { %v16764_v16 = vpop.f32.mrf.mxu3 }
 0x25b   :  { %v16707_v25 = vmul.f32 0.015625, %v2065_v21  ;;  %v2153_v51 = vadd.f32 %v2152_v47, %v2151_v15  ;;  %v16778_v13 = vpop.f32.mrf.mxu0  ;;  %v11229_v15 = vld [vmem:[%s24617_s9 + $0x2c0] sm:$0xf]  ;;  %v13855_v47 = vld [vmem:[%s24617_s9 + $0xc4] sm:$0xf]  ;;  %4091 = vmatpush.bf16.msrb.mxu0 %v11010_v11  ;;  %v10914_v11 = vor.u32 %v13839_v58, %v10911_v10 }
 0x25c   :  { %v11230_v32 = vor.u32 %v13923_v57, %v11229_v15  ;;  %v13899_v57 = vld [vmem:[%s24617_s9 + $0x21c] sm:$0xf0] }
 0x25d   :  { %v2181_v30 = vmul.f32 0.015625, %v2153_v51  ;;  %v2185_v52 = vmul.f32 %v16707_v25, %v16707_v25  ;;  %v2221_v45 = vsub.f32 %v16666_v48, %v16707_v25  ;;  %v2225_v0 = vsub.f32 %v16685_v8, %v16707_v25  ;;  %v10975_v51 = vld [vmem:[%s24617_s9 + $0xe0] sm:$0xf0] }
 0x25e   :  { %v10978_v35 = vor.u32 %v13855_v47, %v10975_v51  ;;  %4005 = vmatpush.bf16.msra.mxu1 %v11230_v32  ;;  %v2197_v2 = vsub.f32 %v16637_v40, %v16707_v25  ;;  %v2201_v29 = vsub.f32 %v16634_v37, %v16707_v25  ;;  %v13831_v48 = vld [vmem:[%s24617_s9 + $0x4] sm:$0xf] }
 0x25f   :  { %v2189_v22 = vsub.f32 %v2181_v30, %v2185_v52  ;;  %v16794_v52 = vpop.f32.mrf.mxu2  ;;  %v10879_v8 = vld [vmem:[%s24617_s9 + $0x20] sm:$0xf0] }
 0x260   :  { %4092 = vmatpush.bf16.msrb.mxu0 %v10978_v35 }
 0x261   :  { %v2193_v41 = vmax.f32 %v2189_v22, 0.0  ;;  %v16813_v20 = vpop.f32.mrf.mxu1 }
 0x262   :  { %v16796_v22 = vpop.f32.mrf.mxu3  ;;  %4006 = vmatpush.bf16.msra.mxu1 %v11198_v54 }
 0x263   :  { %v2229_v28 = vadd.f32 1e-05, %v2193_v41  ;;  %v16811_v7 = vpop.f32.mrf.mxu0 }
 0x264   :  { %4093 = vmatpush.bf16.msrb.mxu0 %v10946_v5 }
 0x265   :  { %14548 = vrsqrt.f32 %v2229_v28  ;;  %vm2248_vm3 = vweird.f32 %v2229_v28 }
 0x266   :  { %4007 = vmatpush.bf16.msra.mxu1 %v11166_v9 }
 0x268   :  { %4094 = vmatpush.bf16.msrb.mxu0 %v10914_v11  ;;  %v1852_v11 = vadd.f32 %v16742_v26, %v16740_v4 }
 0x269   :  { %3995 = vmatmul.bf16.gmra.mxu0 %v16616_v1 }
 0x26a   :  { %v16837_v14 = vpop.f32.mrf.mxu3 }
 0x26b   :  { %v14549_v53 = vpop.eup %14548  ;;  %v1829_v51 = vpop.f32.mrf.mxu0 }
 0x26c   :  { %v2243_v21 = vmul.f32 %v14549_v53, %v2229_v28  ;;  %vm2249_vm2 = vweird.f32 %v14549_v53  ;;  %v16835_v28 = vpop.f32.mrf.mxu2 }
 0x26d   :  { %vm2250_vm4 = vmor %vm2248_vm3, %vm2249_vm2 }
 0x26e   :  { %v2244_v30 = vmul.f32 %v14549_v53, %v2243_v21 }
 0x270   :  { %v2245_v18 = vmul.f32 0.5, %v2244_v30  ;;  %v1858_v30 = vpop.f32.mrf.mxu1 }
 0x272   :  { %v2246_v41 = vsub.f32 1.5, %v2245_v18  ;;  %v10882_v18 = vor.u32 %v13831_v48, %v10879_v8  ;;  %v1914_v59 = vpop.f32.mrf.mxu3 }
 0x273   :  { %v1832_v9 = vpop.f32.mrf.mxu0 }
 0x274   :  { %v2247_v46 = vmul.f32 %v14549_v53, %v2246_v41  ;;  %v1885_v55 = vpop.f32.mrf.mxu2  ;;  %4095 = vmatpush.bf16.msrb.mxu0 %v10882_v18 }
 0x276   :  { %v2251_v3 = vsel %vm2250_vm4, %v14549_v53, %v2247_v46  ;;  %v11133_v53 = vld [vmem:[%s24617_s9 + $0x200] sm:$0xf] }
 0x277   :  { %v2297_v15 = vmul.f32 %v2251_v3, %v2221_v45  ;;  %v2301_v40 = vmul.f32 %v2251_v3, %v2225_v0  ;;  %v2273_v21 = vmul.f32 %v2251_v3, %v2197_v2  ;;  %v2277_v37 = vmul.f32 %v2251_v3, %v2201_v29 }
 0x278   :  { %v11134_v32 = vor.u32 %v13899_v57, %v11133_v53  ;;  %v1849_v2 = vadd.f32 %v16705_v39, %v16703_v6  ;;  %v1861_v29 = vpop.f32.mrf.mxu1  ;;  %v2213_v53 = vsub.f32 %v16652_v34, %v16707_v25  ;;  %v1847_v57 = vadd.f32 %v16697_v63, %v16695_v56 }
 0x279   :  { %v2339_v45 = vmul.f32 %v16822_v36, %v2297_v15  ;;  %v2343_v0 = vmul.f32 %v16822_v36, %v2301_v40  ;;  %v2315_v47 = vmul.f32 %v16822_v36, %v2273_v21  ;;  %v2319_v23 = vmul.f32 %v16822_v36, %v2277_v37  ;;  %4096 = vmatmul.bf16.vlgmr.msrb.gmra.mxu0 %v16619_v50 }
 0x27a   :  { %4008 = vmatpush.bf16.msra.mxu1 %v11134_v32  ;;  %v2205_v15 = vsub.f32 %v16640_v49, %v16707_v25  ;;  %v2209_v40 = vsub.f32 %v16644_v24, %v16707_v25  ;;  %v1878_v6 = vadd.f32 %v16762_v33, %v1849_v2  ;;  %v2217_v39 = vsub.f32 %v16657_v38, %v16707_v25  ;;  %v1916_v8 = vpop.f32.mrf.mxu3 }
 0x27b   :  { %v2381_v61 = vadd.f32 %v16833_v27, %v2339_v45  ;;  %v2385_v35 = vadd.f32 %v16833_v27, %v2343_v0  ;;  %v2357_v12 = vadd.f32 %v16833_v27, %v2315_v47  ;;  %v2361_v44 = vadd.f32 %v16833_v27, %v2319_v23  ;;  %v1834_v0 = vpop.f32.mrf.mxu0 }
 0x27c   :  { %v2281_v21 = vmul.f32 %v2251_v3, %v2205_v15  ;;  %v2285_v37 = vmul.f32 %v2251_v3, %v2209_v40  ;;  %v2289_v49 = vmul.f32 %v2251_v3, %v2213_v53  ;;  %v1876_v48 = vadd.f32 %v16717_v31, %v1847_v57  ;;  %v1887_v34 = vpop.f32.mrf.mxu2 }
 0x27d   :  { %v2413_v41 = vmax.f32 %v2381_v61, 0.0  ;;  %v2417_v54 = vmax.f32 %v2385_v35, 0.0  ;;  %v2389_v5 = vmax.f32 %v2357_v12, 0.0  ;;  %v2393_v46 = vmax.f32 %v2361_v44, 0.0 }
 0x27e   :  { %v1854_v24 = vadd.f32 %v16780_v17, %v16778_v13  ;;  %v2293_v45 = vmul.f32 %v2251_v3, %v2217_v39  ;;  %v1881_v56 = vadd.f32 %v16794_v52, %v1852_v11  ;;  %v2323_v63 = vmul.f32 %v16822_v36, %v2281_v21 }
 0x27f   :  { %v16867_v58 = vpack.c.bf16 %v2417_v54, %v2413_v41  ;;  %v16869_v10 = vpack.c.bf16 %v2393_v46, %v2389_v5  ;;  %v2327_v38 = vmul.f32 %v16822_v36, %v2285_v37  ;;  %v2331_v25 = vmul.f32 %v16822_v36, %v2289_v49 }
 0x280   :  { %v16896_v4 = vadd.f32 %v16764_v16, %v1878_v6  ;;  %v1857_v31 = vadd.f32 %v16813_v20, %v16811_v7  ;;  %v2335_v26 = vmul.f32 %v16822_v36, %v2293_v45  ;;  %v1883_v33 = vadd.f32 %v16835_v28, %v1854_v24  ;;  %v1863_v47 = vpop.f32.mrf.mxu1 }
 0x281   :  { %24800 = vst [vmem:[#allocation7_spill] sm:$0xff] %v16869_v10  ;;  %4009 = vmatmul.bf16.vlgmr.msra.gmra.mxu1 %v16869_v10  ;;  %v2365_v13 = vadd.f32 %v16833_v27, %v2323_v63  ;;  %v2369_v17 = vadd.f32 %v16833_v27, %v2327_v38  ;;  %v2373_v52 = vadd.f32 %v16833_v27, %v2331_v25 }
 0x282   :  { %v16906_v3 = vadd.f32 %v16719_v43, %v1876_v48  ;;  %v2377_v16 = vadd.f32 %v16833_v27, %v2335_v26  ;;  %v16910_v32 = vadd.f32 %v16796_v22, %v1881_v56  ;;  %v1859_v7 = vadd.f32 %v1858_v30, %v1829_v51  ;;  %v1919_v22 = vpop.f32.mrf.mxu3 }
 0x283   :  { %v1886_v20 = vadd.f32 %v1885_v55, %v1857_v31  ;;  %v2397_v36 = vmax.f32 %v2365_v13, 0.0  ;;  %v2401_v28 = vmax.f32 %v2369_v17, 0.0  ;;  %v2405_v23 = vmax.f32 %v2373_v52, 0.0 }
 0x284   :  { %v2409_v61 = vmax.f32 %v2377_v16, 0.0  ;;  %v2102_v35 = vmul.f32 %v16896_v4, %v16896_v4  ;;  %v16915_v18 = vadd.f32 %v16837_v14, %v1883_v33  ;;  %v1862_v43 = vadd.f32 %v1861_v29, %v1832_v9  ;;  %v1890_v44 = vpop.f32.mrf.mxu2  ;;  %v16934_v29 = vpop.f32.mrf.mxu0 }
 0x285   :  { %v1888_v12 = vadd.f32 %v1887_v34, %v1859_v7  ;;  %v2098_v27 = vmul.f32 %v16906_v3, %v16906_v3  ;;  %v2066_v51 = vadd.f32 %v16896_v4, %v16906_v3  ;;  %v2106_v30 = vmul.f32 %v16910_v32, %v16910_v32 }
 0x286   :  { %v16919_v41 = vpack.c.bf16 %v2409_v61, %v2405_v23  ;;  %v16925_v54 = vadd.f32 %v1914_v59, %v1886_v20  ;;  %v1891_v55 = vadd.f32 %v1890_v44, %v1862_v43  ;;  %v16927_v14 = vpack.c.bf16 %v2401_v28, %v2397_v36 }
 0x287   :  { %v2154_v5 = vadd.f32 %v2102_v35, %v2098_v27  ;;  %v2067_v46 = vadd.f32 %v2066_v51, %v16910_v32  ;;  %v2110_v2 = vmul.f32 %v16915_v18, %v16915_v18  ;;  %v16932_v9 = vadd.f32 %v1916_v8, %v1888_v12 }
 0x288   :  { %24801 = vst [vmem:[#allocation8_spill] sm:$0xff] %v16927_v14  ;;  %v16936_v15 = vpop.f32.mrf.mxu1  ;;  %v2114_v53 = vmul.f32 %v16925_v54, %v16925_v54  ;;  %v16943_v57 = vadd.f32 %v1919_v22, %v1891_v55  ;;  %v1864_v21 = vadd.f32 %v1863_v47, %v1834_v0 }
 0x289   :  { %4101 = vmatmul.bf16.gmra.mxu0 %v16692_v60  ;;  %v2155_v59 = vadd.f32 %v2154_v5, %v2106_v30  ;;  %v2068_v40 = vadd.f32 %v2067_v46, %v16915_v18  ;;  %v2118_v11 = vmul.f32 %v16932_v9, %v16932_v9 }
 0x28a   :  { %v1921_v49 = vpop.f32.mrf.mxu3  ;;  %v2122_v34 = vmul.f32 %v16943_v57, %v16943_v57 }
 0x28b   :  { %v2156_v6 = vadd.f32 %v2155_v59, %v2110_v2  ;;  %v2069_v39 = vadd.f32 %v2068_v40, %v16925_v54 }
 0x28c   :  { %v1892_v37 = vpop.f32.mrf.mxu2  ;;  %v16954_v38 = vpop.f32.mrf.mxu0 }
 0x28d   :  { %v2157_v48 = vadd.f32 %v2156_v6, %v2114_v53  ;;  %v2070_v24 = vadd.f32 %v2069_v39, %v16932_v9  ;;  %v1893_v8 = vadd.f32 %v1892_v37, %v1864_v21  ;;  %v11613_v6 = vld [vmem:[%s24617_s9 + $0x5c0] sm:$0xf] }
 0x28e   :  { %v14019_v39 = vld [vmem:[%s24617_s9 + $0x5dc] sm:$0xf0] }
 0x28f   :  { %v2158_v45 = vadd.f32 %v2157_v48, %v2118_v11  ;;  %v2071_v56 = vadd.f32 %v2070_v24, %v16943_v57  ;;  %v16952_v63 = vadd.f32 %v1921_v49, %v1893_v8  ;;  %v13951_v11 = vld [vmem:[%s24617_s9 + $0x3c4] sm:$0xf]  ;;  %v11614_v49 = vor.u32 %v14019_v39, %v11613_v6  ;;  %v11581_v24 = vld [vmem:[%s24617_s9 + $0x580] sm:$0xf]  ;;  %v13876_v6 = vld [vmem:[%s24617_s9 + $0x164] sm:$0xf0] }
 0x290   :  { %v16956_v25 = vpop.f32.mrf.mxu1  ;;  %v11359_v48 = vld [vmem:[%s24617_s9 + $0x3e0] sm:$0xf0] }
 0x291   :  { %4014 = vmatmul.bf16.gmra.mxu1 %v16927_v14  ;;  %v2159_v31 = vadd.f32 %v2158_v45, %v2122_v34  ;;  %v2072_v26 = vadd.f32 %v2071_v56, %v16952_v63  ;;  %v2126_v33 = vmul.f32 %v16952_v63, %v16952_v63  ;;  %v14011_v34 = vld [vmem:[%s24617_s9 + $0x59c] sm:$0xf0]  ;;  %v11362_v45 = vor.u32 %v13951_v11, %v11359_v48  ;;  %v13943_v56 = vld [vmem:[%s24617_s9 + $0x384] sm:$0xf] }
 0x292   :  { %v16963_v0 = vpop.f32.mrf.mxu3  ;;  %4030 = vmatpush.bf16.msra.mxu2 %v11614_v49  ;;  %v1965_v39 = vadd.f32 %v16956_v25, %v16954_v38  ;;  %v11263_v38 = vld [vmem:[%s24617_s9 + $0x320] sm:$0xf0] }
 0x293   :  { %v2073_v13 = vrot.slane %v2072_v26, 4  ;;  %v2160_v17 = vadd.f32 %v2159_v31, %v2126_v33  ;;  %v11327_v31 = vld [vmem:[%s24617_s9 + $0x3a0] sm:$0xf0]  ;;  %v11109_v33 = vld [vmem:[%s24617_s9 + $0x1c8] sm:$0xf]  ;;  %4117 = vmatpush.bf16.msrb.mxu1 %v11362_v45 }
 0x294   :  { %v16961_v52 = vpop.f32.mrf.mxu2  ;;  %v16965_v36 = vpop.f32.mrf.mxu0 }
 0x295   :  { %v2074_v47 = vadd.f32 %v2073_v13, %v2072_v26  ;;  %v2161_v16 = vrot.slane %v2160_v17, 4  ;;  %v11582_v26 = vor.u32 %v14011_v34, %v11581_v24  ;;  %v13892_v13 = vld [vmem:[%s24617_s9 + $0x1e4] sm:$0xf0]  ;;  %v13927_v34 = vld [vmem:[%s24617_s9 + $0x304] sm:$0xf] }
 0x297   :  { %v2075_v7 = vrot.slane %v2074_v47, 2  ;;  %v2162_v20 = vadd.f32 %v2161_v16, %v2160_v17  ;;  %v11549_v17 = vld [vmem:[%s24617_s9 + $0x540] sm:$0xf]  ;;  %v11330_v16 = vor.u32 %v13943_v56, %v11327_v31  ;;  %4031 = vmatpush.bf16.msra.mxu2 %v11582_v26  ;;  %v13868_v56 = vld [vmem:[%s24617_s9 + $0x124] sm:$0xf0]  ;;  %v11266_v26 = vor.u32 %v13927_v34, %v11263_v38 }
 0x298   :  { %v16967_v28 = vpop.f32.mrf.mxu1  ;;  %v11199_v34 = vld [vmem:[%s24617_s9 + $0x2a0] sm:$0xf0] }
 0x299   :  { %4106 = vmatmul.bf16.gmra.mxu0 %v16709_v19  ;;  %v2076_v23 = vadd.f32 %v2075_v7, %v2074_v47  ;;  %v2163_v61 = vrot.slane %v2162_v20, 2  ;;  %v11110_v7 = vor.u32 %v13892_v13, %v11109_v33  ;;  %4118 = vmatpush.bf16.msrb.mxu1 %v11330_v16  ;;  %v13987_v33 = vld [vmem:[%s24617_s9 + $0x4dc] sm:$0xf0] }
 0x29a   :  { %v16971_v27 = vpop.f32.mrf.mxu3 }
 0x29b   :  { %v2077_v35 = vrot.slane %v2076_v23, 1  ;;  %v2164_v43 = vadd.f32 %v2163_v61, %v2162_v20  ;;  %v14003_v20 = vld [vmem:[%s24617_s9 + $0x55c] sm:$0xf0]  ;;  %4204 = vmatpush.bf16.msra.mxu0 %v11110_v7  ;;  %v13919_v7 = vld [vmem:[%s24617_s9 + $0x2c4] sm:$0xf] }
 0x29c   :  { %v1993_v12 = vpop.f32.mrf.mxu2  ;;  %v16975_v55 = vpop.f32.mrf.mxu0 }
 0x29d   :  { %v2078_v44 = vadd.f32 %v2077_v35, %v2076_v23  ;;  %v2165_v22 = vrot.slane %v2164_v43, 1  ;;  %v13935_v23 = vld [vmem:[%s24617_s9 + $0x344] sm:$0xf]  ;;  %v1994_v25 = vadd.f32 %v1993_v12, %v1965_v39  ;;  %v11485_v12 = vld [vmem:[%s24617_s9 + $0x4c0] sm:$0xf] }
 0x29e   :  { %v11295_v35 = vld [vmem:[%s24617_s9 + $0x360] sm:$0xf0]  ;;  %v13979_v39 = vld [vmem:[%s24617_s9 + $0x49c] sm:$0xf0] }
 0x29f   :  { %v16973_v51 = vmul.f32 0.015625, %v2078_v44  ;;  %v2166_v30 = vadd.f32 %v2165_v22, %v2164_v43  ;;  %v11077_v43 = vld [vmem:[%s24617_s9 + $0x188] sm:$0xf]  ;;  %v11298_v11 = vor.u32 %v13935_v23, %v11295_v35  ;;  %v17099_v23 = vperm.slane %v16570_v62, 2 }
 0x2a0   :  { %v16977_v5 = vpop.f32.mrf.mxu1  ;;  %v13884_v44 = vld [vmem:[%s24617_s9 + $0x1a4] sm:$0xf0]  ;;  %v17102_v35 = vadd.f32 %v16971_v27, %v1994_v25  ;;  %v1968_v27 = vadd.f32 %v16967_v28, %v16965_v36  ;;  %v17128_v36 = vperm.slane %v16575_v42, 2 }
 0x2a1   :  { %4019 = vmatmul.bf16.gmra.mxu1 %v16919_v41  ;;  %v2182_v46 = vmul.f32 0.015625, %v2166_v30  ;;  %v2186_v2 = vmul.f32 %v16973_v51, %v16973_v51  ;;  %v2222_v59 = vsub.f32 %v16943_v57, %v16973_v51  ;;  %v2226_v40 = vsub.f32 %v16952_v63, %v16973_v51  ;;  %v13860_v62 = vld [vmem:[%s24617_s9 + $0xe4] sm:$0xf0] }
 0x2a2   :  { %v16996_v37 = vpop.f32.mrf.mxu3  ;;  %v1963_v30 = vadd.f32 %v16936_v15, %v16934_v29  ;;  %v11517_v29 = vld [vmem:[%s24617_s9 + $0x500] sm:$0xf]  ;;  %4119 = vmatpush.bf16.msrb.mxu1 %v11298_v11  ;;  %v17146_v42 = vmul.f32 %v17102_v35, %v17102_v35 }
 0x2a3   :  { %v2190_v53 = vsub.f32 %v2182_v46, %v2186_v2  ;;  %v11550_v46 = vor.u32 %v14003_v20, %v11549_v17  ;;  %v11078_v2 = vor.u32 %v13884_v44, %v11077_v43  ;;  %v13995_v15 = vld [vmem:[%s24617_s9 + $0x51c] sm:$0xf0]  ;;  %v11231_v20 = vld [vmem:[%s24617_s9 + $0x2e0] sm:$0xf0]  ;;  %v11486_v44 = vor.u32 %v13987_v33, %v11485_v12  ;;  %v10949_v12 = vld [vmem:[%s24617_s9 + $0x88] sm:$0xf] }
 0x2a4   :  { %v16994_v21 = vpop.f32.mrf.mxu2  ;;  %v17030_v61 = vpop.f32.mrf.mxu0  ;;  %v1992_v49 = vadd.f32 %v16961_v52, %v1963_v30  ;;  %v11518_v45 = vor.u32 %v13995_v15, %v11517_v29  ;;  %v11013_v52 = vld [vmem:[%s24617_s9 + $0x108] sm:$0xf]  ;;  %v11453_v30 = vld [vmem:[%s24617_s9 + $0x480] sm:$0xf] }
 0x2a5   :  { %v2194_v8 = vmax.f32 %v2190_v53, 0.0  ;;  %v11045_v53 = vld [vmem:[%s24617_s9 + $0x148] sm:$0xf]  ;;  %4205 = vmatpush.bf16.msra.mxu0 %v11078_v2  ;;  %4032 = vmatpush.bf16.msra.mxu2 %v11550_v46  ;;  %v11014_v43 = vor.u32 %v13868_v56, %v11013_v52  ;;  %v1970_v2 = vadd.f32 %v16977_v5, %v16975_v55  ;;  %v11869_v11 = vld [vmem:[%s24617_s9 + $0x7c0] sm:$0xf]  ;;  %v1997_v25 = vadd.f32 %v16994_v21, %v1968_v27 }
 0x2a6   :  { %v17088_v17 = vadd.f32 %v16963_v0, %v1992_v49  ;;  %v10981_v46 = vld [vmem:[%s24617_s9 + $0xc8] sm:$0xf]  ;;  %4120 = vmatpush.bf16.msrb.mxu1 %v11266_v26  ;;  %v14083_v29 = vld [vmem:[%s24617_s9 + $0x7dc] sm:$0xf0]  ;;  %v13911_v49 = vld [vmem:[%s24617_s9 + $0x284] sm:$0xf]  ;;  %v11454_v26 = vor.u32 %v13979_v39, %v11453_v30 }
 0x2a7   :  { %v17022_v47 = vadd.f32 1e-05, %v2194_v8  ;;  %v11046_v8 = vor.u32 %v13876_v6, %v11045_v53  ;;  %v11234_v6 = vor.u32 %v13919_v7, %v11231_v20  ;;  %v11870_v38 = vor.u32 %v14083_v29, %v11869_v11  ;;  %v11421_v52 = vld [vmem:[%s24617_s9 + $0x440] sm:$0xf]  ;;  %v13852_v21 = vld [vmem:[%s24617_s9 + $0xa4] sm:$0xf0] }
 0x2a8   :  { %v17044_v22 = vpop.f32.mrf.mxu1  ;;  %v17132_v28 = vmul.f32 %v17088_v17, %v17088_v17  ;;  %v11202_v33 = vor.u32 %v13911_v49, %v11199_v34  ;;  %v13903_v7 = vld [vmem:[%s24617_s9 + $0x244] sm:$0xf] }
 0x2a9   :  { %4111 = vmatmul.bf16.gmra.mxu0 %v16616_v1  ;;  %14550 = vrsqrt.f32 %v17022_v47  ;;  %4033 = vmatpush.bf16.msra.mxu2 %v11518_v45  ;;  %v10982_v45 = vor.u32 %v13860_v62, %v10981_v46  ;;  %v11167_v20 = vld [vmem:[%s24617_s9 + $0x260] sm:$0xf0]  ;;  %vm2258_vm6 = vweird.f32 %v17022_v47  ;;  %v11389_v46 = vld [vmem:[%s24617_s9 + $0x400] sm:$0xf] }
 0x2aa   :  { %v17063_v24 = vpop.f32.mrf.mxu3  ;;  %4206 = vmatpush.bf16.msra.mxu0 %v11046_v8  ;;  %4059 = vmatpush.bf16.msra.mxu3 %v11870_v38  ;;  %v13963_v62 = vld [vmem:[%s24617_s9 + $0x41c] sm:$0xf0]  ;;  %v11170_v39 = vor.u32 %v13903_v7, %v11167_v20 }
 0x2ab   :  { %4121 = vmatpush.bf16.msrb.mxu1 %v11234_v6 }
 0x2ac   :  { %v1998_v48 = vpop.f32.mrf.mxu2  ;;  %v17090_v16 = vpop.f32.mrf.mxu0 }
 0x2ad   :  { %v1999_v8 = vadd.f32 %v1998_v48, %v1970_v2  ;;  %4034 = vmatpush.bf16.msra.mxu2 %v11486_v44  ;;  %v2198_v48 = vsub.f32 %v16906_v3, %v16973_v51  ;;  %v2206_v3 = vsub.f32 %v16910_v32, %v16973_v51  ;;  %v2218_v32 = vsub.f32 %v16932_v9, %v16973_v51 }
 0x2ae   :  { %4207 = vmatpush.bf16.msra.mxu0 %v11014_v43  ;;  %v2202_v43 = vsub.f32 %v16896_v4, %v16973_v51  ;;  %v2214_v4 = vsub.f32 %v16925_v54, %v16973_v51  ;;  %v10950_v2 = vor.u32 %v13852_v21, %v10949_v12 }
 0x2af   :  { %v17077_v31 = vpop.eup %14550  ;;  %v17196_v27 = vadd.f32 %v17063_v24, %v1999_v8  ;;  %4122 = vmatpush.bf16.msrb.mxu1 %v11202_v33 }
 0x2b0   :  { %v2253_v13 = vmul.f32 %v17077_v31, %v17022_v47  ;;  %v1974_v53 = vpop.f32.mrf.mxu1  ;;  %vm2259_vm5 = vweird.f32 %v17077_v31  ;;  %v1973_v47 = vadd.f32 %v17044_v22, %v17030_v61  ;;  %v13844_v61 = vld [vmem:[%s24617_s9 + $0x64] sm:$0xf0] }
 0x2b1   :  { %4024 = vmatmul.bf16.gmra.mxu1 %v16867_v58  ;;  %vm2260_vm7 = vmor %vm2258_vm6, %vm2259_vm5  ;;  %v1975_v54 = vadd.f32 %v1974_v53, %v17090_v16  ;;  %4035 = vmatpush.bf16.msra.mxu2 %v11454_v26  ;;  %v13895_v16 = vld [vmem:[%s24617_s9 + $0x204] sm:$0xf] }
 0x2b2   :  { %v2254_v0 = vmul.f32 %v17077_v31, %v2253_v13  ;;  %v17136_v5 = vpop.f32.mrf.mxu3  ;;  %v13971_v13 = vld [vmem:[%s24617_s9 + $0x45c] sm:$0xf0]  ;;  %4208 = vmatpush.bf16.msra.mxu0 %v10982_v45  ;;  %v11135_v53 = vld [vmem:[%s24617_s9 + $0x220] sm:$0xf0] }
 0x2b3   :  { %v11422_v9 = vor.u32 %v13971_v13, %v11421_v52  ;;  %v11138_v8 = vor.u32 %v13895_v16, %v11135_v53  ;;  %v10885_v52 = vld [vmem:[%s24617_s9 + $0x8] sm:$0xf]  ;;  %4123 = vmatpush.bf16.msrb.mxu1 %v11170_v39 }
 0x2b4   :  { %v2255_v15 = vmul.f32 0.5, %v2254_v0  ;;  %v17134_v55 = vpop.f32.mrf.mxu2  ;;  %v2210_v0 = vsub.f32 %v16915_v18, %v16973_v51  ;;  %v1948_v30 = vpop.f32.mrf.mxu0  ;;  %v17191_v18 = vadd.f32 %v16996_v37, %v1997_v25  ;;  %v10917_v37 = vld [vmem:[%s24617_s9 + $0x48] sm:$0xf] }
 0x2b5   :  { %4036 = vmatpush.bf16.msra.mxu2 %v11422_v9 }
 0x2b6   :  { %v2256_v56 = vsub.f32 1.5, %v2255_v15  ;;  %4209 = vmatpush.bf16.msra.mxu0 %v10950_v2 }
 0x2b7   :  { %4124 = vmatpush.bf16.msrb.mxu1 %v11138_v8 }
 0x2b8   :  { %v2257_v44 = vmul.f32 %v17077_v31, %v2256_v56  ;;  %v1977_v25 = vpop.f32.mrf.mxu1  ;;  %v13836_v56 = vld [vmem:[%s24617_s9 + $0x24] sm:$0xf0] }
 0x2b9   :  { %v1978_v2 = vadd.f32 %v1977_v25, %v1948_v30 }
 0x2ba   :  { %v2261_v6 = vsel %vm2260_vm7, %v17077_v31, %v2257_v44  ;;  %v11390_v31 = vor.u32 %v13963_v62, %v11389_v46  ;;  %v2032_v15 = vpop.f32.mrf.mxu3  ;;  %v2002_v62 = vadd.f32 %v17134_v55, %v1973_v47  ;;  %v2107_v55 = vmul.f32 %v17191_v18, %v17191_v18 }
 0x2bb   :  { %v2298_v22 = vmul.f32 %v2261_v6, %v2222_v59  ;;  %v2302_v24 = vmul.f32 %v2261_v6, %v2226_v40  ;;  %v2274_v11 = vmul.f32 %v2261_v6, %v2198_v48  ;;  %v2278_v49 = vmul.f32 %v2261_v6, %v2202_v43 }
 0x2bc   :  { %v2003_v29 = vpop.f32.mrf.mxu2  ;;  %v2282_v57 = vmul.f32 %v2261_v6, %v2206_v3  ;;  %v2286_v59 = vmul.f32 %v2261_v6, %v2210_v0  ;;  %v2290_v34 = vmul.f32 %v2261_v6, %v2214_v4  ;;  %v10918_v40 = vor.u32 %v13844_v61, %v10917_v37  ;;  %v1950_v7 = vpop.f32.mrf.mxu0  ;;  %4037 = vmatpush.bf16.msra.mxu2 %v11390_v31 }
 0x2bd   :  { %v2340_v63 = vmul.f32 %v17099_v23, %v2298_v22  ;;  %v2344_v51 = vmul.f32 %v17099_v23, %v2302_v24  ;;  %v2316_v38 = vmul.f32 %v17099_v23, %v2274_v11  ;;  %v2320_v45 = vmul.f32 %v17099_v23, %v2278_v49 }
 0x2be   :  { %v2324_v26 = vmul.f32 %v17099_v23, %v2282_v57  ;;  %v2328_v12 = vmul.f32 %v17099_v23, %v2286_v59  ;;  %v2294_v13 = vmul.f32 %v2261_v6, %v2218_v32  ;;  %v2332_v0 = vmul.f32 %v17099_v23, %v2290_v34  ;;  %4210 = vmatpush.bf16.msra.mxu0 %v10918_v40 }
 0x2bf   :  { %v2382_v21 = vadd.f32 %v17128_v36, %v2340_v63  ;;  %v2386_v48 = vadd.f32 %v17128_v36, %v2344_v51  ;;  %v2358_v33 = vadd.f32 %v17128_v36, %v2316_v38  ;;  %v2362_v20 = vadd.f32 %v17128_v36, %v2320_v45 }
 0x2c0   :  { %v2366_v43 = vadd.f32 %v17128_v36, %v2324_v26  ;;  %v2370_v3 = vadd.f32 %v17128_v36, %v2328_v12  ;;  %v10886_v4 = vor.u32 %v13836_v56, %v10885_v52  ;;  %v2004_v37 = vadd.f32 %v2003_v29, %v1975_v54  ;;  %v1979_v51 = vpop.f32.mrf.mxu1 }
 0x2c1   :  { %v2414_v44 = vmax.f32 %v2382_v21, 0.0  ;;  %v2418_v46 = vmax.f32 %v2386_v48, 0.0  ;;  %v2390_v9 = vmax.f32 %v2358_v33, 0.0  ;;  %v2394_v39 = vmax.f32 %v2362_v20, 0.0  ;;  %4125 = vmatmul.bf16.vlgmr.msrb.gmra.mxu1 %v16869_v10 }
 0x2c2   :  { %v2398_v32 = vmax.f32 %v2366_v43, 0.0  ;;  %v2402_v61 = vmax.f32 %v2370_v3, 0.0  ;;  %v2336_v22 = vmul.f32 %v17099_v23, %v2294_v13  ;;  %v2079_v24 = vadd.f32 %v17102_v35, %v17088_v17  ;;  %v2035_v16 = vpop.f32.mrf.mxu3  ;;  %4211 = vmatpush.bf16.msra.mxu0 %v10886_v4 }
 0x2c3   :  { %v17238_v6 = vpack.c.bf16 %v2418_v46, %v2414_v44  ;;  %v17245_v30 = vpack.c.bf16 %v2394_v39, %v2390_v9  ;;  %v2374_v31 = vadd.f32 %v17128_v36, %v2332_v0  ;;  %v17249_v53 = vadd.f32 %v17136_v5, %v2002_v62 }
 0x2c4   :  { %v2006_v47 = vpop.f32.mrf.mxu2  ;;  %v17251_v11 = vpack.c.bf16 %v2402_v61, %v2398_v32  ;;  %v2378_v23 = vadd.f32 %v17128_v36, %v2336_v22  ;;  %v2167_v29 = vadd.f32 %v17146_v42, %v17132_v28  ;;  %v2080_v57 = vadd.f32 %v2079_v24, %v17191_v18  ;;  %v17263_v40 = vpop.f32.mrf.mxu0 }
 0x2c5   :  { %v2007_v54 = vadd.f32 %v2006_v47, %v1978_v2  ;;  %4038 = vmatmul.bf16.vlgmr.msra.gmra.mxu2 %v17245_v30  ;;  %v2406_v49 = vmax.f32 %v2374_v31, 0.0  ;;  %v2111_v5 = vmul.f32 %v17196_v27, %v17196_v27  ;;  %v17261_v59 = vadd.f32 %v2032_v15, %v2004_v37  ;;  %4212 = vmatmul.bf16.vlgmr.msra.gmra.mxu0 %v16619_v50 }
 0x2c6   :  { %24802 = vst [vmem:[#allocation9_spill] sm:$0xff] %v17251_v11  ;;  %v2410_v34 = vmax.f32 %v2378_v23, 0.0  ;;  %v2168_v63 = vadd.f32 %v2167_v29, %v2107_v55  ;;  %v2081_v36 = vadd.f32 %v2080_v57, %v17196_v27  ;;  %v2115_v28 = vmul.f32 %v17249_v53, %v17249_v53 }
 0x2c7   :  { %v17269_v42 = vadd.f32 %v2035_v16, %v2007_v54  ;;  %v2119_v8 = vmul.f32 %v17261_v59, %v17261_v59  ;;  %v1980_v45 = vadd.f32 %v1979_v51, %v1950_v7 }
 0x2c8   :  { %v17271_v38 = vpack.c.bf16 %v2410_v34, %v2406_v49  ;;  %v2169_v25 = vadd.f32 %v2168_v63, %v2111_v5  ;;  %v2082_v15 = vadd.f32 %v2081_v36, %v17249_v53  ;;  %v11837_v5 = vld [vmem:[%s24617_s9 + $0x780] sm:$0xf] }
 0x2c9   :  { %v2123_v12 = vmul.f32 %v17269_v42, %v17269_v42  ;;  %v14075_v34 = vld [vmem:[%s24617_s9 + $0x79c] sm:$0xf0] }
 0x2ca   :  { %24803 = vst [vmem:[#allocation13_spill] sm:$0xff] %v17271_v38  ;;  %v2170_v56 = vadd.f32 %v2169_v25, %v2115_v28  ;;  %v2083_v26 = vadd.f32 %v2082_v15, %v17261_v59  ;;  %v2037_v48 = vpop.f32.mrf.mxu3  ;;  %v11805_v63 = vld [vmem:[%s24617_s9 + $0x740] sm:$0xf]  ;;  %v11838_v51 = vor.u32 %v14075_v34, %v11837_v5  ;;  %v13872_v34 = vld [vmem:[%s24617_s9 + $0x14c] sm:$0xf] }
 0x2cb   :  { %v14067_v36 = vld [vmem:[%s24617_s9 + $0x75c] sm:$0xf0] }
 0x2cc   :  { %v2008_v52 = vpop.f32.mrf.mxu2  ;;  %v2171_v33 = vadd.f32 %v2170_v56, %v2119_v8  ;;  %v2084_v13 = vadd.f32 %v2083_v26, %v17269_v42  ;;  %v17282_v43 = vpop.f32.mrf.mxu0  ;;  %v11773_v25 = vld [vmem:[%s24617_s9 + $0x700] sm:$0xf]  ;;  %4060 = vmatpush.bf16.msra.mxu3 %v11838_v51  ;;  %v11806_v8 = vor.u32 %v14067_v36, %v11805_v63  ;;  %v11365_v56 = vld [vmem:[%s24617_s9 + $0x3c8] sm:$0xf]  ;;  %v13991_v36 = vld [vmem:[%s24617_s9 + $0x504] sm:$0xf] }
 0x2cd   :  { %v2009_v21 = vadd.f32 %v2008_v52, %v1980_v45  ;;  %v14059_v15 = vld [vmem:[%s24617_s9 + $0x71c] sm:$0xf0]  ;;  %v14015_v45 = vld [vmem:[%s24617_s9 + $0x5c4] sm:$0xf] }
 0x2ce   :  { %v2172_v3 = vadd.f32 %v2171_v33, %v2123_v12  ;;  %v11615_v52 = vld [vmem:[%s24617_s9 + $0x5e0] sm:$0xf0] }
 0x2cf   :  { %v17280_v20 = vadd.f32 %v2037_v48, %v2009_v21  ;;  %v11618_v12 = vor.u32 %v14015_v45, %v11615_v52  ;;  %v13956_v21 = vld [vmem:[%s24617_s9 + $0x3e4] sm:$0xf0]  ;;  %v14007_v48 = vld [vmem:[%s24617_s9 + $0x584] sm:$0xf] }
 0x2d0   :  { %v11366_v33 = vor.u32 %v13956_v21, %v11365_v56  ;;  %4061 = vmatpush.bf16.msra.mxu3 %v11806_v8  ;;  %v14043_v8 = vld [vmem:[%s24617_s9 + $0x69c] sm:$0xf0]  ;;  %v11269_v45 = vld [vmem:[%s24617_s9 + $0x308] sm:$0xf] }
 0x2d1   :  { %v2085_v0 = vadd.f32 %v2084_v13, %v17280_v20  ;;  %v2127_v7 = vmul.f32 %v17280_v20, %v17280_v20  ;;  %4130 = vmatmul.bf16.gmra.mxu1 %v16927_v14  ;;  %4146 = vmatpush.bf16.msrb.mxu2 %v11618_v12  ;;  %v13932_v52 = vld [vmem:[%s24617_s9 + $0x324] sm:$0xf0] }
 0x2d2   :  { %4233 = vmatpush.bf16.msra.mxu1 %v11366_v33  ;;  %v17415_v33 = vld [vmem:[%s24617_s9 + $0x640] sm:$0xf] }
 0x2d3   :  { %v2086_v44 = vrot.slane %v2085_v0, 4  ;;  %v2173_v46 = vadd.f32 %v2172_v3, %v2127_v7  ;;  %v11583_v3 = vld [vmem:[%s24617_s9 + $0x5a0] sm:$0xf0]  ;;  %v13948_v7 = vld [vmem:[%s24617_s9 + $0x3a4] sm:$0xf0] }
 0x2d4   :  { %v17289_v39 = vpop.f32.mrf.mxu0 }
 0x2d5   :  { %v2087_v62 = vadd.f32 %v2086_v44, %v2085_v0  ;;  %v2174_v4 = vrot.slane %v2173_v46, 4  ;;  %4043 = vmatmul.bf16.gmra.mxu2 %v17251_v11  ;;  %4217 = vmatmul.bf16.gmra.mxu0 %v16692_v60  ;;  %v11333_v0 = vld [vmem:[%s24617_s9 + $0x388] sm:$0xf]  ;;  %v11741_v44 = vld [vmem:[%s24617_s9 + $0x6c0] sm:$0xf] }
 0x2d7   :  { %v2088_v2 = vrot.slane %v2087_v62, 2  ;;  %v2175_v9 = vadd.f32 %v2174_v4, %v2173_v46  ;;  %v11586_v46 = vor.u32 %v14007_v48, %v11583_v3  ;;  %v11111_v4 = vld [vmem:[%s24617_s9 + $0x1e8] sm:$0xf0]  ;;  %v17420_v3 = vld [vmem:[%s24617_s9 + $0x65c] sm:$0xf0] }
 0x2d9   :  { %v2089_v32 = vadd.f32 %v2088_v2, %v2087_v62  ;;  %v2176_v37 = vrot.slane %v2175_v9, 2  ;;  %v13888_v62 = vld [vmem:[%s24617_s9 + $0x1cc] sm:$0xf]  ;;  %v11774_v2 = vor.u32 %v14059_v15, %v11773_v25  ;;  %4147 = vmatpush.bf16.msrb.mxu2 %v11586_v46 }
 0x2da   :  { %v11047_v25 = vld [vmem:[%s24617_s9 + $0x168] sm:$0xf0] }
 0x2db   :  { %v2090_v61 = vrot.slane %v2089_v32, 1  ;;  %v2177_v22 = vadd.f32 %v2176_v37, %v2175_v9  ;;  %v14051_v9 = vld [vmem:[%s24617_s9 + $0x6dc] sm:$0xf0]  ;;  %v11114_v37 = vor.u32 %v13888_v62, %v11111_v4  ;;  %4062 = vmatpush.bf16.msra.mxu3 %v11774_v2  ;;  %v11050_v21 = vor.u32 %v13872_v34, %v11047_v25  ;;  %v11487_v2 = vld [vmem:[%s24617_s9 + $0x4e0] sm:$0xf0] }
 0x2dc   :  { %v17294_v31 = vpop.f32.mrf.mxu0  ;;  %v11742_v63 = vor.u32 %v14051_v9, %v11741_v44  ;;  %v11015_v44 = vld [vmem:[%s24617_s9 + $0x128] sm:$0xf0]  ;;  %v11270_v4 = vor.u32 %v13932_v52, %v11269_v45  ;;  %v11237_v9 = vld [vmem:[%s24617_s9 + $0x2c8] sm:$0xf]  ;;  %v11678_v45 = vor.u32 %v17420_v3, %v17415_v33 }
 0x2dd   :  { %v2091_v24 = vadd.f32 %v2090_v61, %v2089_v32  ;;  %v2178_v55 = vrot.slane %v2177_v22, 1  ;;  %v11334_v32 = vor.u32 %v13948_v7, %v11333_v0  ;;  %v13999_v61 = vld [vmem:[%s24617_s9 + $0x544] sm:$0xf]  ;;  %4320 = vmatpush.bf16.msrb.mxu0 %v11114_v37  ;;  %v13864_v7 = vld [vmem:[%s24617_s9 + $0x10c] sm:$0xf] }
 0x2de   :  { %v13983_v0 = vld [vmem:[%s24617_s9 + $0x4c4] sm:$0xf] }
 0x2df   :  { %v17292_v47 = vmul.f32 0.015625, %v2091_v24  ;;  %v2179_v16 = vadd.f32 %v2178_v55, %v2177_v22  ;;  %v11551_v22 = vld [vmem:[%s24617_s9 + $0x560] sm:$0xf0]  ;;  %v11301_v24 = vld [vmem:[%s24617_s9 + $0x348] sm:$0xf]  ;;  %4234 = vmatpush.bf16.msra.mxu1 %v11334_v32  ;;  %4063 = vmatpush.bf16.msra.mxu3 %v11742_v63  ;;  %v11490_v34 = vor.u32 %v13983_v0, %v11487_v2 }
 0x2e0   :  { %v13940_v55 = vld [vmem:[%s24617_s9 + $0x364] sm:$0xf0]  ;;  %v17444_v37 = vld [vmem:[%s24617_s9 + $0x484] sm:$0xf]  ;;  %v17481_v63 = vld [vmem:[%s24617_s9 + $0x61c] sm:$0xf0] }
 0x2e1   :  { %v2183_v54 = vmul.f32 0.015625, %v2179_v16  ;;  %v2187_v23 = vmul.f32 %v17292_v47, %v17292_v47  ;;  %v2223_v29 = vsub.f32 %v17269_v42, %v17292_v47  ;;  %v2227_v49 = vsub.f32 %v17280_v20, %v17292_v47  ;;  %4135 = vmatmul.bf16.gmra.mxu1 %v16919_v41  ;;  %v13880_v16 = vld [vmem:[%s24617_s9 + $0x18c] sm:$0xf]  ;;  %v13924_v32 = vld [vmem:[%s24617_s9 + $0x2e4] sm:$0xf0] }
 0x2e2   :  { %v11302_v51 = vor.u32 %v13940_v55, %v11301_v24  ;;  %v17459_v24 = vld [vmem:[%s24617_s9 + $0x2a4] sm:$0xf0]  ;;  %v17464_v55 = vld [vmem:[%s24617_s9 + $0xcc] sm:$0xf]  ;;  %v2207_v25 = vsub.f32 %v17191_v18, %v17292_v47  ;;  %v11238_v52 = vor.u32 %v13924_v32, %v11237_v9  ;;  %v2211_v3 = vsub.f32 %v17196_v27, %v17292_v47  ;;  %v17550_v27 = vld [vmem:[%s24617_s9 + $0x404] sm:$0xf] }
 0x2e3   :  { %v2191_v57 = vsub.f32 %v2183_v54, %v2187_v23  ;;  %v11079_v54 = vld [vmem:[%s24617_s9 + $0x1a8] sm:$0xf0]  ;;  %v11709_v23 = vld [vmem:[%s24617_s9 + $0x680] sm:$0xf]  ;;  %v2215_v0 = vsub.f32 %v17249_v53, %v17292_v47  ;;  %v17555_v9 = vld [vmem:[%s24617_s9 + $0x420] sm:$0xf0] }
 0x2e4   :  { %v17339_v13 = vpop.f32.mrf.mxu0  ;;  %v11082_v5 = vor.u32 %v13880_v16, %v11079_v54  ;;  %v11710_v62 = vor.u32 %v14043_v8, %v11709_v23  ;;  %4235 = vmatpush.bf16.msra.mxu1 %v11302_v51  ;;  %v11018_v54 = vor.u32 %v13864_v7, %v11015_v44  ;;  %v10983_v23 = vld [vmem:[%s24617_s9 + $0xe8] sm:$0xf0]  ;;  %v17486_v51 = vld [vmem:[%s24617_s9 + $0x444] sm:$0xf]  ;;  %v2219_v7 = vsub.f32 %v17261_v59, %v17292_v47 }
 0x2e5   :  { %v2195_v28 = vmax.f32 %v2191_v57, 0.0  ;;  %4048 = vmatmul.bf16.gmra.mxu2 %v17271_v38  ;;  %4222 = vmatmul.bf16.gmra.mxu0 %v16709_v19  ;;  %v11554_v57 = vor.u32 %v13999_v61, %v11551_v22  ;;  %v17449_v61 = vld [vmem:[%s24617_s9 + $0x4a0] sm:$0xf0]  ;;  %v17454_v22 = vld [vmem:[%s24617_s9 + $0x288] sm:$0xf]  ;;  %v10986_v2 = vor.u32 %v17464_v55, %v10983_v23 }
 0x2e6   :  { %4321 = vmatpush.bf16.msrb.mxu0 %v11082_v5  ;;  %v2199_v5 = vsub.f32 %v17088_v17, %v17292_v47  ;;  %4064 = vmatpush.bf16.msra.mxu3 %v11710_v62  ;;  %v11458_v62 = vor.u32 %v17444_v37, %v17449_v61  ;;  %v14079_v32 = vld [vmem:[%s24617_s9 + $0x7c4] sm:$0xf]  ;;  %v17575_v55 = vld [vmem:[%s24617_s9 + $0x224] sm:$0xf0]  ;;  %v14683_v23 = vld [vmem:[%s24616_s8] sm:$0xf] }
 0x2e7   :  { %v17330_v26 = vadd.f32 1e-05, %v2195_v28  ;;  %v11519_v28 = vld [vmem:[%s24617_s9 + $0x520] sm:$0xf0]  ;;  %4148 = vmatpush.bf16.msrb.mxu2 %v11554_v57  ;;  %v17473_v57 = vld [vmem:[%s24617_s9 + $0x600] sm:$0xf] }
 0x2e8   :  { %v11522_v48 = vor.u32 %v13991_v36, %v11519_v28  ;;  %v17491_v36 = vld [vmem:[%s24617_s9 + $0x460] sm:$0xf0]  ;;  %v2203_v28 = vsub.f32 %v17102_v35, %v17292_v47  ;;  %4236 = vmatpush.bf16.msra.mxu1 %v11270_v4  ;;  %v11206_v4 = vor.u32 %v17459_v24, %v17454_v22  ;;  %v11646_v37 = vor.u32 %v17481_v63, %v17473_v57  ;;  %v17570_v24 = vld [vmem:[%s24617_s9 + $0x208] sm:$0xf]  ;;  %s14720_s8 = smov 28  }
 0x2e9   :  { %14552 = vrsqrt.f32 %v17330_v26  ;;  %vm2268_vm9 = vweird.f32 %v17330_v26  ;;  %v11426_v61 = vor.u32 %v17486_v51, %v17491_v36  ;;  %v17586_v57 = vperm.slane %v14683_v23, 3  ;;  %v11775_v59 = vld [vmem:[%s24617_s9 + $0x720] sm:$0xf0] }
 0x2ea   :  { %4322 = vmatpush.bf16.msrb.mxu0 %v11050_v21  ;;  %v17507_v21 = vld [vmem:[%s24617_s9 + $0x264] sm:$0xf0]  ;;  %4065 = vmatpush.bf16.msra.mxu3 %v11678_v45  ;;  %v11839_v45 = vld [vmem:[%s24617_s9 + $0x7a0] sm:$0xf0]  ;;  %v11142_v42 = vor.u32 %v17575_v55, %v17570_v24 }
 0x2eb   :  { %4149 = vmatpush.bf16.msrb.mxu2 %v11522_v48  ;;  %v14682_v48 = vld [vmem:[%s24615_s7] sm:$0xf]  ;;  %v14063_v24 = vld [vmem:[%s24617_s9 + $0x744] sm:$0xf] }
 0x2ec   :  { %v17410_v12 = vpop.f32.mrf.mxu0  ;;  %v17523_v33 = vperm.slane %v14682_v48, 3  ;;  %4237 = vmatpush.bf16.msra.mxu1 %v11238_v52  ;;  %v11394_v52 = vor.u32 %v17550_v27, %v17555_v9  ;;  %v11807_v55 = vld [vmem:[%s24617_s9 + $0x760] sm:$0xf0] }
 0x2ee   :  { %4323 = vmatpush.bf16.msrb.mxu0 %v11018_v54  ;;  %4066 = vmatpush.bf16.msra.mxu3 %v11646_v37 }
 0x2ef   :  { %v17397_v15 = vpop.eup %14552  ;;  %4150 = vmatpush.bf16.msrb.mxu2 %v11490_v34 }
 0x2f0   :  { %v2263_v56 = vmul.f32 %v17397_v15, %v17330_v26  ;;  %vm2269_vm8 = vweird.f32 %v17397_v15  ;;  %v10951_v26 = vld [vmem:[%s24617_s9 + $0xa8] sm:$0xf0]  ;;  %4238 = vmatpush.bf16.msra.mxu1 %v11206_v4 }
 0x2f1   :  { %vm17516_vm10 = vmor %vm2268_vm9, %vm2269_vm8  ;;  %4140 = vmatmul.bf16.gmra.mxu1 %v16867_v58  ;;  %v13832_v4 = vld [vmem:[%s24617_s9 + $0xc] sm:$0xf] }
 0x2f2   :  { %v2264_v46 = vmul.f32 %v17397_v15, %v2263_v56  ;;  %v17502_v56 = vld [vmem:[%s24617_s9 + $0x248] sm:$0xf]  ;;  %4324 = vmatpush.bf16.msrb.mxu0 %v10986_v2 }
 0x2f3   :  { %v11174_v22 = vor.u32 %v17507_v21, %v17502_v56  ;;  %4151 = vmatpush.bf16.msrb.mxu2 %v11458_v62  ;;  %v10919_v56 = vld [vmem:[%s24617_s9 + $0x68] sm:$0xf0] }
 0x2f4   :  { %v2265_v16 = vmul.f32 0.5, %v2264_v46  ;;  %v17540_v46 = vpop.f32.mrf.mxu0 }
 0x2f5   :  { %4053 = vmatmul.bf16.gmra.mxu2 %v17238_v6  ;;  %4227 = vmatmul.bf16.gmra.mxu0 %v16616_v1 }
 0x2f6   :  { %v2266_v8 = vsub.f32 1.5, %v2265_v16  ;;  %v11871_v16 = vld [vmem:[%s24617_s9 + $0x7e0] sm:$0xf0]  ;;  %4239 = vmatpush.bf16.msra.mxu1 %v11174_v22 }
 0x2f7   :  { %v11874_v63 = vor.u32 %v14079_v32, %v11871_v16  ;;  %4152 = vmatpush.bf16.msrb.mxu2 %v11426_v61  ;;  %v11810_v61 = vor.u32 %v14063_v24, %v11807_v55  ;;  %v14055_v22 = vld [vmem:[%s24617_s9 + $0x704] sm:$0xf]  ;;  %v13893_v24 = vld [vmem:[%s24617_s9 + $0x1ec] sm:$0xf0] }
 0x2f8   :  { %v2267_v44 = vmul.f32 %v17397_v15, %v2266_v8  ;;  %v14071_v8 = vld [vmem:[%s24617_s9 + $0x784] sm:$0xf] }
 0x2f9   :  { %4175 = vmatpush.bf16.msrb.mxu3 %v11874_v63  ;;  %v14039_v55 = vld [vmem:[%s24617_s9 + $0x684] sm:$0xf] }
 0x2fa   :  { %v2271_v54 = vsel %vm17516_vm10, %v17397_v15, %v2267_v44  ;;  %4240 = vmatpush.bf16.msra.mxu1 %v11142_v42  ;;  %v14020_v42 = vld [vmem:[%s24617_s9 + $0x5e4] sm:$0xf0] }
 0x2fb   :  { %v2299_v51 = vmul.f32 %v2271_v54, %v2223_v29  ;;  %v2303_v36 = vmul.f32 %v2271_v54, %v2227_v49  ;;  %v2279_v15 = vmul.f32 %v2271_v54, %v2203_v28  ;;  %v2283_v29 = vmul.f32 %v2271_v54, %v2207_v25  ;;  %v13840_v28 = vld [vmem:[%s24617_s9 + $0x4c] sm:$0xf]  ;;  %4153 = vmatpush.bf16.msrb.mxu2 %v11394_v52  ;;  %v14047_v52 = vld [vmem:[%s24617_s9 + $0x6c4] sm:$0xf] }
 0x2fc   :  { %v2287_v20 = vmul.f32 %v2271_v54, %v2211_v3  ;;  %v11842_v25 = vor.u32 %v14071_v8, %v11839_v45  ;;  %v17622_v27 = vpop.f32.mrf.mxu0  ;;  %v10922_v9 = vor.u32 %v13840_v28, %v10919_v56  ;;  %v2291_v16 = vmul.f32 %v2271_v54, %v2215_v0 }
 0x2fd   :  { %v2341_v49 = vmul.f32 %v17523_v33, %v2299_v51  ;;  %v2321_v18 = vmul.f32 %v17523_v33, %v2279_v15  ;;  %v2295_v8 = vmul.f32 %v2271_v54, %v2219_v7  ;;  %v11778_v56 = vor.u32 %v14055_v22, %v11775_v59  ;;  %v13885_v22 = vld [vmem:[%s24617_s9 + $0x1ac] sm:$0xf0] }
 0x2fe   :  { %v4010_v17 = vpop.f32.mrf.mxu1  ;;  %v2333_v45 = vmul.f32 %v17523_v33, %v2291_v16  ;;  %4176 = vmatpush.bf16.msrb.mxu3 %v11842_v25  ;;  %v11711_v16 = vld [vmem:[%s24617_s9 + $0x6a0] sm:$0xf0] }
 0x2ff   :  { %v17510_v35 = vadd.f32 %v4010_v17, %v17263_v40  ;;  %v13848_v40 = vld [vmem:[%s24617_s9 + $0x8c] sm:$0xf]  ;;  %v2275_v17 = vmul.f32 %v2271_v54, %v2199_v5  ;;  %v2345_v5 = vmul.f32 %v17523_v33, %v2303_v36  ;;  %v2383_v3 = vadd.f32 %v17586_v57, %v2341_v49 }
 0x300   :  { %v10954_v34 = vor.u32 %v13848_v40, %v10951_v26  ;;  %v2325_v40 = vmul.f32 %v17523_v33, %v2283_v29  ;;  %v2329_v26 = vmul.f32 %v17523_v33, %v2287_v20  ;;  %v2363_v2 = vadd.f32 %v17586_v57, %v2321_v18  ;;  %v10887_v36 = vld [vmem:[%s24617_s9 + $0x28] sm:$0xf0] }
 0x301   :  { %v2317_v21 = vmul.f32 %v17523_v33, %v2275_v17  ;;  %v2387_v44 = vadd.f32 %v17586_v57, %v2345_v5  ;;  %v2415_v23 = vmax.f32 %v2383_v3, 0.0  ;;  %v10890_v29 = vor.u32 %v13832_v4, %v10887_v36  ;;  %4241 = vmatmul.bf16.vlgmr.msra.gmra.mxu1 %v16869_v10  ;;  %v13952_v18 = vld [vmem:[%s24617_s9 + $0x3cc] sm:$0xf]  ;;  %v11589_v3 = vld [vmem:[%s24617_s9 + $0x588] sm:$0xf] }
 0x302   :  { %4325 = vmatpush.bf16.msrb.mxu0 %v10954_v34  ;;  %v2367_v32 = vadd.f32 %v17586_v57, %v2325_v40  ;;  %v2371_v37 = vadd.f32 %v17586_v57, %v2329_v26  ;;  %v2395_v51 = vmax.f32 %v2363_v2, 0.0  ;;  %v2337_v47 = vmul.f32 %v17523_v33, %v2295_v8  ;;  %4177 = vmatpush.bf16.msrb.mxu3 %v11810_v61  ;;  %v11367_v26 = vld [vmem:[%s24617_s9 + $0x3e8] sm:$0xf0]  ;;  %v14004_v36 = vld [vmem:[%s24617_s9 + $0x564] sm:$0xf0] }
 0x303   :  { %v2359_v62 = vadd.f32 %v17586_v57, %v2317_v21  ;;  %v2419_v34 = vmax.f32 %v2387_v44, 0.0  ;;  %v2375_v7 = vadd.f32 %v17586_v57, %v2333_v45  ;;  %v14012_v44 = vld [vmem:[%s24617_s9 + $0x5a4] sm:$0xf0]  ;;  %v11370_v2 = vor.u32 %v13952_v18, %v11367_v26  ;;  %v11335_v4 = vld [vmem:[%s24617_s9 + $0x3a8] sm:$0xf0] }
 0x304   :  { %v2399_v17 = vmax.f32 %v2367_v32, 0.0  ;;  %v2403_v15 = vmax.f32 %v2371_v37, 0.0  ;;  %v2379_v5 = vadd.f32 %v17586_v57, %v2337_v47  ;;  %v17665_v21 = vpop.f32.mrf.mxu0  ;;  %v11621_v57 = vld [vmem:[%s24617_s9 + $0x5c8] sm:$0xf]  ;;  %v11117_v32 = vld [vmem:[%s24617_s9 + $0x1d0] sm:$0xf]  ;;  %v11590_v37 = vor.u32 %v14012_v44, %v11589_v3 }
 0x305   :  { %v2391_v63 = vmax.f32 %v2359_v62, 0.0  ;;  %v17645_v53 = vpack.c.bf16 %v2419_v34, %v2415_v23  ;;  %v2407_v28 = vmax.f32 %v2375_v7, 0.0  ;;  %4154 = vmatmul.bf16.vlgmr.msrb.gmra.mxu2 %v17245_v30  ;;  %v11622_v40 = vor.u32 %v14020_v42, %v11621_v57  ;;  %4349 = vmatpush.bf16.msrb.mxu1 %v11370_v2  ;;  %v11525_v7 = vld [vmem:[%s24617_s9 + $0x508] sm:$0xf]  ;;  %v14031_v26 = vld [vmem:[%s24617_s9 + $0x644] sm:$0xf] }
 0x306   :  { %v17614_v48 = vpop.f32.mrf.mxu1  ;;  %4326 = vmatpush.bf16.msrb.mxu0 %v10922_v9  ;;  %v17649_v20 = vpack.c.bf16 %v2403_v15, %v2399_v17  ;;  %v2411_v33 = vmax.f32 %v2379_v5, 0.0  ;;  %4178 = vmatpush.bf16.msrb.mxu3 %v11778_v56  ;;  %v13944_v9 = vld [vmem:[%s24617_s9 + $0x38c] sm:$0xf]  ;;  %v11714_v8 = vor.u32 %v14039_v55, %v11711_v16  ;;  %v11053_v5 = vld [vmem:[%s24617_s9 + $0x150] sm:$0xf] }
 0x307   :  { %v17647_v0 = vpack.c.bf16 %v2395_v51, %v2391_v63  ;;  %4262 = vmatpush.bf16.msra.mxu2 %v11622_v40  ;;  %v11338_v34 = vor.u32 %v13944_v9, %v11335_v4  ;;  %v11118_v63 = vor.u32 %v13893_v24, %v11117_v32  ;;  %v11557_v51 = vld [vmem:[%s24617_s9 + $0x548] sm:$0xf]  ;;  %v13936_v17 = vld [vmem:[%s24617_s9 + $0x34c] sm:$0xf]  ;;  %v11679_v3 = vld [vmem:[%s24617_s9 + $0x660] sm:$0xf0] }
 0x308   :  { %24806 = vst [vmem:[#allocation10_spill] sm:$0xff] %v17649_v20  ;;  %v17683_v25 = vpack.c.bf16 %v2411_v33, %v2407_v28  ;;  %v11303_v15 = vld [vmem:[%s24617_s9 + $0x368] sm:$0xf0]  ;;  %v11558_v61 = vor.u32 %v14004_v36, %v11557_v51  ;;  %v13877_v28 = vld [vmem:[%s24617_s9 + $0x16c] sm:$0xf0]  ;;  %v11682_v44 = vor.u32 %v14031_v26, %v11679_v3 }
 0x309   :  { %4067 = vmatmul.bf16.vlgmr.msra.gmra.mxu3 %v17647_v0  ;;  %4350 = vmatpush.bf16.msrb.mxu1 %v11338_v34  ;;  %v11306_v59 = vor.u32 %v13936_v17, %v11303_v15  ;;  %v13928_v56 = vld [vmem:[%s24617_s9 + $0x30c] sm:$0xf]  ;;  %v11021_v32 = vld [vmem:[%s24617_s9 + $0x110] sm:$0xf]  ;;  %v11461_v16 = vld [vmem:[%s24617_s9 + $0x488] sm:$0xf] }
 0x30a   :  { %4327 = vmatpush.bf16.msrb.mxu0 %v10890_v29  ;;  %24807 = vst [vmem:[#allocation14_spill] sm:$0xff] %v17683_v25  ;;  %v11085_v29 = vld [vmem:[%s24617_s9 + $0x190] sm:$0xf]  ;;  %v11271_v33 = vld [vmem:[%s24617_s9 + $0x328] sm:$0xf0] }
 0x30b   :  { %4263 = vmatpush.bf16.msra.mxu2 %v11590_v37  ;;  %v11086_v47 = vor.u32 %v13885_v22, %v11085_v29  ;;  %v11274_v18 = vor.u32 %v13928_v56, %v11271_v33  ;;  %v13920_v2 = vld [vmem:[%s24617_s9 + $0x2cc] sm:$0xf]  ;;  %v13869_v37 = vld [vmem:[%s24617_s9 + $0x12c] sm:$0xf0]  ;;  %v13980_v34 = vld [vmem:[%s24617_s9 + $0x4a4] sm:$0xf0] }
 0x30c   :  { %v17727_v45 = vpop.f32.mrf.mxu0  ;;  %v11239_v4 = vld [vmem:[%s24617_s9 + $0x2e8] sm:$0xf0]  ;;  %v11022_v55 = vor.u32 %v13869_v37, %v11021_v32  ;;  %v10989_v36 = vld [vmem:[%s24617_s9 + $0xd0] sm:$0xf]  ;;  %v14023_v29 = vld [vmem:[%s24617_s9 + $0x604] sm:$0xf] }
 0x30d   :  { %4328 = vmatmul.bf16.vlgmr.msrb.gmra.mxu0 %v16619_v50  ;;  %4351 = vmatpush.bf16.msrb.mxu1 %v11306_v59  ;;  %v11242_v24 = vor.u32 %v13920_v2, %v11239_v4  ;;  %v11207_v51 = vld [vmem:[%s24617_s9 + $0x2a8] sm:$0xf0]  ;;  %v13861_v17 = vld [vmem:[%s24617_s9 + $0xec] sm:$0xf0]  ;;  %v11647_v22 = vld [vmem:[%s24617_s9 + $0x620] sm:$0xf0] }
 0x30e   :  { %v4015_v54 = vpop.f32.mrf.mxu1  ;;  %4436 = vmatpush.bf16.msra.mxu0 %v11118_v63  ;;  %v13912_v63 = vld [vmem:[%s24617_s9 + $0x28c] sm:$0xf]  ;;  %v10957_v33 = vld [vmem:[%s24617_s9 + $0x90] sm:$0xf]  ;;  %v11397_v26 = vld [vmem:[%s24617_s9 + $0x408] sm:$0xf] }
 0x30f   :  { %v17661_v49 = vadd.f32 %v4015_v54, %v17289_v39  ;;  %v11743_v39 = vld [vmem:[%s24617_s9 + $0x6e0] sm:$0xf0]  ;;  %v13996_v54 = vld [vmem:[%s24617_s9 + $0x524] sm:$0xf0]  ;;  %4264 = vmatpush.bf16.msra.mxu2 %v11558_v61  ;;  %v10990_v61 = vor.u32 %v13861_v17, %v10989_v36  ;;  %v11210_v59 = vor.u32 %v13912_v63, %v11207_v51  ;;  %v11143_v2 = vld [vmem:[%s24617_s9 + $0x228] sm:$0xf0] }
 0x310   :  { %v11746_v62 = vor.u32 %v14047_v52, %v11743_v39  ;;  %v11054_v52 = vor.u32 %v13877_v28, %v11053_v5  ;;  %v11526_v57 = vor.u32 %v13996_v54, %v11525_v7  ;;  %v11429_v7 = vld [vmem:[%s24617_s9 + $0x448] sm:$0xf]  ;;  %v13904_v5 = vld [vmem:[%s24617_s9 + $0x24c] sm:$0xf]  ;;  %v13845_v4 = vld [vmem:[%s24617_s9 + $0x6c] sm:$0xf0] }
 0x311   :  { %4246 = vmatmul.bf16.gmra.mxu1 %v16927_v14  ;;  %v13972_v54 = vld [vmem:[%s24617_s9 + $0x464] sm:$0xf0]  ;;  %v11175_v28 = vld [vmem:[%s24617_s9 + $0x268] sm:$0xf0]  ;;  %v10893_v63 = vld [vmem:[%s24617_s9 + $0x10] sm:$0xf] }
 0x312   :  { %4179 = vmatpush.bf16.msrb.mxu3 %v11746_v62  ;;  %4437 = vmatpush.bf16.msra.mxu0 %v11086_v47  ;;  %v13988_v62 = vld [vmem:[%s24617_s9 + $0x4e4] sm:$0xf0]  ;;  %v11650_v47 = vor.u32 %v14023_v29, %v11647_v22  ;;  %v13837_v51 = vld [vmem:[%s24617_s9 + $0x2c] sm:$0xf0] }
 0x313   :  { %4265 = vmatpush.bf16.msra.mxu2 %v11526_v57  ;;  %4352 = vmatpush.bf16.msrb.mxu1 %v11274_v18  ;;  %v11178_v57 = vor.u32 %v13904_v5, %v11175_v28  ;;  %v13964_v3 = vld [vmem:[%s24617_s9 + $0x424] sm:$0xf0]  ;;  %v10894_v36 = vor.u32 %v13837_v51, %v10893_v63  ;;  %v11341_v63 = vld [vmem:[%s24617_s9 + $0x390] sm:$0xf] }
 0x314   :  { %v17758_v40 = vpop.f32.mrf.mxu0  ;;  %v11845_v17 = vld [vmem:[%s24617_s9 + $0x788] sm:$0xf] }
 0x315   :  { %4159 = vmatmul.bf16.gmra.mxu2 %v17251_v11  ;;  %v11781_v5 = vld [vmem:[%s24617_s9 + $0x708] sm:$0xf] }
 0x316   :  { %v17713_v23 = vpop.f32.mrf.mxu1  ;;  %4180 = vmatpush.bf16.msrb.mxu3 %v11714_v8  ;;  %4438 = vmatpush.bf16.msra.mxu0 %v11054_v52  ;;  %v11462_v8 = vor.u32 %v13980_v34, %v11461_v16  ;;  %v13853_v52 = vld [vmem:[%s24617_s9 + $0xac] sm:$0xf0]  ;;  %v11877_v16 = vld [vmem:[%s24617_s9 + $0x7c8] sm:$0xf] }
 0x317   :  { %4353 = vmatpush.bf16.msrb.mxu1 %v11242_v24  ;;  %v10958_v18 = vor.u32 %v13853_v52, %v10957_v33  ;;  %v14084_v34 = vld [vmem:[%s24617_s9 + $0x7e4] sm:$0xf0] }
 0x318   :  { %v14060_v28 = vld [vmem:[%s24617_s9 + $0x724] sm:$0xf0] }
 0x319   :  { %4072 = vmatmul.bf16.gmra.mxu3 %v17649_v20  ;;  %v11782_v33 = vor.u32 %v14060_v28, %v11781_v5  ;;  %v4013_v5 = vadd.f32 %v17614_v48, %v17282_v43 }
 0x31a   :  { %4181 = vmatpush.bf16.msrb.mxu3 %v11682_v44  ;;  %4439 = vmatpush.bf16.msra.mxu0 %v11022_v55  ;;  %v13896_v44 = vld [vmem:[%s24617_s9 + $0x20c] sm:$0xf] }
 0x31b   :  { %4354 = vmatpush.bf16.msrb.mxu1 %v11210_v59  ;;  %v11146_v37 = vor.u32 %v13896_v44, %v11143_v2  ;;  %v11813_v59 = vld [vmem:[%s24617_s9 + $0x748] sm:$0xf]  ;;  %v11373_v2 = vld [vmem:[%s24617_s9 + $0x3d0] sm:$0xf] }
 0x31c   :  { %v17824_v56 = vpop.f32.mrf.mxu0 }
 0x31d   :  { %4333 = vmatmul.bf16.gmra.mxu0 %v16692_v60 }
 0x31e   :  { %v4020_v39 = vpop.f32.mrf.mxu1  ;;  %4182 = vmatpush.bf16.msrb.mxu3 %v11650_v47  ;;  %4440 = vmatpush.bf16.msra.mxu0 %v10990_v61  ;;  %v14068_v47 = vld [vmem:[%s24617_s9 + $0x764] sm:$0xf0] }
 0x31f   :  { %v17755_v42 = vadd.f32 %v4020_v39, %v17339_v13  ;;  %v11493_v13 = vld [vmem:[%s24617_s9 + $0x4c8] sm:$0xf]  ;;  %v11430_v39 = vor.u32 %v13972_v54, %v11429_v7  ;;  %4355 = vmatpush.bf16.msrb.mxu1 %v11178_v57  ;;  %v11814_v54 = vor.u32 %v14068_v47, %v11813_v59 }
 0x320   :  { %v11494_v9 = vor.u32 %v13988_v62, %v11493_v13  ;;  %v11398_v62 = vor.u32 %v13964_v3, %v11397_v26  ;;  %v11749_v26 = vld [vmem:[%s24617_s9 + $0x6c8] sm:$0xf] }
 0x321   :  { %4251 = vmatmul.bf16.gmra.mxu1 %v16919_v41  ;;  %v14052_v3 = vld [vmem:[%s24617_s9 + $0x6e4] sm:$0xf0] }
 0x322   :  { %4266 = vmatpush.bf16.msra.mxu2 %v11494_v9  ;;  %v10925_v9 = vld [vmem:[%s24617_s9 + $0x50] sm:$0xf]  ;;  %4441 = vmatpush.bf16.msra.mxu0 %v10958_v18  ;;  %v11717_v59 = vld [vmem:[%s24617_s9 + $0x688] sm:$0xf] }
 0x323   :  { %v10926_v24 = vor.u32 %v13845_v4, %v10925_v9  ;;  %4356 = vmatpush.bf16.msrb.mxu1 %v11146_v37  ;;  %v13957_v37 = vld [vmem:[%s24617_s9 + $0x3ec] sm:$0xf0]  ;;  %v14044_v47 = vld [vmem:[%s24617_s9 + $0x6a4] sm:$0xf0] }
 0x324   :  { %v17855_v55 = vpop.f32.mrf.mxu0 }
 0x325   :  { %4164 = vmatmul.bf16.gmra.mxu2 %v17271_v38 }
 0x326   :  { %v17804_v15 = vpop.f32.mrf.mxu1  ;;  %4267 = vmatpush.bf16.msra.mxu2 %v11462_v8  ;;  %4442 = vmatpush.bf16.msra.mxu0 %v10926_v24  ;;  %v14076_v8 = vld [vmem:[%s24617_s9 + $0x7a4] sm:$0xf0] }
 0x327   :  { %v11846_v61 = vor.u32 %v14076_v8, %v11845_v17  ;;  %v11119_v17 = vld [vmem:[%s24617_s9 + $0x1f0] sm:$0xf0] }
 0x329   :  { %4077 = vmatmul.bf16.gmra.mxu3 %v17683_v25 }
 0x32a   :  { %4268 = vmatpush.bf16.msra.mxu2 %v11430_v39  ;;  %4443 = vmatpush.bf16.msra.mxu0 %v10894_v36  ;;  %v13889_v36 = vld [vmem:[%s24617_s9 + $0x1d4] sm:$0xf] }
 0x32c   :  { %v17877_v29 = vpop.f32.mrf.mxu0 }
 0x32d   :  { %4338 = vmatmul.bf16.gmra.mxu0 %v16709_v19 }
 0x32e   :  { %v4025_v13 = vpop.f32.mrf.mxu1  ;;  %4269 = vmatpush.bf16.msra.mxu2 %v11398_v62  ;;  %v11623_v62 = vld [vmem:[%s24617_s9 + $0x5e8] sm:$0xf0] }
 0x32f   :  { %v17852_v32 = vadd.f32 %v4025_v13, %v17540_v46  ;;  %v11878_v46 = vor.u32 %v14084_v34, %v11877_v16  ;;  %v11750_v13 = vor.u32 %v14052_v3, %v11749_v26  ;;  %v11374_v16 = vor.u32 %v13957_v37, %v11373_v2  ;;  %v11309_v26 = vld [vmem:[%s24617_s9 + $0x350] sm:$0xf] }
 0x330   :  { %v13941_v3 = vld [vmem:[%s24617_s9 + $0x36c] sm:$0xf0] }
 0x331   :  { %4291 = vmatpush.bf16.msra.mxu3 %v11878_v46  ;;  %4256 = vmatmul.bf16.gmra.mxu1 %v16867_v58  ;;  %v11591_v46 = vld [vmem:[%s24617_s9 + $0x5a8] sm:$0xf0]  ;;  %v11310_v48 = vor.u32 %v13941_v3, %v11309_v26  ;;  %v13925_v3 = vld [vmem:[%s24617_s9 + $0x2ec] sm:$0xf0] }
 0x332   :  { %4465 = vmatpush.bf16.msra.mxu1 %v11374_v16  ;;  %v11527_v16 = vld [vmem:[%s24617_s9 + $0x528] sm:$0xf0] }
 0x334   :  { %v17881_v22 = vpop.f32.mrf.mxu0 }
 0x335   :  { %4292 = vmatpush.bf16.msra.mxu3 %v11846_v61  ;;  %4169 = vmatmul.bf16.gmra.mxu2 %v17238_v6  ;;  %v11122_v61 = vor.u32 %v13889_v36, %v11119_v17 }
 0x336   :  { %v17890_v7 = vpop.f32.mrf.mxu1 }
 0x337   :  { %4552 = vmatpush.bf16.msrb.mxu0 %v11122_v61  ;;  %v14036_v61 = vld [vmem:[%s24617_s9 + $0x664] sm:$0xf0] }
 0x339   :  { %4082 = vmatmul.bf16.gmra.mxu3 %v17645_v53 }
 0x33a   :  { %4293 = vmatpush.bf16.msra.mxu3 %v11814_v54  ;;  %v14000_v54 = vld [vmem:[%s24617_s9 + $0x54c] sm:$0xf] }
 0x33c   :  { %v17899_v52 = vpop.f32.mrf.mxu0 }
 0x33d   :  { %4343 = vmatmul.bf16.gmra.mxu0 %v16616_v1 }
 0x33e   :  { %4294 = vmatpush.bf16.msra.mxu3 %v11782_v33  ;;  %v4126_v39 = vpop.f32.mrf.mxu1  ;;  %v11718_v33 = vor.u32 %v14044_v47, %v11717_v59 }
 0x33f   :  { %v17902_v57 = vadd.f32 %v4126_v39, %v17665_v21  ;;  %v14016_v21 = vld [vmem:[%s24617_s9 + $0x5cc] sm:$0xf] }
 0x340   :  { %v11626_v4 = vor.u32 %v14016_v21, %v11623_v62  ;;  %v11559_v39 = vld [vmem:[%s24617_s9 + $0x568] sm:$0xf0]  ;;  %v13881_v21 = vld [vmem:[%s24617_s9 + $0x194] sm:$0xf] }
 0x341   :  { %4357 = vmatmul.bf16.vlgmr.msrb.gmra.mxu1 %v16869_v10  ;;  %v11562_v43 = vor.u32 %v14000_v54, %v11559_v39  ;;  %v11087_v62 = vld [vmem:[%s24617_s9 + $0x1b0] sm:$0xf0]  ;;  %v13984_v54 = vld [vmem:[%s24617_s9 + $0x4cc] sm:$0xf] }
 0x342   :  { %4295 = vmatpush.bf16.msra.mxu3 %v11750_v13  ;;  %4378 = vmatpush.bf16.msrb.mxu2 %v11626_v4  ;;  %v11090_v4 = vor.u32 %v13881_v21, %v11087_v62 }
 0x344   :  { %v17906_v18 = vpop.f32.mrf.mxu0  ;;  %4553 = vmatpush.bf16.msrb.mxu0 %v11090_v4  ;;  %v11463_v4 = vld [vmem:[%s24617_s9 + $0x4a8] sm:$0xf0] }
 0x345   :  { %4270 = vmatmul.bf16.vlgmr.msra.gmra.mxu2 %v17245_v30 }
 0x346   :  { %v4128_v24 = vpop.f32.mrf.mxu1  ;;  %4296 = vmatpush.bf16.msra.mxu3 %v11718_v33  ;;  %v11245_v33 = vld [vmem:[%s24617_s9 + $0x2d0] sm:$0xf] }
 0x347   :  { %v17932_v34 = vadd.f32 %v4128_v24, %v17727_v45  ;;  %v13949_v45 = vld [vmem:[%s24617_s9 + $0x3ac] sm:$0xf0]  ;;  %v13992_v24 = vld [vmem:[%s24617_s9 + $0x50c] sm:$0xf] }
 0x348   :  { %v4039_v44 = vpop.f32.mrf.mxu2  ;;  %v11342_v8 = vor.u32 %v13949_v45, %v11341_v63  ;;  %v13873_v63 = vld [vmem:[%s24617_s9 + $0x154] sm:$0xf] }
 0x349   :  { %4183 = vmatmul.bf16.vlgmr.msrb.gmra.mxu3 %v17647_v0  ;;  %v17925_v9 = vadd.f32 %v4039_v44, %v17510_v35  ;;  %v14008_v35 = vld [vmem:[%s24617_s9 + $0x58c] sm:$0xf] }
 0x34a   :  { %v11594_v51 = vor.u32 %v14008_v35, %v11591_v46  ;;  %4466 = vmatpush.bf16.msra.mxu1 %v11342_v8  ;;  %v11277_v35 = vld [vmem:[%s24617_s9 + $0x310] sm:$0xf]  ;;  %v11530_v46 = vor.u32 %v13992_v24, %v11527_v16  ;;  %v11685_v8 = vld [vmem:[%s24617_s9 + $0x648] sm:$0xf] }
 0x34b   :  { %v11686_v47 = vor.u32 %v14036_v61, %v11685_v8  ;;  %v11213_v24 = vld [vmem:[%s24617_s9 + $0x290] sm:$0xf]  ;;  %v4018_v8 = vadd.f32 %v17713_v23, %v17294_v31  ;;  %v13849_v23 = vld [vmem:[%s24617_s9 + $0x94] sm:$0xf] }
 0x34c   :  { %v17963_v28 = vpop.f32.mrf.mxu0  ;;  %4379 = vmatpush.bf16.msrb.mxu2 %v11594_v51  ;;  %v11055_v51 = vld [vmem:[%s24617_s9 + $0x170] sm:$0xf0] }
 0x34d   :  { %4444 = vmatmul.bf16.vlgmr.msra.gmra.mxu0 %v16619_v50  ;;  %v11058_v36 = vor.u32 %v13873_v63, %v11055_v51  ;;  %4297 = vmatpush.bf16.msra.mxu3 %v11686_v47  ;;  %v11653_v51 = vld [vmem:[%s24617_s9 + $0x608] sm:$0xf]  ;;  %v11431_v47 = vld [vmem:[%s24617_s9 + $0x468] sm:$0xf0] }
 0x34e   :  { %v4131_v2 = vpop.f32.mrf.mxu1  ;;  %4467 = vmatpush.bf16.msra.mxu1 %v11310_v48  ;;  %v13865_v48 = vld [vmem:[%s24617_s9 + $0x114] sm:$0xf] }
 0x34f   :  { %v17983_v37 = vadd.f32 %v4131_v2, %v17758_v40  ;;  %v13933_v40 = vld [vmem:[%s24617_s9 + $0x32c] sm:$0xf0]  ;;  %4554 = vmatpush.bf16.msrb.mxu0 %v11058_v36  ;;  %v13976_v2 = vld [vmem:[%s24617_s9 + $0x48c] sm:$0xf] }
 0x350   :  { %v4041_v44 = vpop.f32.mrf.mxu2  ;;  %4380 = vmatpush.bf16.msrb.mxu2 %v11562_v43  ;;  %v11278_v45 = vor.u32 %v13933_v40, %v11277_v35  ;;  %v11246_v43 = vor.u32 %v13925_v3, %v11245_v33  ;;  %v11466_v16 = vor.u32 %v13976_v2, %v11463_v4  ;;  %v13857_v35 = vld [vmem:[%s24617_s9 + $0xd4] sm:$0xf]  ;;  %v13968_v36 = vld [vmem:[%s24617_s9 + $0x44c] sm:$0xf]  ;;  %v11149_v4 = vld [vmem:[%s24617_s9 + $0x210] sm:$0xf] }
 0x351   :  { %v17974_v13 = vadd.f32 %v4041_v44, %v4013_v5  ;;  %4362 = vmatmul.bf16.gmra.mxu1 %v16927_v14  ;;  %v11495_v5 = vld [vmem:[%s24617_s9 + $0x4e8] sm:$0xf0] }
 0x352   :  { %4468 = vmatpush.bf16.msra.mxu1 %v11278_v45  ;;  %v11498_v26 = vor.u32 %v13984_v54, %v11495_v5  ;;  %v14028_v45 = vld [vmem:[%s24617_s9 + $0x624] sm:$0xf0]  ;;  %v11181_v54 = vld [vmem:[%s24617_s9 + $0x250] sm:$0xf]  ;;  %v11399_v2 = vld [vmem:[%s24617_s9 + $0x428] sm:$0xf0] }
 0x353   :  { %v13909_v5 = vld [vmem:[%s24617_s9 + $0x26c] sm:$0xf0] }
 0x354   :  { %v18005_v17 = vpop.f32.mrf.mxu0  ;;  %4381 = vmatpush.bf16.msrb.mxu2 %v11530_v46  ;;  %v10991_v46 = vld [vmem:[%s24617_s9 + $0xf0] sm:$0xf0]  ;;  %v11182_v31 = vor.u32 %v13909_v5, %v11181_v54 }
 0x355   :  { %4275 = vmatmul.bf16.gmra.mxu2 %v17251_v11  ;;  %v10994_v63 = vor.u32 %v13857_v35, %v10991_v46  ;;  %v10927_v35 = vld [vmem:[%s24617_s9 + $0x70] sm:$0xf0] }
 0x356   :  { %v4133_v44 = vpop.f32.mrf.mxu1  ;;  %4469 = vmatpush.bf16.msra.mxu1 %v11246_v43  ;;  %v10895_v54 = vld [vmem:[%s24617_s9 + $0x30] sm:$0xf0] }
 0x357   :  { %v18037_v21 = vadd.f32 %v4133_v44, %v17824_v56  ;;  %v13917_v56 = vld [vmem:[%s24617_s9 + $0x2ac] sm:$0xf0]  ;;  %v10959_v44 = vld [vmem:[%s24617_s9 + $0xb0] sm:$0xf0] }
 0x358   :  { %v4044_v59 = vpop.f32.mrf.mxu2  ;;  %4382 = vmatpush.bf16.msrb.mxu2 %v11498_v26  ;;  %v11214_v40 = vor.u32 %v13917_v56, %v11213_v24  ;;  %v11434_v26 = vor.u32 %v13968_v36, %v11431_v47  ;;  %v13841_v56 = vld [vmem:[%s24617_s9 + $0x54] sm:$0xf] }
 0x359   :  { %4188 = vmatmul.bf16.gmra.mxu3 %v17649_v20  ;;  %v18024_v39 = vadd.f32 %v4044_v59, %v17661_v49  ;;  %v11023_v49 = vld [vmem:[%s24617_s9 + $0x130] sm:$0xf0]  ;;  %v11654_v59 = vor.u32 %v14028_v45, %v11653_v51  ;;  %v14080_v51 = vld [vmem:[%s24617_s9 + $0x7cc] sm:$0xf] }
 0x35a   :  { %v11026_v62 = vor.u32 %v13865_v48, %v11023_v49  ;;  %4470 = vmatpush.bf16.msra.mxu1 %v11214_v40  ;;  %v10962_v48 = vor.u32 %v13849_v23, %v10959_v44  ;;  %v11879_v45 = vld [vmem:[%s24617_s9 + $0x7e8] sm:$0xf0]  ;;  %v13833_v47 = vld [vmem:[%s24617_s9 + $0x14] sm:$0xf] }
 0x35b   :  { %4298 = vmatpush.bf16.msra.mxu3 %v11654_v59 }
 0x35c   :  { %4555 = vmatpush.bf16.msrb.mxu0 %v11026_v62  ;;  %v18068_v61 = vpop.f32.mrf.mxu0  ;;  %4383 = vmatpush.bf16.msrb.mxu2 %v11466_v16  ;;  %v13960_v62 = vld [vmem:[%s24617_s9 + $0x40c] sm:$0xf]  ;;  %v13901_v16 = vld [vmem:[%s24617_s9 + $0x22c] sm:$0xf0] }
 0x35d   :  { %4449 = vmatmul.bf16.gmra.mxu0 %v16692_v60  ;;  %v11402_v24 = vor.u32 %v13960_v62, %v11399_v2  ;;  %v11150_v40 = vor.u32 %v13901_v16, %v11149_v4 }
 0x35e   :  { %v4136_v43 = vpop.f32.mrf.mxu1  ;;  %4471 = vmatpush.bf16.msra.mxu1 %v11182_v31  ;;  %v4023_v31 = vadd.f32 %v17804_v15, %v17410_v12  ;;  %v14064_v12 = vld [vmem:[%s24617_s9 + $0x74c] sm:$0xf] }
 0x35f   :  { %v18088_v49 = vadd.f32 %v4136_v43, %v17855_v55  ;;  %v11815_v15 = vld [vmem:[%s24617_s9 + $0x768] sm:$0xf0] }
 0x360   :  { %v4046_v33 = vpop.f32.mrf.mxu2  ;;  %4556 = vmatpush.bf16.msrb.mxu0 %v10994_v63  ;;  %4384 = vmatpush.bf16.msrb.mxu2 %v11434_v26  ;;  %v10930_v63 = vor.u32 %v13841_v56, %v10927_v35  ;;  %v11847_v26 = vld [vmem:[%s24617_s9 + $0x7a8] sm:$0xf0]  ;;  %v11818_v4 = vor.u32 %v14064_v12, %v11815_v15 }
 0x361   :  { %v18079_v3 = vadd.f32 %v4046_v33, %v4018_v8  ;;  %4367 = vmatmul.bf16.gmra.mxu1 %v16919_v41  ;;  %v11882_v8 = vor.u32 %v14080_v51, %v11879_v45  ;;  %v14072_v33 = vld [vmem:[%s24617_s9 + $0x78c] sm:$0xf] }
 0x362   :  { %4472 = vmatpush.bf16.msra.mxu1 %v11150_v40  ;;  %v11850_v44 = vor.u32 %v14072_v33, %v11847_v26  ;;  %v14056_v35 = vld [vmem:[%s24617_s9 + $0x70c] sm:$0xf]  ;;  %v14021_v33 = vld [vmem:[%s24617_s9 + $0x5ec] sm:$0xf0]  ;;  %v13953_v26 = vld [vmem:[%s24617_s9 + $0x3d4] sm:$0xf] }
 0x363   :  { %4407 = vmatpush.bf16.msrb.mxu3 %v11882_v8 }
 0x364   :  { %4557 = vmatpush.bf16.msrb.mxu0 %v10962_v48  ;;  %v18101_v55 = vpop.f32.mrf.mxu0  ;;  %4385 = vmatpush.bf16.msrb.mxu2 %v11402_v24 }
 0x365   :  { %4280 = vmatmul.bf16.gmra.mxu2 %v17271_v38 }
 0x366   :  { %v4138_v59 = vpop.f32.mrf.mxu1 }
 0x367   :  { %v18130_v5 = vadd.f32 %v4138_v59, %v17877_v29  ;;  %4408 = vmatpush.bf16.msrb.mxu3 %v11850_v44  ;;  %v11375_v44 = vld [vmem:[%s24617_s9 + $0x3f0] sm:$0xf0] }
 0x368   :  { %v4049_v46 = vpop.f32.mrf.mxu2  ;;  %4558 = vmatpush.bf16.msrb.mxu0 %v10930_v63 }
 0x369   :  { %4193 = vmatmul.bf16.gmra.mxu3 %v17683_v25  ;;  %v18120_v36 = vadd.f32 %v4049_v46, %v17755_v42  ;;  %v10898_v42 = vor.u32 %v13833_v47, %v10895_v54  ;;  %v11783_v46 = vld [vmem:[%s24617_s9 + $0x728] sm:$0xf0] }
 0x36a   :  { %v11786_v63 = vor.u32 %v14056_v35, %v11783_v46  ;;  %v14048_v54 = vld [vmem:[%s24617_s9 + $0x6cc] sm:$0xf] }
 0x36b   :  { %4409 = vmatpush.bf16.msrb.mxu3 %v11818_v4  ;;  %v11597_v4 = vld [vmem:[%s24617_s9 + $0x590] sm:$0xf] }
 0x36c   :  { %v18140_v23 = vpop.f32.mrf.mxu0  ;;  %4559 = vmatpush.bf16.msrb.mxu0 %v10898_v42  ;;  %v11629_v42 = vld [vmem:[%s24617_s9 + $0x5d0] sm:$0xf] }
 0x36d   :  { %4454 = vmatmul.bf16.gmra.mxu0 %v16709_v19 }
 0x36e   :  { %v4141_v29 = vpop.f32.mrf.mxu1 }
 0x36f   :  { %v18145_v62 = vadd.f32 %v4141_v29, %v17881_v22  ;;  %4410 = vmatpush.bf16.msrb.mxu3 %v11786_v63  ;;  %v11125_v63 = vld [vmem:[%s24617_s9 + $0x1d8] sm:$0xf] }
 0x370   :  { %v4051_v43 = vpop.f32.mrf.mxu2 }
 0x371   :  { %v18142_v48 = vadd.f32 %v4051_v43, %v4023_v31  ;;  %4372 = vmatmul.bf16.gmra.mxu1 %v16867_v58  ;;  %v11630_v31 = vor.u32 %v14021_v33, %v11629_v42  ;;  %v11378_v43 = vor.u32 %v13953_v26, %v11375_v44  ;;  %v14005_v33 = vld [vmem:[%s24617_s9 + $0x56c] sm:$0xf0]  ;;  %v13937_v26 = vld [vmem:[%s24617_s9 + $0x354] sm:$0xf] }
 0x373   :  { %4494 = vmatpush.bf16.msra.mxu2 %v11630_v31  ;;  %4581 = vmatpush.bf16.msrb.mxu1 %v11378_v43  ;;  %v11311_v31 = vld [vmem:[%s24617_s9 + $0x370] sm:$0xf0] }
 0x374   :  { %v18149_v2 = vpop.f32.mrf.mxu0 }
 0x375   :  { %4285 = vmatmul.bf16.gmra.mxu2 %v17238_v6 }
 0x376   :  { %v4143_v16 = vpop.f32.mrf.mxu1 }
 0x377   :  { %v18163_v56 = vadd.f32 %v4143_v16, %v17899_v52  ;;  %v13945_v16 = vld [vmem:[%s24617_s9 + $0x394] sm:$0xf] }
 0x378   :  { %v4054_v24 = vpop.f32.mrf.mxu2 }
 0x379   :  { %4198 = vmatmul.bf16.gmra.mxu3 %v17645_v53  ;;  %v18159_v22 = vadd.f32 %v4054_v24, %v17852_v32  ;;  %v4028_v32 = vadd.f32 %v17890_v7, %v17622_v27  ;;  %v11751_v27 = vld [vmem:[%s24617_s9 + $0x6e8] sm:$0xf0]  ;;  %v14013_v24 = vld [vmem:[%s24617_s9 + $0x5ac] sm:$0xf0] }
 0x37a   :  { %v11598_v46 = vor.u32 %v14013_v24, %v11597_v4  ;;  %v11314_v24 = vor.u32 %v13937_v26, %v11311_v31 }
 0x37c   :  { %v18171_v40 = vpop.f32.mrf.mxu0  ;;  %4495 = vmatpush.bf16.msra.mxu2 %v11598_v46  ;;  %v13886_v46 = vld [vmem:[%s24617_s9 + $0x1b4] sm:$0xf0] }
 0x37d   :  { %4459 = vmatmul.bf16.gmra.mxu0 %v16616_v1 }
 0x37e   :  { %v4242_v52 = vpop.f32.mrf.mxu1 }
 0x37f   :  { %v18179_v8 = vadd.f32 %v4242_v52, %v17906_v18  ;;  %v11754_v18 = vor.u32 %v14048_v54, %v11751_v27  ;;  %v14040_v54 = vld [vmem:[%s24617_s9 + $0x68c] sm:$0xf] }
 0x380   :  { %v4056_v51 = vpop.f32.mrf.mxu2  ;;  %v11719_v27 = vld [vmem:[%s24617_s9 + $0x6a8] sm:$0xf0] }
 0x381   :  { %v18175_v45 = vadd.f32 %v4056_v51, %v4028_v32  ;;  %4473 = vmatmul.bf16.vlgmr.msra.gmra.mxu1 %v16869_v10  ;;  %4411 = vmatpush.bf16.msrb.mxu3 %v11754_v18  ;;  %v13894_v32 = vld [vmem:[%s24617_s9 + $0x1f4] sm:$0xf0]  ;;  %v11565_v18 = vld [vmem:[%s24617_s9 + $0x550] sm:$0xf] }
 0x385   :  { %4386 = vmatmul.bf16.vlgmr.msrb.gmra.mxu2 %v17245_v30 }
 0x386   :  { %v4244_v12 = vpop.f32.mrf.mxu1 }
 0x387   :  { %v18211_v15 = vadd.f32 %v4244_v12, %v17963_v28  ;;  %v11343_v28 = vld [vmem:[%s24617_s9 + $0x3b0] sm:$0xf0]  ;;  %v11566_v12 = vor.u32 %v14005_v33, %v11565_v18 }
 0x388   :  { %v11346_v52 = vor.u32 %v13945_v16, %v11343_v28  ;;  %v11279_v18 = vld [vmem:[%s24617_s9 + $0x330] sm:$0xf0] }
 0x389   :  { %4299 = vmatmul.bf16.vlgmr.msra.gmra.mxu3 %v17647_v0  ;;  %4496 = vmatpush.bf16.msra.mxu2 %v11566_v12  ;;  %v11501_v12 = vld [vmem:[%s24617_s9 + $0x4d0] sm:$0xf] }
 0x38a   :  { %v18182_v47 = vpop.f32.mrf.mxu0  ;;  %4582 = vmatpush.bf16.msrb.mxu1 %v11346_v52  ;;  %v13997_v52 = vld [vmem:[%s24617_s9 + $0x52c] sm:$0xf0] }
 0x38c   :  { %v4068_v59 = vpop.f32.mrf.mxu3 }
 0x38d   :  { %v18192_v7 = vadd.f32 %v4068_v59, %v17925_v9  ;;  %v4155_v9 = vpop.f32.mrf.mxu2  ;;  %4560 = vmatmul.bf16.vlgmr.msrb.gmra.mxu0 %v16619_v50  ;;  %v11126_v59 = vor.u32 %v13894_v32, %v11125_v63 }
 0x38e   :  { %v18208_v29 = vadd.f32 %v4155_v9, %v17902_v57  ;;  %v4247_v28 = vpop.f32.mrf.mxu1  ;;  %4583 = vmatpush.bf16.msrb.mxu1 %v11314_v24 }
 0x38f   :  { %v5012_v42 = vmul.f32 %v18192_v7, %v18192_v7  ;;  %4668 = vmatpush.bf16.msra.mxu0 %v11126_v59  ;;  %v18271_v32 = vadd.f32 %v4247_v28, %v18005_v17  ;;  %v13929_v59 = vld [vmem:[%s24617_s9 + $0x314] sm:$0xf] }
 0x390   :  { %v11282_v26 = vor.u32 %v13929_v59, %v11279_v18  ;;  %v11029_v18 = vld [vmem:[%s24617_s9 + $0x118] sm:$0xf] }
 0x391   :  { %4478 = vmatmul.bf16.gmra.mxu1 %v16927_v14 }
 0x392   :  { %v18222_v35 = vpop.f32.mrf.mxu0  ;;  %4584 = vmatpush.bf16.msrb.mxu1 %v11282_v26 }
 0x394   :  { %v4070_v57 = vpop.f32.mrf.mxu3 }
 0x395   :  { %v18234_v51 = vadd.f32 %v4070_v57, %v17974_v13  ;;  %v11722_v13 = vor.u32 %v14040_v54, %v11719_v27  ;;  %v4157_v43 = vpop.f32.mrf.mxu2  ;;  %v11093_v57 = vld [vmem:[%s24617_s9 + $0x198] sm:$0xf]  ;;  %4391 = vmatmul.bf16.gmra.mxu2 %v17251_v11 }
 0x396   :  { %v18261_v4 = vadd.f32 %v4157_v43, %v17932_v34  ;;  %v11094_v63 = vor.u32 %v13886_v46, %v11093_v57  ;;  %v11533_v34 = vld [vmem:[%s24617_s9 + $0x510] sm:$0xf]  ;;  %v11687_v43 = vld [vmem:[%s24617_s9 + $0x668] sm:$0xf0]  ;;  %v13921_v57 = vld [vmem:[%s24617_s9 + $0x2d4] sm:$0xf] }
 0x397   :  { %v4900_v44 = vadd.f32 %v18234_v51, %v18192_v7  ;;  %v5020_v9 = vmul.f32 %v18234_v51, %v18234_v51  ;;  %4412 = vmatpush.bf16.msrb.mxu3 %v11722_v13  ;;  %v11534_v17 = vor.u32 %v13997_v52, %v11533_v34  ;;  %v13878_v13 = vld [vmem:[%s24617_s9 + $0x174] sm:$0xf0]  ;;  %v11247_v46 = vld [vmem:[%s24617_s9 + $0x2f0] sm:$0xf0] }
 0x398   :  { %4669 = vmatpush.bf16.msra.mxu0 %v11094_v63 }
 0x399   :  { %v5076_v16 = vadd.f32 %v5020_v9, %v5012_v42  ;;  %4304 = vmatmul.bf16.gmra.mxu3 %v17649_v20  ;;  %v11061_v42 = vld [vmem:[%s24617_s9 + $0x158] sm:$0xf]  ;;  %v14032_v9 = vld [vmem:[%s24617_s9 + $0x64c] sm:$0xf]  ;;  %4497 = vmatpush.bf16.msra.mxu2 %v11534_v17 }
 0x39a   :  { %v18283_v27 = vpop.f32.mrf.mxu0  ;;  %v11062_v31 = vor.u32 %v13878_v13, %v11061_v42  ;;  %v11690_v24 = vor.u32 %v14032_v9, %v11687_v43  ;;  %v4249_v42 = vpop.f32.mrf.mxu1 }
 0x39b   :  { %v18330_v26 = vadd.f32 %v4249_v42, %v18068_v61  ;;  %v11215_v61 = vld [vmem:[%s24617_s9 + $0x2b0] sm:$0xf0] }
 0x39c   :  { %v4073_v54 = vpop.f32.mrf.mxu3  ;;  %4670 = vmatpush.bf16.msra.mxu0 %v11062_v31  ;;  %4413 = vmatpush.bf16.msrb.mxu3 %v11690_v24  ;;  %v13913_v31 = vld [vmem:[%s24617_s9 + $0x294] sm:$0xf]  ;;  %v10997_v24 = vld [vmem:[%s24617_s9 + $0xd8] sm:$0xf] }
 0x39d   :  { %v18296_v33 = vadd.f32 %v4073_v54, %v18024_v39  ;;  %v13989_v39 = vld [vmem:[%s24617_s9 + $0x4ec] sm:$0xf0]  ;;  %v4160_v34 = vpop.f32.mrf.mxu2  ;;  %4565 = vmatmul.bf16.gmra.mxu0 %v16692_v60  ;;  %v11250_v54 = vor.u32 %v13921_v57, %v11247_v46  ;;  %v11218_v46 = vor.u32 %v13913_v31, %v11215_v61  ;;  %v11183_v42 = vld [vmem:[%s24617_s9 + $0x270] sm:$0xf0] }
 0x39e   :  { %v11502_v52 = vor.u32 %v13989_v39, %v11501_v12  ;;  %v18321_v59 = vadd.f32 %v4160_v34, %v17983_v37  ;;  %v11469_v37 = vld [vmem:[%s24617_s9 + $0x490] sm:$0xf]  ;;  %v13862_v39 = vld [vmem:[%s24617_s9 + $0xf4] sm:$0xf0]  ;;  %v14024_v34 = vld [vmem:[%s24617_s9 + $0x60c] sm:$0xf] }
 0x39f   :  { %v4901_v28 = vadd.f32 %v4900_v44, %v18296_v33  ;;  %v5028_v63 = vmul.f32 %v18296_v33, %v18296_v33  ;;  %v13870_v44 = vld [vmem:[%s24617_s9 + $0x134] sm:$0xf0]  ;;  %4585 = vmatpush.bf16.msrb.mxu1 %v11250_v54  ;;  %v11437_v54 = vld [vmem:[%s24617_s9 + $0x450] sm:$0xf] }
 0x3a0   :  { %4498 = vmatpush.bf16.msra.mxu2 %v11502_v52  ;;  %v11030_v13 = vor.u32 %v13870_v44, %v11029_v18  ;;  %v11655_v52 = vld [vmem:[%s24617_s9 + $0x628] sm:$0xf0]  ;;  %v13905_v44 = vld [vmem:[%s24617_s9 + $0x254] sm:$0xf] }
 0x3a1   :  { %v5077_v17 = vadd.f32 %v5076_v16, %v5028_v63  ;;  %v13981_v16 = vld [vmem:[%s24617_s9 + $0x4ac] sm:$0xf0]  ;;  %v10998_v63 = vor.u32 %v13862_v39, %v10997_v24  ;;  %v11658_v18 = vor.u32 %v14024_v34, %v11655_v52  ;;  %4483 = vmatmul.bf16.gmra.mxu1 %v16919_v41 }
 0x3a2   :  { %v18341_v43 = vpop.f32.mrf.mxu0  ;;  %4671 = vmatpush.bf16.msra.mxu0 %v11030_v13  ;;  %v11470_v12 = vor.u32 %v13981_v16, %v11469_v37  ;;  %v4252_v24 = vpop.f32.mrf.mxu1 }
 0x3a3   :  { %4586 = vmatpush.bf16.msrb.mxu1 %v11218_v46  ;;  %4414 = vmatpush.bf16.msrb.mxu3 %v11658_v18  ;;  %v18381_v39 = vadd.f32 %v4252_v24, %v18101_v55 }
 0x3a4   :  { %v4075_v9 = vpop.f32.mrf.mxu3  ;;  %4499 = vmatpush.bf16.msra.mxu2 %v11470_v12 }
 0x3a5   :  { %v18353_v57 = vadd.f32 %v4075_v9, %v18079_v3  ;;  %v13973_v3 = vld [vmem:[%s24617_s9 + $0x46c] sm:$0xf0]  ;;  %v4162_v16 = vpop.f32.mrf.mxu2  ;;  %v11186_v9 = vor.u32 %v13905_v44, %v11183_v42  ;;  %4396 = vmatmul.bf16.gmra.mxu2 %v17271_v38 }
 0x3a6   :  { %v11438_v31 = vor.u32 %v13973_v3, %v11437_v54  ;;  %v18377_v12 = vadd.f32 %v4162_v16, %v18037_v21  ;;  %4672 = vmatpush.bf16.msra.mxu0 %v10998_v63 }
 0x3a7   :  { %v4902_v13 = vadd.f32 %v4901_v28, %v18353_v57  ;;  %v5036_v37 = vmul.f32 %v18353_v57, %v18353_v57  ;;  %4587 = vmatpush.bf16.msrb.mxu1 %v11186_v9 }
 0x3a8   :  { %4500 = vmatpush.bf16.msra.mxu2 %v11438_v31 }
 0x3a9   :  { %v5078_v61 = vadd.f32 %v5077_v17, %v5036_v37  ;;  %4309 = vmatmul.bf16.gmra.mxu3 %v17683_v25 }
 0x3aa   :  { %v18384_v46 = vpop.f32.mrf.mxu0  ;;  %v4254_v54 = vpop.f32.mrf.mxu1 }
 0x3ab   :  { %v18398_v18 = vadd.f32 %v4254_v54, %v18140_v23 }
 0x3ac   :  { %v4078_v28 = vpop.f32.mrf.mxu3 }
 0x3ad   :  { %v18388_v21 = vadd.f32 %v4078_v28, %v18120_v36  ;;  %v4165_v34 = vpop.f32.mrf.mxu2  ;;  %4570 = vmatmul.bf16.gmra.mxu0 %v16709_v19 }
 0x3ae   :  { %v18395_v55 = vadd.f32 %v4165_v34, %v18088_v49 }
 0x3af   :  { %v4903_v17 = vadd.f32 %v4902_v13, %v18388_v21  ;;  %v5044_v63 = vmul.f32 %v18388_v21, %v18388_v21 }
 0x3b1   :  { %v5079_v52 = vadd.f32 %v5078_v61, %v5044_v63  ;;  %4488 = vmatmul.bf16.gmra.mxu1 %v16867_v58  ;;  %v10965_v63 = vld [vmem:[%s24617_s9 + $0x98] sm:$0xf] }
 0x3b2   :  { %v18400_v44 = vpop.f32.mrf.mxu0  ;;  %v4257_v23 = vpop.f32.mrf.mxu1 }
 0x3b3   :  { %v18413_v31 = vadd.f32 %v4257_v23, %v18149_v2 }
 0x3b4   :  { %v4080_v3 = vpop.f32.mrf.mxu3 }
 0x3b5   :  { %v18403_v36 = vadd.f32 %v4080_v3, %v18142_v48  ;;  %v4167_v37 = vpop.f32.mrf.mxu2  ;;  %4401 = vmatmul.bf16.gmra.mxu2 %v17238_v6  ;;  %v11405_v3 = vld [vmem:[%s24617_s9 + $0x410] sm:$0xf] }
 0x3b6   :  { %v18409_v49 = vadd.f32 %v4167_v37, %v18130_v5 }
 0x3b7   :  { %v4904_v42 = vadd.f32 %v4903_v17, %v18403_v36  ;;  %v5052_v13 = vmul.f32 %v18403_v36, %v18403_v36 }
 0x3b9   :  { %v5080_v16 = vadd.f32 %v5079_v52, %v5052_v13  ;;  %4314 = vmatmul.bf16.gmra.mxu3 %v17645_v53 }
 0x3ba   :  { %v18416_v9 = vpop.f32.mrf.mxu0  ;;  %v4259_v34 = vpop.f32.mrf.mxu1 }
 0x3bb   :  { %v18436_v54 = vadd.f32 %v4259_v34, %v18171_v40  ;;  %v11151_v40 = vld [vmem:[%s24617_s9 + $0x230] sm:$0xf0] }
 0x3bc   :  { %v4083_v48 = vpop.f32.mrf.mxu3 }
 0x3bd   :  { %v18420_v61 = vadd.f32 %v4083_v48, %v18159_v22  ;;  %v4170_v28 = vpop.f32.mrf.mxu2  ;;  %4575 = vmatmul.bf16.gmra.mxu0 %v16616_v1  ;;  %v13854_v22 = vld [vmem:[%s24617_s9 + $0xb4] sm:$0xf0] }
 0x3be   :  { %v18427_v2 = vadd.f32 %v4170_v28, %v18145_v62  ;;  %v10966_v52 = vor.u32 %v13854_v22, %v10965_v63  ;;  %v13965_v62 = vld [vmem:[%s24617_s9 + $0x42c] sm:$0xf0]  ;;  %v13846_v28 = vld [vmem:[%s24617_s9 + $0x74] sm:$0xf0] }
 0x3bf   :  { %v4905_v5 = vadd.f32 %v4904_v42, %v18420_v61  ;;  %v5060_v24 = vmul.f32 %v18420_v61, %v18420_v61  ;;  %v13897_v42 = vld [vmem:[%s24617_s9 + $0x214] sm:$0xf] }
 0x3c0   :  { %4673 = vmatpush.bf16.msra.mxu0 %v10966_v52  ;;  %v11154_v48 = vor.u32 %v13897_v42, %v11151_v40  ;;  %v10901_v42 = vld [vmem:[%s24617_s9 + $0x18] sm:$0xf] }
 0x3c1   :  { %v5081_v17 = vadd.f32 %v5080_v16, %v5060_v24  ;;  %v11406_v16 = vor.u32 %v13965_v62, %v11405_v3  ;;  %v10933_v24 = vld [vmem:[%s24617_s9 + $0x58] sm:$0xf] }
 0x3c2   :  { %v18447_v37 = vpop.f32.mrf.mxu0  ;;  %v10934_v63 = vor.u32 %v13846_v28, %v10933_v24  ;;  %4588 = vmatpush.bf16.msrb.mxu1 %v11154_v48 }
 0x3c3   :  { %4501 = vmatpush.bf16.msra.mxu2 %v11406_v16 }
 0x3c4   :  { %v4085_v13 = vpop.f32.mrf.mxu3  ;;  %4674 = vmatpush.bf16.msra.mxu0 %v10934_v63 }
 0x3c5   :  { %v18453_v23 = vadd.f32 %v4085_v13, %v18175_v45  ;;  %v4172_v52 = vpop.f32.mrf.mxu2  ;;  %v4358_v13 = vpop.f32.mrf.mxu1  ;;  %4589 = vmatmul.bf16.vlgmr.msrb.gmra.mxu1 %v16869_v10 }
 0x3c6   :  { %v18465_v45 = vadd.f32 %v4172_v52, %v18163_v56  ;;  %v18475_v56 = vadd.f32 %v4358_v13, %v18182_v47  ;;  %4502 = vmatmul.bf16.vlgmr.msra.gmra.mxu2 %v17245_v30 }
 0x3c7   :  { %v4906_v22 = vadd.f32 %v4905_v5, %v18453_v23  ;;  %v5068_v34 = vmul.f32 %v18453_v23, %v18453_v23  ;;  %v13838_v5 = vld [vmem:[%s24617_s9 + $0x34] sm:$0xf0] }
 0x3c8   :  { %v10902_v16 = vor.u32 %v13838_v5, %v10901_v42  ;;  %24808 = vst [vmem:[#allocation11_spill] sm:$0xff] %v18475_v56 }
 0x3c9   :  { %v4907_v3 = vrot.slane %v4906_v22, 4  ;;  %v5082_v62 = vadd.f32 %v5081_v17, %v5068_v34  ;;  %4415 = vmatmul.bf16.vlgmr.msrb.gmra.mxu3 %v17647_v0 }
 0x3ca   :  { %v18478_v24 = vpop.f32.mrf.mxu0  ;;  %4675 = vmatpush.bf16.msra.mxu0 %v10902_v16 }
 0x3cb   :  { %v4908_v40 = vadd.f32 %v4907_v3, %v4906_v22  ;;  %v5083_v48 = vrot.slane %v5082_v62, 4 }
 0x3cc   :  { %v4184_v17 = vpop.f32.mrf.mxu3 }
 0x3cd   :  { %v4909_v28 = vrot.slane %v4908_v40, 2  ;;  %v5084_v63 = vadd.f32 %v5083_v48, %v5082_v62  ;;  %v18482_v34 = vadd.f32 %v4184_v17, %v18208_v29  ;;  %v4271_v22 = vpop.f32.mrf.mxu2  ;;  %4676 = vmatmul.bf16.vlgmr.msra.gmra.mxu0 %v16619_v50  ;;  %v4360_v13 = vpop.f32.mrf.mxu1 }
 0x3ce   :  { %v18486_v47 = vadd.f32 %v4271_v22, %v18179_v8  ;;  %v18489_v62 = vadd.f32 %v4360_v13, %v18222_v35  ;;  %v11885_v13 = vld [vmem:[%s24617_s9 + $0x7d0] sm:$0xf] }
 0x3cf   :  { %24809 = vst [vmem:[#allocation15_spill] sm:$0xff] %v18482_v34  ;;  %v4910_v52 = vadd.f32 %v4909_v28, %v4908_v40  ;;  %v5085_v42 = vrot.slane %v5084_v63, 2  ;;  %v5013_v8 = vmul.f32 %v18482_v34, %v18482_v34 }
 0x3d0   :  { %24810 = vst [vmem:[#allocation12_spill] sm:$0xff] %v18489_v62 }
 0x3d1   :  { %v4911_v3 = vrot.slane %v4910_v52, 1  ;;  %v5086_v5 = vadd.f32 %v5085_v42, %v5084_v63 }
 0x3d2   :  { %v18491_v10 = vpop.f32.mrf.mxu0 }
 0x3d3   :  { %v4912_v56 = vadd.f32 %v4911_v3, %v4910_v52  ;;  %v5087_v16 = vrot.slane %v5086_v5, 1  ;;  %24811 = vst [vmem:[#allocation16_spill] sm:$0xff] %v18491_v10 }
 0x3d4   :  { %v4186_v48 = vpop.f32.mrf.mxu3 }
 0x3d5   :  { %v18493_v29 = vmul.f32 0.015625, %v4912_v56  ;;  %v5088_v40 = vadd.f32 %v5087_v16, %v5086_v5  ;;  %v18496_v17 = vadd.f32 %v4186_v48, %v18261_v4  ;;  %v4273_v42 = vpop.f32.mrf.mxu2  ;;  %v14085_v16 = vld [vmem:[%s24617_s9 + $0x7ec] sm:$0xf0]  ;;  %v4363_v52 = vpop.f32.mrf.mxu1  ;;  %4594 = vmatmul.bf16.gmra.mxu1 %v16927_v14 }
 0x3d6   :  { %v18511_v22 = vadd.f32 %v4273_v42, %v18211_v15  ;;  %v11853_v48 = vld [vmem:[%s24617_s9 + $0x790] sm:$0xf]  ;;  %4507 = vmatmul.bf16.gmra.mxu2 %v17251_v11  ;;  %v11127_v11 = vld [vmem:[%s24617_s9 + $0x1f8] sm:$0xf0] }
 0x3d7   :  { %24812 = vst [vmem:[#allocation17_spill] sm:$0xff] %v18496_v17  ;;  %v5180_v28 = vmul.f32 0.015625, %v5088_v40  ;;  %v5188_v63 = vmul.f32 %v18493_v29, %v18493_v29  ;;  %v4913_v56 = vadd.f32 %v18496_v17, %v18482_v34  ;;  %v5021_v4 = vmul.f32 %v18496_v17, %v18496_v17  ;;  %v14077_v42 = vld [vmem:[%s24617_s9 + $0x7ac] sm:$0xf0]  ;;  %v13958_v17 = vld [vmem:[%s24617_s9 + $0x3f4] sm:$0xf0] }
 0x3d8   :  { %24813 = vst [vmem:[#allocation18_spill] sm:$0xff] %v18511_v22  ;;  %v11854_v40 = vor.u32 %v14077_v42, %v11853_v48  ;;  %v11631_v48 = vld [vmem:[%s24617_s9 + $0x5f0] sm:$0xf0]  ;;  %v18677_v34 = vld [vmem:[%s24617_s9 + $0x650] sm:$0xf] }
 0x3d9   :  { %v5196_v5 = vsub.f32 %v5180_v28, %v5188_v63  ;;  %4420 = vmatmul.bf16.gmra.mxu3 %v17649_v20  ;;  %v11886_v63 = vor.u32 %v14085_v16, %v11885_v13  ;;  %v5089_v3 = vadd.f32 %v5021_v4, %v5013_v8  ;;  %v18539_v20 = vadd.f32 %v4363_v52, %v18283_v27  ;;  %v11821_v13 = vld [vmem:[%s24617_s9 + $0x750] sm:$0xf]  ;;  %v14017_v27 = vld [vmem:[%s24617_s9 + $0x5d4] sm:$0xf]  ;;  %v11349_v28 = vld [vmem:[%s24617_s9 + $0x398] sm:$0xf] }
 0x3da   :  { %v14069_v8 = vld [vmem:[%s24617_s9 + $0x76c] sm:$0xf0]  ;;  %v18548_v16 = vpop.f32.mrf.mxu0  ;;  %v11634_v42 = vor.u32 %v14017_v27, %v11631_v48  ;;  %v18728_v22 = vld [vmem:[%s24617_s9 + $0x298] sm:$0xf] }
 0x3db   :  { %v5204_v15 = vmax.f32 %v5196_v5, 0.0  ;;  %24814 = vst [vmem:[#allocation19_spill] sm:$0xff] %v18539_v20  ;;  %4523 = vmatpush.bf16.msra.mxu3 %v11886_v63  ;;  %v11381_v63 = vld [vmem:[%s24617_s9 + $0x3d8] sm:$0xf] }
 0x3dc   :  { %v4189_v4 = vpop.f32.mrf.mxu3  ;;  %24815 = vst [vmem:[#allocation20_spill] sm:$0xff] %v18548_v16  ;;  %v13950_v20 = vld [vmem:[%s24617_s9 + $0x3b4] sm:$0xf0]  ;;  %4610 = vmatpush.bf16.msrb.mxu2 %v11634_v42  ;;  %v11567_v42 = vld [vmem:[%s24617_s9 + $0x570] sm:$0xf0] }
 0x3dd   :  { %v18553_v52 = vadd.f32 1e-05, %v5204_v15  ;;  %v18557_v5 = vadd.f32 %v4189_v4, %v18321_v59  ;;  %v14009_v15 = vld [vmem:[%s24617_s9 + $0x594] sm:$0xf]  ;;  %v11822_v4 = vor.u32 %v14069_v8, %v11821_v13  ;;  %v4276_v48 = vpop.f32.mrf.mxu2  ;;  %4681 = vmatmul.bf16.gmra.mxu0 %v16692_v60  ;;  %v13890_v13 = vld [vmem:[%s24617_s9 + $0x1dc] sm:$0xf]  ;;  %v11382_v60 = vor.u32 %v13958_v17, %v11381_v63  ;;  %v4365_v17 = vpop.f32.mrf.mxu1 }
 0x3de   :  { %v11599_v59 = vld [vmem:[%s24617_s9 + $0x5b0] sm:$0xf0]  ;;  %v11789_v8 = vld [vmem:[%s24617_s9 + $0x710] sm:$0xf]  ;;  %v11350_v63 = vor.u32 %v13950_v20, %v11349_v28 }
 0x3df   :  { %24816 = vst [vmem:[#allocation21_spill] sm:$0xff] %v18557_v5  ;;  %14554 = vrsqrt.f32 %v18553_v52  ;;  %v4914_v35 = vadd.f32 %v4913_v56, %v18557_v5  ;;  %v5029_v27 = vmul.f32 %v18557_v5, %v18557_v5  ;;  %4524 = vmatpush.bf16.msra.mxu3 %v11854_v40  ;;  %v18589_v56 = vadd.f32 %v4276_v48, %v18271_v32  ;;  %v14061_v5 = vld [vmem:[%s24617_s9 + $0x72c] sm:$0xf0]  ;;  %v14001_v32 = vld [vmem:[%s24617_s9 + $0x554] sm:$0xf] }
 0x3e0   :  { %v11602_v14 = vor.u32 %v14009_v15, %v11599_v59  ;;  %v11130_v40 = vor.u32 %v13890_v13, %v11127_v11  ;;  %4697 = vmatpush.bf16.msra.mxu1 %v11382_v60  ;;  %v11095_v15 = vld [vmem:[%s24617_s9 + $0x1b8] sm:$0xf0]  ;;  %v18613_v11 = vadd.f32 %v4365_v17, %v18341_v43  ;;  %v11317_v59 = vld [vmem:[%s24617_s9 + $0x358] sm:$0xf]  ;;  %v11790_v28 = vor.u32 %v14061_v5, %v11789_v8  ;;  %v14053_v8 = vld [vmem:[%s24617_s9 + $0x6ec] sm:$0xf0] }
 0x3e1   :  { %24817 = vst [vmem:[#allocation22_spill] sm:$0xff] %v18589_v56  ;;  %v5090_v16 = vadd.f32 %v5089_v3, %v5029_v27  ;;  %v13882_v3 = vld [vmem:[%s24617_s9 + $0x19c] sm:$0xf]  ;;  %v13942_v60 = vld [vmem:[%s24617_s9 + $0x374] sm:$0xf0]  ;;  %v11570_v13 = vor.u32 %v14001_v32, %v11567_v42  ;;  %vm5290_vm12 = vweird.f32 %v18553_v52 }
 0x3e2   :  { %24818 = vst [vmem:[#allocation23_spill] sm:$0xff] %v18613_v11  ;;  %4784 = vmatpush.bf16.msrb.mxu0 %v11130_v40  ;;  %v11098_v20 = vor.u32 %v13882_v3, %v11095_v15  ;;  %v18621_v48 = vpop.f32.mrf.mxu0  ;;  %4611 = vmatpush.bf16.msrb.mxu2 %v11602_v14  ;;  %v13874_v43 = vld [vmem:[%s24617_s9 + $0x15c] sm:$0xf]  ;;  %v11757_v14 = vld [vmem:[%s24617_s9 + $0x6d0] sm:$0xf]  ;;  %v11318_v3 = vor.u32 %v13942_v60, %v11317_v59 }
 0x3e3   :  { %4525 = vmatpush.bf16.msra.mxu3 %v11822_v4  ;;  %24819 = vst [vmem:[#allocation24_spill] sm:$0xff] %v18621_v48  ;;  %v11063_v40 = vld [vmem:[%s24617_s9 + $0x178] sm:$0xf0]  ;;  %v18634_v4 = vld [vmem:[%s24618_s10] sm:$0xff]  ;;  %v18650_v42 = vld [vmem:[%s24617_s9 + $0x690] sm:$0xf] }
 0x3e4   :  { %v4191_v27 = vpop.f32.mrf.mxu3  ;;  %4698 = vmatpush.bf16.msra.mxu1 %v11350_v63  ;;  %v13993_v15 = vld [vmem:[%s24617_s9 + $0x514] sm:$0xf]  ;;  %v11285_v63 = vld [vmem:[%s24617_s9 + $0x318] sm:$0xf]  ;;  %v11066_v60 = vor.u32 %v13874_v43, %v11063_v40 }
 0x3e5   :  { %v18629_v17 = vpop.eup %14554  ;;  %v18637_v5 = vadd.f32 %v4191_v27, %v18377_v12  ;;  %v18655_v12 = vld [vmem:[%s24617_s9 + $0x6ac] sm:$0xf0]  ;;  %v11535_v27 = vld [vmem:[%s24617_s9 + $0x530] sm:$0xf0]  ;;  %v4278_v56 = vpop.f32.mrf.mxu2  ;;  %v13934_v59 = vld [vmem:[%s24617_s9 + $0x334] sm:$0xf0]  ;;  %4599 = vmatmul.bf16.gmra.mxu1 %v16919_v41 }
 0x3e6   :  { %v5285_v32 = vmul.f32 %v18629_v17, %v18553_v52  ;;  %4785 = vmatpush.bf16.msrb.mxu0 %v11098_v20  ;;  %v18686_v20 = vadd.f32 %v4278_v56, %v18330_v26  ;;  %4612 = vmatpush.bf16.msrb.mxu2 %v11570_v13  ;;  %v18691_v43 = vld [vmem:[%s24617_s9 + $0x4d4] sm:$0xf]  ;;  %v18706_v26 = vld [vmem:[%s24617_s9 + $0x2f4] sm:$0xf0]  ;;  %v13866_v56 = vld [vmem:[%s24617_s9 + $0x11c] sm:$0xf]  ;;  %vm5291_vm11 = vweird.f32 %v18629_v17 }
 0x3e7   :  { %24820 = vst [vmem:[#allocation25_spill] sm:$0xff] %v18637_v5  ;;  %v18667_v11 = vadd.f32 %v4914_v35, %v18637_v5  ;;  %v5037_v48 = vmul.f32 %v18637_v5, %v18637_v5  ;;  %v18682_v35 = vld [vmem:[%s24617_s9 + $0x66c] sm:$0xf0]  ;;  %4526 = vmatpush.bf16.msra.mxu3 %v11790_v28  ;;  %v11758_v5 = vor.u32 %v14053_v8, %v11757_v14  ;;  %v18696_v40 = vld [vmem:[%s24617_s9 + $0x4f0] sm:$0xf0]  ;;  %vm5292_vm13 = vmor %vm5290_vm12, %vm5291_vm11 }
 0x3e8   :  { %v5286_v62 = vmul.f32 %v18629_v17, %v5285_v32  ;;  %24821 = vst [vmem:[#allocation26_spill] sm:$0xff] %v18686_v20  ;;  %v18701_v32 = vld [vmem:[%s24617_s9 + $0x2d8] sm:$0xf]  ;;  %v11031_v28 = vld [vmem:[%s24617_s9 + $0x138] sm:$0xf0]  ;;  %v11538_v14 = vor.u32 %v13993_v15, %v11535_v27  ;;  %4699 = vmatpush.bf16.msra.mxu1 %v11318_v3  ;;  %v11286_v15 = vor.u32 %v13934_v59, %v11285_v63 }
 0x3e9   :  { %v5091_v13 = vadd.f32 %v5090_v16, %v5037_v48  ;;  %4425 = vmatmul.bf16.gmra.mxu3 %v17683_v25  ;;  %v18718_v8 = vld [vmem:[%s24617_s9 + $0x494] sm:$0xf]  ;;  %v18731_v16 = vperm.slane %v18634_v4, 0  ;;  %v4368_v48 = vpop.f32.mrf.mxu1  ;;  %v18736_v27 = vld [vmem:[%s24617_s9 + $0x2b4] sm:$0xf0]  ;;  %4512 = vmatmul.bf16.gmra.mxu2 %v17271_v38 }
 0x3ea   :  { %v18723_v20 = vld [vmem:[%s24617_s9 + $0x4b0] sm:$0xf0]  ;;  %v5287_v10 = vmul.f32 0.5, %v5286_v62  ;;  %v13858_v25 = vld [vmem:[%s24617_s9 + $0xdc] sm:$0xf]  ;;  %v18742_v50 = vadd.f32 %v4368_v48, %v18384_v46  ;;  %v11726_v62 = vor.u32 %v18655_v12, %v18650_v42  ;;  %4786 = vmatpush.bf16.msrb.mxu0 %v11066_v60  ;;  %v18761_v12 = vpop.f32.mrf.mxu0  ;;  %v11694_v60 = vor.u32 %v18682_v35, %v18677_v34  ;;  %4613 = vmatpush.bf16.msrb.mxu2 %v11538_v14 }
 0x3eb   :  { %v10999_v3 = vld [vmem:[%s24617_s9 + $0xf8] sm:$0xf0]  ;;  %v18752_v63 = vld [vmem:[%s24617_s9 + $0x610] sm:$0xf]  ;;  %4527 = vmatpush.bf16.msra.mxu3 %v11758_v5  ;;  %v11034_v48 = vor.u32 %v13866_v56, %v11031_v28  ;;  %v18779_v5 = vld [vmem:[%s24619_s11] sm:$0xff]  ;;  %v11506_v35 = vor.u32 %v18691_v43, %v18696_v40  ;;  %v11254_v56 = vor.u32 %v18706_v26, %v18701_v32  ;;  %v11474_v14 = vor.u32 %v18718_v8, %v18723_v20 }
 0x3ec   :  { %24822 = vst [vmem:[#allocation27_spill] sm:$0xff] %v18742_v50  ;;  %v18757_v59 = vld [vmem:[%s24617_s9 + $0x62c] sm:$0xf0]  ;;  %v5288_v46 = vsub.f32 1.5, %v5287_v10  ;;  %v4194_v42 = vpop.f32.mrf.mxu3  ;;  %v18768_v50 = vld [vmem:[%s24617_s9 + $0x454] sm:$0xf]  ;;  %4700 = vmatpush.bf16.msra.mxu1 %v11286_v15  ;;  %v11222_v43 = vor.u32 %v18736_v27, %v18728_v22  ;;  %v11002_v40 = vor.u32 %v13858_v25, %v10999_v3  ;;  %v24823_v27 = vsub.f32 %v18420_v61, %v18493_v29 }
 0x3ed   :  { %v18773_v10 = vld [vmem:[%s24617_s9 + $0x470] sm:$0xf0]  ;;  %v18783_v34 = vadd.f32 %v4194_v42, %v18395_v55  ;;  %v18792_v52 = vld [vmem:[%s24617_s9 + $0x258] sm:$0xf]  ;;  %v4281_v42 = vpop.f32.mrf.mxu2  ;;  %4686 = vmatmul.bf16.gmra.mxu0 %v16709_v19  ;;  %v11662_v15 = vor.u32 %v18757_v59, %v18752_v63  ;;  %v18817_v22 = vperm.slane %v18779_v5, 0  ;;  %v24825_v59 = vsub.f32 %v18192_v7, %v18493_v29 }
 0x3ee   :  { %v18797_v28 = vld [vmem:[%s24617_s9 + $0x274] sm:$0xf0]  ;;  %v5289_v55 = vmul.f32 %v18629_v17, %v5288_v46  ;;  %v11442_v20 = vor.u32 %v18768_v50, %v18773_v10  ;;  %v18820_v8 = vadd.f32 %v4281_v42, %v18381_v39  ;;  %4787 = vmatpush.bf16.msrb.mxu0 %v11034_v48  ;;  %v24824_v50 = vsub.f32 %v18453_v23, %v18493_v29 }
 0x3ef   :  { %v4916_v32 = vadd.f32 %v18667_v11, %v18783_v34  ;;  %v5045_v26 = vmul.f32 %v18783_v34, %v18783_v34  ;;  %4528 = vmatpush.bf16.msra.mxu3 %v11726_v62  ;;  %v11190_v11 = vor.u32 %v18797_v28, %v18792_v52  ;;  %4614 = vmatpush.bf16.msrb.mxu2 %v11506_v35 }
 0x3f0   :  { %v5293_v25 = vsel %vm5292_vm13, %v18629_v17, %v5289_v55  ;;  %4701 = vmatpush.bf16.msra.mxu1 %v11254_v56  ;;  %v24826_v62 = vsub.f32 %v18234_v51, %v18493_v29  ;;  %v24827_v61 = vsub.f32 %v18296_v33, %v18493_v29  ;;  %v24828_v23 = vsub.f32 %v18353_v57, %v18493_v29 }
 0x3f1   :  { %v5412_v3 = vmul.f32 %v5293_v25, %v24823_v27  ;;  %v5420_v63 = vmul.f32 %v5293_v25, %v24824_v50  ;;  %v5092_v17 = vadd.f32 %v5091_v13, %v5045_v26  ;;  %v5364_v39 = vmul.f32 %v5293_v25, %v24825_v59  ;;  %v4370_v46 = vpop.f32.mrf.mxu1 }
 0x3f2   :  { %v5372_v48 = vmul.f32 %v5293_v25, %v24826_v62  ;;  %v5380_v10 = vmul.f32 %v5293_v25, %v24827_v61  ;;  %v5388_v52 = vmul.f32 %v5293_v25, %v24828_v23  ;;  %v24829_v13 = vsub.f32 %v18388_v21, %v18493_v29  ;;  %v18851_v33 = vpop.f32.mrf.mxu0  ;;  %4788 = vmatpush.bf16.msrb.mxu0 %v11002_v40 }
 0x3f3   :  { %v5494_v7 = vmul.f32 %v18731_v16, %v5412_v3  ;;  %v5502_v56 = vmul.f32 %v18731_v16, %v5420_v63  ;;  %v18848_v28 = vadd.f32 %v4370_v46, %v18400_v44  ;;  %v5446_v51 = vmul.f32 %v18731_v16, %v5364_v39  ;;  %4529 = vmatpush.bf16.msra.mxu3 %v11694_v60 }
 0x3f4   :  { %v5396_v35 = vmul.f32 %v5293_v25, %v24829_v13  ;;  %v4196_v55 = vpop.f32.mrf.mxu3  ;;  %v5454_v57 = vmul.f32 %v18731_v16, %v5372_v48  ;;  %v5462_v26 = vmul.f32 %v18731_v16, %v5380_v10  ;;  %v5470_v21 = vmul.f32 %v18731_v16, %v5388_v52  ;;  %4615 = vmatpush.bf16.msrb.mxu2 %v11474_v14 }
 0x3f5   :  { %v5576_v42 = vadd.f32 %v18817_v22, %v5494_v7  ;;  %v5584_v27 = vadd.f32 %v18817_v22, %v5502_v56  ;;  %v18859_v44 = vadd.f32 %v4196_v55, %v18409_v49  ;;  %v5528_v3 = vadd.f32 %v18817_v22, %v5446_v51  ;;  %4702 = vmatpush.bf16.msra.mxu1 %v11222_v43  ;;  %v4283_v14 = vpop.f32.mrf.mxu2 }
 0x3f6   :  { %v5536_v60 = vadd.f32 %v18817_v22, %v5454_v57  ;;  %v5544_v40 = vadd.f32 %v18817_v22, %v5462_v26  ;;  %v5552_v50 = vadd.f32 %v18817_v22, %v5470_v21  ;;  %v24830_v63 = vsub.f32 %v18403_v36, %v18493_v29  ;;  %4604 = vmatmul.bf16.gmra.mxu1 %v16867_v58  ;;  %v10967_v21 = vld [vmem:[%s24617_s9 + $0xb8] sm:$0xf0] }
 0x3f7   :  { %v5640_v39 = vmax.f32 %v5576_v42, 0.0  ;;  %v5648_v46 = vmax.f32 %v5584_v27, 0.0  ;;  %v4917_v62 = vadd.f32 %v4916_v32, %v18859_v44  ;;  %v5053_v49 = vmul.f32 %v18859_v44, %v18859_v44  ;;  %4530 = vmatpush.bf16.msra.mxu3 %v11662_v15 }
 0x3f8   :  { %v5404_v59 = vmul.f32 %v5293_v25, %v24830_v63  ;;  %v18872_v43 = vadd.f32 %v4283_v14, %v18398_v18  ;;  %v5592_v48 = vmax.f32 %v5528_v3, 0.0  ;;  %v5600_v61 = vmax.f32 %v5536_v60, 0.0  ;;  %4616 = vmatpush.bf16.msrb.mxu2 %v11442_v20  ;;  %v11407_v60 = vld [vmem:[%s24617_s9 + $0x430] sm:$0xf0] }
 0x3f9   :  { %v5608_v10 = vmax.f32 %v5544_v40, 0.0  ;;  %v18874_v23 = vpack.c.bf16 %v5648_v46, %v5640_v39  ;;  %v5093_v52 = vadd.f32 %v5092_v17, %v5053_v49  ;;  %4430 = vmatmul.bf16.gmra.mxu3 %v17645_v53  ;;  %v5616_v36 = vmax.f32 %v5552_v50, 0.0  ;;  %v4373_v32 = vpop.f32.mrf.mxu1  ;;  %4703 = vmatpush.bf16.msra.mxu1 %v11190_v11  ;;  %v11157_v40 = vld [vmem:[%s24617_s9 + $0x218] sm:$0xf]  ;;  %v10935_v49 = vld [vmem:[%s24617_s9 + $0x78] sm:$0xf0] }
 0x3fa   :  { %v5478_v29 = vmul.f32 %v18731_v16, %v5396_v35  ;;  %v18878_v25 = vpack.c.bf16 %v5600_v61, %v5592_v48  ;;  %v5486_v18 = vmul.f32 %v18731_v16, %v5404_v59  ;;  %v18882_v15 = vadd.f32 %v4373_v32, %v18416_v9  ;;  %4517 = vmatmul.bf16.gmra.mxu2 %v17238_v6  ;;  %v18888_v20 = vpop.f32.mrf.mxu0  ;;  %v10903_v32 = vld [vmem:[%s24617_s9 + $0x38] sm:$0xf0] }
 0x3fb   :  { %24831 = vst [vmem:[#allocation28_spill] sm:$0xff] %v18874_v23  ;;  %v18884_v13 = vpack.c.bf16 %v5616_v36, %v5608_v10  ;;  %v11351_v23 = vld [vmem:[%s24617_s9 + $0x3b8] sm:$0xf0] }
 0x3fc   :  { %24832 = vst [vmem:[#allocation29_spill] sm:$0xff] %v18878_v25  ;;  %v5560_v7 = vadd.f32 %v18817_v22, %v5478_v29  ;;  %v4199_v17 = vpop.f32.mrf.mxu3  ;;  %v5568_v35 = vadd.f32 %v18817_v22, %v5486_v18  ;;  %v13834_v29 = vld [vmem:[%s24617_s9 + $0x1c] sm:$0xf] }
 0x3fd   :  { %24833 = vst [vmem:[#allocation30_spill] sm:$0xff] %v18884_v13  ;;  %v18893_v11 = vadd.f32 %v4199_v17, %v18427_v2  ;;  %v4286_v55 = vpop.f32.mrf.mxu2  ;;  %4691 = vmatmul.bf16.gmra.mxu0 %v16616_v1  ;;  %v13850_v2 = vld [vmem:[%s24617_s9 + $0x9c] sm:$0xf] }
 0x3fe   :  { %v5624_v16 = vmax.f32 %v5560_v7, 0.0  ;;  %v5632_v56 = vmax.f32 %v5568_v35, 0.0  ;;  %v18900_v57 = vadd.f32 %v4286_v55, %v18413_v31  ;;  %v10970_v27 = vor.u32 %v13850_v2, %v10967_v21  ;;  %v13961_v31 = vld [vmem:[%s24617_s9 + $0x414] sm:$0xf] }
 0x3ff   :  { %v4918_v9 = vadd.f32 %v4917_v62, %v18893_v11  ;;  %v5061_v51 = vmul.f32 %v18893_v11, %v18893_v11  ;;  %v11410_v59 = vor.u32 %v13961_v31, %v11407_v60  ;;  %v13842_v62 = vld [vmem:[%s24617_s9 + $0x5c] sm:$0xf]  ;;  %v10906_v7 = vor.u32 %v13834_v29, %v10903_v32  ;;  %v24836_v55 = vld [vmem:[#allocation7_spill] sm:$0xff] }
 0x400   :  { %v18902_v26 = vpack.c.bf16 %v5632_v56, %v5624_v16  ;;  %4789 = vmatpush.bf16.msrb.mxu0 %v10970_v27  ;;  %v10938_v14 = vor.u32 %v13842_v62, %v10935_v49  ;;  %v24838_v27 = vld [vmem:[#allocation5_spill] sm:$0xff]  ;;  %v11383_v32 = vld [vmem:[%s24617_s9 + $0x3f8] sm:$0xf0] }
 0x401   :  { %v5094_v22 = vadd.f32 %v5093_v52, %v5061_v51  ;;  %v4375_v42 = vpop.f32.mrf.mxu1  ;;  %4617 = vmatpush.bf16.msrb.mxu2 %v11410_v59 }
 0x402   :  { %24834 = vst [vmem:[#allocation31_spill] sm:$0xff] %v18902_v26  ;;  %v18911_v3 = vadd.f32 %v4375_v42, %v18447_v37  ;;  %v18922_v63 = vpop.f32.mrf.mxu0  ;;  %v13902_v37 = vld [vmem:[%s24617_s9 + $0x234] sm:$0xf0] }
 0x403   :  { %v11158_v46 = vor.u32 %v13902_v37, %v11157_v40 }
 0x404   :  { %v4201_v50 = vpop.f32.mrf.mxu3  ;;  %4790 = vmatpush.bf16.msrb.mxu0 %v10938_v14 }
 0x405   :  { %v18928_v39 = vadd.f32 %v4201_v50, %v18465_v45  ;;  %v4288_v10 = vpop.f32.mrf.mxu2  ;;  %4704 = vmatpush.bf16.msra.mxu1 %v11158_v46  ;;  %v24841_v46 = vld [vmem:[#allocation16_spill] sm:$0xff] }
 0x406   :  { %v18940_v45 = vadd.f32 %v4288_v10, %v18436_v54 }
 0x407   :  { %v4919_v48 = vadd.f32 %v4918_v9, %v18928_v39  ;;  %v5069_v61 = vmul.f32 %v18928_v39, %v18928_v39 }
 0x408   :  { %4791 = vmatpush.bf16.msrb.mxu0 %v10906_v7  ;;  %4705 = vmatmul.bf16.vlgmr.msra.gmra.mxu1 %v24836_v55 }
 0x409   :  { %v4920_v52 = vrot.slane %v4919_v48, 4  ;;  %v5095_v36 = vadd.f32 %v5094_v22, %v5069_v61  ;;  %4531 = vmatmul.bf16.vlgmr.msra.gmra.mxu3 %v17647_v0  ;;  %v4474_v18 = vpop.f32.mrf.mxu1  ;;  %v24844_v61 = vld [vmem:[#allocation18_spill] sm:$0xff] }
 0x40a   :  { %v18950_v54 = vadd.f32 %v4474_v18, %v18478_v24  ;;  %4618 = vmatmul.bf16.vlgmr.msrb.gmra.mxu2 %v17245_v30  ;;  %v18953_v56 = vpop.f32.mrf.mxu0  ;;  %v24839_v24 = vld [vmem:[#allocation11_spill] sm:$0xff] }
 0x40b   :  { %v4921_v17 = vadd.f32 %v4920_v52, %v4919_v48  ;;  %v5096_v35 = vrot.slane %v5095_v36, 4 }
 0x40c   :  { %24835 = vst [vmem:[#allocation32_spill] sm:$0xff] %v18950_v54  ;;  %v4300_v16 = vpop.f32.mrf.mxu3  ;;  %v13946_v54 = vld [vmem:[%s24617_s9 + $0x39c] sm:$0xf] }
 0x40d   :  { %v4922_v9 = vrot.slane %v4921_v17, 2  ;;  %v5097_v51 = vadd.f32 %v5096_v35, %v5095_v36  ;;  %v18957_v22 = vadd.f32 %v4300_v16, %v18486_v47  ;;  %v4387_v42 = vpop.f32.mrf.mxu2  ;;  %4792 = vmatmul.bf16.vlgmr.msrb.gmra.mxu0 %v24838_v27  ;;  %v24846_v16 = vld [vmem:[#allocation12_spill] sm:$0xff]  ;;  %v11887_v27 = vld [vmem:[%s24617_s9 + $0x7f0] sm:$0xf0] }
 0x40e   :  { %v18961_v31 = vadd.f32 %v4387_v42, %v24839_v24  ;;  %v14081_v42 = vld [vmem:[%s24617_s9 + $0x7d4] sm:$0xf] }
 0x40f   :  { %24837 = vst [vmem:[#allocation7_spill] sm:$0xff] %v18957_v22  ;;  %v4923_v2 = vadd.f32 %v4922_v9, %v4921_v17  ;;  %v5098_v21 = vrot.slane %v5097_v51, 2  ;;  %v5014_v52 = vmul.f32 %v18957_v22, %v18957_v22  ;;  %v14073_v24 = vld [vmem:[%s24617_s9 + $0x794] sm:$0xf] }
 0x410   :  { %24840 = vst [vmem:[#allocation5_spill] sm:$0xff] %v18961_v31 }
 0x411   :  { %v4924_v60 = vrot.slane %v4923_v2, 1  ;;  %v5099_v40 = vadd.f32 %v5098_v21, %v5097_v51  ;;  %v4476_v50 = vpop.f32.mrf.mxu1  ;;  %v24848_v51 = vld [vmem:[#allocation15_spill] sm:$0xff] }
 0x412   :  { %v18964_v62 = vadd.f32 %v4476_v50, %v24841_v46  ;;  %v18966_v14 = vpop.f32.mrf.mxu0  ;;  %v24852_v46 = vld [vmem:[#allocation25_spill] sm:$0xff] }
 0x413   :  { %v4925_v59 = vadd.f32 %v4924_v60, %v4923_v2  ;;  %v5100_v37 = vrot.slane %v5099_v40, 1  ;;  %24843 = vst [vmem:[#allocation16_spill] sm:$0xff] %v18966_v14  ;;  %v24849_v60 = vld [vmem:[#allocation10_spill] sm:$0xff]  ;;  %v24853_v2 = vld [vmem:[#allocation20_spill] sm:$0xff] }
 0x414   :  { %24842 = vst [vmem:[#allocation11_spill] sm:$0xff] %v18964_v62  ;;  %v4302_v49 = vpop.f32.mrf.mxu3  ;;  %v24860_v62 = vld [vmem:[#allocation6_spill] sm:$0xff]  ;;  %v19196_v14 = vld [vmem:[%s24617_s9 + $0x29c] sm:$0xf] }
 0x415   :  { %v18968_v47 = vmul.f32 0.015625, %v4925_v59  ;;  %v5101_v48 = vadd.f32 %v5100_v37, %v5099_v40  ;;  %v18971_v10 = vadd.f32 %v4302_v49, %v24844_v61  ;;  %v4389_v7 = vpop.f32.mrf.mxu2  ;;  %v24850_v40 = vld [vmem:[#allocation17_spill] sm:$0xff]  ;;  %v11855_v61 = vld [vmem:[%s24617_s9 + $0x7b0] sm:$0xf0] }
 0x416   :  { %v18986_v9 = vadd.f32 %v4389_v7, %v24846_v16  ;;  %v24851_v59 = vld [vmem:[#allocation21_spill] sm:$0xff]  ;;  %v11858_v37 = vor.u32 %v14073_v24, %v11855_v61  ;;  %v24857_v24 = vld [vmem:[#allocation8_spill] sm:$0xff] }
 0x417   :  { %24845 = vst [vmem:[#allocation18_spill] sm:$0xff] %v18971_v10  ;;  %v5181_v36 = vmul.f32 0.015625, %v5101_v48  ;;  %v5189_v29 = vmul.f32 %v18968_v47, %v18968_v47  ;;  %v4926_v17 = vadd.f32 %v18971_v10, %v18957_v22  ;;  %v5022_v35 = vmul.f32 %v18971_v10, %v18971_v10  ;;  %v24855_v49 = vld [vmem:[#allocation9_spill] sm:$0xff]  ;;  %v13954_v16 = vld [vmem:[%s24617_s9 + $0x3dc] sm:$0xf] }
 0x418   :  { %24847 = vst [vmem:[#allocation12_spill] sm:$0xff] %v18986_v9  ;;  %v11890_v48 = vor.u32 %v14081_v42, %v11887_v27  ;;  %v14065_v42 = vld [vmem:[%s24617_s9 + $0x754] sm:$0xf]  ;;  %4710 = vmatmul.bf16.gmra.mxu1 %v24857_v24  ;;  %v11386_v26 = vor.u32 %v13954_v16, %v11383_v32  ;;  %v14139_v24 = vld [vmem:[%s24620_s12 + $0x1a0] sm:$0xf0]  ;;  %v11354_v16 = vor.u32 %v13946_v54, %v11351_v23 }
 0x419   :  { %v5197_v21 = vsub.f32 %v5181_v36, %v5189_v29  ;;  %4536 = vmatmul.bf16.gmra.mxu3 %v24849_v60  ;;  %v5102_v36 = vadd.f32 %v5022_v35, %v5014_v52  ;;  %v4479_v29 = vpop.f32.mrf.mxu1  ;;  %v11823_v52 = vld [vmem:[%s24617_s9 + $0x770] sm:$0xf0]  ;;  %v11319_v23 = vld [vmem:[%s24617_s9 + $0x378] sm:$0xf0]  ;;  %v19191_v9 = vld [vmem:[%s24617_s9 + $0x4b4] sm:$0xf0] }
 0x41a   :  { %v19014_v18 = vadd.f32 %v4479_v29, %v24853_v2  ;;  %4639 = vmatpush.bf16.msrb.mxu3 %v11890_v48  ;;  %4623 = vmatmul.bf16.gmra.mxu2 %v24855_v49  ;;  %v19023_v27 = vpop.f32.mrf.mxu0  ;;  %v11637_v2 = vld [vmem:[%s24617_s9 + $0x5d8] sm:$0xf]  ;;  %v24858_v48 = vld [vmem:[#allocation22_spill] sm:$0xff]  ;;  %v19145_v10 = vld [vmem:[%s24617_s9 + $0x654] sm:$0xf] }
 0x41b   :  { %v5205_v50 = vmax.f32 %v5197_v21, 0.0  ;;  %24856 = vst [vmem:[#allocation17_spill] sm:$0xff] %v19023_v27  ;;  %v14022_v29 = vld [vmem:[%s24617_s9 + $0x5f4] sm:$0xf0]  ;;  %v11791_v27 = vld [vmem:[%s24617_s9 + $0x730] sm:$0xf0]  ;;  %4813 = vmatpush.bf16.msrb.mxu1 %v11386_v26 }
 0x41c   :  { %24854 = vst [vmem:[#allocation15_spill] sm:$0xff] %v19014_v18  ;;  %v4305_v35 = vpop.f32.mrf.mxu3  ;;  %v11638_v7 = vor.u32 %v14022_v29, %v11637_v2  ;;  %v19150_v60 = vld [vmem:[%s24617_s9 + $0x670] sm:$0xf0] }
 0x41d   :  { %v19028_v21 = vadd.f32 1e-05, %v5205_v50  ;;  %v19032_v61 = vadd.f32 %v4305_v35, %v24858_v48  ;;  %v11605_v50 = vld [vmem:[%s24617_s9 + $0x598] sm:$0xf]  ;;  %v11826_v48 = vor.u32 %v14065_v42, %v11823_v52  ;;  %v4392_v29 = vpop.f32.mrf.mxu2  ;;  %4797 = vmatmul.bf16.gmra.mxu0 %v24860_v62  ;;  %v12097_v42 = vld [vmem:[%s24620_s12 + $0x188] sm:$0xf] }
 0x41e   :  { %v14014_v35 = vld [vmem:[%s24617_s9 + $0x5b4] sm:$0xf0]  ;;  %4640 = vmatpush.bf16.msrb.mxu3 %v11858_v37  ;;  %v14057_v62 = vld [vmem:[%s24617_s9 + $0x714] sm:$0xf]  ;;  %4726 = vmatpush.bf16.msra.mxu2 %v11638_v7  ;;  %v12098_v37 = vor.u32 %v14139_v24, %v12097_v42 }
 0x41f   :  { %24859 = vst [vmem:[#allocation21_spill] sm:$0xff] %v19032_v61  ;;  %14556 = vrsqrt.f32 %v19028_v21  ;;  %v4927_v18 = vadd.f32 %v4926_v17, %v19032_v61  ;;  %v5030_v2 = vmul.f32 %v19032_v61, %v19032_v61  ;;  %v24861_v17 = vld [vmem:[#allocation19_spill] sm:$0xff]  ;;  %v11606_v13 = vor.u32 %v14014_v35, %v11605_v50  ;;  %v14006_v7 = vld [vmem:[%s24617_s9 + $0x574] sm:$0xf0]  ;;  %v14132_v50 = vld [vmem:[%s24620_s12 + $0x168] sm:$0xf0]  ;;  %4814 = vmatpush.bf16.msrb.mxu1 %v11354_v16 }
 0x420   :  { %v19064_v52 = vadd.f32 %v4392_v29, %v24861_v17  ;;  %v11573_v29 = vld [vmem:[%s24617_s9 + $0x558] sm:$0xf]  ;;  %8520 = vmatpush.bf16.msra.mxu0 %v12098_v37  ;;  %v11794_v54 = vor.u32 %v14057_v62, %v11791_v27  ;;  %v14125_v37 = vld [vmem:[%s24620_s12 + $0x130] sm:$0xf0]  ;;  %v13930_v16 = vld [vmem:[%s24617_s9 + $0x31c] sm:$0xf]  ;;  %vm5300_vm15 = vweird.f32 %v19028_v21 }
 0x421   :  { %v5103_v49 = vadd.f32 %v5102_v36, %v5030_v2  ;;  %v4481_v32 = vpop.f32.mrf.mxu1  ;;  %v12069_v36 = vld [vmem:[%s24620_s12 + $0x150] sm:$0xf]  ;;  %v24863_v24 = vld [vmem:[#allocation24_spill] sm:$0xff]  ;;  %v11574_v17 = vor.u32 %v14006_v7, %v11573_v29  ;;  %v14049_v27 = vld [vmem:[%s24617_s9 + $0x6d4] sm:$0xf] }
 0x422   :  { %24862 = vst [vmem:[#allocation25_spill] sm:$0xff] %v19064_v52  ;;  %v19088_v35 = vadd.f32 %v4481_v32, %v24863_v24  ;;  %v13938_v2 = vld [vmem:[%s24617_s9 + $0x35c] sm:$0xf]  ;;  %v12070_v26 = vor.u32 %v14132_v50, %v12069_v36  ;;  %4641 = vmatpush.bf16.msrb.mxu3 %v11826_v48  ;;  %4727 = vmatpush.bf16.msra.mxu2 %v11606_v13  ;;  %v12041_v32 = vld [vmem:[%s24620_s12 + $0x118] sm:$0xf]  ;;  %v19115_v62 = vpop.f32.mrf.mxu0 }
 0x423   :  { %v11759_v13 = vld [vmem:[%s24617_s9 + $0x6f0] sm:$0xf0]  ;;  %24867 = vst [vmem:[#allocation6_spill] sm:$0xff] %v19115_v62  ;;  %v11322_v36 = vor.u32 %v13938_v2, %v11319_v23  ;;  %v11541_v50 = vld [vmem:[%s24617_s9 + $0x518] sm:$0xf]  ;;  %v12042_v23 = vor.u32 %v14125_v37, %v12041_v32 }
 0x424   :  { %24864 = vst [vmem:[#allocation20_spill] sm:$0xff] %v19088_v35  ;;  %v4307_v42 = vpop.f32.mrf.mxu3  ;;  %v24865_v35 = vld [vmem:[#allocation26_spill] sm:$0xff]  ;;  %v19120_v29 = vld [vmem:[%s24617_s9 + $0x694] sm:$0xf]  ;;  %8521 = vmatpush.bf16.msra.mxu0 %v12070_v26  ;;  %v11287_v2 = vld [vmem:[%s24617_s9 + $0x338] sm:$0xf0]  ;;  %v11762_v22 = vor.u32 %v14049_v27, %v11759_v13 }
 0x425   :  { %v19102_v24 = vpop.eup %14556  ;;  %v19105_v52 = vadd.f32 %v4307_v42, %v24865_v35  ;;  %v19125_v7 = vld [vmem:[%s24617_s9 + $0x6b0] sm:$0xf0]  ;;  %v13998_v35 = vld [vmem:[%s24617_s9 + $0x534] sm:$0xf0]  ;;  %v4394_v61 = vpop.f32.mrf.mxu2  ;;  %v24870_v27 = vld [vmem:[#allocation14_spill] sm:$0xff]  ;;  %4815 = vmatpush.bf16.msrb.mxu1 %v11322_v36 }
 0x426   :  { %v5295_v48 = vmul.f32 %v19102_v24, %v19028_v21  ;;  %4642 = vmatpush.bf16.msrb.mxu3 %v11794_v54  ;;  %4728 = vmatpush.bf16.msra.mxu2 %v11574_v17  ;;  %v19159_v32 = vld [vmem:[%s24617_s9 + $0x4d8] sm:$0xf]  ;;  %v14118_v54 = vld [vmem:[%s24620_s12 + $0xf8] sm:$0xf0]  ;;  %v11542_v13 = vor.u32 %v13998_v35, %v11541_v50  ;;  %v11290_v50 = vor.u32 %v13930_v16, %v11287_v2  ;;  %v19220_v36 = vld [vmem:[%s24617_s9 + $0x614] sm:$0xf]  ;;  %vm5301_vm14 = vweird.f32 %v19102_v24 }
 0x427   :  { %24866 = vst [vmem:[#allocation22_spill] sm:$0xff] %v19105_v52  ;;  %v4928_v42 = vadd.f32 %v4927_v18, %v19105_v52  ;;  %v5038_v62 = vmul.f32 %v19105_v52, %v19105_v52  ;;  %v24868_v52 = vld [vmem:[#allocation23_spill] sm:$0xff]  ;;  %v19164_v37 = vld [vmem:[%s24617_s9 + $0x4f4] sm:$0xf0]  ;;  %v19204_v35 = vld [vmem:[%s24617_s9 + $0x2b8] sm:$0xf0] }
 0x428   :  { %v5296_v18 = vmul.f32 %v19102_v24, %v5295_v48  ;;  %v19154_v26 = vadd.f32 %v4394_v61, %v24868_v52  ;;  %v19169_v48 = vld [vmem:[%s24617_s9 + $0x2dc] sm:$0xf]  ;;  %v12013_v52 = vld [vmem:[%s24620_s12 + $0xe0] sm:$0xf]  ;;  %8522 = vmatpush.bf16.msra.mxu0 %v12042_v23  ;;  %v19225_v16 = vld [vmem:[%s24617_s9 + $0x630] sm:$0xf0]  ;;  %4715 = vmatmul.bf16.gmra.mxu1 %v16919_v41 }
 0x429   :  { %v19174_v61 = vld [vmem:[%s24617_s9 + $0x2f8] sm:$0xf0]  ;;  %v5104_v17 = vadd.f32 %v5103_v49, %v5038_v62  ;;  %4541 = vmatmul.bf16.gmra.mxu3 %v24870_v27  ;;  %v19199_v49 = vperm.slane %v18634_v4, 1  ;;  %v4484_v62 = vpop.f32.mrf.mxu1  ;;  %v11985_v27 = vld [vmem:[%s24620_s12 + $0xa8] sm:$0xf]  ;;  %v12014_v2 = vor.u32 %v14118_v54, %v12013_v52  ;;  %4816 = vmatpush.bf16.msrb.mxu1 %v11290_v50  ;;  %vm5302_vm0 = vmor %vm5300_vm15, %vm5301_vm14 }
 0x42a   :  { %24869 = vst [vmem:[#allocation19_spill] sm:$0xff] %v19154_v26  ;;  %v19186_v26 = vld [vmem:[%s24617_s9 + $0x498] sm:$0xf]  ;;  %v5297_v25 = vmul.f32 0.5, %v5296_v18  ;;  %v19210_v31 = vadd.f32 %v4484_v62, %v18761_v12  ;;  %v11730_v18 = vor.u32 %v19120_v29, %v19125_v7  ;;  %v14111_v4 = vld [vmem:[%s24620_s12 + $0xc0] sm:$0xf0]  ;;  %4628 = vmatmul.bf16.gmra.mxu2 %v17271_v38  ;;  %4643 = vmatpush.bf16.msrb.mxu3 %v11762_v22 }
 0x42b   :  { %v11698_v7 = vor.u32 %v19145_v10, %v19150_v60  ;;  %v19234_v23 = vld [vmem:[%s24617_s9 + $0x458] sm:$0xf]  ;;  %4729 = vmatpush.bf16.msra.mxu2 %v11542_v13  ;;  %v11510_v22 = vor.u32 %v19164_v37, %v19159_v32  ;;  %v11258_v10 = vor.u32 %v19169_v48, %v19174_v61  ;;  %v19253_v60 = vld [vmem:[%s24617_s9 + $0x25c] sm:$0xf]  ;;  %v11478_v52 = vor.u32 %v19191_v9, %v19186_v26 }
 0x42c   :  { %24871 = vst [vmem:[#allocation24_spill] sm:$0xff] %v19210_v31  ;;  %v5298_v12 = vsub.f32 1.5, %v5297_v25  ;;  %v4310_v29 = vpop.f32.mrf.mxu3  ;;  %v19239_v62 = vld [vmem:[%s24617_s9 + $0x474] sm:$0xf0]  ;;  %v19258_v21 = vld [vmem:[%s24617_s9 + $0x278] sm:$0xf0]  ;;  %v11226_v32 = vor.u32 %v19196_v14, %v19204_v35  ;;  %v11986_v37 = vor.u32 %v14111_v4, %v11985_v27  ;;  %v11666_v13 = vor.u32 %v19220_v36, %v19225_v16  ;;  %8523 = vmatpush.bf16.msra.mxu0 %v12014_v2 }
 0x42d   :  { %v19244_v25 = vadd.f32 %v4310_v29, %v18820_v8  ;;  %v4397_v54 = vpop.f32.mrf.mxu2  ;;  %4802 = vmatmul.bf16.gmra.mxu0 %v16709_v19  ;;  %v11446_v9 = vor.u32 %v19239_v62, %v19234_v23  ;;  %v19277_v26 = vperm.slane %v18779_v5, 1  ;;  %v24872_v27 = vld [vmem:[#allocation27_spill] sm:$0xff]  ;;  %v11194_v19 = vor.u32 %v19253_v60, %v19258_v21  ;;  %4817 = vmatpush.bf16.msrb.mxu1 %v11258_v10 }
 0x42e   :  { %v5299_v8 = vmul.f32 %v19102_v24, %v5298_v12  ;;  %v19280_v50 = vadd.f32 %v4397_v54, %v24872_v27  ;;  %4644 = vmatpush.bf16.msrb.mxu3 %v11730_v18  ;;  %v24873_v35 = vsub.f32 %v18893_v11, %v18968_v47  ;;  %v24875_v16 = vsub.f32 %v24848_v51, %v18968_v47 }
 0x42f   :  { %v4929_v48 = vadd.f32 %v4928_v42, %v19244_v25  ;;  %v5046_v61 = vmul.f32 %v19244_v25, %v19244_v25  ;;  %v19282_v42 = vpop.f32.mrf.mxu0  ;;  %4730 = vmatpush.bf16.msra.mxu2 %v11510_v22  ;;  %v24876_v18 = vsub.f32 %v24850_v40, %v18968_v47  ;;  %v24877_v11 = vsub.f32 %v24851_v59, %v18968_v47 }
 0x430   :  { %v5303_v14 = vsel %vm5302_vm0, %v19102_v24, %v5299_v8  ;;  %v24874_v24 = vsub.f32 %v18928_v39, %v18968_v47  ;;  %v24878_v39 = vsub.f32 %v24852_v46, %v18968_v47  ;;  %8524 = vmatpush.bf16.msra.mxu0 %v11986_v37 }
 0x431   :  { %v5413_v4 = vmul.f32 %v5303_v14, %v24873_v35  ;;  %v5105_v5 = vadd.f32 %v5104_v17, %v5046_v61  ;;  %v5365_v12 = vmul.f32 %v5303_v14, %v24875_v16  ;;  %v4486_v29 = vpop.f32.mrf.mxu1  ;;  %v5373_v2 = vmul.f32 %v5303_v14, %v24876_v18  ;;  %4818 = vmatpush.bf16.msrb.mxu1 %v11226_v32 }
 0x432   :  { %v5421_v36 = vmul.f32 %v5303_v14, %v24874_v24  ;;  %v5381_v23 = vmul.f32 %v5303_v14, %v24877_v11  ;;  %v5389_v62 = vmul.f32 %v5303_v14, %v24878_v39  ;;  %v24879_v17 = vsub.f32 %v18783_v34, %v18968_v47  ;;  %4645 = vmatpush.bf16.msrb.mxu3 %v11698_v7 }
 0x433   :  { %v5495_v51 = vmul.f32 %v19199_v49, %v5413_v4  ;;  %v19310_v60 = vadd.f32 %v4486_v29, %v18851_v33  ;;  %v5447_v40 = vmul.f32 %v19199_v49, %v5365_v12  ;;  %v5455_v59 = vmul.f32 %v19199_v49, %v5373_v2  ;;  %4731 = vmatpush.bf16.msra.mxu2 %v11478_v52 }
 0x434   :  { %v5397_v22 = vmul.f32 %v5303_v14, %v24879_v17  ;;  %v5503_v10 = vmul.f32 %v19199_v49, %v5421_v36  ;;  %v4312_v21 = vpop.f32.mrf.mxu3  ;;  %v5463_v46 = vmul.f32 %v19199_v49, %v5381_v23  ;;  %v5471_v8 = vmul.f32 %v19199_v49, %v5389_v62 }
 0x435   :  { %24880 = vst [vmem:[#allocation26_spill] sm:$0xff] %v19310_v60  ;;  %v5577_v34 = vadd.f32 %v19277_v26, %v5495_v51  ;;  %v19319_v54 = vadd.f32 %v4312_v21, %v18872_v43  ;;  %v5529_v33 = vadd.f32 %v19277_v26, %v5447_v40  ;;  %v5537_v7 = vadd.f32 %v19277_v26, %v5455_v59  ;;  %v4399_v52 = vpop.f32.mrf.mxu2  ;;  %v14104_v21 = vld [vmem:[%s24620_s12 + $0x88] sm:$0xf0] }
 0x436   :  { %v5585_v61 = vadd.f32 %v19277_v26, %v5503_v10  ;;  %v5545_v37 = vadd.f32 %v19277_v26, %v5463_v46  ;;  %v5553_v27 = vadd.f32 %v19277_v26, %v5471_v8  ;;  %v24881_v35 = vsub.f32 %v18859_v44, %v18968_v47  ;;  %4646 = vmatpush.bf16.msrb.mxu3 %v11666_v13 }
 0x437   :  { %v5641_v24 = vmax.f32 %v5577_v34, 0.0  ;;  %v4930_v16 = vadd.f32 %v4929_v48, %v19319_v54  ;;  %v5054_v43 = vmul.f32 %v19319_v54, %v19319_v54  ;;  %v19332_v32 = vadd.f32 %v4399_v52, %v18848_v28  ;;  %4732 = vmatpush.bf16.msra.mxu2 %v11446_v9  ;;  %v19338_v48 = vpop.f32.mrf.mxu0  ;;  %4819 = vmatpush.bf16.msrb.mxu1 %v11194_v19  ;;  %v13898_v34 = vld [vmem:[%s24617_s9 + $0x21c] sm:$0xf] }
 0x438   :  { %v5405_v4 = vmul.f32 %v5303_v14, %v24881_v35  ;;  %v5649_v36 = vmax.f32 %v5585_v61, 0.0  ;;  %v5593_v12 = vmax.f32 %v5529_v33, 0.0  ;;  %v5601_v29 = vmax.f32 %v5537_v7, 0.0  ;;  %4720 = vmatmul.bf16.gmra.mxu1 %v16867_v58  ;;  %v11929_v35 = vld [vmem:[%s24620_s12 + $0x38] sm:$0xf] }
 0x439   :  { %v5609_v18 = vmax.f32 %v5545_v37, 0.0  ;;  %v5106_v11 = vadd.f32 %v5105_v5, %v5054_v43  ;;  %4546 = vmatmul.bf16.gmra.mxu3 %v17645_v53  ;;  %v5617_v44 = vmax.f32 %v5553_v27, 0.0  ;;  %v5479_v47 = vmul.f32 %v19199_v49, %v5397_v22  ;;  %v4489_v14 = vpop.f32.mrf.mxu1 }
 0x43a   :  { %v19334_v2 = vpack.c.bf16 %v5649_v36, %v5641_v24  ;;  %v19340_v23 = vpack.c.bf16 %v5601_v29, %v5593_v12  ;;  %v5487_v28 = vmul.f32 %v19199_v49, %v5405_v4  ;;  %v19344_v13 = vadd.f32 %v4489_v14, %v18888_v20  ;;  %4633 = vmatmul.bf16.gmra.mxu2 %v17238_v6  ;;  %v14097_v4 = vld [vmem:[%s24620_s12 + $0x50] sm:$0xf0]  ;;  %v11901_v29 = vld [vmem:[%s24620_s12] sm:$0xf] }
 0x43b   :  { %v19346_v39 = vpack.c.bf16 %v5617_v44, %v5609_v18  ;;  %v5561_v5 = vadd.f32 %v19277_v26, %v5479_v47  ;;  %v11930_v24 = vor.u32 %v14097_v4, %v11929_v35  ;;  %v14090_v18 = vld [vmem:[%s24620_s12 + $0x18] sm:$0xf0] }
 0x43c   :  { %24882 = vst [vmem:[#allocation23_spill] sm:$0xff] %v19334_v2  ;;  %v4315_v9 = vpop.f32.mrf.mxu3  ;;  %v5569_v62 = vadd.f32 %v19277_v26, %v5487_v28  ;;  %v11902_v44 = vor.u32 %v14090_v18, %v11901_v29  ;;  %v24895_v29 = vld [vmem:[#allocation7_spill] sm:$0xff] }
 0x43d   :  { %24883 = vst [vmem:[#allocation27_spill] sm:$0xff] %v19340_v23  ;;  %v19353_v19 = vadd.f32 %v4315_v9, %v18900_v57  ;;  %v5625_v17 = vmax.f32 %v5561_v5, 0.0  ;;  %v4402_v51 = vpop.f32.mrf.mxu2  ;;  %4807 = vmatmul.bf16.gmra.mxu0 %v16616_v1  ;;  %v11957_v57 = vld [vmem:[%s24620_s12 + $0x70] sm:$0xf]  ;;  %v11413_v1 = vld [vmem:[%s24617_s9 + $0x418] sm:$0xf] }
 0x43e   :  { %24884 = vst [vmem:[#allocation33_spill] sm:$0xff] %v19344_v13  ;;  %v5633_v22 = vmax.f32 %v5569_v62, 0.0  ;;  %v19360_v10 = vadd.f32 %v4402_v51, %v18882_v15  ;;  %v11958_v46 = vor.u32 %v14104_v21, %v11957_v57  ;;  %v13966_v15 = vld [vmem:[%s24617_s9 + $0x434] sm:$0xf0]  ;;  %v24889_v62 = vld [vmem:[#allocation5_spill] sm:$0xff] }
 0x43f   :  { %24885 = vst [vmem:[#allocation34_spill] sm:$0xff] %v19346_v39  ;;  %v4931_v49 = vadd.f32 %v4930_v16, %v19353_v19  ;;  %v5062_v20 = vmul.f32 %v19353_v19, %v19353_v19  ;;  %v19382_v61 = vpop.f32.mrf.mxu0  ;;  %v11414_v7 = vor.u32 %v13966_v15, %v11413_v1  ;;  %v24891_v1 = vld [vmem:[#allocation16_spill] sm:$0xff] }
 0x440   :  { %v19362_v40 = vpack.c.bf16 %v5633_v22, %v5625_v17  ;;  %8525 = vmatpush.bf16.msra.mxu0 %v11958_v46  ;;  %v19612_v13 = vld [vmem:[%s24617_s9 + $0x49c] sm:$0xf] }
 0x441   :  { %v5107_v26 = vadd.f32 %v5106_v11, %v5062_v20  ;;  %v4491_v59 = vpop.f32.mrf.mxu1  ;;  %4733 = vmatpush.bf16.msra.mxu2 %v11414_v7  ;;  %v24893_v7 = vld [vmem:[#allocation12_spill] sm:$0xff] }
 0x442   :  { %24886 = vst [vmem:[#allocation35_spill] sm:$0xff] %v19362_v40  ;;  %v19371_v8 = vadd.f32 %v4491_v59, %v18922_v63  ;;  %v11159_v63 = vld [vmem:[%s24617_s9 + $0x238] sm:$0xf0] }
 0x443   :  { %v11162_v27 = vor.u32 %v13898_v34, %v11159_v63 }
 0x444   :  { %24887 = vst [vmem:[#allocation36_spill] sm:$0xff] %v19371_v8  ;;  %v4317_v33 = vpop.f32.mrf.mxu3  ;;  %8526 = vmatpush.bf16.msra.mxu0 %v11930_v24 }
 0x445   :  { %v19388_v37 = vadd.f32 %v4317_v33, %v18940_v45  ;;  %v4404_v43 = vpop.f32.mrf.mxu2  ;;  %4820 = vmatpush.bf16.msrb.mxu1 %v11162_v27 }
 0x446   :  { %v19400_v45 = vadd.f32 %v4404_v43, %v18911_v3 }
 0x447   :  { %v4932_v36 = vadd.f32 %v4931_v49, %v19388_v37  ;;  %v5070_v16 = vmul.f32 %v19388_v37, %v19388_v37  ;;  %v19417_v22 = vpop.f32.mrf.mxu0 }
 0x448   :  { %8527 = vmatpush.bf16.msra.mxu0 %v11902_v44  ;;  %4821 = vmatmul.bf16.vlgmr.msrb.gmra.mxu1 %v24836_v55  ;;  %v11893_v44 = vld [vmem:[%s24617_s9 + $0x7d8] sm:$0xf] }
 0x449   :  { %v4933_v52 = vrot.slane %v4932_v36, 4  ;;  %v5108_v12 = vadd.f32 %v5107_v26, %v5070_v16  ;;  %4647 = vmatmul.bf16.vlgmr.msrb.gmra.mxu3 %v17647_v0  ;;  %v4590_v11 = vpop.f32.mrf.mxu1  ;;  %v24890_v26 = vld [vmem:[#allocation29_spill] sm:$0xff] }
 0x44a   :  { %v19410_v3 = vadd.f32 %v4590_v11, %v18953_v56  ;;  %4734 = vmatmul.bf16.vlgmr.msra.gmra.mxu2 %v17245_v30 }
 0x44b   :  { %v4934_v47 = vadd.f32 %v4933_v52, %v4932_v36  ;;  %v5109_v14 = vrot.slane %v5108_v12, 4 }
 0x44c   :  { %24888 = vst [vmem:[#allocation37_spill] sm:$0xff] %v19410_v3  ;;  %v4416_v28 = vpop.f32.mrf.mxu3  ;;  %v24910_v3 = vld [vmem:[#allocation14_spill] sm:$0xff] }
 0x44d   :  { %v4935_v5 = vrot.slane %v4934_v47, 2  ;;  %v5110_v9 = vadd.f32 %v5109_v14, %v5108_v12  ;;  %v19415_v17 = vadd.f32 %v4416_v28, %v24889_v62  ;;  %v19419_v51 = vpop.f32.mrf.mxu2  ;;  %8528 = vmatmul.bf16.vlgmr.msra.gmra.mxu0 %v24890_v26  ;;  %v11861_v14 = vld [vmem:[%s24617_s9 + $0x798] sm:$0xf]  ;;  %v24896_v28 = vld [vmem:[#allocation10_spill] sm:$0xff]  ;;  %v24898_v62 = vld [vmem:[#allocation21_spill] sm:$0xff] }
 0x44f   :  { %v4936_v49 = vadd.f32 %v4935_v5, %v4934_v47  ;;  %v5111_v20 = vrot.slane %v5110_v9, 2  ;;  %v5015_v16 = vmul.f32 %v19415_v17, %v19415_v17  ;;  %v19440_v43 = vpop.f32.mrf.mxu0  ;;  %v14086_v47 = vld [vmem:[%s24617_s9 + $0x7f4] sm:$0xf0]  ;;  %v24897_v5 = vld [vmem:[#allocation18_spill] sm:$0xff] }
 0x450   :  { %24894 = vst [vmem:[#allocation16_spill] sm:$0xff] %v19440_v43  ;;  %v14002_v43 = vld [vmem:[%s24617_s9 + $0x55c] sm:$0xf] }
 0x451   :  { %v4937_v56 = vrot.slane %v4936_v49, 1  ;;  %v5112_v57 = vadd.f32 %v5111_v20, %v5110_v9  ;;  %v4592_v21 = vpop.f32.mrf.mxu1  ;;  %v24899_v20 = vld [vmem:[#allocation22_spill] sm:$0xff] }
 0x452   :  { %v19423_v15 = vadd.f32 %v4592_v21, %v24891_v1  ;;  %v14078_v21 = vld [vmem:[%s24617_s9 + $0x7b4] sm:$0xf0]  ;;  %v14195_v1 = vld [vmem:[%s24620_s12 + $0x360] sm:$0xf0]  ;;  %v14188_v9 = vld [vmem:[%s24620_s12 + $0x328] sm:$0xf0] }
 0x453   :  { %v4938_v59 = vadd.f32 %v4937_v56, %v4936_v49  ;;  %v5113_v46 = vrot.slane %v5112_v57, 1  ;;  %v24902_v56 = vld [vmem:[#allocation9_spill] sm:$0xff]  ;;  %v12293_v49 = vld [vmem:[%s24620_s12 + $0x310] sm:$0xf] }
 0x454   :  { %24892 = vst [vmem:[#allocation5_spill] sm:$0xff] %v19423_v15  ;;  %v4418_v55 = vpop.f32.mrf.mxu3 }
 0x455   :  { %v19425_v34 = vmul.f32 0.015625, %v4938_v59  ;;  %v5114_v33 = vadd.f32 %v5113_v46, %v5112_v57  ;;  %v19428_v63 = vadd.f32 %v4418_v55, %v24893_v7  ;;  %v19436_v36 = vpop.f32.mrf.mxu2  ;;  %v11894_v57 = vor.u32 %v14086_v47, %v11893_v44  ;;  %v24900_v7 = vld [vmem:[#allocation17_spill] sm:$0xff]  ;;  %v11829_v44 = vld [vmem:[%s24617_s9 + $0x758] sm:$0xf] }
 0x457   :  { %v5182_v27 = vmul.f32 0.015625, %v5114_v33  ;;  %v5190_v35 = vmul.f32 %v19425_v34, %v19425_v34  ;;  %v4939_v52 = vadd.f32 %v19428_v63, %v19415_v17  ;;  %v5023_v12 = vmul.f32 %v19428_v63, %v19428_v63  ;;  %4755 = vmatpush.bf16.msra.mxu3 %v11894_v57 }
 0x459   :  { %v5198_v11 = vsub.f32 %v5182_v27, %v5190_v35  ;;  %4652 = vmatmul.bf16.gmra.mxu3 %v24896_v28  ;;  %v5115_v59 = vadd.f32 %v5023_v12, %v5015_v16  ;;  %v4595_v46 = vpop.f32.mrf.mxu1  ;;  %v11862_v35 = vor.u32 %v14078_v21, %v11861_v14  ;;  %v14070_v16 = vld [vmem:[%s24617_s9 + $0x774] sm:$0xf0]  ;;  %v24904_v14 = vld [vmem:[#allocation25_spill] sm:$0xff]  ;;  %v11639_v21 = vld [vmem:[%s24617_s9 + $0x5f8] sm:$0xf0] }
 0x45a   :  { %v19472_v27 = vadd.f32 %v4595_v46, %v24900_v7  ;;  %4739 = vmatmul.bf16.gmra.mxu2 %v24902_v56  ;;  %v24903_v46 = vld [vmem:[#allocation8_spill] sm:$0xff]  ;;  %v12321_v7 = vld [vmem:[%s24620_s12 + $0x348] sm:$0xf]  ;;  %v11830_v18 = vor.u32 %v14070_v16, %v11829_v44  ;;  %v19530_v44 = vpop.f32.mrf.mxu0 }
 0x45b   :  { %v5206_v33 = vmax.f32 %v5198_v11, 0.0  ;;  %v14018_v11 = vld [vmem:[%s24617_s9 + $0x5dc] sm:$0xf]  ;;  %4826 = vmatmul.bf16.gmra.mxu1 %v24903_v46  ;;  %4756 = vmatpush.bf16.msra.mxu3 %v11862_v35  ;;  %v12322_v24 = vor.u32 %v14195_v1, %v12321_v7  ;;  %24906 = vst [vmem:[#allocation7_spill] sm:$0xff] %v19530_v44  ;;  %v24907_v1 = vld [vmem:[#allocation6_spill] sm:$0xff] }
 0x45c   :  { %24901 = vst [vmem:[#allocation12_spill] sm:$0xff] %v19472_v27  ;;  %v4421_v12 = vpop.f32.mrf.mxu3  ;;  %v11642_v55 = vor.u32 %v14018_v11, %v11639_v21  ;;  %v24905_v21 = vld [vmem:[#allocation30_spill] sm:$0xff]  ;;  %v11575_v35 = vld [vmem:[%s24617_s9 + $0x578] sm:$0xf0] }
 0x45d   :  { %v19484_v47 = vadd.f32 1e-05, %v5206_v33  ;;  %v19488_v57 = vadd.f32 %v4421_v12, %v24904_v14  ;;  %v14010_v33 = vld [vmem:[%s24617_s9 + $0x59c] sm:$0xf]  ;;  %v19509_v11 = vpop.f32.mrf.mxu2  ;;  %8533 = vmatmul.bf16.gmra.mxu0 %v24905_v21  ;;  %v14062_v21 = vld [vmem:[%s24617_s9 + $0x734] sm:$0xf0]  ;;  %8549 = vmatpush.bf16.msra.mxu1 %v12322_v24  ;;  %v11578_v27 = vor.u32 %v14002_v43, %v11575_v35 }
 0x45e   :  { %v11607_v12 = vld [vmem:[%s24617_s9 + $0x5b8] sm:$0xf0]  ;;  %4842 = vmatpush.bf16.msrb.mxu2 %v11642_v55  ;;  %v12294_v55 = vor.u32 %v14188_v9, %v12293_v49  ;;  %v24909_v24 = vld [vmem:[#allocation19_spill] sm:$0xff]  ;;  %v11765_v49 = vld [vmem:[%s24617_s9 + $0x6d8] sm:$0xf] }
 0x45f   :  { %14558 = vrsqrt.f32 %v19484_v47  ;;  %v4940_v46 = vadd.f32 %v4939_v52, %v19488_v57  ;;  %v5031_v14 = vmul.f32 %v19488_v57, %v19488_v57  ;;  %v11797_v52 = vld [vmem:[%s24617_s9 + $0x718] sm:$0xf]  ;;  %v11610_v4 = vor.u32 %v14010_v33, %v11607_v12  ;;  %v14181_v33 = vld [vmem:[%s24620_s12 + $0x2f0] sm:$0xf0]  ;;  %4757 = vmatpush.bf16.msra.mxu3 %v11830_v18  ;;  %v11543_v43 = vld [vmem:[%s24617_s9 + $0x538] sm:$0xf0] }
 0x460   :  { %v11798_v12 = vor.u32 %v14062_v21, %v11797_v52  ;;  %vm5310_vm2 = vweird.f32 %v19484_v47 }
 0x461   :  { %v5116_v26 = vadd.f32 %v5115_v59, %v5031_v14  ;;  %v4597_v16 = vpop.f32.mrf.mxu1  ;;  %v12265_v59 = vld [vmem:[%s24620_s12 + $0x2d8] sm:$0xf]  ;;  %8550 = vmatpush.bf16.msra.mxu1 %v12294_v55  ;;  %v12237_v55 = vld [vmem:[%s24620_s12 + $0x2a0] sm:$0xf] }
 0x462   :  { %v19533_v7 = vadd.f32 %v4597_v16, %v24907_v1  ;;  %4843 = vmatpush.bf16.msrb.mxu2 %v11610_v4  ;;  %v14054_v16 = vld [vmem:[%s24617_s9 + $0x6f4] sm:$0xf0]  ;;  %v12266_v21 = vor.u32 %v14181_v33, %v12265_v59  ;;  %v13994_v4 = vld [vmem:[%s24617_s9 + $0x51c] sm:$0xf] }
 0x463   :  { %v14174_v59 = vld [vmem:[%s24620_s12 + $0x2b8] sm:$0xf0]  ;;  %4758 = vmatpush.bf16.msra.mxu3 %v11798_v12  ;;  %v11546_v8 = vor.u32 %v13994_v4, %v11543_v43  ;;  %v19585_v12 = vld [vmem:[%s24617_s9 + $0x658] sm:$0xf]  ;;  %v19604_v4 = vld [vmem:[%s24618_s10] sm:$0xff] }
 0x464   :  { %24908 = vst [vmem:[#allocation10_spill] sm:$0xff] %v19533_v7  ;;  %v4423_v14 = vpop.f32.mrf.mxu3  ;;  %v13986_v7 = vld [vmem:[%s24617_s9 + $0x4dc] sm:$0xf]  ;;  %v19607_v43 = vperm.slane %v19604_v4, 2  ;;  %v12238_v2 = vor.u32 %v14174_v59, %v12237_v55  ;;  %v19635_v55 = vld [vmem:[%s24617_s9 + $0x618] sm:$0xf] }
 0x465   :  { %v19541_v44 = vpop.eup %14558  ;;  %v19544_v9 = vadd.f32 %v4423_v14, %v24909_v24  ;;  %v19563_v1 = vpop.f32.mrf.mxu2  ;;  %v11766_v14 = vor.u32 %v14054_v16, %v11765_v49  ;;  %v14046_v24 = vld [vmem:[%s24617_s9 + $0x6b4] sm:$0xf0]  ;;  %v14167_v16 = vld [vmem:[%s24620_s12 + $0x280] sm:$0xf0]  ;;  %24911 = vst [vmem:[#allocation18_spill] sm:$0xff] %v19604_v4  ;;  %8551 = vmatpush.bf16.msra.mxu1 %v12266_v21 }
 0x466   :  { %v5305_v18 = vmul.f32 %v19541_v44, %v19484_v47  ;;  %4844 = vmatpush.bf16.msrb.mxu2 %v11578_v27  ;;  %v19590_v49 = vld [vmem:[%s24617_s9 + $0x674] sm:$0xf0]  ;;  %v11511_v27 = vld [vmem:[%s24617_s9 + $0x4f8] sm:$0xf0]  ;;  %v19625_v4 = vld [vmem:[%s24620_s12 + $0x230] sm:$0xf]  ;;  %vm5311_vm1 = vweird.f32 %v19541_v44 }
 0x467   :  { %v4941_v52 = vadd.f32 %v4940_v46, %v19544_v9  ;;  %v5039_v35 = vmul.f32 %v19544_v9, %v19544_v9  ;;  %v11733_v46 = vld [vmem:[%s24617_s9 + $0x698] sm:$0xf]  ;;  %v19630_v21 = vld [vmem:[%s24620_s12 + $0x248] sm:$0xf0]  ;;  %4759 = vmatpush.bf16.msra.mxu3 %v11766_v14  ;;  %v19666_v14 = vld [vmem:[%s24617_s9 + $0x478] sm:$0xf0] }
 0x468   :  { %v5306_v33 = vmul.f32 %v19541_v44, %v5305_v18  ;;  %v11734_v31 = vor.u32 %v14046_v24, %v11733_v46  ;;  %v19671_v46 = vld [vmem:[%s24620_s12 + $0x1f8] sm:$0xf]  ;;  %v19676_v24 = vld [vmem:[%s24620_s12 + $0x210] sm:$0xf0]  ;;  %vm5312_vm3 = vmor %vm5310_vm2, %vm5311_vm1 }
 0x469   :  { %v5117_v15 = vadd.f32 %v5116_v26, %v5039_v35  ;;  %4657 = vmatmul.bf16.gmra.mxu3 %v24910_v3  ;;  %v12209_v26 = vld [vmem:[%s24620_s12 + $0x268] sm:$0xf]  ;;  %v4600_v35 = vpop.f32.mrf.mxu1  ;;  %v19657_v3 = vld [vmem:[%s24617_s9 + $0x45c] sm:$0xf]  ;;  %8552 = vmatpush.bf16.msra.mxu1 %v12238_v2  ;;  %v12182_v2 = vor.u32 %v19630_v21, %v19625_v4 }
 0x46a   :  { %v5307_v18 = vmul.f32 0.5, %v5306_v33  ;;  %v19617_v33 = vld [vmem:[%s24617_s9 + $0x4b8] sm:$0xf0]  ;;  %v19620_v60 = vadd.f32 %v4600_v35, %v19282_v42  ;;  %v19641_v42 = vld [vmem:[%s24619_s11] sm:$0xff]  ;;  %4744 = vmatmul.bf16.gmra.mxu2 %v17271_v38  ;;  %v24915_v38 = vld [vmem:[#allocation31_spill] sm:$0xff] }
 0x46b   :  { %24913 = vst [vmem:[#allocation22_spill] sm:$0xff] %v19641_v42  ;;  %v19644_v35 = vperm.slane %v19641_v42, 2  ;;  %4831 = vmatmul.bf16.gmra.mxu1 %v16919_v41  ;;  %4845 = vmatpush.bf16.msrb.mxu2 %v11546_v8  ;;  %v11482_v47 = vor.u32 %v19612_v13, %v19617_v33  ;;  %v24917_v13 = vsub.f32 %v19388_v37, %v19425_v34 }
 0x46c   :  { %24912 = vst [vmem:[#allocation21_spill] sm:$0xff] %v19620_v60  ;;  %v5308_v59 = vsub.f32 1.5, %v5307_v18  ;;  %v19646_v60 = vpop.f32.mrf.mxu0  ;;  %v4426_v40 = vpop.f32.mrf.mxu3  ;;  %v19652_v18 = vld [vmem:[%s24617_s9 + $0x634] sm:$0xf0]  ;;  %4760 = vmatpush.bf16.msra.mxu3 %v11734_v31  ;;  %v24918_v31 = vsub.f32 %v24895_v29, %v19425_v34  ;;  %v24921_v37 = vsub.f32 %v24899_v20, %v19425_v34 }
 0x46d   :  { %24914 = vst [vmem:[#allocation17_spill] sm:$0xff] %v19646_v60  ;;  %v19661_v42 = vadd.f32 %v4426_v40, %v19280_v50  ;;  %v11514_v60 = vor.u32 %v13986_v7, %v11511_v27  ;;  %v11702_v50 = vor.u32 %v19590_v49, %v19585_v12  ;;  %v12210_v40 = vor.u32 %v14167_v16, %v12209_v26  ;;  %v19687_v27 = vpop.f32.mrf.mxu2 }
 0x46e   :  { %v5309_v41 = vmul.f32 %v19541_v44, %v5308_v59  ;;  %8538 = vmatmul.bf16.gmra.mxu0 %v24915_v38  ;;  %v11670_v49 = vor.u32 %v19652_v18, %v19635_v55  ;;  %v12154_v26 = vor.u32 %v19676_v24, %v19671_v46  ;;  %v24916_v16 = vsub.f32 %v19353_v19, %v19425_v34 }
 0x46f   :  { %v4942_v8 = vadd.f32 %v4941_v52, %v19661_v42  ;;  %v5047_v7 = vmul.f32 %v19661_v42, %v19661_v42  ;;  %v11450_v52 = vor.u32 %v19657_v3, %v19666_v14  ;;  %4846 = vmatpush.bf16.msrb.mxu2 %v11514_v60  ;;  %8553 = vmatpush.bf16.msra.mxu1 %v12210_v40 }
 0x470   :  { %v5313_v12 = vsel %vm5312_vm3, %v19541_v44, %v5309_v41  ;;  %v24919_v3 = vsub.f32 %v24897_v5, %v19425_v34  ;;  %v24920_v19 = vsub.f32 %v24898_v62, %v19425_v34  ;;  %v24922_v60 = vsub.f32 %v19244_v25, %v19425_v34  ;;  %4761 = vmatpush.bf16.msra.mxu3 %v11702_v50 }
 0x471   :  { %v5414_v59 = vmul.f32 %v5313_v12, %v24916_v16  ;;  %v5422_v4 = vmul.f32 %v5313_v12, %v24917_v13  ;;  %v5118_v33 = vadd.f32 %v5117_v15, %v5047_v7  ;;  %v5366_v44 = vmul.f32 %v5313_v12, %v24918_v31  ;;  %v4602_v21 = vpop.f32.mrf.mxu1 }
 0x472   :  { %v5374_v55 = vmul.f32 %v5313_v12, %v24919_v3  ;;  %v5382_v18 = vmul.f32 %v5313_v12, %v24920_v19  ;;  %v5390_v14 = vmul.f32 %v5313_v12, %v24921_v37  ;;  %v5398_v15 = vmul.f32 %v5313_v12, %v24922_v60 }
 0x473   :  { %v5496_v29 = vmul.f32 %v19607_v43, %v5414_v59  ;;  %v5504_v46 = vmul.f32 %v19607_v43, %v5422_v4  ;;  %v19725_v24 = vadd.f32 %v4602_v21, %v19338_v48  ;;  %v5448_v5 = vmul.f32 %v19607_v43, %v5366_v44  ;;  %4847 = vmatpush.bf16.msrb.mxu2 %v11482_v47 }
 0x474   :  { %v4428_v41 = vpop.f32.mrf.mxu3  ;;  %v5456_v62 = vmul.f32 %v19607_v43, %v5374_v55  ;;  %v5464_v20 = vmul.f32 %v19607_v43, %v5382_v18  ;;  %v5472_v40 = vmul.f32 %v19607_v43, %v5390_v14  ;;  %v24923_v25 = vsub.f32 %v19319_v54, %v19425_v34  ;;  %v19740_v13 = vpop.f32.mrf.mxu0  ;;  %8554 = vmatpush.bf16.msra.mxu1 %v12182_v2 }
 0x475   :  { %v5578_v16 = vadd.f32 %v19644_v35, %v5496_v29  ;;  %v5586_v59 = vadd.f32 %v19644_v35, %v5504_v46  ;;  %v19737_v48 = vadd.f32 %v4428_v41, %v19332_v32  ;;  %v5530_v50 = vadd.f32 %v19644_v35, %v5448_v5  ;;  %24924 = vst [vmem:[#allocation9_spill] sm:$0xff] %v19740_v13  ;;  %v19749_v47 = vpop.f32.mrf.mxu2 }
 0x476   :  { %v5406_v7 = vmul.f32 %v5313_v12, %v24923_v25  ;;  %v5538_v4 = vadd.f32 %v19644_v35, %v5456_v62  ;;  %v5546_v31 = vadd.f32 %v19644_v35, %v5464_v20  ;;  %v5554_v54 = vadd.f32 %v19644_v35, %v5472_v40  ;;  %4762 = vmatpush.bf16.msra.mxu3 %v11670_v49  ;;  %v24928_v62 = vld [vmem:[#allocation28_spill] sm:$0xff] }
 0x477   :  { %v5480_v34 = vmul.f32 %v19607_v43, %v5398_v15  ;;  %v5642_v12 = vmax.f32 %v5578_v16, 0.0  ;;  %v5650_v44 = vmax.f32 %v5586_v59, 0.0  ;;  %v4943_v21 = vadd.f32 %v4942_v8, %v19737_v48  ;;  %4848 = vmatpush.bf16.msrb.mxu2 %v11450_v52  ;;  %v12125_v16 = vld [vmem:[%s24620_s12 + $0x1c0] sm:$0xf] }
 0x478   :  { %v5055_v32 = vmul.f32 %v19737_v48, %v19737_v48  ;;  %v5594_v3 = vmax.f32 %v5530_v50, 0.0  ;;  %v5602_v2 = vmax.f32 %v5538_v4, 0.0  ;;  %v5610_v55 = vmax.f32 %v5546_v31, 0.0  ;;  %8555 = vmatpush.bf16.msra.mxu1 %v12154_v26  ;;  %v14146_v4 = vld [vmem:[%s24620_s12 + $0x1d8] sm:$0xf0] }
 0x479   :  { %v19751_v19 = vpack.c.bf16 %v5650_v44, %v5642_v12  ;;  %4662 = vmatmul.bf16.gmra.mxu3 %v17645_v53  ;;  %v5618_v37 = vmax.f32 %v5554_v54, 0.0  ;;  %v5488_v14 = vmul.f32 %v19607_v43, %v5406_v7  ;;  %v4605_v60 = vpop.f32.mrf.mxu1  ;;  %v5562_v15 = vadd.f32 %v19644_v35, %v5480_v34  ;;  %v11415_v7 = vld [vmem:[%s24617_s9 + $0x438] sm:$0xf0] }
 0x47a   :  { %v5119_v18 = vadd.f32 %v5118_v33, %v5055_v32  ;;  %v19755_v8 = vpack.c.bf16 %v5602_v2, %v5594_v3  ;;  %v19759_v49 = vadd.f32 %v4605_v60, %v19382_v61  ;;  %4749 = vmatmul.bf16.gmra.mxu2 %v17238_v6  ;;  %v12126_v31 = vor.u32 %v14146_v4, %v12125_v16 }
 0x47b   :  { %24925 = vst [vmem:[#allocation8_spill] sm:$0xff] %v19751_v19  ;;  %v19761_v29 = vpack.c.bf16 %v5618_v37, %v5610_v55  ;;  %v5570_v46 = vadd.f32 %v19644_v35, %v5488_v14  ;;  %v5626_v52 = vmax.f32 %v5562_v15, 0.0  ;;  %4836 = vmatmul.bf16.gmra.mxu1 %v16867_v58  ;;  %vm10235_vm3 = vcmask 125952  }
 0x47c   :  { %24926 = vst [vmem:[#allocation25_spill] sm:$0xff] %v19755_v8  ;;  %v4431_v33 = vpop.f32.mrf.mxu3  ;;  %v19777_v20 = vpop.f32.mrf.mxu0  ;;  %8556 = vmatpush.bf16.msra.mxu1 %v12126_v31 }
 0x47d   :  { %24927 = vst [vmem:[#allocation6_spill] sm:$0xff] %v19761_v29  ;;  %v19767_v43 = vadd.f32 %v4431_v33, %v19360_v10  ;;  %v5634_v26 = vmax.f32 %v5570_v46, 0.0  ;;  %v19772_v41 = vpop.f32.mrf.mxu2  ;;  %v13962_v10 = vld [vmem:[%s24617_s9 + $0x41c] sm:$0xf] }
 0x47e   :  { %8543 = vmatmul.bf16.gmra.mxu0 %v24928_v62  ;;  %24930 = vst [vmem:[#allocation38_spill] sm:$0xff] %v19777_v20  ;;  %v11418_v50 = vor.u32 %v13962_v10, %v11415_v7 }
 0x47f   :  { %v4944_v5 = vadd.f32 %v4943_v21, %v19767_v43  ;;  %v5063_v61 = vmul.f32 %v19767_v43, %v19767_v43  ;;  %v19775_v35 = vpack.c.bf16 %v5634_v26, %v5626_v52  ;;  %v24932_v52 = vld [vmem:[#allocation32_spill] sm:$0xff] }
 0x480   :  { %4849 = vmatpush.bf16.msrb.mxu2 %v11418_v50  ;;  %v4504_v26 = vadd.f32 %v19419_v51, %v24932_v52 }
 0x481   :  { %24929 = vst [vmem:[#allocation19_spill] sm:$0xff] %v19775_v35  ;;  %v5120_v40 = vadd.f32 %v5119_v18, %v5063_v61  ;;  %v4607_v25 = vpop.f32.mrf.mxu1  ;;  %v24933_v61 = vld [vmem:[#allocation11_spill] sm:$0xff] }
 0x482   :  { %v19780_v58 = vadd.f32 %v4607_v25, %v19417_v22 }
 0x484   :  { %v4433_v59 = vpop.f32.mrf.mxu3  ;;  %v19803_v32 = vpop.f32.mrf.mxu0 }
 0x485   :  { %v19795_v22 = vadd.f32 %v4433_v59, %v19400_v45  ;;  %v19800_v12 = vpop.f32.mrf.mxu2  ;;  %24931 = vst [vmem:[#allocation39_spill] sm:$0xff] %v19803_v32 }
 0x487   :  { %v4945_v54 = vadd.f32 %v4944_v5, %v19795_v22  ;;  %v5071_v34 = vmul.f32 %v19795_v22, %v19795_v22 }
 0x489   :  { %v4946_v44 = vrot.slane %v4945_v54, 4  ;;  %v5121_v21 = vadd.f32 %v5120_v40, %v5071_v34  ;;  %4763 = vmatmul.bf16.vlgmr.msra.gmra.mxu3 %v17647_v0  ;;  %v19805_v3 = vpop.f32.mrf.mxu1  ;;  %v4506_v40 = vadd.f32 %v19436_v36, %v24933_v61 }
 0x48a   :  { %4850 = vmatmul.bf16.vlgmr.msrb.gmra.mxu2 %v17245_v30 }
 0x48b   :  { %v4947_v45 = vadd.f32 %v4946_v44, %v4945_v54  ;;  %v5122_v2 = vrot.slane %v5121_v21, 4  ;;  %8557 = vmatmul.bf16.vlgmr.msra.gmra.mxu1 %v19340_v23  ;;  %v14042_v54 = vld [vmem:[%s24617_s9 + $0x69c] sm:$0xf] }
 0x48c   :  { %v4532_v55 = vpop.f32.mrf.mxu3  ;;  %v19817_v10 = vpop.f32.mrf.mxu0 }
 0x48d   :  { %v4948_v18 = vrot.slane %v4947_v45, 2  ;;  %v5123_v37 = vadd.f32 %v5122_v2, %v5121_v21  ;;  %v19809_v15 = vpop.f32.mrf.mxu2  ;;  %24934 = vst [vmem:[#allocation32_spill] sm:$0xff] %v19817_v10  ;;  %v19819_v7 = vadd.f32 %v4532_v55, %v4504_v26  ;;  %v11863_v26 = vld [vmem:[%s24617_s9 + $0x7b8] sm:$0xf0] }
 0x48e   :  { %v11767_v2 = vld [vmem:[%s24617_s9 + $0x6f8] sm:$0xf0] }
 0x48f   :  { %v4949_v14 = vadd.f32 %v4948_v18, %v4947_v45  ;;  %v5124_v60 = vrot.slane %v5123_v37, 2  ;;  %v5016_v44 = vmul.f32 %v19819_v7, %v19819_v7  ;;  %v14082_v18 = vld [vmem:[%s24617_s9 + $0x7dc] sm:$0xf] }
 0x491   :  { %v4950_v46 = vrot.slane %v4949_v14, 1  ;;  %v5125_v33 = vadd.f32 %v5124_v60, %v5123_v37  ;;  %v19813_v5 = vpop.f32.mrf.mxu1  ;;  %v11895_v37 = vld [vmem:[%s24617_s9 + $0x7f8] sm:$0xf0] }
 0x492   :  { %v11898_v52 = vor.u32 %v14082_v18, %v11895_v37  ;;  %v12545_v37 = vld [vmem:[%s24620_s12 + $0x508] sm:$0xf]  ;;  %v14050_v60 = vld [vmem:[%s24617_s9 + $0x6dc] sm:$0xf] }
 0x493   :  { %v4951_v30 = vadd.f32 %v4950_v46, %v4949_v14  ;;  %v5126_v25 = vrot.slane %v5125_v33, 1  ;;  %v14074_v14 = vld [vmem:[%s24617_s9 + $0x79c] sm:$0xf] }
 0x494   :  { %v4534_v16 = vpop.f32.mrf.mxu3  ;;  %4871 = vmatpush.bf16.msrb.mxu3 %v11898_v52 }
 0x495   :  { %v19821_v59 = vmul.f32 0.015625, %v4951_v30  ;;  %v5127_v50 = vadd.f32 %v5126_v25, %v5125_v33  ;;  %v19823_v4 = vadd.f32 %v4534_v16, %v4506_v40  ;;  %v19831_v34 = vpop.f32.mrf.mxu2  ;;  %v24935_v16 = vld [vmem:[#allocation15_spill] sm:$0xff]  ;;  %v14058_v30 = vld [vmem:[%s24617_s9 + $0x71c] sm:$0xf] }
 0x496   :  { %v11799_v33 = vld [vmem:[%s24617_s9 + $0x738] sm:$0xf0] }
 0x497   :  { %v5183_v31 = vmul.f32 0.015625, %v5127_v50  ;;  %v5191_v51 = vmul.f32 %v19821_v59, %v19821_v59  ;;  %v4952_v21 = vadd.f32 %v19823_v4, %v19819_v7  ;;  %v5024_v45 = vmul.f32 %v19823_v4, %v19823_v4 }
 0x498   :  { %v4509_v50 = vadd.f32 %v19509_v11, %v24935_v16 }
 0x499   :  { %v5199_v55 = vsub.f32 %v5183_v31, %v5191_v51  ;;  %4768 = vmatmul.bf16.gmra.mxu3 %v24896_v28  ;;  %v5128_v61 = vadd.f32 %v5024_v45, %v5016_v44  ;;  %v19860_v40 = vpop.f32.mrf.mxu1  ;;  %v11866_v51 = vor.u32 %v14074_v14, %v11863_v26  ;;  %v14066_v44 = vld [vmem:[%s24617_s9 + $0x75c] sm:$0xf]  ;;  %v19889_v14 = vpop.f32.mrf.mxu0  ;;  %v14244_v26 = vld [vmem:[%s24620_s12 + $0x4e8] sm:$0xf0] }
 0x49a   :  { %4855 = vmatmul.bf16.gmra.mxu2 %v24902_v56  ;;  %v11831_v45 = vld [vmem:[%s24617_s9 + $0x778] sm:$0xf0]  ;;  %v14251_v56 = vld [vmem:[%s24620_s12 + $0x520] sm:$0xf0]  ;;  %24936 = vst [vmem:[#allocation11_spill] sm:$0xff] %v19889_v14 }
 0x49b   :  { %v5207_v31 = vmax.f32 %v5199_v55, 0.0  ;;  %8562 = vmatmul.bf16.gmra.mxu1 %v19346_v39  ;;  %v12517_v55 = vld [vmem:[%s24620_s12 + $0x4d0] sm:$0xf]  ;;  %v12546_v52 = vor.u32 %v14251_v56, %v12545_v37  ;;  %4872 = vmatpush.bf16.msrb.mxu3 %v11866_v51  ;;  %v14237_v51 = vld [vmem:[%s24620_s12 + $0x4b0] sm:$0xf0] }
 0x49c   :  { %v4537_v18 = vpop.f32.mrf.mxu3  ;;  %v12518_v37 = vor.u32 %v14244_v26, %v12517_v55  ;;  %v11802_v55 = vor.u32 %v14058_v30, %v11799_v33  ;;  %v14230_v33 = vld [vmem:[%s24620_s12 + $0x478] sm:$0xf0] }
 0x49d   :  { %v19878_v25 = vadd.f32 1e-05, %v5207_v31  ;;  %v19881_v11 = vadd.f32 %v4537_v18, %v4509_v50  ;;  %v19898_v31 = vpop.f32.mrf.mxu2  ;;  %v11834_v18 = vor.u32 %v14066_v44, %v11831_v45  ;;  %8578 = vmatpush.bf16.msra.mxu2 %v12546_v52  ;;  %v24938_v45 = vld [vmem:[#allocation20_spill] sm:$0xff] }
 0x49e   :  { %v4511_v46 = vadd.f32 %v19563_v1, %v24938_v45  ;;  %v12461_v1 = vld [vmem:[%s24620_s12 + $0x460] sm:$0xf] }
 0x49f   :  { %14560 = vrsqrt.f32 %v19878_v25  ;;  %v4953_v16 = vadd.f32 %v4952_v21, %v19881_v11  ;;  %v5032_v50 = vmul.f32 %v19881_v11, %v19881_v11  ;;  %v12489_v21 = vld [vmem:[%s24620_s12 + $0x498] sm:$0xf]  ;;  %4873 = vmatpush.bf16.msrb.mxu3 %v11834_v18  ;;  %v12462_v39 = vor.u32 %v14230_v33, %v12461_v1  ;;  %v24943_v1 = vld [vmem:[#allocation13_spill] sm:$0xff] }
 0x4a0   :  { %v12490_v52 = vor.u32 %v14237_v51, %v12489_v21  ;;  %v11770_v51 = vor.u32 %v14050_v60, %v11767_v2  ;;  %v14223_v2 = vld [vmem:[%s24620_s12 + $0x440] sm:$0xf0]  ;;  %v24942_v60 = vld [vmem:[#allocation24_spill] sm:$0xff]  ;;  %vm5320_vm5 = vweird.f32 %v19878_v25 }
 0x4a1   :  { %v5129_v56 = vadd.f32 %v5128_v61, %v5032_v50  ;;  %v19912_v44 = vpop.f32.mrf.mxu1  ;;  %8579 = vmatpush.bf16.msra.mxu2 %v12518_v37  ;;  %v19936_v21 = vpop.f32.mrf.mxu0 }
 0x4a2   :  { %24937 = vst [vmem:[#allocation15_spill] sm:$0xff] %v19912_v44  ;;  %v24949_v44 = vsub.f32 %v19795_v22, %v19821_v59  ;;  %v24955_v22 = vsub.f32 %v19544_v9, %v19821_v59 }
 0x4a3   :  { %24939 = vst [vmem:[#allocation20_spill] sm:$0xff] %v19936_v21  ;;  %4874 = vmatpush.bf16.msrb.mxu3 %v11802_v55  ;;  %v14034_v55 = vld [vmem:[%s24617_s9 + $0x65c] sm:$0xf]  ;;  %v12405_v21 = vld [vmem:[%s24620_s12 + $0x3f0] sm:$0xf] }
 0x4a4   :  { %v4539_v61 = vpop.f32.mrf.mxu3 }
 0x4a5   :  { %v14561_v26 = vpop.eup %14560  ;;  %v19916_v50 = vadd.f32 %v4539_v61, %v4511_v46  ;;  %v19934_v18 = vpop.f32.mrf.mxu2  ;;  %8580 = vmatpush.bf16.msra.mxu2 %v12490_v52  ;;  %v24940_v61 = vld [vmem:[#allocation14_spill] sm:$0xff] }
 0x4a6   :  { %v5315_v36 = vmul.f32 %v14561_v26, %v19878_v25  ;;  %vm5321_vm4 = vweird.f32 %v14561_v26  ;;  %v12377_v25 = vld [vmem:[%s24620_s12 + $0x3b8] sm:$0xf] }
 0x4a7   :  { %v4954_v46 = vadd.f32 %v4953_v16, %v19916_v50  ;;  %v5040_v30 = vmul.f32 %v19916_v50, %v19916_v50  ;;  %v11735_v16 = vld [vmem:[%s24617_s9 + $0x6b8] sm:$0xf0]  ;;  %4875 = vmatpush.bf16.msrb.mxu3 %v11770_v51  ;;  %v14216_v51 = vld [vmem:[%s24620_s12 + $0x408] sm:$0xf0]  ;;  %vm5322_vm6 = vmor %vm5320_vm5, %vm5321_vm4 }
 0x4a8   :  { %v5316_v37 = vmul.f32 %v14561_v26, %v5315_v36  ;;  %v12433_v36 = vld [vmem:[%s24620_s12 + $0x428] sm:$0xf] }
 0x4a9   :  { %v5130_v45 = vadd.f32 %v5129_v56, %v5040_v30  ;;  %4773 = vmatmul.bf16.gmra.mxu3 %v24940_v61  ;;  %v19945_v62 = vpop.f32.mrf.mxu1  ;;  %v4514_v56 = vadd.f32 %v19687_v27, %v24942_v60  ;;  %v11738_v30 = vor.u32 %v14042_v54, %v11735_v16  ;;  %v24944_v27 = vld [vmem:[#allocation35_spill] sm:$0xff]  ;;  %8581 = vmatpush.bf16.msra.mxu2 %v12462_v39  ;;  %v14026_v54 = vld [vmem:[%s24617_s9 + $0x61c] sm:$0xf]  ;;  %v24946_v39 = vld [vmem:[#allocation18_spill] sm:$0xff] }
 0x4aa   :  { %v5317_v23 = vmul.f32 0.5, %v5316_v37  ;;  %24941 = vst [vmem:[#allocation14_spill] sm:$0xff] %v19945_v62  ;;  %4860 = vmatmul.bf16.gmra.mxu2 %v24943_v1  ;;  %v11703_v37 = vld [vmem:[%s24617_s9 + $0x678] sm:$0xf0]  ;;  %v24945_v1 = vld [vmem:[#allocation26_spill] sm:$0xff] }
 0x4ab   :  { %8567 = vmatmul.bf16.gmra.mxu1 %v24944_v27  ;;  %v11671_v16 = vld [vmem:[%s24617_s9 + $0x638] sm:$0xf0]  ;;  %v4516_v38 = vadd.f32 %v19749_v47, %v24945_v1  ;;  %4876 = vmatpush.bf16.msrb.mxu3 %v11738_v30  ;;  %v11706_v62 = vor.u32 %v14034_v55, %v11703_v37  ;;  %v12406_v47 = vor.u32 %v14216_v51, %v12405_v21  ;;  %v14209_v1 = vld [vmem:[%s24620_s12 + $0x3d0] sm:$0xf0]  ;;  %v20003_v37 = vpop.f32.mrf.mxu0 }
 0x4ac   :  { %v5318_v52 = vsub.f32 1.5, %v5317_v23  ;;  %v4542_v33 = vpop.f32.mrf.mxu3  ;;  %v12434_v23 = vor.u32 %v14223_v2, %v12433_v36  ;;  %v5433_v36 = vperm.slane %v24946_v39, 3  ;;  %v24947_v2 = vld [vmem:[#allocation22_spill] sm:$0xff]  ;;  %v24950_v21 = vsub.f32 %v19415_v17, %v19821_v59  ;;  %24951 = vst [vmem:[#allocation24_spill] sm:$0xff] %v20003_v37 }
 0x4ad   :  { %v19966_v60 = vadd.f32 %v4542_v33, %v4514_v56  ;;  %v5515_v56 = vperm.slane %v24947_v2, 3  ;;  %v19986_v10 = vpop.f32.mrf.mxu2  ;;  %v24953_v51 = vsub.f32 %v19428_v63, %v19821_v59  ;;  %v24956_v17 = vsub.f32 %v19661_v42, %v19821_v59 }
 0x4ae   :  { %v5319_v27 = vmul.f32 %v14561_v26, %v5318_v52  ;;  %v11674_v52 = vor.u32 %v14026_v54, %v11671_v16  ;;  %8582 = vmatpush.bf16.msra.mxu2 %v12434_v23 }
 0x4af   :  { %v4955_v33 = vadd.f32 %v4954_v46, %v19966_v60  ;;  %v5048_v14 = vmul.f32 %v19966_v60, %v19966_v60  ;;  %v24948_v46 = vsub.f32 %v19767_v43, %v19821_v59  ;;  %v24954_v43 = vsub.f32 %v19488_v57, %v19821_v59  ;;  %4877 = vmatpush.bf16.msrb.mxu3 %v11706_v62 }
 0x4b0   :  { %v5323_v32 = vsel %vm5322_vm6, %v14561_v26, %v5319_v27  ;;  %v24957_v57 = vsub.f32 %v19737_v48, %v19821_v59 }
 0x4b1   :  { %v5415_v20 = vmul.f32 %v5323_v32, %v24948_v46  ;;  %v5423_v26 = vmul.f32 %v5323_v32, %v24949_v44  ;;  %v5131_v30 = vadd.f32 %v5130_v45, %v5048_v14  ;;  %v5367_v55 = vmul.f32 %v5323_v32, %v24950_v21  ;;  %v20005_v27 = vpop.f32.mrf.mxu1 }
 0x4b2   :  { %24952 = vst [vmem:[#allocation13_spill] sm:$0xff] %v20005_v27  ;;  %v5375_v54 = vmul.f32 %v5323_v32, %v24953_v51  ;;  %v5383_v16 = vmul.f32 %v5323_v32, %v24954_v43  ;;  %v5391_v14 = vmul.f32 %v5323_v32, %v24955_v22  ;;  %v5399_v44 = vmul.f32 %v5323_v32, %v24956_v17 }
 0x4b3   :  { %v5497_v45 = vmul.f32 %v5433_v36, %v5415_v20  ;;  %v5505_v23 = vmul.f32 %v5433_v36, %v5423_v26  ;;  %v12378_v46 = vor.u32 %v14209_v1, %v12377_v25  ;;  %v5449_v21 = vmul.f32 %v5433_v36, %v5367_v55  ;;  %8583 = vmatpush.bf16.msra.mxu2 %v12406_v47 }
 0x4b4   :  { %v4544_v37 = vpop.f32.mrf.mxu3  ;;  %v5457_v63 = vmul.f32 %v5433_v36, %v5375_v54  ;;  %v5465_v51 = vmul.f32 %v5433_v36, %v5383_v16  ;;  %v5473_v27 = vmul.f32 %v5433_v36, %v5391_v14  ;;  %v5407_v43 = vmul.f32 %v5323_v32, %v24957_v57  ;;  %4878 = vmatpush.bf16.msrb.mxu3 %v11674_v52 }
 0x4b5   :  { %v5579_v13 = vadd.f32 %v5515_v56, %v5497_v45  ;;  %v5587_v9 = vadd.f32 %v5515_v56, %v5505_v23  ;;  %v20022_v22 = vadd.f32 %v4544_v37, %v4516_v38  ;;  %v5531_v42 = vadd.f32 %v5515_v56, %v5449_v21  ;;  %v20027_v16 = vpop.f32.mrf.mxu2  ;;  %v20040_v21 = vpop.f32.mrf.mxu0 }
 0x4b6   :  { %v5539_v17 = vadd.f32 %v5515_v56, %v5457_v63  ;;  %v5547_v20 = vadd.f32 %v5515_v56, %v5465_v51  ;;  %v5555_v26 = vadd.f32 %v5515_v56, %v5473_v27  ;;  %v5481_v25 = vmul.f32 %v5433_v36, %v5399_v44  ;;  %v24960_v44 = vld [vmem:[#allocation33_spill] sm:$0xff] }
 0x4b7   :  { %v5643_v1 = vmax.f32 %v5579_v13, 0.0  ;;  %v5651_v55 = vmax.f32 %v5587_v9, 0.0  ;;  %v4956_v62 = vadd.f32 %v4955_v33, %v20022_v22  ;;  %v5056_v54 = vmul.f32 %v20022_v22, %v20022_v22  ;;  %8584 = vmatpush.bf16.msra.mxu2 %v12378_v46  ;;  %v24962_v46 = vld [vmem:[#allocation23_spill] sm:$0xff] }
 0x4b8   :  { %v5595_v48 = vmax.f32 %v5531_v42, 0.0  ;;  %v5603_v32 = vmax.f32 %v5539_v17, 0.0  ;;  %v5611_v38 = vmax.f32 %v5547_v20, 0.0  ;;  %v5619_v37 = vmax.f32 %v5555_v26, 0.0  ;;  %v12349_v20 = vld [vmem:[%s24620_s12 + $0x380] sm:$0xf] }
 0x4b9   :  { %v20029_v59 = vpack.c.bf16 %v5651_v55, %v5643_v1  ;;  %v5132_v47 = vadd.f32 %v5131_v30, %v5056_v54  ;;  %4778 = vmatmul.bf16.gmra.mxu3 %v17645_v53  ;;  %v5489_v13 = vmul.f32 %v5433_v36, %v5407_v43  ;;  %v20032_v27 = vpop.f32.mrf.mxu1  ;;  %v5563_v14 = vadd.f32 %v5515_v56, %v5481_v25  ;;  %v14202_v26 = vld [vmem:[%s24620_s12 + $0x398] sm:$0xf0] }
 0x4ba   :  { %v20034_v33 = vpack.c.bf16 %v5603_v32, %v5595_v48  ;;  %v4519_v45 = vadd.f32 %v19772_v41, %v24960_v44  ;;  %v20038_v52 = vpack.c.bf16 %v5619_v37, %v5611_v38  ;;  %4865 = vmatmul.bf16.gmra.mxu2 %v17238_v6  ;;  %v24964_v6 = vld [vmem:[#allocation36_spill] sm:$0xff]  ;;  %v12350_v1 = vor.u32 %v14202_v26, %v12349_v20 }
 0x4bb   :  { %24958 = vst [vmem:[#allocation26_spill] sm:$0xff] %v20029_v59  ;;  %v5571_v23 = vadd.f32 %v5515_v56, %v5489_v13  ;;  %v5627_v63 = vmax.f32 %v5563_v14, 0.0  ;;  %8572 = vmatmul.bf16.gmra.mxu1 %v24962_v46  ;;  %v4521_v17 = vadd.f32 %v19800_v12, %v24964_v6 }
 0x4bc   :  { %24959 = vst [vmem:[#allocation18_spill] sm:$0xff] %v20034_v33  ;;  %v4547_v30 = vpop.f32.mrf.mxu3  ;;  %8585 = vmatpush.bf16.msra.mxu2 %v12350_v1 }
 0x4bd   :  { %24961 = vst [vmem:[#allocation22_spill] sm:$0xff] %v20038_v52  ;;  %v20044_v36 = vadd.f32 %v4547_v30, %v4519_v45  ;;  %v5635_v51 = vmax.f32 %v5571_v23, 0.0  ;;  %v20049_v41 = vpop.f32.mrf.mxu2 }
 0x4bf   :  { %v4957_v57 = vadd.f32 %v4956_v62, %v20044_v36  ;;  %v5064_v43 = vmul.f32 %v20044_v36, %v20044_v36  ;;  %v20051_v9 = vpack.c.bf16 %v5635_v51, %v5627_v63  ;;  %v20065_v62 = vpop.f32.mrf.mxu0 }
 0x4c0   :  { %24965 = vst [vmem:[#allocation36_spill] sm:$0xff] %v20065_v62 }
 0x4c1   :  { %24963 = vst [vmem:[#allocation33_spill] sm:$0xff] %v20051_v9  ;;  %v5133_v56 = vadd.f32 %v5132_v47, %v5064_v43  ;;  %v20053_v42 = vpop.f32.mrf.mxu1 }
 0x4c4   :  { %v4549_v25 = vpop.f32.mrf.mxu3 }
 0x4c5   :  { %v20063_v55 = vadd.f32 %v4549_v25, %v4521_v17  ;;  %v20070_v48 = vpop.f32.mrf.mxu2  ;;  %v24968_v17 = vld [vmem:[#allocation5_spill] sm:$0xff] }
 0x4c6   :  { %v4622_v20 = vadd.f32 %v19831_v34, %v24968_v17  ;;  %v14307_v17 = vld [vmem:[%s24620_s12 + $0x6e0] sm:$0xf0]  ;;  %v14293_v34 = vld [vmem:[%s24620_s12 + $0x670] sm:$0xf0] }
 0x4c7   :  { %v4958_v54 = vadd.f32 %v4957_v57, %v20063_v55  ;;  %v5072_v12 = vmul.f32 %v20063_v55, %v20063_v55  ;;  %v20078_v51 = vpop.f32.mrf.mxu0 }
 0x4c8   :  { %24966 = vst [vmem:[#allocation40_spill] sm:$0xff] %v20078_v51 }
 0x4c9   :  { %v4959_v32 = vrot.slane %v4958_v54, 4  ;;  %v5134_v38 = vadd.f32 %v5133_v56, %v5072_v12  ;;  %4879 = vmatmul.bf16.vlgmr.msrb.gmra.mxu3 %v17647_v0  ;;  %v20073_v47 = vpop.f32.mrf.mxu1  ;;  %v24967_v56 = vld [vmem:[#allocation37_spill] sm:$0xff] }
 0x4ca   :  { %8586 = vmatmul.bf16.vlgmr.msra.gmra.mxu2 %v19755_v8  ;;  %v4620_v0 = vadd.f32 %v19809_v15, %v24967_v56  ;;  %v14363_v56 = vld [vmem:[%s24620_s12 + $0x8a0] sm:$0xf0]  ;;  %v14286_v8 = vld [vmem:[%s24620_s12 + $0x638] sm:$0xf0] }
 0x4cb   :  { %v4960_v37 = vadd.f32 %v4959_v32, %v4958_v54  ;;  %v5135_v13 = vrot.slane %v5134_v38, 4 }
 0x4cc   :  { %v4648_v14 = vpop.f32.mrf.mxu3 }
 0x4cd   :  { %v4961_v44 = vrot.slane %v4960_v37, 2  ;;  %v5136_v45 = vadd.f32 %v5135_v13, %v5134_v38  ;;  %v20076_v63 = vpop.f32.mrf.mxu2  ;;  %v20086_v1 = vadd.f32 %v4648_v14, %v4620_v0  ;;  %v12965_v0 = vld [vmem:[%s24620_s12 + $0x850] sm:$0xf] }
 0x4cf   :  { %v4962_v23 = vadd.f32 %v4961_v44, %v4960_v37  ;;  %v5137_v30 = vrot.slane %v5136_v45, 2  ;;  %v5017_v14 = vmul.f32 %v20086_v1, %v20086_v1 }
 0x4d1   :  { %v4963_v57 = vrot.slane %v4962_v23, 1  ;;  %v5138_v43 = vadd.f32 %v5137_v30, %v5136_v45  ;;  %v20082_v6 = vpop.f32.mrf.mxu1 }
 0x4d3   :  { %v4964_v26 = vadd.f32 %v4963_v57, %v4962_v23  ;;  %v5139_v25 = vrot.slane %v5138_v43, 1 }
 0x4d4   :  { %v4650_v54 = vpop.f32.mrf.mxu3 }
 0x4d5   :  { %v20088_v12 = vmul.f32 0.015625, %v4964_v26  ;;  %v5140_v32 = vadd.f32 %v5139_v25, %v5138_v43  ;;  %v20090_v38 = vadd.f32 %v4650_v54, %v4622_v20  ;;  %v20098_v44 = vpop.f32.mrf.mxu2  ;;  %v12993_v43 = vld [vmem:[%s24620_s12 + $0x888] sm:$0xf]  ;;  %v20124_v26 = vpop.f32.mrf.mxu0  ;;  %v24970_v20 = vld [vmem:[#allocation12_spill] sm:$0xff] }
 0x4d6   :  { %24969 = vst [vmem:[#allocation37_spill] sm:$0xff] %v20124_v26  ;;  %v4625_v30 = vadd.f32 %v19898_v31, %v24970_v20  ;;  %v12741_v20 = vld [vmem:[%s24620_s12 + $0x690] sm:$0xf] }
 0x4d7   :  { %v5184_v37 = vmul.f32 0.015625, %v5140_v32  ;;  %v5192_v13 = vmul.f32 %v20088_v12, %v20088_v12  ;;  %v4965_v45 = vadd.f32 %v20090_v38, %v20086_v1  ;;  %v5025_v23 = vmul.f32 %v20090_v38, %v20090_v38 }
 0x4d8   :  { %v12994_v32 = vor.u32 %v14363_v56, %v12993_v43  ;;  %v12937_v43 = vld [vmem:[%s24620_s12 + $0x818] sm:$0xf]  ;;  %v12769_v56 = vld [vmem:[%s24620_s12 + $0x6c8] sm:$0xf] }
 0x4d9   :  { %v5200_v57 = vsub.f32 %v5184_v37, %v5192_v13  ;;  %4884 = vmatmul.bf16.gmra.mxu3 %v24896_v28  ;;  %v5141_v25 = vadd.f32 %v5025_v23, %v5017_v14  ;;  %v20126_v54 = vpop.f32.mrf.mxu1  ;;  %v14356_v37 = vld [vmem:[%s24620_s12 + $0x868] sm:$0xf0] }
 0x4da   :  { %8591 = vmatmul.bf16.gmra.mxu2 %v19761_v29  ;;  %8636 = vmatpush.bf16.msrb.mxu0 %v12994_v32  ;;  %v12966_v23 = vor.u32 %v14356_v37, %v12965_v0  ;;  %v12770_v0 = vor.u32 %v14307_v17, %v12769_v56  ;;  %v14300_v32 = vld [vmem:[%s24620_s12 + $0x6a8] sm:$0xf0]  ;;  %v12713_v56 = vld [vmem:[%s24620_s12 + $0x658] sm:$0xf] }
 0x4db   :  { %v5208_v28 = vmax.f32 %v5200_v57, 0.0  ;;  %v14349_v57 = vld [vmem:[%s24620_s12 + $0x830] sm:$0xf0] }
 0x4dc   :  { %v4653_v14 = vpop.f32.mrf.mxu3  ;;  %8607 = vmatpush.bf16.msra.mxu3 %v12770_v0  ;;  %v12938_v17 = vor.u32 %v14349_v57, %v12937_v43  ;;  %v14342_v0 = vld [vmem:[%s24620_s12 + $0x7f8] sm:$0xf0]  ;;  %v24972_v43 = vld [vmem:[#allocation10_spill] sm:$0xff] }
 0x4dd   :  { %v20147_v13 = vadd.f32 1e-05, %v5208_v28  ;;  %v20149_v31 = vadd.f32 %v4653_v14, %v4625_v30  ;;  %v20164_v37 = vpop.f32.mrf.mxu2  ;;  %v12742_v14 = vor.u32 %v14300_v32, %v12741_v20  ;;  %v4627_v57 = vadd.f32 %v19934_v18, %v24972_v43  ;;  %v20182_v32 = vpop.f32.mrf.mxu0  ;;  %v12881_v18 = vld [vmem:[%s24620_s12 + $0x7a8] sm:$0xf] }
 0x4de   :  { %8637 = vmatpush.bf16.msrb.mxu0 %v12966_v23  ;;  %v12714_v20 = vor.u32 %v14293_v34, %v12713_v56  ;;  %24973 = vst [vmem:[#allocation12_spill] sm:$0xff] %v20182_v32  ;;  %v14335_v34 = vld [vmem:[%s24620_s12 + $0x7c0] sm:$0xf0] }
 0x4df   :  { %14562 = vrsqrt.f32 %v20147_v13  ;;  %v4966_v28 = vadd.f32 %v4965_v45, %v20149_v31  ;;  %v5033_v30 = vmul.f32 %v20149_v31, %v20149_v31  ;;  %v12909_v45 = vld [vmem:[%s24620_s12 + $0x7e0] sm:$0xf]  ;;  %v12882_v43 = vor.u32 %v14335_v34, %v12881_v18  ;;  %v14279_v32 = vld [vmem:[%s24620_s12 + $0x600] sm:$0xf0] }
 0x4e0   :  { %8608 = vmatpush.bf16.msra.mxu3 %v12742_v14  ;;  %vm5330_vm8 = vweird.f32 %v20147_v13 }
 0x4e1   :  { %v5142_v15 = vadd.f32 %v5141_v25, %v5033_v30  ;;  %v20178_v23 = vpop.f32.mrf.mxu1  ;;  %v12910_v25 = vor.u32 %v14342_v0, %v12909_v45  ;;  %v12685_v30 = vld [vmem:[%s24620_s12 + $0x620] sm:$0xf] }
 0x4e2   :  { %24971 = vst [vmem:[#allocation5_spill] sm:$0xff] %v20178_v23  ;;  %8638 = vmatpush.bf16.msrb.mxu0 %v12938_v17 }
 0x4e4   :  { %v4655_v29 = vpop.f32.mrf.mxu3  ;;  %8609 = vmatpush.bf16.msra.mxu3 %v12714_v20 }
 0x4e5   :  { %v14563_v46 = vpop.eup %14562  ;;  %v20190_v26 = vadd.f32 %v4655_v29, %v4627_v57  ;;  %v20202_v45 = vpop.f32.mrf.mxu2  ;;  %v12686_v29 = vor.u32 %v14286_v8, %v12685_v30  ;;  %v12657_v57 = vld [vmem:[%s24620_s12 + $0x5e8] sm:$0xf]  ;;  %v14328_v8 = vld [vmem:[%s24620_s12 + $0x788] sm:$0xf0]  ;;  %v24975_v30 = vld [vmem:[#allocation21_spill] sm:$0xff] }
 0x4e6   :  { %v5325_v17 = vmul.f32 %v14563_v46, %v20147_v13  ;;  %8639 = vmatpush.bf16.msrb.mxu0 %v12910_v25  ;;  %v4630_v18 = vadd.f32 %v19986_v10, %v24975_v30  ;;  %vm5331_vm7 = vweird.f32 %v14563_v46  ;;  %v14272_v10 = vld [vmem:[%s24620_s12 + $0x5c8] sm:$0xf0] }
 0x4e7   :  { %v4967_v14 = vadd.f32 %v4966_v28, %v20190_v26  ;;  %v5041_v56 = vmul.f32 %v20190_v26, %v20190_v26  ;;  %v12853_v28 = vld [vmem:[%s24620_s12 + $0x770] sm:$0xf]  ;;  %vm5332_vm9 = vmor %vm5330_vm8, %vm5331_vm7 }
 0x4e8   :  { %v5326_v0 = vmul.f32 %v14563_v46, %v5325_v17  ;;  %8610 = vmatpush.bf16.msra.mxu3 %v12686_v29  ;;  %v12797_v29 = vld [vmem:[%s24620_s12 + $0x700] sm:$0xf] }
 0x4e9   :  { %v5143_v51 = vadd.f32 %v5142_v15, %v5041_v56  ;;  %4889 = vmatmul.bf16.gmra.mxu3 %v24940_v61  ;;  %v20217_v25 = vpop.f32.mrf.mxu1  ;;  %v12825_v15 = vld [vmem:[%s24620_s12 + $0x738] sm:$0xf]  ;;  %v12658_v61 = vor.u32 %v14279_v32, %v12657_v57  ;;  %v12854_v56 = vor.u32 %v14328_v8, %v12853_v28  ;;  %v14321_v32 = vld [vmem:[%s24620_s12 + $0x750] sm:$0xf0]  ;;  %v4632_v57 = vadd.f32 %v20027_v16, %v19725_v24  ;;  %v20245_v8 = vpop.f32.mrf.mxu0 }
 0x4ea   :  { %v5327_v20 = vmul.f32 0.5, %v5326_v0  ;;  %24974 = vst [vmem:[#allocation10_spill] sm:$0xff] %v20217_v25  ;;  %8596 = vmatmul.bf16.gmra.mxu2 %v19775_v35  ;;  %8640 = vmatpush.bf16.msrb.mxu0 %v12882_v43  ;;  %v12629_v0 = vld [vmem:[%s24620_s12 + $0x5b0] sm:$0xf]  ;;  %v14314_v43 = vld [vmem:[%s24620_s12 + $0x718] sm:$0xf0]  ;;  %v12826_v16 = vor.u32 %v14321_v32, %v12825_v15  ;;  %v24979_v15 = vsub.f32 %v19819_v7, %v20088_v12 }
 0x4eb   :  { %24976 = vst [vmem:[#allocation21_spill] sm:$0xff] %v20245_v8  ;;  %v12630_v25 = vor.u32 %v14272_v10, %v12629_v0  ;;  %v5516_v24 = vperm.slane %v24947_v2, 4  ;;  %v12798_v13 = vor.u32 %v14314_v43, %v12797_v29  ;;  %v24981_v10 = vsub.f32 %v19823_v4, %v20088_v12 }
 0x4ec   :  { %v5328_v34 = vsub.f32 1.5, %v5327_v20  ;;  %v4658_v17 = vpop.f32.mrf.mxu3  ;;  %v5434_v20 = vperm.slane %v24946_v39, 4  ;;  %8611 = vmatpush.bf16.msra.mxu3 %v12658_v61  ;;  %v14265_v39 = vld [vmem:[%s24620_s12 + $0x590] sm:$0xf0]  ;;  %v24982_v29 = vsub.f32 %v19881_v11, %v20088_v12  ;;  %v24983_v43 = vsub.f32 %v19916_v50, %v20088_v12 }
 0x4ed   :  { %v20231_v30 = vadd.f32 %v4658_v17, %v4630_v18  ;;  %v20252_v35 = vpop.f32.mrf.mxu2  ;;  %v24985_v11 = vsub.f32 %v20022_v22, %v20088_v12 }
 0x4ee   :  { %v5329_v28 = vmul.f32 %v14563_v46, %v5328_v34  ;;  %8641 = vmatpush.bf16.msrb.mxu0 %v12854_v56  ;;  %v12601_v34 = vld [vmem:[%s24620_s12 + $0x578] sm:$0xf] }
 0x4ef   :  { %v4968_v18 = vadd.f32 %v4967_v14, %v20231_v30  ;;  %v5049_v17 = vmul.f32 %v20231_v30, %v20231_v30  ;;  %v24977_v14 = vsub.f32 %v20044_v36, %v20088_v12 }
 0x4f0   :  { %v5333_v23 = vsel %vm5332_vm9, %v14563_v46, %v5329_v28  ;;  %v24978_v46 = vsub.f32 %v20063_v55, %v20088_v12  ;;  %8612 = vmatpush.bf16.msra.mxu3 %v12630_v25 }
 0x4f1   :  { %v5416_v8 = vmul.f32 %v5333_v23, %v24977_v14  ;;  %v5144_v2 = vadd.f32 %v5143_v51, %v5049_v17  ;;  %v5368_v56 = vmul.f32 %v5333_v23, %v24979_v15  ;;  %v20270_v0 = vpop.f32.mrf.mxu1  ;;  %v5376_v32 = vmul.f32 %v5333_v23, %v24981_v10  ;;  %v8529_v22 = vpop.f32.mrf.mxu0 }
 0x4f2   :  { %v5424_v61 = vmul.f32 %v5333_v23, %v24978_v46  ;;  %24980 = vst [vmem:[#allocation41_spill] sm:$0xff] %v20270_v0  ;;  %v5384_v36 = vmul.f32 %v5333_v23, %v24982_v29  ;;  %v5392_v55 = vmul.f32 %v5333_v23, %v24983_v43  ;;  %v24984_v51 = vsub.f32 %v19966_v60, %v20088_v12 }
 0x4f3   :  { %v5498_v7 = vmul.f32 %v5434_v20, %v5416_v8  ;;  %v5450_v14 = vmul.f32 %v5434_v20, %v5368_v56  ;;  %v12602_v46 = vor.u32 %v14265_v39, %v12601_v34  ;;  %8642 = vmatpush.bf16.msrb.mxu0 %v12826_v16  ;;  %v5458_v4 = vmul.f32 %v5434_v20, %v5376_v32 }
 0x4f4   :  { %v5400_v28 = vmul.f32 %v5333_v23, %v24984_v51  ;;  %v5506_v17 = vmul.f32 %v5434_v20, %v5424_v61  ;;  %v4660_v15 = vpop.f32.mrf.mxu3  ;;  %v5466_v10 = vmul.f32 %v5434_v20, %v5384_v36  ;;  %v5474_v0 = vmul.f32 %v5434_v20, %v5392_v55 }
 0x4f5   :  { %v5408_v29 = vmul.f32 %v5333_v23, %v24985_v11  ;;  %v5580_v50 = vadd.f32 %v5516_v24, %v5498_v7  ;;  %v20287_v62 = vadd.f32 %v4660_v15, %v4632_v57  ;;  %v5532_v60 = vadd.f32 %v5516_v24, %v5450_v14  ;;  %v20292_v39 = vpop.f32.mrf.mxu2  ;;  %8613 = vmatpush.bf16.msra.mxu3 %v12602_v46 }
 0x4f6   :  { %v5588_v43 = vadd.f32 %v5516_v24, %v5506_v17  ;;  %v5540_v51 = vadd.f32 %v5516_v24, %v5458_v4  ;;  %v5548_v8 = vadd.f32 %v5516_v24, %v5466_v10  ;;  %v5556_v61 = vadd.f32 %v5516_v24, %v5474_v0 }
 0x4f7   :  { %v5644_v56 = vmax.f32 %v5580_v50, 0.0  ;;  %v4969_v34 = vadd.f32 %v4968_v18, %v20287_v62  ;;  %v5057_v16 = vmul.f32 %v20287_v62, %v20287_v62  ;;  %8643 = vmatpush.bf16.msrb.mxu0 %v12798_v13  ;;  %v5596_v12 = vmax.f32 %v5532_v60, 0.0  ;;  %v12573_v60 = vld [vmem:[%s24620_s12 + $0x540] sm:$0xf] }
 0x4f8   :  { %v5652_v25 = vmax.f32 %v5588_v43, 0.0  ;;  %v5604_v23 = vmax.f32 %v5540_v51, 0.0  ;;  %v5612_v57 = vmax.f32 %v5548_v8, 0.0  ;;  %v5620_v0 = vmax.f32 %v5556_v61, 0.0  ;;  %v14258_v51 = vld [vmem:[%s24620_s12 + $0x558] sm:$0xf0] }
 0x4f9   :  { %v5145_v36 = vadd.f32 %v5144_v2, %v5057_v16  ;;  %4894 = vmatmul.bf16.gmra.mxu3 %v17645_v53  ;;  %v5482_v55 = vmul.f32 %v5434_v20, %v5400_v28  ;;  %v20297_v7 = vpop.f32.mrf.mxu1  ;;  %v5490_v17 = vmul.f32 %v5434_v20, %v5408_v29  ;;  %v4635_v14 = vadd.f32 %v20049_v41, %v19759_v49  ;;  %v6200_v29 = vld [vmem:[%s24621_s13] sm:$0x7f]  ;;  %v20319_v50 = vpop.f32.mrf.mxu0 }
 0x4fa   :  { %v20294_v32 = vpack.c.bf16 %v5652_v25, %v5644_v56  ;;  %v20299_v18 = vpack.c.bf16 %v5604_v23, %v5596_v12  ;;  %v20303_v46 = vpack.c.bf16 %v5620_v0, %v5612_v57  ;;  %8601 = vmatmul.bf16.gmra.mxu2 %v19751_v19  ;;  %24990 = vst [vmem:[#allocation46_spill] sm:$0xff] %v20319_v50  ;;  %v20331_v56 = vperm.slane %v6200_v29, 0  ;;  %v13077_v19 = vld [vmem:[%s24620_s12 + $0x930] sm:$0xf]  ;;  %v25000_v50 = vld [vmem:[#allocation9_spill] sm:$0xff] }
 0x4fb   :  { %v5564_v13 = vadd.f32 %v5516_v24, %v5482_v55  ;;  %v5572_v15 = vadd.f32 %v5516_v24, %v5490_v17  ;;  %v4637_v43 = vadd.f32 %v20070_v48, %v19780_v58  ;;  %v12574_v61 = vor.u32 %v14258_v51, %v12573_v60 }
 0x4fc   :  { %24986 = vst [vmem:[#allocation42_spill] sm:$0xff] %v20294_v32  ;;  %8644 = vmatmul.bf16.vlgmr.msrb.gmra.mxu0 %v20299_v18  ;;  %v4663_v2 = vpop.f32.mrf.mxu3  ;;  %v8530_v16 = vadd.f32 %v8529_v22, %v20331_v56 }
 0x4fd   :  { %24987 = vst [vmem:[#allocation43_spill] sm:$0xff] %v20299_v18  ;;  %v20307_v53 = vadd.f32 %v4663_v2, %v4635_v14  ;;  %v5628_v28 = vmax.f32 %v5564_v13, 0.0  ;;  %v5636_v4 = vmax.f32 %v5572_v15, 0.0  ;;  %v20312_v11 = vpop.f32.mrf.mxu2  ;;  %8614 = vmatpush.bf16.msra.mxu3 %v12574_v61 }
 0x4fe   :  { %24988 = vst [vmem:[#allocation44_spill] sm:$0xff] %v20303_v46 }
 0x4ff   :  { %v4970_v10 = vadd.f32 %v4969_v34, %v20307_v53  ;;  %v5065_v20 = vmul.f32 %v20307_v53, %v20307_v53  ;;  %v20314_v49 = vpack.c.bf16 %v5636_v4, %v5628_v28 }
 0x501   :  { %24989 = vst [vmem:[#allocation45_spill] sm:$0xff] %v20314_v49  ;;  %v5146_v41 = vadd.f32 %v5145_v36, %v5065_v20  ;;  %v20321_v24 = vpop.f32.mrf.mxu1  ;;  %v8534_v17 = vpop.f32.mrf.mxu0 }
 0x502   :  { %24991 = vst [vmem:[#allocation47_spill] sm:$0xff] %v20321_v24 }
 0x504   :  { %v4665_v8 = vpop.f32.mrf.mxu3 }
 0x505   :  { %v20333_v25 = vadd.f32 %v4665_v8, %v4637_v43  ;;  %v20338_v48 = vpop.f32.mrf.mxu2 }
 0x507   :  { %v4971_v34 = vadd.f32 %v4970_v10, %v20333_v25  ;;  %v5073_v58 = vmul.f32 %v20333_v25, %v20333_v25 }
 0x509   :  { %v4972_v12 = vrot.slane %v4971_v34, 4  ;;  %v5147_v23 = vadd.f32 %v5146_v41, %v5073_v58  ;;  %8615 = vmatmul.bf16.vlgmr.msra.gmra.mxu3 %v20034_v33  ;;  %v8558_v57 = vpop.f32.mrf.mxu1  ;;  %v20355_v8 = vpop.f32.mrf.mxu0  ;;  %v14391_v58 = vld [vmem:[%s24620_s12 + $0x980] sm:$0xf0]  ;;  %v14108_v33 = vld [vmem:[%s24620_s12 + $0xac] sm:$0xf] }
 0x50a   :  { %v20342_v55 = vadd.f32 %v8558_v57, %v8530_v16  ;;  %24993 = vst [vmem:[#allocation49_spill] sm:$0xff] %v20355_v8  ;;  %v24996_v8 = vld [vmem:[#allocation16_spill] sm:$0xff] }
 0x50b   :  { %v4973_v36 = vadd.f32 %v4972_v12, %v4971_v34  ;;  %v5148_v0 = vrot.slane %v5147_v23, 4 }
 0x50c   :  { %8649 = vmatmul.bf16.gmra.mxu0 %v20303_v46  ;;  %v20345_v14 = vpop.f32.mrf.mxu3  ;;  %v25004_v46 = vld [vmem:[#allocation39_spill] sm:$0xff] }
 0x50d   :  { %v4974_v13 = vrot.slane %v4973_v36, 2  ;;  %v5149_v2 = vadd.f32 %v5148_v0, %v5147_v23  ;;  %v20347_v4 = vpop.f32.mrf.mxu2  ;;  %v8535_v23 = vadd.f32 %v8534_v17, %v20331_v56  ;;  %v13217_v0 = vld [vmem:[%s24620_s12 + $0xa48] sm:$0xf]  ;;  %v12071_v17 = vld [vmem:[%s24620_s12 + $0x16c] sm:$0xf0] }
 0x50f   :  { %v4975_v15 = vadd.f32 %v4974_v13, %v4973_v36  ;;  %v5150_v28 = vrot.slane %v5149_v2, 2  ;;  %v14419_v13 = vld [vmem:[%s24620_s12 + $0xa60] sm:$0xf0] }
 0x511   :  { %v4976_v22 = vrot.slane %v4975_v15, 1  ;;  %v5151_v10 = vadd.f32 %v5150_v28, %v5149_v2  ;;  %v20349_v20 = vpop.f32.mrf.mxu1  ;;  %v14136_v2 = vld [vmem:[%s24620_s12 + $0x18c] sm:$0xf] }
 0x512   :  { %24992 = vst [vmem:[#allocation48_spill] sm:$0xff] %v20349_v20  ;;  %v4707_v20 = vadd.f32 %v19805_v3, %v24996_v8  ;;  %v25001_v3 = vld [vmem:[#allocation15_spill] sm:$0xff] }
 0x513   :  { %v4977_v41 = vadd.f32 %v4976_v22, %v4975_v15  ;;  %v5152_v29 = vrot.slane %v5151_v10, 1  ;;  %v14129_v15 = vld [vmem:[%s24620_s12 + $0x154] sm:$0xf]  ;;  %v4714_v8 = vadd.f32 %v25001_v3, %v25000_v50 }
 0x514   :  { %v20351_v43 = vpop.f32.mrf.mxu3  ;;  %v4736_v3 = vadd.f32 %v20076_v63, %v4707_v20 }
 0x515   :  { %v20353_v60 = vmul.f32 0.015625, %v4977_v41  ;;  %v5153_v51 = vadd.f32 %v5152_v29, %v5151_v10  ;;  %v20363_v12 = vpop.f32.mrf.mxu2  ;;  %v13218_v10 = vor.u32 %v14419_v13, %v13217_v0  ;;  %v12099_v41 = vld [vmem:[%s24620_s12 + $0x1a4] sm:$0xf0]  ;;  %v13189_v29 = vld [vmem:[%s24620_s12 + $0xa10] sm:$0xf] }
 0x516   :  { %v12102_v13 = vor.u32 %v14136_v2, %v12099_v41  ;;  %v14405_v2 = vld [vmem:[%s24620_s12 + $0x9f0] sm:$0xf0] }
 0x517   :  { %v5185_v61 = vmul.f32 0.015625, %v5153_v51  ;;  %v5193_v34 = vmul.f32 %v20353_v60, %v20353_v60  ;;  %v14412_v51 = vld [vmem:[%s24620_s12 + $0xa28] sm:$0xf0]  ;;  %8665 = vmatpush.bf16.msrb.mxu1 %v13218_v10  ;;  %v12043_v10 = vld [vmem:[%s24620_s12 + $0x134] sm:$0xf0] }
 0x518   :  { %8752 = vmatpush.bf16.msra.mxu0 %v12102_v13 }
 0x519   :  { %v5201_v36 = vsub.f32 %v5185_v61, %v5193_v34  ;;  %8620 = vmatmul.bf16.gmra.mxu3 %v20038_v52  ;;  %v8563_v22 = vpop.f32.mrf.mxu1  ;;  %v13190_v61 = vor.u32 %v14412_v51, %v13189_v29  ;;  %v13133_v29 = vld [vmem:[%s24620_s12 + $0x9a0] sm:$0xf]  ;;  %v14398_v51 = vld [vmem:[%s24620_s12 + $0x9b8] sm:$0xf0]  ;;  %v14115_v34 = vld [vmem:[%s24620_s12 + $0xe4] sm:$0xf] }
 0x51a   :  { %v20397_v0 = vadd.f32 %v8563_v22, %v8535_v23  ;;  %v12074_v23 = vor.u32 %v14129_v15, %v12071_v17  ;;  %v14122_v22 = vld [vmem:[%s24620_s12 + $0x11c] sm:$0xf]  ;;  %v8539_v17 = vpop.f32.mrf.mxu0 }
 0x51b   :  { %v5209_v28 = vmax.f32 %v5201_v36, 0.0  ;;  %v13161_v36 = vld [vmem:[%s24620_s12 + $0x9d8] sm:$0xf]  ;;  %8666 = vmatpush.bf16.msrb.mxu1 %v13190_v61  ;;  %v12046_v41 = vor.u32 %v14122_v22, %v12043_v10  ;;  %v12015_v61 = vld [vmem:[%s24620_s12 + $0xfc] sm:$0xf0] }
 0x51c   :  { %8654 = vmatmul.bf16.gmra.mxu0 %v20314_v49  ;;  %v20406_v57 = vpop.f32.mrf.mxu3  ;;  %v13162_v15 = vor.u32 %v14405_v2, %v13161_v36  ;;  %v13134_v36 = vor.u32 %v14398_v51, %v13133_v29  ;;  %v12018_v22 = vor.u32 %v14115_v34, %v12015_v61  ;;  %v13105_v10 = vld [vmem:[%s24620_s12 + $0x968] sm:$0xf]  ;;  %v8540_v51 = vadd.f32 %v8539_v17, %v20331_v56 }
 0x51d   :  { %v20408_v16 = vadd.f32 1e-05, %v5209_v28  ;;  %v20423_v28 = vpop.f32.mrf.mxu2  ;;  %8753 = vmatpush.bf16.msra.mxu0 %v12074_v23  ;;  %v13106_v29 = vor.u32 %v14391_v58, %v13105_v10  ;;  %v25002_v49 = vld [vmem:[#allocation38_spill] sm:$0xff] }
 0x51f   :  { %14564 = vrsqrt.f32 %v20408_v16  ;;  %8667 = vmatpush.bf16.msrb.mxu1 %v13162_v15  ;;  %v11987_v15 = vld [vmem:[%s24620_s12 + $0xc4] sm:$0xf0]  ;;  %vm5340_vm11 = vweird.f32 %v20408_v16 }
 0x520   :  { %v11990_v61 = vor.u32 %v14108_v33, %v11987_v15  ;;  %v14101_v15 = vld [vmem:[%s24620_s12 + $0x74] sm:$0xf] }
 0x521   :  { %v20431_v13 = vpop.f32.mrf.mxu1  ;;  %8754 = vmatpush.bf16.msra.mxu0 %v12046_v41 }
 0x522   :  { %24994 = vst [vmem:[#allocation50_spill] sm:$0xff] %v20431_v13  ;;  %v14384_v13 = vld [vmem:[%s24620_s12 + $0x948] sm:$0xf0] }
 0x523   :  { %8668 = vmatpush.bf16.msrb.mxu1 %v13134_v36  ;;  %v24998_v36 = vld [vmem:[#allocation17_spill] sm:$0xff]  ;;  %v13078_v50 = vor.u32 %v14384_v13, %v13077_v19 }
 0x524   :  { %v20439_v23 = vpop.f32.mrf.mxu3  ;;  %v4712_v17 = vadd.f32 %v19860_v40, %v24998_v36  ;;  %v25005_v40 = vld [vmem:[#allocation13_spill] sm:$0xff] }
 0x525   :  { %v14565_v2 = vpop.eup %14564  ;;  %v20454_v41 = vpop.f32.mrf.mxu2  ;;  %8755 = vmatpush.bf16.msra.mxu0 %v12018_v22  ;;  %v4719_v36 = vadd.f32 %v25005_v40, %v25004_v46 }
 0x526   :  { %v5335_v52 = vmul.f32 %v14565_v2, %v20408_v16  ;;  %24995 = vst [vmem:[#allocation51_spill] sm:$0xff] %v20454_v41  ;;  %v20470_v22 = vpop.f32.mrf.mxu0  ;;  %vm5341_vm10 = vweird.f32 %v14565_v2  ;;  %v4741_v46 = vadd.f32 %v20164_v37, %v4712_v17  ;;  %v13021_v17 = vld [vmem:[%s24620_s12 + $0x8c0] sm:$0xf] }
 0x527   :  { %24999 = vst [vmem:[#allocation16_spill] sm:$0xff] %v20470_v22  ;;  %8669 = vmatpush.bf16.msrb.mxu1 %v13106_v29  ;;  %v20516_v37 = vadd.f32 %v20292_v39, %v4719_v36  ;;  %vm5342_vm12 = vmor %vm5340_vm11, %vm5341_vm10  ;;  %v20534_v39 = vadd.f32 %v20345_v14, %v4736_v3  ;;  %v14370_v14 = vld [vmem:[%s24620_s12 + $0x8d8] sm:$0xf0]  ;;  %v14087_v36 = vld [vmem:[%s24620_s12 + $0x4] sm:$0xf] }
 0x528   :  { %v5336_v34 = vmul.f32 %v14565_v2, %v5335_v52  ;;  %v24997_v52 = vld [vmem:[#allocation7_spill] sm:$0xff] }
 0x529   :  { %8625 = vmatmul.bf16.gmra.mxu3 %v20051_v9  ;;  %v4709_v58 = vadd.f32 %v19813_v5, %v24997_v52  ;;  %v8568_v10 = vpop.f32.mrf.mxu1  ;;  %v11959_v9 = vld [vmem:[%s24620_s12 + $0x8c] sm:$0xf0]  ;;  %v25003_v5 = vld [vmem:[#allocation14_spill] sm:$0xff]  ;;  %8756 = vmatpush.bf16.msra.mxu0 %v11990_v61  ;;  %v20542_v61 = vadd.f32 %v20406_v57, %v4741_v46  ;;  %v25014_v46 = vsub.f32 %v20231_v30, %v20353_v60 }
 0x52a   :  { %v5337_v33 = vmul.f32 0.5, %v5336_v34  ;;  %v4717_v52 = vadd.f32 %v25003_v5, %v25002_v49  ;;  %v20484_v22 = vadd.f32 %v8568_v10, %v8540_v51  ;;  %v25006_v34 = vld [vmem:[#allocation32_spill] sm:$0xff]  ;;  %v11962_v51 = vor.u32 %v14101_v15, %v11959_v9 }
 0x52b   :  { %v20488_v24 = vadd.f32 %v20032_v27, %v25006_v34  ;;  %v4738_v49 = vadd.f32 %v20098_v44, %v4709_v58  ;;  %v13049_v27 = vld [vmem:[%s24620_s12 + $0x8f8] sm:$0xf]  ;;  %v20503_v10 = vadd.f32 %v20202_v45, %v4714_v8  ;;  %v14094_v9 = vld [vmem:[%s24620_s12 + $0x3c] sm:$0xf]  ;;  %8670 = vmatpush.bf16.msrb.mxu1 %v13078_v50  ;;  %v25007_v15 = vsub.f32 %v20307_v53, %v20353_v60  ;;  %v11903_v53 = vld [vmem:[%s24620_s12 + $0x1c] sm:$0xf0] }
 0x52c   :  { %v5338_v18 = vsub.f32 1.5, %v5337_v33  ;;  %8659 = vmatmul.bf16.gmra.mxu0 %v20294_v32  ;;  %v20491_v41 = vpop.f32.mrf.mxu3  ;;  %v14377_v33 = vld [vmem:[%s24620_s12 + $0x910] sm:$0xf0]  ;;  %v20506_v19 = vadd.f32 %v20252_v35, %v4717_v52  ;;  %v11931_v44 = vld [vmem:[%s24620_s12 + $0x54] sm:$0xf0]  ;;  %v20522_v35 = vld [vmem:[%s24618_s10] sm:$0xff]  ;;  %v25009_v5 = vsub.f32 %v20086_v1, %v20353_v60  ;;  %v25012_v50 = vsub.f32 %v20149_v31, %v20353_v60 }
 0x52d   :  { %v5435_v45 = vperm.slane %v20522_v35, 5  ;;  %v20536_v16 = vpop.f32.mrf.mxu2  ;;  %v20539_v29 = vadd.f32 %v20351_v43, %v4738_v49  ;;  %v13050_v58 = vor.u32 %v14377_v33, %v13049_v27  ;;  %v25008_v43 = vsub.f32 %v20333_v25, %v20353_v60  ;;  %8757 = vmatpush.bf16.msra.mxu0 %v11962_v51 }
 0x52e   :  { %v5339_v63 = vmul.f32 %v14565_v2, %v5338_v18  ;;  %v20528_v18 = vld [vmem:[%s24619_s11] sm:$0xff]  ;;  %v11934_v57 = vor.u32 %v14094_v9, %v11931_v44  ;;  %v25011_v25 = vsub.f32 %v20090_v38, %v20353_v60  ;;  %v25013_v1 = vsub.f32 %v20190_v26, %v20353_v60  ;;  %v8544_v44 = vpop.f32.mrf.mxu0 }
 0x52f   :  { %v20531_v20 = vperm.slane %v20528_v18, 5  ;;  %8671 = vmatpush.bf16.msrb.mxu1 %v13050_v58  ;;  %v25015_v31 = vsub.f32 %v20287_v62, %v20353_v60  ;;  %v11906_v30 = vor.u32 %v14087_v36, %v11903_v53  ;;  %v5018_v60 = vmul.f32 %v20534_v39, %v20534_v39 }
 0x530   :  { %v5343_v13 = vsel %vm5342_vm12, %v14565_v2, %v5339_v63  ;;  %v13022_v63 = vor.u32 %v14370_v14, %v13021_v17 }
 0x531   :  { %v5417_v2 = vmul.f32 %v5343_v13, %v25007_v15  ;;  %v5425_v8 = vmul.f32 %v5343_v13, %v25008_v43  ;;  %v5369_v52 = vmul.f32 %v5343_v13, %v25009_v5  ;;  %v20559_v40 = vpop.f32.mrf.mxu1  ;;  %v5377_v34 = vmul.f32 %v5343_v13, %v25011_v25  ;;  %8758 = vmatpush.bf16.msra.mxu0 %v11934_v57 }
 0x532   :  { %25010 = vst [vmem:[#allocation7_spill] sm:$0xff] %v20559_v40  ;;  %v5385_v3 = vmul.f32 %v5343_v13, %v25012_v50  ;;  %v5393_v49 = vmul.f32 %v5343_v13, %v25013_v1  ;;  %v5401_v51 = vmul.f32 %v5343_v13, %v25014_v46  ;;  %v5409_v25 = vmul.f32 %v5343_v13, %v25015_v31  ;;  %v25019_v31 = vld [vmem:[#allocation29_spill] sm:$0xff] }
 0x533   :  { %v5499_v27 = vmul.f32 %v5435_v45, %v5417_v2  ;;  %v5507_v33 = vmul.f32 %v5435_v45, %v5425_v8  ;;  %v5451_v9 = vmul.f32 %v5435_v45, %v5369_v52  ;;  %v5459_v38 = vmul.f32 %v5435_v45, %v5377_v34  ;;  %8672 = vmatpush.bf16.msrb.mxu1 %v13022_v63 }
 0x534   :  { %v4776_v15 = vpop.f32.mrf.mxu3  ;;  %v5467_v43 = vmul.f32 %v5435_v45, %v5385_v3  ;;  %v5475_v5 = vmul.f32 %v5435_v45, %v5393_v49  ;;  %v5483_v8 = vmul.f32 %v5435_v45, %v5401_v51  ;;  %v8545_v52 = vadd.f32 %v8544_v44, %v20331_v56 }
 0x535   :  { %v5581_v26 = vadd.f32 %v20531_v20, %v5499_v27  ;;  %v5589_v50 = vadd.f32 %v20531_v20, %v5507_v33  ;;  %v5533_v2 = vadd.f32 %v20531_v20, %v5451_v9  ;;  %v5541_v17 = vadd.f32 %v20531_v20, %v5459_v38  ;;  %v20591_v13 = vpop.f32.mrf.mxu2  ;;  %8759 = vmatpush.bf16.msra.mxu0 %v11906_v30 }
 0x536   :  { %v5549_v14 = vadd.f32 %v20531_v20, %v5467_v43  ;;  %v5557_v58 = vadd.f32 %v20531_v20, %v5475_v5  ;;  %v5026_v57 = vmul.f32 %v20539_v29, %v20539_v29  ;;  %v20599_v49 = vadd.f32 %v20439_v23, %v20503_v10 }
 0x537   :  { %v5645_v34 = vmax.f32 %v5581_v26, 0.0  ;;  %v5653_v62 = vmax.f32 %v5589_v50, 0.0  ;;  %v5597_v36 = vmax.f32 %v5533_v2, 0.0  ;;  %v5605_v53 = vmax.f32 %v5541_v17, 0.0 }
 0x538   :  { %v5613_v3 = vmax.f32 %v5549_v14, 0.0  ;;  %v5621_v46 = vmax.f32 %v5557_v58, 0.0  ;;  %v5491_v51 = vmul.f32 %v5435_v45, %v5409_v25  ;;  %v4978_v27 = vadd.f32 %v20539_v29, %v20534_v39  ;;  %v25021_v58 = vld [vmem:[#allocation11_spill] sm:$0xff] }
 0x539   :  { %v20595_v1 = vpack.c.bf16 %v5653_v62, %v5645_v34  ;;  %8630 = vmatmul.bf16.gmra.mxu3 %v20029_v59  ;;  %v5034_v33 = vmul.f32 %v20542_v61, %v20542_v61  ;;  %v8573_v63 = vpop.f32.mrf.mxu1  ;;  %v20606_v9 = vpack.c.bf16 %v5605_v53, %v5597_v36  ;;  %v5565_v44 = vadd.f32 %v20531_v20, %v5483_v8 }
 0x53a   :  { %v20611_v23 = vadd.f32 %v20491_v41, %v20506_v19  ;;  %v20613_v10 = vadd.f32 %v8573_v63, %v8545_v52  ;;  %v20615_v38 = vpack.c.bf16 %v5621_v46, %v5613_v3  ;;  %v5573_v45 = vadd.f32 %v20531_v20, %v5491_v51 }
 0x53b   :  { %25016 = vst [vmem:[#allocation17_spill] sm:$0xff] %v20595_v1  ;;  %v4751_v43 = vadd.f32 %v20312_v11, %v20488_v24  ;;  %v5154_v5 = vadd.f32 %v5026_v57, %v5018_v60  ;;  %8673 = vmatmul.bf16.vlgmr.msrb.gmra.mxu1 %v20606_v9  ;;  %v5629_v26 = vmax.f32 %v5565_v44, 0.0  ;;  %v4979_v50 = vadd.f32 %v4978_v27, %v20542_v61 }
 0x53c   :  { %25017 = vst [vmem:[#allocation9_spill] sm:$0xff] %v20606_v9  ;;  %8760 = vmatmul.bf16.vlgmr.msra.gmra.mxu0 %v25019_v31  ;;  %v4779_v25 = vpop.f32.mrf.mxu3  ;;  %v5042_v41 = vmul.f32 %v20599_v49, %v20599_v49  ;;  %v20626_v19 = vadd.f32 %v4776_v15, %v20516_v37  ;;  %v5637_v30 = vmax.f32 %v5573_v45, 0.0  ;;  %v5050_v11 = vmul.f32 %v20611_v23, %v20611_v23 }
 0x53d   :  { %25018 = vst [vmem:[#allocation15_spill] sm:$0xff] %v20615_v38  ;;  %v5155_v20 = vadd.f32 %v5154_v5, %v5034_v33  ;;  %v4980_v2 = vadd.f32 %v4979_v50, %v20599_v49  ;;  %v20631_v24 = vadd.f32 %v4779_v25, %v4751_v43  ;;  %v20633_v17 = vpop.f32.mrf.mxu2  ;;  %v4724_v8 = vadd.f32 %v20053_v42, %v25021_v58  ;;  %v25022_v43 = vld [vmem:[#allocation30_spill] sm:$0xff] }
 0x53e   :  { %v20635_v14 = vpack.c.bf16 %v5637_v30, %v5629_v26  ;;  %v5058_v15 = vmul.f32 %v20626_v19, %v20626_v19 }
 0x53f   :  { %v5156_v52 = vadd.f32 %v5155_v20, %v5042_v41  ;;  %v4981_v37 = vadd.f32 %v4980_v2, %v20611_v23  ;;  %v4753_v34 = vadd.f32 %v20338_v48, %v4724_v8  ;;  %v5066_v57 = vmul.f32 %v20631_v24, %v20631_v24 }
 0x540   :  { %25020 = vst [vmem:[#allocation38_spill] sm:$0xff] %v20635_v14 }
 0x541   :  { %v5157_v62 = vadd.f32 %v5156_v52, %v5050_v11  ;;  %v4982_v60 = vadd.f32 %v4981_v37, %v20626_v19 }
 0x543   :  { %v5158_v53 = vadd.f32 %v5157_v62, %v5058_v15  ;;  %v4983_v3 = vadd.f32 %v4982_v60, %v20631_v24  ;;  %v12883_v60 = vld [vmem:[%s24620_s12 + $0x7c4] sm:$0xf0] }
 0x544   :  { %v4781_v36 = vpop.f32.mrf.mxu3 }
 0x545   :  { %v20647_v46 = vadd.f32 %v4781_v36, %v4753_v34  ;;  %v5159_v42 = vadd.f32 %v5158_v53, %v5066_v57  ;;  %v20652_v33 = vpop.f32.mrf.mxu2  ;;  %v13441_v53 = vld [vmem:[%s24620_s12 + $0xc08] sm:$0xf] }
 0x547   :  { %v4984_v51 = vadd.f32 %v4983_v3, %v20647_v46  ;;  %v5074_v27 = vmul.f32 %v20647_v46, %v20647_v46  ;;  %v14475_v3 = vld [vmem:[%s24620_s12 + $0xc20] sm:$0xf0] }
 0x549   :  { %v4985_v48 = vrot.slane %v4984_v51, 4  ;;  %v5160_v63 = vadd.f32 %v5159_v42, %v5074_v27  ;;  %v14192_v42 = vld [vmem:[%s24620_s12 + $0x34c] sm:$0xf] }
 0x54b   :  { %v4986_v44 = vadd.f32 %v4985_v48, %v4984_v51  ;;  %v5161_v45 = vrot.slane %v5160_v63, 4  ;;  %8678 = vmatmul.bf16.gmra.mxu1 %v20615_v38  ;;  %v13442_v48 = vor.u32 %v14475_v3, %v13441_v53 }
 0x54c   :  { %8765 = vmatmul.bf16.gmra.mxu0 %v25022_v43  ;;  %v20656_v5 = vpop.f32.mrf.mxu3 }
 0x54d   :  { %v4987_v25 = vrot.slane %v4986_v44, 2  ;;  %v5162_v26 = vadd.f32 %v5161_v45, %v5160_v63  ;;  %v8587_v30 = vpop.f32.mrf.mxu2  ;;  %v12323_v63 = vld [vmem:[%s24620_s12 + $0x364] sm:$0xf0]  ;;  %8694 = vmatpush.bf16.msrb.mxu2 %v13442_v48  ;;  %v14178_v48 = vld [vmem:[%s24620_s12 + $0x2dc] sm:$0xf] }
 0x54e   :  { %v20659_v20 = vadd.f32 %v8587_v30, %v20342_v55  ;;  %v12995_v45 = vld [vmem:[%s24620_s12 + $0x8a4] sm:$0xf0]  ;;  %v14332_v55 = vld [vmem:[%s24620_s12 + $0x7ac] sm:$0xf] }
 0x54f   :  { %v4988_v50 = vadd.f32 %v4987_v25, %v4986_v44  ;;  %v5163_v41 = vrot.slane %v5162_v26, 2  ;;  %v14360_v44 = vld [vmem:[%s24620_s12 + $0x88c] sm:$0xf]  ;;  %v14171_v25 = vld [vmem:[%s24620_s12 + $0x2a4] sm:$0xf] }
 0x550   :  { %v12998_v30 = vor.u32 %v14360_v44, %v12995_v45  ;;  %v14461_v45 = vld [vmem:[%s24620_s12 + $0xbb0] sm:$0xf0] }
 0x551   :  { %v4989_v2 = vrot.slane %v4988_v50, 1  ;;  %v5164_v11 = vadd.f32 %v5163_v41, %v5162_v26  ;;  %v12326_v41 = vor.u32 %v14192_v42, %v12323_v63  ;;  %v12967_v42 = vld [vmem:[%s24620_s12 + $0x86c] sm:$0xf0]  ;;  %v13385_v63 = vld [vmem:[%s24620_s12 + $0xb98] sm:$0xf] }
 0x552   :  { %8868 = vmatpush.bf16.msrb.mxu0 %v12998_v30  ;;  %v14346_v30 = vld [vmem:[%s24620_s12 + $0x81c] sm:$0xf] }
 0x553   :  { %v4990_v58 = vadd.f32 %v4989_v2, %v4988_v50  ;;  %v5165_v8 = vrot.slane %v5164_v11, 1  ;;  %v13413_v2 = vld [vmem:[%s24620_s12 + $0xbd0] sm:$0xf]  ;;  %8781 = vmatpush.bf16.msra.mxu1 %v12326_v41  ;;  %v14454_v26 = vld [vmem:[%s24620_s12 + $0xb78] sm:$0xf0] }
 0x554   :  { %v20661_v52 = vpop.f32.mrf.mxu3 }
 0x555   :  { %v20663_v37 = vmul.f32 0.015625, %v4990_v58  ;;  %v5166_v15 = vadd.f32 %v5165_v8, %v5164_v11  ;;  %v20671_v57 = vpop.f32.mrf.mxu2  ;;  %v14468_v11 = vld [vmem:[%s24620_s12 + $0xbe8] sm:$0xf0]  ;;  %v25023_v58 = vld [vmem:[#allocation31_spill] sm:$0xff] }
 0x556   :  { %v13414_v53 = vor.u32 %v14468_v11, %v13413_v2  ;;  %v12939_v2 = vld [vmem:[%s24620_s12 + $0x834] sm:$0xf0] }
 0x557   :  { %v5186_v34 = vmul.f32 0.015625, %v5166_v15  ;;  %v5194_v62 = vmul.f32 %v20663_v37, %v20663_v37  ;;  %v14185_v15 = vld [vmem:[%s24620_s12 + $0x314] sm:$0xf] }
 0x558   :  { %8695 = vmatpush.bf16.msrb.mxu2 %v13414_v53  ;;  %v14339_v53 = vld [vmem:[%s24620_s12 + $0x7e4] sm:$0xf] }
 0x559   :  { %v5202_v36 = vsub.f32 %v5186_v34, %v5194_v62  ;;  %v12295_v34 = vld [vmem:[%s24620_s12 + $0x32c] sm:$0xf0]  ;;  %v14353_v62 = vld [vmem:[%s24620_s12 + $0x854] sm:$0xf] }
 0x55a   :  { %v12298_v3 = vor.u32 %v14185_v15, %v12295_v34  ;;  %v12970_v44 = vor.u32 %v14353_v62, %v12967_v42  ;;  %v13386_v15 = vor.u32 %v14461_v45, %v13385_v63  ;;  %v13357_v62 = vld [vmem:[%s24620_s12 + $0xb60] sm:$0xf]  ;;  %v12942_v42 = vor.u32 %v14346_v30, %v12939_v2  ;;  %v14447_v2 = vld [vmem:[%s24620_s12 + $0xb40] sm:$0xf0] }
 0x55b   :  { %v5210_v50 = vmax.f32 %v5202_v36, 0.0  ;;  %8683 = vmatmul.bf16.gmra.mxu1 %v20635_v14  ;;  %v13358_v45 = vor.u32 %v14454_v26, %v13357_v62  ;;  %v25024_v26 = vld [vmem:[#allocation20_spill] sm:$0xff]  ;;  %v20814_v14 = vld [vmem:[%s24620_s12 + $0xb08] sm:$0xf0] }
 0x55c   :  { %8770 = vmatmul.bf16.gmra.mxu0 %v25023_v58  ;;  %v20707_v8 = vpop.f32.mrf.mxu3  ;;  %8782 = vmatpush.bf16.msra.mxu1 %v12298_v3  ;;  %v12911_v3 = vld [vmem:[%s24620_s12 + $0x7fc] sm:$0xf0]  ;;  %v25025_v62 = vld [vmem:[#allocation24_spill] sm:$0xff] }
 0x55d   :  { %v20718_v36 = vadd.f32 1e-05, %v5210_v50  ;;  %v12267_v50 = vld [vmem:[%s24620_s12 + $0x2f4] sm:$0xf0]  ;;  %v8592_v41 = vpop.f32.mrf.mxu2  ;;  %8869 = vmatpush.bf16.msrb.mxu0 %v12970_v44  ;;  %8696 = vmatpush.bf16.msrb.mxu2 %v13386_v15  ;;  %v12914_v30 = vor.u32 %v14339_v53, %v12911_v3  ;;  %v14164_v15 = vld [vmem:[%s24620_s12 + $0x26c] sm:$0xf] }
 0x55e   :  { %v20743_v11 = vadd.f32 %v8592_v41, %v20397_v0  ;;  %v12270_v34 = vor.u32 %v14178_v48, %v12267_v50  ;;  %v12239_v0 = vld [vmem:[%s24620_s12 + $0x2bc] sm:$0xf0]  ;;  %v13329_v50 = vld [vmem:[%s24620_s12 + $0xb28] sm:$0xf]  ;;  %v25026_v53 = vld [vmem:[#allocation36_spill] sm:$0xff] }
 0x55f   :  { %14566 = vrsqrt.f32 %v20718_v36  ;;  %v12242_v48 = vor.u32 %v14171_v25, %v12239_v0  ;;  %v12211_v25 = vld [vmem:[%s24620_s12 + $0x284] sm:$0xf0]  ;;  %v4825_v0 = vadd.f32 %v20082_v6, %v25025_v62  ;;  %v25027_v3 = vld [vmem:[#allocation5_spill] sm:$0xff]  ;;  %vm5350_vm14 = vweird.f32 %v20718_v36 }
 0x560   :  { %8783 = vmatpush.bf16.msra.mxu1 %v12270_v34  ;;  %v4823_v34 = vadd.f32 %v20073_v47, %v25024_v26  ;;  %v4830_v27 = vadd.f32 %v25027_v3, %v25026_v53  ;;  %v25028_v47 = vld [vmem:[#allocation40_spill] sm:$0xff]  ;;  %v25029_v26 = vld [vmem:[#allocation10_spill] sm:$0xff]  ;;  %v25030_v6 = vld [vmem:[#allocation37_spill] sm:$0xff] }
 0x561   :  { %8870 = vmatpush.bf16.msrb.mxu0 %v12942_v42  ;;  %v4828_v42 = vadd.f32 %v20126_v54, %v20040_v21  ;;  %v4833_v59 = vadd.f32 %v25029_v26, %v25028_v47  ;;  %v25031_v62 = vld [vmem:[#allocation41_spill] sm:$0xff]  ;;  %v25032_v21 = vld [vmem:[#allocation12_spill] sm:$0xff]  ;;  %v20809_v3 = vld [vmem:[%s24620_s12 + $0xaf0] sm:$0xf]  ;;  %8697 = vmatpush.bf16.msrb.mxu2 %v13358_v45  ;;  %v12214_v26 = vor.u32 %v14164_v15, %v12211_v25 }
 0x562   :  { %v4835_v58 = vadd.f32 %v25031_v62, %v25030_v6  ;;  %v20803_v54 = vadd.f32 %v20297_v7, %v25032_v21  ;;  %v20819_v47 = vld [vmem:[%s24620_s12 + $0x234] sm:$0xf]  ;;  %v4852_v7 = vadd.f32 %v20347_v4, %v4823_v34  ;;  %v12183_v6 = vld [vmem:[%s24620_s12 + $0x24c] sm:$0xf0]  ;;  %v4854_v40 = vadd.f32 %v20363_v12, %v4825_v0  ;;  %v13665_v12 = vld [vmem:[%s24620_s12 + $0xdc8] sm:$0xf] }
 0x563   :  { %v14325_v62 = vld [vmem:[%s24620_s12 + $0x774] sm:$0xf]  ;;  %v12855_v21 = vld [vmem:[%s24620_s12 + $0x78c] sm:$0xf0]  ;;  %v20833_v4 = vadd.f32 %v20423_v28, %v4828_v42  ;;  %v14531_v28 = vld [vmem:[%s24620_s12 + $0xde0] sm:$0xf0] }
 0x564   :  { %v20763_v63 = vpop.f32.mrf.mxu3  ;;  %8784 = vmatpush.bf16.msra.mxu1 %v12242_v48  ;;  %v12886_v48 = vor.u32 %v14332_v55, %v12883_v60  ;;  %v20855_v55 = vadd.f32 %v20536_v16, %v4833_v59  ;;  %v20858_v15 = vadd.f32 %v20591_v13, %v4835_v58  ;;  %v20863_v25 = vld [vmem:[%s24620_s12 + $0x1fc] sm:$0xf]  ;;  %v13666_v34 = vor.u32 %v14531_v28, %v13665_v12  ;;  %v13637_v0 = vld [vmem:[%s24620_s12 + $0xd90] sm:$0xf]  ;;  %v12827_v28 = vld [vmem:[%s24620_s12 + $0x754] sm:$0xf0] }
 0x565   :  { %v20765_v44 = vpop.eup %14566  ;;  %v20789_v51 = vpop.f32.mrf.mxu2  ;;  %8871 = vmatpush.bf16.msrb.mxu0 %v12914_v30  ;;  %v25033_v30 = vld [vmem:[#allocation51_spill] sm:$0xff]  ;;  %v20873_v59 = vperm.slane %v20522_v35, 6  ;;  %v20876_v16 = vadd.f32 %v20656_v5, %v4852_v7  ;;  %v25034_v13 = vld [vmem:[#allocation28_spill] sm:$0xff]  ;;  %v20889_v12 = vadd.f32 %v20661_v52, %v4854_v40  ;;  %v13302_v5 = vor.u32 %v20814_v14, %v20809_v3  ;;  %v14143_v3 = vld [vmem:[%s24620_s12 + $0x1c4] sm:$0xf] }
 0x566   :  { %v5345_v41 = vmul.f32 %v20765_v44, %v20718_v36  ;;  %v20852_v60 = vadd.f32 %v25033_v30, %v4830_v27  ;;  %v14524_v27 = vld [vmem:[%s24620_s12 + $0xda8] sm:$0xf0]  ;;  %vm5351_vm13 = vweird.f32 %v20765_v44  ;;  %v12186_v7 = vor.u32 %v20819_v47, %v12183_v6  ;;  %v20900_v30 = vld [vmem:[%s24620_s12 + $0xa80] sm:$0xf]  ;;  %v20905_v40 = vld [vmem:[%s24620_s12 + $0xa98] sm:$0xf0]  ;;  %8723 = vmatpush.bf16.msrb.mxu3 %v13666_v34 }
 0x567   :  { %v12858_v14 = vor.u32 %v14325_v62, %v12855_v21  ;;  %v12127_v47 = vld [vmem:[%s24620_s12 + $0x1dc] sm:$0xf0]  ;;  %vm5352_vm15 = vmor %vm5350_vm14, %vm5351_vm13  ;;  %v5218_v62 = vsub.f32 %v20534_v39, %v20663_v37  ;;  %v5226_v21 = vsub.f32 %v20539_v29, %v20663_v37  ;;  %v25036_v39 = vsub.f32 %v20647_v46, %v20663_v37 }
 0x568   :  { %v5346_v53 = vmul.f32 %v20765_v44, %v5345_v41  ;;  %v13330_v41 = vor.u32 %v14447_v2, %v13329_v50  ;;  %v20838_v50 = vld [vmem:[%s24620_s12 + $0xab8] sm:$0xf]  ;;  %v20843_v2 = vld [vmem:[%s24620_s12 + $0xad0] sm:$0xf0]  ;;  %8785 = vmatpush.bf16.msra.mxu1 %v12214_v26  ;;  %v5518_v29 = vperm.slane %v20528_v18, 6  ;;  %v25037_v46 = vsub.f32 %v20542_v61, %v20663_v37 }
 0x569   :  { %8872 = vmatpush.bf16.msrb.mxu0 %v12886_v48  ;;  %v13274_v6 = vor.u32 %v20843_v2, %v20838_v50  ;;  %v25035_v50 = vsub.f32 %v20631_v24, %v20663_v37 }
 0x56a   :  { %v5347_v45 = vmul.f32 0.5, %v5346_v53  ;;  %v12155_v53 = vld [vmem:[%s24620_s12 + $0x214] sm:$0xf0]  ;;  %8698 = vmatpush.bf16.msrb.mxu2 %v13330_v41  ;;  %v13638_v41 = vor.u32 %v14524_v27, %v13637_v0  ;;  %v13246_v27 = vor.u32 %v20905_v40, %v20900_v30  ;;  %v25039_v40 = vsub.f32 %v20611_v23, %v20663_v37 }
 0x56b   :  { %8688 = vmatmul.bf16.gmra.mxu1 %v20595_v1  ;;  %v12158_v36 = vor.u32 %v20863_v25, %v12155_v53  ;;  %v12799_v53 = vld [vmem:[%s24620_s12 + $0x71c] sm:$0xf0] }
 0x56c   :  { %v5348_v42 = vsub.f32 1.5, %v5347_v45  ;;  %8775 = vmatmul.bf16.gmra.mxu0 %v25034_v13  ;;  %v20880_v58 = vpop.f32.mrf.mxu3  ;;  %v14318_v45 = vld [vmem:[%s24620_s12 + $0x73c] sm:$0xf]  ;;  %8786 = vmatpush.bf16.msra.mxu1 %v12186_v7  ;;  %v25038_v7 = vsub.f32 %v20599_v49, %v20663_v37 }
 0x56d   :  { %v8597_v26 = vpop.f32.mrf.mxu2  ;;  %v12830_v0 = vor.u32 %v14318_v45, %v12827_v28  ;;  %8873 = vmatpush.bf16.msrb.mxu0 %v12858_v14  ;;  %8724 = vmatpush.bf16.msrb.mxu3 %v13638_v41  ;;  %v25040_v41 = vsub.f32 %v20626_v19, %v20663_v37  ;;  %v20967_v19 = vadd.f32 %v20707_v8, %v20833_v4 }
 0x56e   :  { %v5349_v52 = vmul.f32 %v20765_v44, %v5348_v42  ;;  %v20926_v34 = vadd.f32 %v8597_v26, %v20484_v22  ;;  %v20930_v42 = vpop.f32.mrf.mxu0  ;;  %8699 = vmatpush.bf16.msrb.mxu2 %v13302_v5  ;;  %v12130_v22 = vor.u32 %v14143_v3, %v12127_v47  ;;  %v5019_v4 = vmul.f32 %v20876_v16, %v20876_v16 }
 0x570   :  { %v5353_v48 = vsel %vm5352_vm15, %v20765_v44, %v5349_v52  ;;  %v14311_v44 = vld [vmem:[%s24620_s12 + $0x704] sm:$0xf]  ;;  %8787 = vmatpush.bf16.msra.mxu1 %v12158_v36 }
 0x571   :  { %v5418_v2 = vmul.f32 %v5353_v48, %v25035_v50  ;;  %v5426_v25 = vmul.f32 %v5353_v48, %v25036_v39  ;;  %v5370_v24 = vmul.f32 %v5353_v48, %v5218_v62  ;;  %v5378_v45 = vmul.f32 %v5353_v48, %v5226_v21  ;;  %8874 = vmatpush.bf16.msrb.mxu0 %v12830_v0 }
 0x572   :  { %v5386_v28 = vmul.f32 %v5353_v48, %v25037_v46  ;;  %v5394_v30 = vmul.f32 %v5353_v48, %v25038_v7  ;;  %v5402_v52 = vmul.f32 %v5353_v48, %v25039_v40  ;;  %v5410_v26 = vmul.f32 %v5353_v48, %v25040_v41  ;;  %8700 = vmatpush.bf16.msrb.mxu2 %v13274_v6  ;;  %v25043_v7 = vld [vmem:[#allocation27_spill] sm:$0xff] }
 0x573   :  { %v5500_v18 = vmul.f32 %v20873_v59, %v5418_v2  ;;  %v5508_v5 = vmul.f32 %v20873_v59, %v5426_v25  ;;  %v5452_v3 = vmul.f32 %v20873_v59, %v5370_v24  ;;  %v5460_v47 = vmul.f32 %v20873_v59, %v5378_v45 }
 0x574   :  { %v4892_v14 = vpop.f32.mrf.mxu3  ;;  %v5468_v61 = vmul.f32 %v20873_v59, %v5386_v28  ;;  %v12802_v49 = vor.u32 %v14311_v44, %v12799_v53  ;;  %v5476_v2 = vmul.f32 %v20873_v59, %v5394_v30  ;;  %v4867_v25 = vadd.f32 %v20633_v17, %v20803_v54  ;;  %8788 = vmatpush.bf16.msra.mxu1 %v12130_v22 }
 0x575   :  { %v5582_v62 = vadd.f32 %v5518_v29, %v5500_v18  ;;  %v5590_v21 = vadd.f32 %v5518_v29, %v5508_v5  ;;  %v5534_v50 = vadd.f32 %v5518_v29, %v5452_v3  ;;  %v5542_v23 = vadd.f32 %v5518_v29, %v5460_v47  ;;  %v20969_v37 = vpop.f32.mrf.mxu2 }
 0x576   :  { %v5550_v39 = vadd.f32 %v5518_v29, %v5468_v61  ;;  %v5027_v6 = vmul.f32 %v20889_v12, %v20889_v12  ;;  %v5558_v0 = vadd.f32 %v5518_v29, %v5476_v2  ;;  %v20977_v53 = vadd.f32 %v20763_v63, %v20852_v60  ;;  %8701 = vmatpush.bf16.msrb.mxu2 %v13246_v27 }
 0x577   :  { %v5646_v24 = vmax.f32 %v5582_v62, 0.0  ;;  %v5654_v45 = vmax.f32 %v5590_v21, 0.0  ;;  %v5598_v36 = vmax.f32 %v5534_v50, 0.0  ;;  %v5606_v48 = vmax.f32 %v5542_v23, 0.0  ;;  %8875 = vmatpush.bf16.msrb.mxu0 %v12802_v49 }
 0x578   :  { %v5614_v8 = vmax.f32 %v5550_v39, 0.0  ;;  %v5484_v54 = vmul.f32 %v20873_v59, %v5402_v52  ;;  %v5622_v28 = vmax.f32 %v5558_v0, 0.0  ;;  %v5492_v18 = vmul.f32 %v20873_v59, %v5410_v26 }
 0x579   :  { %v20973_v44 = vpack.c.bf16 %v5654_v45, %v5646_v24  ;;  %v20979_v17 = vpop.f32.mrf.mxu0  ;;  %v20984_v46 = vpack.c.bf16 %v5606_v48, %v5598_v36  ;;  %v4991_v63 = vadd.f32 %v20889_v12, %v20876_v16  ;;  %v5035_v60 = vmul.f32 %v20967_v19, %v20967_v19 }
 0x57a   :  { %v20993_v27 = vadd.f32 %v20880_v58, %v20855_v55  ;;  %v5566_v22 = vadd.f32 %v5518_v29, %v5484_v54  ;;  %v5167_v5 = vadd.f32 %v5027_v6, %v5019_v4  ;;  %v20997_v40 = vpack.c.bf16 %v5622_v28, %v5614_v8  ;;  %v25045_v55 = vld [vmem:[#allocation43_spill] sm:$0xff] }
 0x57b   :  { %25041 = vst [vmem:[#allocation14_spill] sm:$0xff] %v20973_v44  ;;  %8702 = vmatmul.bf16.vlgmr.msrb.gmra.mxu2 %v20984_v46  ;;  %8789 = vmatmul.bf16.vlgmr.msra.gmra.mxu1 %v25043_v7  ;;  %v5574_v59 = vadd.f32 %v5518_v29, %v5492_v18  ;;  %v4992_v52 = vadd.f32 %v4991_v63, %v20967_v19 }
 0x57c   :  { %25042 = vst [vmem:[#allocation39_spill] sm:$0xff] %v20984_v46  ;;  %v4895_v30 = vpop.f32.mrf.mxu3  ;;  %v5043_v3 = vmul.f32 %v20977_v53, %v20977_v53  ;;  %v21003_v47 = vadd.f32 %v4892_v14, %v20858_v15  ;;  %8876 = vmatmul.bf16.vlgmr.msrb.gmra.mxu0 %v25045_v55  ;;  %v5630_v58 = vmax.f32 %v5566_v22, 0.0  ;;  %v5168_v41 = vadd.f32 %v5167_v5, %v5035_v60  ;;  %v25047_v15 = vld [vmem:[#allocation21_spill] sm:$0xff]  ;;  %v25048_v14 = vld [vmem:[#allocation47_spill] sm:$0xff]  ;;  %v25054_v55 = vld [vmem:[#allocation48_spill] sm:$0xff] }
 0x57d   :  { %25044 = vst [vmem:[#allocation13_spill] sm:$0xff] %v20997_v40  ;;  %v5638_v61 = vmax.f32 %v5574_v59, 0.0  ;;  %v4993_v26 = vadd.f32 %v4992_v52, %v20977_v53  ;;  %v5051_v62 = vmul.f32 %v20993_v27, %v20993_v27  ;;  %v21009_v21 = vadd.f32 %v4895_v30, %v4867_v25  ;;  %v8602_v29 = vpop.f32.mrf.mxu2  ;;  %v25049_v30 = vld [vmem:[#allocation34_spill] sm:$0xff]  ;;  %v21301_v46 = vld [vmem:[%s24620_s12 + $0x39c] sm:$0xf0] }
 0x57e   :  { %v21012_v49 = vadd.f32 %v8602_v29, %v20613_v10  ;;  %v4840_v23 = vadd.f32 %v25048_v14, %v25047_v15  ;;  %v5169_v2 = vadd.f32 %v5168_v41, %v5043_v3  ;;  %v5059_v24 = vmul.f32 %v21003_v47, %v21003_v47 }
 0x57f   :  { %v21014_v50 = vpack.c.bf16 %v5638_v61, %v5630_v58  ;;  %v4994_v39 = vadd.f32 %v4993_v26, %v20993_v27  ;;  %v5067_v10 = vmul.f32 %v21009_v21, %v21009_v21  ;;  %v25050_v58 = vld [vmem:[#allocation44_spill] sm:$0xff] }
 0x580   :  { %v4869_v25 = vadd.f32 %v20652_v33, %v4840_v23  ;;  %v5170_v6 = vadd.f32 %v5169_v2, %v5051_v62 }
 0x581   :  { %25046 = vst [vmem:[#allocation32_spill] sm:$0xff] %v21014_v50  ;;  %v21021_v45 = vpop.f32.mrf.mxu0  ;;  %v4995_v36 = vadd.f32 %v4994_v39, %v21003_v47 }
 0x582   :  { %v5171_v0 = vadd.f32 %v5170_v6, %v5059_v24 }
 0x583   :  { %v4996_v8 = vadd.f32 %v4995_v36, %v21009_v21  ;;  %v25053_v36 = vld [vmem:[#allocation46_spill] sm:$0xff] }
 0x584   :  { %v4897_v48 = vpop.f32.mrf.mxu3  ;;  %v5172_v4 = vadd.f32 %v5171_v0, %v5067_v10  ;;  %v13609_v0 = vld [vmem:[%s24620_s12 + $0xd58] sm:$0xf]  ;;  %v14388_v10 = vld [vmem:[%s24620_s12 + $0x96c] sm:$0xf] }
 0x585   :  { %v21028_v54 = vadd.f32 %v4897_v48, %v4869_v25 }
 0x587   :  { %v4997_v28 = vadd.f32 %v4996_v8, %v21028_v54  ;;  %v5075_v18 = vmul.f32 %v21028_v54, %v21028_v54  ;;  %v14517_v8 = vld [vmem:[%s24620_s12 + $0xd70] sm:$0xf0] }
 0x589   :  { %v4998_v63 = vrot.slane %v4997_v28, 4  ;;  %v5173_v33 = vadd.f32 %v5172_v4, %v5075_v18  ;;  %v21033_v60 = vpop.f32.mrf.mxu0  ;;  %v13581_v4 = vld [vmem:[%s24620_s12 + $0xd20] sm:$0xf] }
 0x58b   :  { %v4999_v22 = vadd.f32 %v4998_v63, %v4997_v28  ;;  %v5174_v5 = vrot.slane %v5173_v33, 4  ;;  %8707 = vmatmul.bf16.gmra.mxu2 %v20997_v40  ;;  %8794 = vmatmul.bf16.gmra.mxu1 %v25049_v30  ;;  %v21251_v30 = vld [vmem:[%s24620_s12 + $0x3bc] sm:$0xf]  ;;  %v21256_v40 = vld [vmem:[%s24620_s12 + $0x3d4] sm:$0xf0] }
 0x58c   :  { %v8616_v59 = vpop.f32.mrf.mxu3  ;;  %8881 = vmatmul.bf16.gmra.mxu0 %v25050_v58 }
 0x58d   :  { %v5000_v52 = vrot.slane %v4999_v22, 2  ;;  %v5175_v3 = vadd.f32 %v5174_v5, %v5173_v33  ;;  %v8617_v61 = vadd.f32 %v8616_v59, %v20659_v20  ;;  %v14510_v5 = vld [vmem:[%s24620_s12 + $0xd38] sm:$0xf0] }
 0x58f   :  { %v5001_v41 = vadd.f32 %v5000_v52, %v4999_v22  ;;  %v5176_v26 = vrot.slane %v5175_v3, 2  ;;  %v21040_v62 = vadd.f32 %v20979_v17, %v8617_v61  ;;  %v13610_v22 = vor.u32 %v14517_v8, %v13609_v0  ;;  %v13553_v52 = vld [vmem:[%s24620_s12 + $0xce8] sm:$0xf]  ;;  %v14248_v61 = vld [vmem:[%s24620_s12 + $0x50c] sm:$0xf] }
 0x591   :  { %v5002_v29 = vrot.slane %v5001_v41, 1  ;;  %v5177_v15 = vadd.f32 %v5176_v26, %v5175_v3  ;;  %v21042_v14 = vpop.f32.mrf.mxu0  ;;  %v14503_v3 = vld [vmem:[%s24620_s12 + $0xd00] sm:$0xf0]  ;;  %8725 = vmatpush.bf16.msrb.mxu3 %v13610_v22  ;;  %v13582_v26 = vor.u32 %v14510_v5, %v13581_v4  ;;  %v14140_v4 = vld [vmem:[%s24620_s12 + $0x1a8] sm:$0xf0] }
 0x592   :  { %v14241_v22 = vld [vmem:[%s24620_s12 + $0x4d4] sm:$0xf] }
 0x593   :  { %v5003_v23 = vadd.f32 %v5002_v29, %v5001_v41  ;;  %v5178_v2 = vrot.slane %v5177_v15, 1  ;;  %v12547_v41 = vld [vmem:[%s24620_s12 + $0x524] sm:$0xf0] }
 0x594   :  { %v21044_v39 = vpop.f32.mrf.mxu3 }
 0x595   :  { %v21046_v24 = vmul.f32 0.015625, %v5003_v23  ;;  %v5179_v25 = vadd.f32 %v5178_v2, %v5177_v15  ;;  %v12550_v15 = vor.u32 %v14248_v61, %v12547_v41  ;;  %v14416_v23 = vld [vmem:[%s24620_s12 + $0xa4c] sm:$0xf]  ;;  %v13219_v2 = vld [vmem:[%s24620_s12 + $0xa64] sm:$0xf0]  ;;  %8726 = vmatpush.bf16.msrb.mxu3 %v13582_v26 }
 0x596   :  { %v13222_v8 = vor.u32 %v14416_v23, %v13219_v2  ;;  %v14409_v61 = vld [vmem:[%s24620_s12 + $0xa14] sm:$0xf]  ;;  %v13525_v2 = vld [vmem:[%s24620_s12 + $0xcb0] sm:$0xf]  ;;  %v12049_v26 = vld [vmem:[%s24620_s12 + $0x120] sm:$0xf] }
 0x597   :  { %v5187_v6 = vmul.f32 0.015625, %v5179_v25  ;;  %v5195_v20 = vmul.f32 %v21046_v24, %v21046_v24  ;;  %v12105_v25 = vld [vmem:[%s24620_s12 + $0x190] sm:$0xf]  ;;  %8810 = vmatpush.bf16.msra.mxu2 %v12550_v15  ;;  %v12077_v15 = vld [vmem:[%s24620_s12 + $0x158] sm:$0xf] }
 0x598   :  { %v12106_v5 = vor.u32 %v14140_v4, %v12105_v25  ;;  %8897 = vmatpush.bf16.msrb.mxu1 %v13222_v8  ;;  %v14133_v23 = vld [vmem:[%s24620_s12 + $0x170] sm:$0xf0]  ;;  %v13554_v25 = vor.u32 %v14503_v3, %v13553_v52  ;;  %v14496_v8 = vld [vmem:[%s24620_s12 + $0xcc8] sm:$0xf0]  ;;  %v14402_v52 = vld [vmem:[%s24620_s12 + $0x9dc] sm:$0xf] }
 0x599   :  { %v5203_v48 = vsub.f32 %v5187_v6, %v5195_v20  ;;  %v21065_v28 = vpop.f32.mrf.mxu0  ;;  %v25051_v20 = vld [vmem:[#allocation35_spill] sm:$0xff]  ;;  %v12078_v4 = vor.u32 %v14133_v23, %v12077_v15  ;;  %v13163_v3 = vld [vmem:[%s24620_s12 + $0x9f4] sm:$0xf0]  ;;  %v14227_v15 = vld [vmem:[%s24620_s12 + $0x464] sm:$0xf]  ;;  %v13526_v33 = vor.u32 %v14496_v8, %v13525_v2 }
 0x59a   :  { %8984 = vmatpush.bf16.msra.mxu0 %v12106_v5  ;;  %v12463_v23 = vld [vmem:[%s24620_s12 + $0x47c] sm:$0xf0]  ;;  %8727 = vmatpush.bf16.msrb.mxu3 %v13554_v25  ;;  %v14119_v2 = vld [vmem:[%s24620_s12 + $0x100] sm:$0xf0]  ;;  %v13497_v25 = vld [vmem:[%s24620_s12 + $0xc78] sm:$0xf] }
 0x59b   :  { %v5211_v59 = vmax.f32 %v5203_v48, 0.0  ;;  %8712 = vmatmul.bf16.gmra.mxu2 %v21014_v50  ;;  %8799 = vmatmul.bf16.gmra.mxu1 %v25051_v20  ;;  %v25052_v48 = vld [vmem:[#allocation45_spill] sm:$0xff]  ;;  %v12466_v8 = vor.u32 %v14227_v15, %v12463_v23  ;;  %v21199_v15 = vld [vmem:[%s24620_s12 + $0xb0] sm:$0xf]  ;;  %v21246_v50 = vperm.slane %v20522_v35, 7 }
 0x59c   :  { %v8621_v29 = vpop.f32.mrf.mxu3  ;;  %8886 = vmatmul.bf16.gmra.mxu0 %v25052_v48  ;;  %v21232_v48 = vld [vmem:[%s24620_s12 + $0x78] sm:$0xf] }
 0x59d   :  { %v21098_v6 = vadd.f32 1e-05, %v5211_v59  ;;  %v8622_v0 = vadd.f32 %v8621_v29, %v20743_v11  ;;  %v12519_v59 = vld [vmem:[%s24620_s12 + $0x4ec] sm:$0xf0] }
 0x59e   :  { %v13191_v11 = vld [vmem:[%s24620_s12 + $0xa2c] sm:$0xf0]  ;;  %v12522_v41 = vor.u32 %v14241_v22, %v12519_v59  ;;  %v14234_v22 = vld [vmem:[%s24620_s12 + $0x49c] sm:$0xf]  ;;  %v12491_v59 = vld [vmem:[%s24620_s12 + $0x4b4] sm:$0xf0]  ;;  %8985 = vmatpush.bf16.msra.mxu0 %v12078_v4  ;;  %8728 = vmatpush.bf16.msrb.mxu3 %v13526_v33 }
 0x59f   :  { %14568 = vrsqrt.f32 %v21098_v6  ;;  %v13194_v29 = vor.u32 %v14409_v61, %v13191_v11  ;;  %v21138_v61 = vadd.f32 %v21033_v60, %v8622_v0  ;;  %v12494_v5 = vor.u32 %v14234_v22, %v12491_v59  ;;  %v14126_v60 = vld [vmem:[%s24620_s12 + $0x138] sm:$0xf0]  ;;  %v14395_v22 = vld [vmem:[%s24620_s12 + $0x9a4] sm:$0xf] }
 0x5a0   :  { %8811 = vmatpush.bf16.msra.mxu2 %v12522_v41  ;;  %v13166_v0 = vor.u32 %v14402_v52, %v13163_v3  ;;  %v12050_v41 = vor.u32 %v14126_v60, %v12049_v26  ;;  %v12021_v52 = vld [vmem:[%s24620_s12 + $0xe8] sm:$0xf]  ;;  %v14489_v3 = vld [vmem:[%s24620_s12 + $0xc90] sm:$0xf0]  ;;  %v14220_v26 = vld [vmem:[%s24620_s12 + $0x42c] sm:$0xf]  ;;  %vm5360_vm1 = vweird.f32 %v21098_v6 }
 0x5a1   :  { %v21140_v11 = vpop.f32.mrf.mxu0  ;;  %8898 = vmatpush.bf16.msrb.mxu1 %v13194_v29  ;;  %v13135_v29 = vld [vmem:[%s24620_s12 + $0x9bc] sm:$0xf0]  ;;  %v12435_v60 = vld [vmem:[%s24620_s12 + $0x444] sm:$0xf0]  ;;  %v12022_v17 = vor.u32 %v14119_v2, %v12021_v52  ;;  %v21222_v52 = vld [vmem:[%s24620_s12 + $0x934] sm:$0xf] }
 0x5a2   :  { %v13138_v18 = vor.u32 %v14395_v22, %v13135_v29  ;;  %8986 = vmatpush.bf16.msra.mxu0 %v12050_v41  ;;  %v21208_v22 = vld [vmem:[%s24620_s12 + $0x3f4] sm:$0xf]  ;;  %v21213_v29 = vld [vmem:[%s24620_s12 + $0x40c] sm:$0xf0]  ;;  %v13498_v41 = vor.u32 %v14489_v3, %v13497_v25  ;;  %v13469_v25 = vld [vmem:[%s24620_s12 + $0xc40] sm:$0xf]  ;;  %v12438_v58 = vor.u32 %v14220_v26, %v12435_v60 }
 0x5a3   :  { %v21227_v2 = vld [vmem:[%s24620_s12 + $0x94c] sm:$0xf0]  ;;  %v14482_v3 = vld [vmem:[%s24620_s12 + $0xc58] sm:$0xf0]  ;;  %v21270_v26 = vld [vmem:[%s24620_s12 + $0x914] sm:$0xf0] }
 0x5a4   :  { %v21160_v63 = vpop.f32.mrf.mxu3  ;;  %8812 = vmatpush.bf16.msra.mxu2 %v12494_v5  ;;  %v13107_v5 = vld [vmem:[%s24620_s12 + $0x984] sm:$0xf0]  ;;  %v21275_v60 = vld [vmem:[%s24620_s12 + $0x40] sm:$0xf]  ;;  %8729 = vmatpush.bf16.msrb.mxu3 %v13498_v41  ;;  %v13082_v41 = vor.u32 %v21222_v52, %v21227_v2  ;;  %v12743_v2 = vld [vmem:[%s24620_s12 + $0x6ac] sm:$0xf0] }
 0x5a5   :  { %v21168_v59 = vpop.eup %14568  ;;  %8899 = vmatpush.bf16.msrb.mxu1 %v13166_v0  ;;  %v14112_v0 = vld [vmem:[%s24620_s12 + $0xc8] sm:$0xf0]  ;;  %v13110_v35 = vor.u32 %v14388_v10, %v13107_v5  ;;  %v21282_v5 = vld [vmem:[%s24620_s12 + $0x58] sm:$0xf0]  ;;  %v12771_v52 = vld [vmem:[%s24620_s12 + $0x6e4] sm:$0xf0] }
 0x5a6   :  { %v5355_v4 = vmul.f32 %v21168_v59, %v21098_v6  ;;  %vm5361_vm0 = vweird.f32 %v21168_v59  ;;  %8987 = vmatpush.bf16.msra.mxu0 %v12022_v17  ;;  %v5227_v17 = vsub.f32 %v20889_v12, %v21046_v24  ;;  %v21311_v12 = vld [vmem:[%s24620_s12 + $0x8dc] sm:$0xf0] }
 0x5a7   :  { %vm21316_vm2 = vmor %vm5360_vm1, %vm5361_vm0 }
 0x5a8   :  { %v5356_v23 = vmul.f32 %v21168_v59, %v5355_v4  ;;  %v8532_v4 = vadd.f32 %v25053_v36, %v20331_v56  ;;  %v21237_v36 = vld [vmem:[%s24620_s12 + $0x90] sm:$0xf0]  ;;  %8813 = vmatpush.bf16.msra.mxu2 %v12466_v8  ;;  %v21265_v8 = vld [vmem:[%s24620_s12 + $0x8fc] sm:$0xf] }
 0x5a9   :  { %v21217_v33 = vpop.f32.mrf.mxu0  ;;  %8900 = vmatpush.bf16.msrb.mxu1 %v13138_v18  ;;  %v11994_v18 = vor.u32 %v14112_v0, %v21199_v15  ;;  %v12410_v0 = vor.u32 %v21208_v22, %v21213_v29  ;;  %v14688_v22 = vld [vmem:[%s24619_s11] sm:$0xff] }
 0x5aa   :  { %v5357_v20 = vmul.f32 0.5, %v5356_v23  ;;  %v21259_v7 = vadd.f32 %v25054_v55, %v8532_v4  ;;  %v21287_v23 = vld [vmem:[%s24620_s12 + $0x384] sm:$0xf]  ;;  %v5219_v4 = vsub.f32 %v20876_v16, %v21046_v24  ;;  %v21323_v29 = vperm.slane %v14688_v22, 7 }
 0x5ab   :  { %8717 = vmatmul.bf16.gmra.mxu2 %v20973_v44  ;;  %v13470_v44 = vor.u32 %v14482_v3, %v13469_v25  ;;  %v21306_v16 = vld [vmem:[%s24620_s12 + $0x8c4] sm:$0xf]  ;;  %v11966_v25 = vor.u32 %v21237_v36, %v21232_v48  ;;  %v14304_v3 = vld [vmem:[%s24620_s12 + $0x6cc] sm:$0xf]  ;;  %v14297_v48 = vld [vmem:[%s24620_s12 + $0x694] sm:$0xf]  ;;  %8988 = vmatpush.bf16.msra.mxu0 %v11994_v18  ;;  %v12354_v36 = vor.u32 %v21287_v23, %v21301_v46 }
 0x5ac   :  { %v5358_v55 = vsub.f32 1.5, %v5357_v20  ;;  %v8626_v10 = vpop.f32.mrf.mxu3  ;;  %v25055_v20 = vld [vmem:[#allocation23_spill] sm:$0xff]  ;;  %8891 = vmatmul.bf16.gmra.mxu0 %v20294_v32  ;;  %8814 = vmatpush.bf16.msra.mxu2 %v12438_v58  ;;  %v11938_v58 = vor.u32 %v21282_v5, %v21275_v60  ;;  %v25058_v60 = vsub.f32 %v21009_v21, %v21046_v24  ;;  %v11909_v46 = vld [vmem:[%s24620_s12 + $0x8] sm:$0xf]  ;;  %v12746_v21 = vor.u32 %v14297_v48, %v12743_v2 }
 0x5ad   :  { %8804 = vmatmul.bf16.gmra.mxu1 %v25055_v20  ;;  %v8627_v15 = vadd.f32 %v8626_v10, %v20926_v34  ;;  %v13054_v10 = vor.u32 %v21265_v8, %v21270_v26  ;;  %v12774_v8 = vor.u32 %v14304_v3, %v12771_v52  ;;  %v21358_v26 = vpop.f32.mrf.mxu1  ;;  %8730 = vmatpush.bf16.msrb.mxu3 %v13470_v44 }
 0x5ae   :  { %v5359_v34 = vmul.f32 %v21168_v59, %v5358_v55  ;;  %8901 = vmatpush.bf16.msrb.mxu1 %v13110_v35  ;;  %v12382_v55 = vor.u32 %v21251_v30, %v21256_v40  ;;  %v13026_v35 = vor.u32 %v21306_v16, %v21311_v12  ;;  %v25061_v44 = vsub.f32 %v20977_v53, %v21046_v24 }
 0x5af   :  { %v21349_v40 = vadd.f32 %v21065_v28, %v8627_v15  ;;  %v25059_v28 = vsub.f32 %v21028_v54, %v21046_v24  ;;  %v25060_v54 = vsub.f32 %v20967_v19, %v21046_v24  ;;  %8989 = vmatpush.bf16.msra.mxu0 %v11966_v25  ;;  %v25062_v2 = vsub.f32 %v20993_v27, %v21046_v24 }
 0x5b0   :  { %v5363_v30 = vsel %vm21316_vm2, %v21168_v59, %v5359_v34  ;;  %v14091_v59 = vld [vmem:[%s24620_s12 + $0x20] sm:$0xf0]  ;;  %8815 = vmatpush.bf16.msra.mxu2 %v12410_v0  ;;  %v14290_v34 = vld [vmem:[%s24620_s12 + $0x65c] sm:$0xf] }
 0x5b1   :  { %v5419_v5 = vmul.f32 %v5363_v30, %v25058_v60  ;;  %v5427_v15 = vmul.f32 %v5363_v30, %v25059_v28  ;;  %v21366_v6 = vpop.f32.mrf.mxu0  ;;  %v5371_v18 = vmul.f32 %v5363_v30, %v5219_v4  ;;  %v5379_v23 = vmul.f32 %v5363_v30, %v5227_v17  ;;  %8839 = vmatpush.bf16.msra.mxu3 %v12774_v8  ;;  %v12715_v4 = vld [vmem:[%s24620_s12 + $0x674] sm:$0xf0] }
 0x5b2   :  { %v5387_v16 = vmul.f32 %v5363_v30, %v25060_v54  ;;  %v5395_v12 = vmul.f32 %v5363_v30, %v25061_v44  ;;  %8902 = vmatpush.bf16.msrb.mxu1 %v13082_v41  ;;  %v11910_v3 = vor.u32 %v14091_v59, %v11909_v46  ;;  %v5403_v8 = vmul.f32 %v5363_v30, %v25062_v2  ;;  %v13443_v2 = vld [vmem:[%s24620_s12 + $0xc24] sm:$0xf0] }
 0x5b3   :  { %v5501_v17 = vmul.f32 %v21246_v50, %v5419_v5  ;;  %v5509_v0 = vmul.f32 %v21246_v50, %v5427_v15  ;;  %v5453_v19 = vmul.f32 %v21246_v50, %v5371_v18  ;;  %v5461_v22 = vmul.f32 %v21246_v50, %v5379_v23  ;;  %v14283_v23 = vld [vmem:[%s24620_s12 + $0x624] sm:$0xf]  ;;  %8990 = vmatpush.bf16.msra.mxu0 %v11938_v58 }
 0x5b4   :  { %v21390_v53 = vpop.f32.mrf.mxu3  ;;  %v5469_v52 = vmul.f32 %v21246_v50, %v5387_v16  ;;  %v5477_v48 = vmul.f32 %v21246_v50, %v5395_v12  ;;  %v12718_v28 = vor.u32 %v14290_v34, %v12715_v4  ;;  %8816 = vmatpush.bf16.msra.mxu2 %v12382_v55  ;;  %v25063_v54 = vsub.f32 %v21003_v47, %v21046_v24  ;;  %v12687_v12 = vld [vmem:[%s24620_s12 + $0x63c] sm:$0xf0] }
 0x5b5   :  { %v5583_v60 = vadd.f32 %v21323_v29, %v5501_v17  ;;  %v5591_v41 = vadd.f32 %v21323_v29, %v5509_v0  ;;  %v5535_v5 = vadd.f32 %v21323_v29, %v5453_v19  ;;  %v5543_v25 = vadd.f32 %v21323_v29, %v5461_v22  ;;  %8840 = vmatpush.bf16.msra.mxu3 %v12746_v21 }
 0x5b6   :  { %v5551_v15 = vadd.f32 %v21323_v29, %v5469_v52  ;;  %v5559_v46 = vadd.f32 %v21323_v29, %v5477_v48  ;;  %8903 = vmatpush.bf16.msrb.mxu1 %v13054_v10  ;;  %v5411_v16 = vmul.f32 %v5363_v30, %v25063_v54  ;;  %v5485_v34 = vmul.f32 %v21246_v50, %v5403_v8  ;;  %v12329_v8 = vld [vmem:[%s24620_s12 + $0x350] sm:$0xf]  ;;  %v12301_v54 = vld [vmem:[%s24620_s12 + $0x318] sm:$0xf] }
 0x5b7   :  { %v5647_v59 = vmax.f32 %v5583_v60, 0.0  ;;  %v5655_v18 = vmax.f32 %v5591_v41, 0.0  ;;  %v5599_v27 = vmax.f32 %v5535_v5, 0.0  ;;  %v5607_v55 = vmax.f32 %v5543_v25, 0.0  ;;  %8991 = vmatpush.bf16.msra.mxu0 %v11910_v3  ;;  %v13001_v25 = vld [vmem:[%s24620_s12 + $0x890] sm:$0xf] }
 0x5b8   :  { %v5615_v44 = vmax.f32 %v5551_v15, 0.0  ;;  %v5623_v21 = vmax.f32 %v5559_v46, 0.0  ;;  %v8674_v4 = vpop.f32.mrf.mxu1  ;;  %v5493_v0 = vmul.f32 %v21246_v50, %v5411_v16  ;;  %v8590_v47 = vadd.f32 %v20671_v57, %v21259_v7  ;;  %8817 = vmatpush.bf16.msra.mxu2 %v12354_v36  ;;  %v25066_v7 = vld [vmem:[#allocation25_spill] sm:$0xff]  ;;  %v14364_v15 = vld [vmem:[%s24620_s12 + $0x8a8] sm:$0xf0] }
 0x5b9   :  { %v21413_v10 = vpack.c.bf16 %v5655_v18, %v5647_v59  ;;  %v21415_v17 = vpop.f32.mrf.mxu0  ;;  %v21421_v24 = vadd.f32 %v8674_v4, %v21040_v62  ;;  %v21423_v58 = vpack.c.bf16 %v5607_v55, %v5599_v27  ;;  %8841 = vmatpush.bf16.msra.mxu3 %v12718_v28  ;;  %v12690_v19 = vor.u32 %v14283_v23, %v12687_v12  ;;  %v14196_v28 = vld [vmem:[%s24620_s12 + $0x368] sm:$0xf0]  ;;  %v13415_v23 = vld [vmem:[%s24620_s12 + $0xbec] sm:$0xf0]  ;;  %v14189_v55 = vld [vmem:[%s24620_s12 + $0x330] sm:$0xf0] }
 0x5ba   :  { %v21425_v30 = vpack.c.bf16 %v5623_v21, %v5615_v44  ;;  %8904 = vmatpush.bf16.msrb.mxu1 %v13026_v35  ;;  %v5567_v22 = vadd.f32 %v21323_v29, %v5485_v34  ;;  %v5575_v52 = vadd.f32 %v21323_v29, %v5493_v0  ;;  %v8619_v50 = vadd.f32 %v21044_v39, %v8590_v47  ;;  %v14276_v35 = vld [vmem:[%s24620_s12 + $0x5ec] sm:$0xf]  ;;  %v12659_v29 = vld [vmem:[%s24620_s12 + $0x604] sm:$0xf0]  ;;  %v12973_v44 = vld [vmem:[%s24620_s12 + $0x858] sm:$0xf] }
 0x5bb   :  { %25064 = vst [vmem:[#allocation11_spill] sm:$0xff] %v21423_v58  ;;  %8731 = vmatmul.bf16.vlgmr.msrb.gmra.mxu3 %v21423_v58  ;;  %8818 = vmatmul.bf16.vlgmr.msra.gmra.mxu2 %v25066_v7  ;;  %v12662_v3 = vor.u32 %v14276_v35, %v12659_v29  ;;  %v13002_v18 = vor.u32 %v14364_v15, %v13001_v25  ;;  %v14357_v21 = vld [vmem:[%s24620_s12 + $0x870] sm:$0xf0]  ;;  %v12631_v0 = vld [vmem:[%s24620_s12 + $0x5cc] sm:$0xf0] }
 0x5bc   :  { %25065 = vst [vmem:[#allocation20_spill] sm:$0xff] %v21425_v30  ;;  %v8631_v57 = vpop.f32.mrf.mxu3  ;;  %v5631_v36 = vmax.f32 %v5567_v22, 0.0  ;;  %v5639_v48 = vmax.f32 %v5575_v52, 0.0  ;;  %8992 = vmatmul.bf16.vlgmr.msra.gmra.mxu0 %v25019_v31  ;;  %v8648_v41 = vadd.f32 %v21021_v45, %v8619_v50  ;;  %v14465_v45 = vld [vmem:[%s24620_s12 + $0xbd4] sm:$0xf]  ;;  %v12302_v12 = vor.u32 %v14189_v55, %v12301_v54 }
 0x5bd   :  { %v8632_v62 = vadd.f32 %v8631_v57, %v21012_v49  ;;  %8905 = vmatmul.bf16.vlgmr.msrb.gmra.mxu1 %v20606_v9  ;;  %8842 = vmatpush.bf16.msra.mxu3 %v12690_v19  ;;  %v14472_v49 = vld [vmem:[%s24620_s12 + $0xc0c] sm:$0xf]  ;;  %v13418_v16 = vor.u32 %v14465_v45, %v13415_v23  ;;  %v12974_v34 = vor.u32 %v14357_v21, %v12973_v44  ;;  %v14269_v4 = vld [vmem:[%s24620_s12 + $0x5b4] sm:$0xf]  ;;  %v14458_v47 = vld [vmem:[%s24620_s12 + $0xb9c] sm:$0xf] }
 0x5be   :  { %v21441_v39 = vpack.c.bf16 %v5639_v48, %v5631_v36  ;;  %v13446_v5 = vor.u32 %v14472_v49, %v13443_v2  ;;  %9100 = vmatpush.bf16.msrb.mxu0 %v13002_v18  ;;  %v12634_v19 = vor.u32 %v14269_v4, %v12631_v0  ;;  %v13387_v22 = vld [vmem:[%s24620_s12 + $0xbb4] sm:$0xf0]  ;;  %v12273_v52 = vld [vmem:[%s24620_s12 + $0x2e0] sm:$0xf]  ;;  %v14182_v50 = vld [vmem:[%s24620_s12 + $0x2f8] sm:$0xf0] }
 0x5bf   :  { %v21453_v60 = vadd.f32 %v21217_v33, %v8632_v62  ;;  %v12330_v33 = vor.u32 %v14196_v28, %v12329_v8  ;;  %v25067_v57 = vld [vmem:[#allocation49_spill] sm:$0xff]  ;;  %v13390_v36 = vor.u32 %v14458_v47, %v13387_v22  ;;  %v14350_v35 = vld [vmem:[%s24620_s12 + $0x838] sm:$0xf0]  ;;  %v12274_v29 = vor.u32 %v14182_v50, %v12273_v52  ;;  %v12603_v44 = vld [vmem:[%s24620_s12 + $0x594] sm:$0xf0] }
 0x5c0   :  { %v8676_v46 = vpop.f32.mrf.mxu1  ;;  %8926 = vmatpush.bf16.msrb.mxu2 %v13446_v5  ;;  %v8537_v62 = vadd.f32 %v25067_v57, %v20331_v56  ;;  %v12945_v48 = vld [vmem:[%s24620_s12 + $0x820] sm:$0xf]  ;;  %v14451_v25 = vld [vmem:[%s24620_s12 + $0xb64] sm:$0xf]  ;;  %v14262_v55 = vld [vmem:[%s24620_s12 + $0x57c] sm:$0xf] }
 0x5c1   :  { %v21465_v59 = vpop.f32.mrf.mxu0  ;;  %v21467_v27 = vadd.f32 %v8676_v46, %v8648_v41  ;;  %8843 = vmatpush.bf16.msra.mxu3 %v12662_v3  ;;  %9013 = vmatpush.bf16.msra.mxu1 %v12330_v33  ;;  %v25068_v3 = vld [vmem:[#allocation50_spill] sm:$0xff]  ;;  %v12946_v2 = vor.u32 %v14350_v35, %v12945_v48  ;;  %v13359_v15 = vld [vmem:[%s24620_s12 + $0xb7c] sm:$0xf0]  ;;  %v14343_v18 = vld [vmem:[%s24620_s12 + $0x800] sm:$0xf0]  ;;  %v12606_v21 = vor.u32 %v14262_v55, %v12603_v44 }
 0x5c2   :  { %v8566_v49 = vadd.f32 %v25068_v3, %v8537_v62  ;;  %9101 = vmatpush.bf16.msrb.mxu0 %v12974_v34  ;;  %v12245_v46 = vld [vmem:[%s24620_s12 + $0x2a8] sm:$0xf]  ;;  %v13362_v33 = vor.u32 %v14451_v25, %v13359_v15  ;;  %v12217_v34 = vld [vmem:[%s24620_s12 + $0x270] sm:$0xf]  ;;  %v14168_v47 = vld [vmem:[%s24620_s12 + $0x288] sm:$0xf0] }
 0x5c3   :  { %v14336_v22 = vld [vmem:[%s24620_s12 + $0x7c8] sm:$0xf0]  ;;  %v12218_v57 = vor.u32 %v14168_v47, %v12217_v34  ;;  %v13303_v48 = vld [vmem:[%s24620_s12 + $0xb0c] sm:$0xf0]  ;;  %v12189_v35 = vld [vmem:[%s24620_s12 + $0x238] sm:$0xf] }
 0x5c4   :  { %8927 = vmatpush.bf16.msrb.mxu2 %v13418_v16  ;;  %v8595_v5 = vadd.f32 %v20789_v51, %v8566_v49  ;;  %v14175_v51 = vld [vmem:[%s24620_s12 + $0x2c0] sm:$0xf0]  ;;  %v25069_v16 = vld [vmem:[#allocation6_spill] sm:$0xff]  ;;  %v14161_v3 = vld [vmem:[%s24620_s12 + $0x250] sm:$0xf0] }
 0x5c5   :  { %9014 = vmatpush.bf16.msra.mxu1 %v12302_v12  ;;  %8844 = vmatpush.bf16.msra.mxu3 %v12634_v19  ;;  %v12246_v23 = vor.u32 %v14175_v51, %v12245_v46  ;;  %v13331_v12 = vld [vmem:[%s24620_s12 + $0xb44] sm:$0xf0]  ;;  %v12889_v19 = vld [vmem:[%s24620_s12 + $0x7b0] sm:$0xf]  ;;  %v12861_v49 = vld [vmem:[%s24620_s12 + $0x778] sm:$0xf] }
 0x5c6   :  { %v8624_v45 = vadd.f32 %v21160_v63, %v8595_v5  ;;  %9102 = vmatpush.bf16.msrb.mxu0 %v12946_v2  ;;  %v14444_v63 = vld [vmem:[%s24620_s12 + $0xb2c] sm:$0xf]  ;;  %v14329_v2 = vld [vmem:[%s24620_s12 + $0x790] sm:$0xf0]  ;;  %v14255_v25 = vld [vmem:[%s24620_s12 + $0x544] sm:$0xf] }
 0x5c7   :  { %v13334_v0 = vor.u32 %v14444_v63, %v13331_v12  ;;  %v12862_v5 = vor.u32 %v14329_v2, %v12861_v49  ;;  %v12575_v15 = vld [vmem:[%s24620_s12 + $0x55c] sm:$0xf0]  ;;  %v14430_v46 = vld [vmem:[%s24620_s12 + $0xabc] sm:$0xf]  ;;  %v13275_v51 = vld [vmem:[%s24620_s12 + $0xad4] sm:$0xf0] }
 0x5c8   :  { %v8679_v8 = vpop.f32.mrf.mxu1  ;;  %8928 = vmatpush.bf16.msrb.mxu2 %v13390_v36  ;;  %v8653_v4 = vadd.f32 %v21042_v14, %v8624_v45  ;;  %v12890_v14 = vor.u32 %v14336_v22, %v12889_v19  ;;  %v14437_v36 = vld [vmem:[%s24620_s12 + $0xaf4] sm:$0xf]  ;;  %v25070_v45 = vld [vmem:[#allocation16_spill] sm:$0xff]  ;;  %v12833_v55 = vld [vmem:[%s24620_s12 + $0x740] sm:$0xf] }
 0x5c9   :  { %v21514_v41 = vpop.f32.mrf.mxu0  ;;  %v21518_v28 = vadd.f32 %v8679_v8, %v21138_v61  ;;  %9015 = vmatpush.bf16.msra.mxu1 %v12274_v29  ;;  %v12917_v61 = vld [vmem:[%s24620_s12 + $0x7e8] sm:$0xf]  ;;  %8845 = vmatpush.bf16.msra.mxu3 %v12606_v21  ;;  %v13306_v29 = vor.u32 %v14437_v36, %v13303_v48  ;;  %v12190_v8 = vor.u32 %v14161_v3, %v12189_v35  ;;  %v14322_v44 = vld [vmem:[%s24620_s12 + $0x758] sm:$0xf0]  ;;  %v25071_v63 = vld [vmem:[#allocation7_spill] sm:$0xff] }
 0x5ca   :  { %v12918_v54 = vor.u32 %v14343_v18, %v12917_v61  ;;  %v12161_v61 = vld [vmem:[%s24620_s12 + $0x200] sm:$0xf]  ;;  %v14154_v18 = vld [vmem:[%s24620_s12 + $0x218] sm:$0xf0]  ;;  %v12834_v34 = vor.u32 %v14322_v44, %v12833_v55  ;;  %v14423_v22 = vld [vmem:[%s24620_s12 + $0xa84] sm:$0xf] }
 0x5cb   :  { %8736 = vmatmul.bf16.gmra.mxu3 %v21425_v30  ;;  %8823 = vmatmul.bf16.gmra.mxu2 %v25069_v16  ;;  %v12162_v21 = vor.u32 %v14154_v18, %v12161_v61  ;;  %v14315_v36 = vld [vmem:[%s24620_s12 + $0x720] sm:$0xf0]  ;;  %v25072_v3 = vld [vmem:[#allocation19_spill] sm:$0xff]  ;;  %v14528_v49 = vld [vmem:[%s24620_s12 + $0xdcc] sm:$0xf] }
 0x5cc   :  { %8929 = vmatpush.bf16.msrb.mxu2 %v13362_v33  ;;  %8997 = vmatmul.bf16.gmra.mxu0 %v25022_v43  ;;  %v12578_v33 = vor.u32 %v14255_v25, %v12575_v15  ;;  %v13667_v2 = vld [vmem:[%s24620_s12 + $0xde4] sm:$0xf0]  ;;  %v13639_v61 = vld [vmem:[%s24620_s12 + $0xdac] sm:$0xf0] }
 0x5cd   :  { %8910 = vmatmul.bf16.gmra.mxu1 %v20615_v38  ;;  %9103 = vmatpush.bf16.msrb.mxu0 %v12918_v54  ;;  %v13278_v54 = vor.u32 %v14430_v46, %v13275_v51  ;;  %v14521_v51 = vld [vmem:[%s24620_s12 + $0xd94] sm:$0xf] }
 0x5ce   :  { %9016 = vmatpush.bf16.msra.mxu1 %v12246_v23  ;;  %v8542_v23 = vadd.f32 %v25070_v45, %v20331_v56  ;;  %8846 = vmatpush.bf16.msra.mxu3 %v12578_v33  ;;  %v13642_v18 = vor.u32 %v14521_v51, %v13639_v61  ;;  %v8604_v45 = vpop.f32.mrf.mxu2  ;;  %v12553_v61 = vld [vmem:[%s24620_s12 + $0x510] sm:$0xf] }
 0x5d0   :  { %v8681_v52 = vpop.f32.mrf.mxu1  ;;  %8930 = vmatpush.bf16.msrb.mxu2 %v13334_v0  ;;  %v8571_v12 = vadd.f32 %v25071_v63, %v8542_v23 }
 0x5d1   :  { %v21568_v50 = vpop.f32.mrf.mxu0  ;;  %v21570_v62 = vadd.f32 %v8681_v52, %v8653_v4  ;;  %9104 = vmatpush.bf16.msrb.mxu0 %v12890_v14  ;;  %v13247_v52 = vld [vmem:[%s24620_s12 + $0xa9c] sm:$0xf0] }
 0x5d2   :  { %9017 = vmatpush.bf16.msra.mxu1 %v12218_v57  ;;  %v8600_v47 = vadd.f32 %v20969_v37, %v8571_v12  ;;  %v12133_v57 = vld [vmem:[%s24620_s12 + $0x1c8] sm:$0xf]  ;;  %v13250_v14 = vor.u32 %v14423_v22, %v13247_v52  ;;  %v14147_v37 = vld [vmem:[%s24620_s12 + $0x1e0] sm:$0xf0] }
 0x5d3   :  { %v12134_v35 = vor.u32 %v14147_v37, %v12133_v57  ;;  %v14507_v52 = vld [vmem:[%s24620_s12 + $0xd24] sm:$0xf]  ;;  %v13583_v57 = vld [vmem:[%s24620_s12 + $0xd3c] sm:$0xf0] }
 0x5d4   :  { %8931 = vmatpush.bf16.msrb.mxu2 %v13306_v29  ;;  %v8629_v48 = vadd.f32 %v21390_v53, %v8600_v47  ;;  %v25074_v53 = vld [vmem:[#allocation31_spill] sm:$0xff]  ;;  %v21695_v37 = vld [vmem:[%s24621_s13] sm:$0x7f] }
 0x5d5   :  { %9105 = vmatpush.bf16.msrb.mxu0 %v12862_v5  ;;  %v13670_v5 = vor.u32 %v14528_v49, %v13667_v2  ;;  %v25077_v49 = vld [vmem:[#allocation39_spill] sm:$0xff]  ;;  %v14500_v2 = vld [vmem:[%s24620_s12 + $0xcec] sm:$0xf] }
 0x5d6   :  { %9018 = vmatpush.bf16.msra.mxu1 %v12190_v8  ;;  %v25073_v8 = vld [vmem:[#allocation38_spill] sm:$0xff]  ;;  %v8658_v25 = vadd.f32 %v21140_v11, %v8629_v48  ;;  %v8547_v11 = vadd.f32 %v20930_v42, %v20331_v56  ;;  %v14514_v56 = vld [vmem:[%s24620_s12 + $0xd5c] sm:$0xf]  ;;  %v13611_v42 = vld [vmem:[%s24620_s12 + $0xd74] sm:$0xf0] }
 0x5d7   :  { %8955 = vmatpush.bf16.msrb.mxu3 %v13670_v5  ;;  %v13555_v5 = vld [vmem:[%s24620_s12 + $0xd04] sm:$0xf0] }
 0x5d8   :  { %v8684_v4 = vpop.f32.mrf.mxu1  ;;  %8932 = vmatpush.bf16.msrb.mxu2 %v13278_v54  ;;  %v8576_v23 = vadd.f32 %v21358_v26, %v8547_v11  ;;  %v8633_v54 = vpop.f32.mrf.mxu3  ;;  %v13614_v26 = vor.u32 %v14514_v56, %v13611_v42  ;;  %v13225_v11 = vld [vmem:[%s24620_s12 + $0xa50] sm:$0xf] }
 0x5d9   :  { %v21617_v0 = vpop.f32.mrf.mxu0  ;;  %v21621_v19 = vadd.f32 %v8684_v4, %v21349_v40  ;;  %v12805_v40 = vld [vmem:[%s24620_s12 + $0x708] sm:$0xf]  ;;  %9106 = vmatpush.bf16.msrb.mxu0 %v12834_v34  ;;  %v25075_v34 = vld [vmem:[#allocation8_spill] sm:$0xff] }
 0x5da   :  { %9019 = vmatpush.bf16.msra.mxu1 %v12162_v21  ;;  %v12806_v29 = vor.u32 %v14315_v36, %v12805_v40  ;;  %v8605_v21 = vadd.f32 %v8604_v45, %v8576_v23 }
 0x5db   :  { %8741 = vmatmul.bf16.gmra.mxu3 %v21441_v39  ;;  %8828 = vmatmul.bf16.gmra.mxu2 %v25072_v3 }
 0x5dc   :  { %8933 = vmatpush.bf16.msrb.mxu2 %v13250_v14  ;;  %9002 = vmatmul.bf16.gmra.mxu0 %v25074_v53  ;;  %v8634_v12 = vadd.f32 %v8633_v54, %v8605_v21  ;;  %v13586_v14 = vor.u32 %v14507_v52, %v13583_v57  ;;  %v14137_v21 = vld [vmem:[%s24620_s12 + $0x194] sm:$0xf]  ;;  %v13197_v52 = vld [vmem:[%s24620_s12 + $0xa18] sm:$0xf] }
 0x5dd   :  { %8915 = vmatmul.bf16.gmra.mxu1 %v25073_v8  ;;  %9107 = vmatpush.bf16.msrb.mxu0 %v12806_v29  ;;  %v25076_v29 = vld [vmem:[#allocation18_spill] sm:$0xff] }
 0x5de   :  { %9020 = vmatpush.bf16.msra.mxu1 %v12134_v35  ;;  %8956 = vmatpush.bf16.msrb.mxu3 %v13642_v18  ;;  %v14252_v18 = vld [vmem:[%s24620_s12 + $0x528] sm:$0xf0] }
 0x5df   :  { %v12554_v54 = vor.u32 %v14252_v18, %v12553_v61  ;;  %v12497_v61 = vld [vmem:[%s24620_s12 + $0x4a0] sm:$0xf] }
 0x5e0   :  { %v8686_v15 = vpop.f32.mrf.mxu1 }
 0x5e1   :  { %v21653_v46 = vpop.f32.mrf.mxu0  ;;  %v21655_v33 = vadd.f32 %v8686_v15, %v8658_v25  ;;  %v25078_v25 = vld [vmem:[#allocation27_spill] sm:$0xff]  ;;  %9042 = vmatpush.bf16.msra.mxu2 %v12554_v54  ;;  %v14406_v54 = vld [vmem:[%s24620_s12 + $0x9f8] sm:$0xf0] }
 0x5e2   :  { %8957 = vmatpush.bf16.msrb.mxu3 %v13614_v26  ;;  %v25079_v15 = vld [vmem:[#allocation43_spill] sm:$0xff] }
 0x5e6   :  { %8958 = vmatpush.bf16.msrb.mxu3 %v13586_v14  ;;  %v14413_v14 = vld [vmem:[%s24620_s12 + $0xa30] sm:$0xf0] }
 0x5e8   :  { %v8689_v55 = vpop.f32.mrf.mxu1 }
 0x5e9   :  { %v21666_v44 = vpop.f32.mrf.mxu0  ;;  %v21669_v63 = vadd.f32 %v8689_v55, %v21453_v60  ;;  %v8663_v60 = vadd.f32 %v21366_v6, %v8634_v12  ;;  %v21698_v6 = vperm.slane %v21695_v37, 1  ;;  %v14420_v55 = vld [vmem:[%s24620_s12 + $0xa68] sm:$0xf0]  ;;  %v12107_v12 = vld [vmem:[%s24620_s12 + $0x1ac] sm:$0xf0] }
 0x5ea   :  { %v13226_v42 = vor.u32 %v14420_v55, %v13225_v11  ;;  %v14238_v11 = vld [vmem:[%s24620_s12 + $0x4b8] sm:$0xf0] }
 0x5eb   :  { %8746 = vmatmul.bf16.gmra.mxu3 %v21413_v10  ;;  %8833 = vmatmul.bf16.gmra.mxu2 %v25075_v34  ;;  %v8762_v40 = vadd.f32 %v21415_v17, %v21698_v6  ;;  %v13558_v17 = vor.u32 %v14500_v2, %v13555_v5  ;;  %v8764_v45 = vadd.f32 %v21465_v59, %v21698_v6 }
 0x5ec   :  { %9007 = vmatmul.bf16.gmra.mxu0 %v25034_v13  ;;  %v12110_v59 = vor.u32 %v14137_v21, %v12107_v12  ;;  %9129 = vmatpush.bf16.msrb.mxu1 %v13226_v42  ;;  %v13198_v2 = vor.u32 %v14413_v14, %v13197_v52  ;;  %v12498_v21 = vor.u32 %v14238_v11, %v12497_v61  ;;  %v12051_v42 = vld [vmem:[%s24620_s12 + $0x13c] sm:$0xf0] }
 0x5ed   :  { %8920 = vmatmul.bf16.gmra.mxu1 %v20595_v1  ;;  %8959 = vmatpush.bf16.msrb.mxu3 %v13558_v17  ;;  %v14493_v17 = vld [vmem:[%s24620_s12 + $0xcb4] sm:$0xf]  ;;  %v25082_v61 = vld [vmem:[#allocation13_spill] sm:$0xff] }
 0x5ee   :  { %9216 = vmatpush.bf16.msra.mxu0 %v12110_v59  ;;  %v8767_v59 = vadd.f32 %v21514_v41, %v21698_v6  ;;  %v14231_v41 = vld [vmem:[%s24620_s12 + $0x480] sm:$0xf0] }
 0x5f0   :  { %v8691_v4 = vpop.f32.mrf.mxu1  ;;  %9130 = vmatpush.bf16.msrb.mxu1 %v13198_v2 }
 0x5f1   :  { %v21682_v47 = vpop.f32.mrf.mxu0  ;;  %v21684_v22 = vadd.f32 %v8691_v4, %v8663_v60  ;;  %v12525_v60 = vld [vmem:[%s24620_s12 + $0x4d8] sm:$0xf]  ;;  %v14245_v4 = vld [vmem:[%s24620_s12 + $0x4f0] sm:$0xf0] }
 0x5f2   :  { %v12526_v57 = vor.u32 %v14245_v4, %v12525_v60 }
 0x5f4   :  { %9043 = vmatpush.bf16.msra.mxu2 %v12526_v57 }
 0x5f8   :  { %v8790_v36 = vpop.f32.mrf.mxu1  ;;  %9044 = vmatpush.bf16.msra.mxu2 %v12498_v21 }
 0x5f9   :  { %v21702_v48 = vadd.f32 %v8790_v36, %v8762_v40  ;;  %v21704_v35 = vpop.f32.mrf.mxu0  ;;  %v14130_v40 = vld [vmem:[%s24620_s12 + $0x15c] sm:$0xf]  ;;  %v12079_v36 = vld [vmem:[%s24620_s12 + $0x174] sm:$0xf0] }
 0x5fa   :  { %v12082_v5 = vor.u32 %v14130_v40, %v12079_v36  ;;  %v12469_v40 = vld [vmem:[%s24620_s12 + $0x468] sm:$0xf] }
 0x5fb   :  { %8847 = vmatmul.bf16.vlgmr.msra.gmra.mxu3 %v25076_v29  ;;  %8934 = vmatmul.bf16.vlgmr.msrb.gmra.mxu2 %v25077_v49  ;;  %v25081_v36 = vld [vmem:[#allocation22_spill] sm:$0xff]  ;;  %v12470_v2 = vor.u32 %v14231_v41, %v12469_v40 }
 0x5fc   :  { %9108 = vmatmul.bf16.vlgmr.msrb.gmra.mxu0 %v25079_v15 }
 0x5fd   :  { %9021 = vmatmul.bf16.vlgmr.msra.gmra.mxu1 %v25078_v25  ;;  %9217 = vmatpush.bf16.msra.mxu0 %v12082_v5  ;;  %v14399_v5 = vld [vmem:[%s24620_s12 + $0x9c0] sm:$0xf0] }
 0x5fe   :  { %v8703_v51 = vpop.f32.mrf.mxu2  ;;  %9045 = vmatpush.bf16.msra.mxu2 %v12470_v2  ;;  %v14109_v2 = vld [vmem:[%s24620_s12 + $0xb4] sm:$0xf] }
 0x5ff   :  { %v21728_v23 = vadd.f32 %v8703_v51, %v21421_v24  ;;  %v13527_v51 = vld [vmem:[%s24620_s12 + $0xccc] sm:$0xf0] }
 0x600   :  { %v8792_v56 = vpop.f32.mrf.mxu1  ;;  %v13530_v18 = vor.u32 %v14493_v17, %v13527_v51  ;;  %v14116_v17 = vld [vmem:[%s24620_s12 + $0xec] sm:$0xf]  ;;  %v12023_v51 = vld [vmem:[%s24620_s12 + $0x104] sm:$0xf0] }
 0x601   :  { %v21739_v26 = vadd.f32 %v8792_v56, %v8764_v45  ;;  %v21741_v24 = vpop.f32.mrf.mxu0  ;;  %v13169_v45 = vld [vmem:[%s24620_s12 + $0x9e0] sm:$0xf]  ;;  %v14123_v56 = vld [vmem:[%s24620_s12 + $0x124] sm:$0xf]  ;;  %v12026_v11 = vor.u32 %v14116_v17, %v12023_v51 }
 0x602   :  { %25080 = vst [vmem:[#allocation24_spill] sm:$0xff] %v21741_v24  ;;  %v13170_v12 = vor.u32 %v14406_v54, %v13169_v45  ;;  %8960 = vmatpush.bf16.msrb.mxu3 %v13530_v18  ;;  %v12054_v4 = vor.u32 %v14123_v56, %v12051_v42  ;;  %v14486_v45 = vld [vmem:[%s24620_s12 + $0xc7c] sm:$0xf]  ;;  %v13499_v54 = vld [vmem:[%s24620_s12 + $0xc94] sm:$0xf0]  ;;  %v8774_v24 = vadd.f32 %v21653_v46, %v21698_v6 }
 0x603   :  { %v13502_v21 = vor.u32 %v14486_v45, %v13499_v54  ;;  %v12441_v42 = vld [vmem:[%s24620_s12 + $0x430] sm:$0xf]  ;;  %v14217_v45 = vld [vmem:[%s24620_s12 + $0x410] sm:$0xf0]  ;;  %v13085_v54 = vld [vmem:[%s24620_s12 + $0x938] sm:$0xf] }
 0x604   :  { %9131 = vmatpush.bf16.msrb.mxu1 %v13170_v12  ;;  %9218 = vmatpush.bf16.msra.mxu0 %v12054_v4  ;;  %v25084_v12 = vld [vmem:[#allocation44_spill] sm:$0xff]  ;;  %v13113_v4 = vld [vmem:[%s24620_s12 + $0x970] sm:$0xf] }
 0x606   :  { %v8705_v55 = vpop.f32.mrf.mxu2  ;;  %8961 = vmatpush.bf16.msrb.mxu3 %v13502_v21 }
 0x607   :  { %v21788_v60 = vadd.f32 %v8705_v55, %v21467_v27  ;;  %v13141_v27 = vld [vmem:[%s24620_s12 + $0x9a8] sm:$0xf] }
 0x608   :  { %v8795_v52 = vpop.f32.mrf.mxu1  ;;  %v13142_v18 = vor.u32 %v14399_v5, %v13141_v27  ;;  %v25083_v55 = vld [vmem:[#allocation34_spill] sm:$0xff]  ;;  %9219 = vmatpush.bf16.msra.mxu0 %v12026_v11  ;;  %v11995_v5 = vld [vmem:[%s24620_s12 + $0xcc] sm:$0xf0]  ;;  %v12413_v11 = vld [vmem:[%s24620_s12 + $0x3f8] sm:$0xf] }
 0x609   :  { %v21790_v57 = vadd.f32 %v8795_v52, %v8767_v59  ;;  %v21792_v14 = vpop.f32.mrf.mxu0  ;;  %v14224_v59 = vld [vmem:[%s24620_s12 + $0x448] sm:$0xf0]  ;;  %v8769_v52 = vadd.f32 %v21568_v50, %v21698_v6  ;;  %v11998_v51 = vor.u32 %v14109_v2, %v11995_v5  ;;  %v12414_v21 = vor.u32 %v14217_v45, %v12413_v11  ;;  %v12385_v2 = vld [vmem:[%s24620_s12 + $0x3c0] sm:$0xf] }
 0x60a   :  { %9132 = vmatpush.bf16.msrb.mxu1 %v13142_v18  ;;  %v12442_v41 = vor.u32 %v14224_v59, %v12441_v42  ;;  %v14392_v27 = vld [vmem:[%s24620_s12 + $0x988] sm:$0xf0]  ;;  %v14102_v42 = vld [vmem:[%s24620_s12 + $0x7c] sm:$0xf]  ;;  %v11967_v59 = vld [vmem:[%s24620_s12 + $0x94] sm:$0xf0] }
 0x60b   :  { %8852 = vmatmul.bf16.gmra.mxu3 %v25081_v36  ;;  %8939 = vmatmul.bf16.gmra.mxu2 %v25082_v61  ;;  %v13114_v50 = vor.u32 %v14392_v27, %v13113_v4  ;;  %v13471_v27 = vld [vmem:[%s24620_s12 + $0xc5c] sm:$0xf0] }
 0x60c   :  { %9113 = vmatmul.bf16.gmra.mxu0 %v25084_v12  ;;  %9046 = vmatpush.bf16.msra.mxu2 %v12442_v41  ;;  %v14479_v41 = vld [vmem:[%s24620_s12 + $0xc44] sm:$0xf] }
 0x60d   :  { %9026 = vmatmul.bf16.gmra.mxu1 %v25083_v55  ;;  %9220 = vmatpush.bf16.msra.mxu0 %v11998_v51  ;;  %v13474_v5 = vor.u32 %v14479_v41, %v13471_v27  ;;  %v14378_v51 = vld [vmem:[%s24620_s12 + $0x918] sm:$0xf0]  ;;  %v8772_v41 = vadd.f32 %v21617_v0, %v21698_v6  ;;  %v14203_v0 = vld [vmem:[%s24620_s12 + $0x3a0] sm:$0xf0] }
 0x60e   :  { %v8708_v56 = vpop.f32.mrf.mxu2  ;;  %9133 = vmatpush.bf16.msrb.mxu1 %v13114_v50  ;;  %v13057_v50 = vld [vmem:[%s24620_s12 + $0x900] sm:$0xf] }
 0x60f   :  { %v21834_v40 = vadd.f32 %v8708_v56, %v21518_v28  ;;  %v14385_v56 = vld [vmem:[%s24620_s12 + $0x950] sm:$0xf0]  ;;  %8962 = vmatpush.bf16.msrb.mxu3 %v13474_v5 }
 0x610   :  { %v8797_v17 = vpop.f32.mrf.mxu1  ;;  %v13086_v4 = vor.u32 %v14385_v56, %v13085_v54  ;;  %9047 = vmatpush.bf16.msra.mxu2 %v12414_v21  ;;  %v13058_v54 = vor.u32 %v14378_v51, %v13057_v50  ;;  %v14095_v21 = vld [vmem:[%s24620_s12 + $0x44] sm:$0xf]  ;;  %v11939_v56 = vld [vmem:[%s24620_s12 + $0x5c] sm:$0xf0]  ;;  %v25087_v50 = vld [vmem:[#allocation32_spill] sm:$0xff] }
 0x611   :  { %v21845_v28 = vadd.f32 %v8797_v17, %v8769_v52  ;;  %v21847_v18 = vpop.f32.mrf.mxu0  ;;  %v11970_v52 = vor.u32 %v14102_v42, %v11967_v59  ;;  %v14210_v17 = vld [vmem:[%s24620_s12 + $0x3d8] sm:$0xf0]  ;;  %v11942_v59 = vor.u32 %v14095_v21, %v11939_v56  ;;  %v25088_v5 = vld [vmem:[#allocation35_spill] sm:$0xff]  ;;  %v25089_v21 = vld [vmem:[#allocation45_spill] sm:$0xff] }
 0x612   :  { %25085 = vst [vmem:[#allocation36_spill] sm:$0xff] %v21847_v18  ;;  %9134 = vmatpush.bf16.msrb.mxu1 %v13086_v4  ;;  %v12386_v45 = vor.u32 %v14210_v17, %v12385_v2  ;;  %v25086_v17 = vld [vmem:[#allocation33_spill] sm:$0xff] }
 0x613   :  { %9221 = vmatpush.bf16.msra.mxu0 %v11970_v52  ;;  %v13029_v52 = vld [vmem:[%s24620_s12 + $0x8c8] sm:$0xf] }
 0x614   :  { %9048 = vmatpush.bf16.msra.mxu2 %v12386_v45  ;;  %v14088_v45 = vld [vmem:[%s24620_s12 + $0xc] sm:$0xf] }
 0x616   :  { %v8710_v11 = vpop.f32.mrf.mxu2  ;;  %9135 = vmatpush.bf16.msrb.mxu1 %v13058_v54  ;;  %v11911_v54 = vld [vmem:[%s24620_s12 + $0x24] sm:$0xf0] }
 0x617   :  { %v21892_v42 = vadd.f32 %v8710_v11, %v21570_v62  ;;  %9222 = vmatpush.bf16.msra.mxu0 %v11942_v59  ;;  %v12357_v62 = vld [vmem:[%s24620_s12 + $0x388] sm:$0xf]  ;;  %v14371_v11 = vld [vmem:[%s24620_s12 + $0x8e0] sm:$0xf0] }
 0x618   :  { %v8800_v4 = vpop.f32.mrf.mxu1  ;;  %v12358_v51 = vor.u32 %v14203_v0, %v12357_v62  ;;  %v13030_v59 = vor.u32 %v14371_v11, %v13029_v52  ;;  %v14308_v62 = vld [vmem:[%s24620_s12 + $0x6e8] sm:$0xf0] }
 0x619   :  { %v21896_v27 = vpop.f32.mrf.mxu0  ;;  %v21898_v2 = vadd.f32 %v8800_v4, %v8772_v41  ;;  %v11914_v41 = vor.u32 %v14088_v45, %v11911_v54  ;;  %v12777_v4 = vld [vmem:[%s24620_s12 + $0x6d0] sm:$0xf]  ;;  %v12749_v54 = vld [vmem:[%s24620_s12 + $0x698] sm:$0xf] }
 0x61a   :  { %9049 = vmatpush.bf16.msra.mxu2 %v12358_v51  ;;  %v12778_v18 = vor.u32 %v14308_v62, %v12777_v4  ;;  %9136 = vmatpush.bf16.msrb.mxu1 %v13030_v59  ;;  %v8777_v59 = vadd.f32 %v21666_v44, %v21698_v6  ;;  %v25092_v4 = vld [vmem:[#allocation26_spill] sm:$0xff] }
 0x61b   :  { %8857 = vmatmul.bf16.gmra.mxu3 %v25086_v17  ;;  %8944 = vmatmul.bf16.gmra.mxu2 %v25087_v50  ;;  %v25093_v62 = vld [vmem:[#allocation14_spill] sm:$0xff] }
 0x61c   :  { %9118 = vmatmul.bf16.gmra.mxu0 %v25089_v21  ;;  %9071 = vmatpush.bf16.msra.mxu3 %v12778_v18 }
 0x61d   :  { %9031 = vmatmul.bf16.gmra.mxu1 %v25088_v5  ;;  %9223 = vmatpush.bf16.msra.mxu0 %v11914_v41 }
 0x61e   :  { %v8713_v56 = vpop.f32.mrf.mxu2 }
 0x61f   :  { %v21929_v0 = vadd.f32 %v8713_v56, %v21621_v19  ;;  %v14301_v19 = vld [vmem:[%s24620_s12 + $0x6b0] sm:$0xf0] }
 0x620   :  { %v8802_v52 = vpop.f32.mrf.mxu1  ;;  %v12750_v51 = vor.u32 %v14301_v19, %v12749_v54 }
 0x621   :  { %v21933_v11 = vpop.f32.mrf.mxu0  ;;  %v21935_v45 = vadd.f32 %v8802_v52, %v8774_v24  ;;  %v12721_v52 = vld [vmem:[%s24620_s12 + $0x660] sm:$0xf] }
 0x622   :  { %25090 = vst [vmem:[#allocation5_spill] sm:$0xff] %v21933_v11  ;;  %9072 = vmatpush.bf16.msra.mxu3 %v12750_v51  ;;  %v8779_v51 = vadd.f32 %v21682_v47, %v21698_v6  ;;  %v12693_v11 = vld [vmem:[%s24620_s12 + $0x628] sm:$0xf] }
 0x626   :  { %v8715_v56 = vpop.f32.mrf.mxu2 }
 0x627   :  { %v21944_v46 = vadd.f32 %v8715_v56, %v21655_v33  ;;  %v14294_v33 = vld [vmem:[%s24620_s12 + $0x678] sm:$0xf0] }
 0x628   :  { %v12722_v44 = vor.u32 %v14294_v33, %v12721_v52  ;;  %v14287_v52 = vld [vmem:[%s24620_s12 + $0x640] sm:$0xf0] }
 0x629   :  { %v21950_v41 = vpop.f32.mrf.mxu0  ;;  %v12694_v33 = vor.u32 %v14287_v52, %v12693_v11  ;;  %v14280_v11 = vld [vmem:[%s24620_s12 + $0x608] sm:$0xf0] }
 0x62a   :  { %v8805_v18 = vpop.f32.mrf.mxu1  ;;  %25091 = vst [vmem:[#allocation40_spill] sm:$0xff] %v21950_v41  ;;  %9073 = vmatpush.bf16.msra.mxu3 %v12722_v44  ;;  %v14476_v52 = vld [vmem:[%s24620_s12 + $0xc28] sm:$0xf0] }
 0x62b   :  { %v21948_v24 = vadd.f32 %v8805_v18, %v8777_v59  ;;  %8862 = vmatmul.bf16.gmra.mxu3 %v25092_v4  ;;  %8949 = vmatmul.bf16.gmra.mxu2 %v25093_v62 }
 0x62c   :  { %9123 = vmatmul.bf16.gmra.mxu0 %v20294_v32 }
 0x62d   :  { %9036 = vmatmul.bf16.gmra.mxu1 %v25055_v20 }
 0x62e   :  { %v8718_v54 = vpop.f32.mrf.mxu2  ;;  %9074 = vmatpush.bf16.msra.mxu3 %v12694_v33  ;;  %v14193_v33 = vld [vmem:[%s24620_s12 + $0x354] sm:$0xf] }
 0x62f   :  { %v21963_v19 = vadd.f32 %v8718_v54, %v21669_v63  ;;  %v12665_v54 = vld [vmem:[%s24620_s12 + $0x5f0] sm:$0xf] }
 0x631   :  { %v21969_v18 = vpop.f32.mrf.mxu0 }
 0x632   :  { %v8807_v56 = vpop.f32.mrf.mxu1  ;;  %25094 = vst [vmem:[#allocation10_spill] sm:$0xff] %v21969_v18 }
 0x633   :  { %v21967_v59 = vadd.f32 %v8807_v56, %v8779_v51  ;;  %v13449_v56 = vld [vmem:[%s24620_s12 + $0xc10] sm:$0xf] }
 0x636   :  { %v8720_v63 = vpop.f32.mrf.mxu2 }
 0x637   :  { %v21978_v44 = vadd.f32 %v8720_v63, %v21684_v22  ;;  %v12666_v22 = vor.u32 %v14280_v11, %v12665_v54  ;;  %v13450_v54 = vor.u32 %v14476_v52, %v13449_v56  ;;  %v12331_v11 = vld [vmem:[%s24620_s12 + $0x36c] sm:$0xf0]  ;;  %v13421_v52 = vld [vmem:[%s24620_s12 + $0xbd8] sm:$0xf] }
 0x639   :  { %v21982_v6 = vpop.f32.mrf.mxu0  ;;  %9075 = vmatpush.bf16.msra.mxu3 %v12666_v22  ;;  %9158 = vmatpush.bf16.msrb.mxu2 %v13450_v54 }
 0x63a   :  { %v21980_v47 = vpop.f32.mrf.mxu1 }
 0x63b   :  { %8963 = vmatmul.bf16.vlgmr.msrb.gmra.mxu3 %v21423_v58  ;;  %9050 = vmatmul.bf16.vlgmr.msra.gmra.mxu2 %v25066_v7 }
 0x63c   :  { %9224 = vmatmul.bf16.vlgmr.msra.gmra.mxu0 %v25019_v31  ;;  %v14361_v31 = vld [vmem:[%s24620_s12 + $0x894] sm:$0xf] }
 0x63d   :  { %9137 = vmatmul.bf16.vlgmr.msrb.gmra.mxu1 %v20606_v9  ;;  %v13003_v9 = vld [vmem:[%s24620_s12 + $0x8ac] sm:$0xf0] }
 0x63e   :  { %v8732_v51 = vpop.f32.mrf.mxu3  ;;  %v8819_v18 = vpop.f32.mrf.mxu2 }
 0x63f   :  { %v22004_v63 = vadd.f32 %v8732_v51, %v21728_v23  ;;  %v22016_v7 = vadd.f32 %v8819_v18, %v21702_v48  ;;  %v12334_v23 = vor.u32 %v14193_v33, %v12331_v11  ;;  %v13006_v51 = vor.u32 %v14361_v31, %v13003_v9  ;;  %v14186_v48 = vld [vmem:[%s24620_s12 + $0x31c] sm:$0xf]  ;;  %v12303_v31 = vld [vmem:[%s24620_s12 + $0x334] sm:$0xf0] }
 0x640   :  { %v14354_v18 = vld [vmem:[%s24620_s12 + $0x85c] sm:$0xf]  ;;  %v12975_v33 = vld [vmem:[%s24620_s12 + $0x874] sm:$0xf0]  ;;  %v12306_v11 = vor.u32 %v14186_v48, %v12303_v31  ;;  %v14179_v31 = vld [vmem:[%s24620_s12 + $0x2e4] sm:$0xf] }
 0x641   :  { %25095 = vst [vmem:[#allocation37_spill] sm:$0xff] %v22004_v63  ;;  %9245 = vmatpush.bf16.msra.mxu1 %v12334_v23  ;;  %9332 = vmatpush.bf16.msrb.mxu0 %v13006_v51  ;;  %v22020_v56 = vpop.f32.mrf.mxu0  ;;  %v14469_v63 = vld [vmem:[%s24620_s12 + $0xbf0] sm:$0xf0]  ;;  %v12978_v23 = vor.u32 %v14354_v18, %v12975_v33  ;;  %v12637_v51 = vld [vmem:[%s24620_s12 + $0x5b8] sm:$0xf] }
 0x642   :  { %v22018_v22 = vpop.f32.mrf.mxu1  ;;  %v13422_v9 = vor.u32 %v14469_v63, %v13421_v52  ;;  %v14273_v63 = vld [vmem:[%s24620_s12 + $0x5d0] sm:$0xf0]  ;;  %v13393_v52 = vld [vmem:[%s24620_s12 + $0xba0] sm:$0xf]  ;;  %v14462_v48 = vld [vmem:[%s24620_s12 + $0xbb8] sm:$0xf0] }
 0x643   :  { %25096 = vst [vmem:[#allocation41_spill] sm:$0xff] %v22018_v22  ;;  %v12638_v41 = vor.u32 %v14273_v63, %v12637_v51  ;;  %v12275_v18 = vld [vmem:[%s24620_s12 + $0x2fc] sm:$0xf0] }
 0x644   :  { %9159 = vmatpush.bf16.msrb.mxu2 %v13422_v9  ;;  %v12278_v9 = vor.u32 %v14179_v31, %v12275_v18  ;;  %v12947_v51 = vld [vmem:[%s24620_s12 + $0x83c] sm:$0xf0] }
 0x645   :  { %9246 = vmatpush.bf16.msra.mxu1 %v12306_v11  ;;  %9333 = vmatpush.bf16.msrb.mxu0 %v12978_v23  ;;  %v12247_v23 = vld [vmem:[%s24620_s12 + $0x2c4] sm:$0xf0] }
 0x646   :  { %v8734_v54 = vpop.f32.mrf.mxu3  ;;  %v8821_v58 = vpop.f32.mrf.mxu2  ;;  %9076 = vmatpush.bf16.msra.mxu3 %v12638_v41  ;;  %v14172_v41 = vld [vmem:[%s24620_s12 + $0x2ac] sm:$0xf] }
 0x647   :  { %v22050_v22 = vadd.f32 %v8734_v54, %v21788_v60  ;;  %v22062_v33 = vadd.f32 %v8821_v58, %v21739_v26  ;;  %v13394_v60 = vor.u32 %v14462_v48, %v13393_v52  ;;  %v14347_v54 = vld [vmem:[%s24620_s12 + $0x824] sm:$0xf]  ;;  %v13365_v58 = vld [vmem:[%s24620_s12 + $0xb68] sm:$0xf]  ;;  %v14340_v52 = vld [vmem:[%s24620_s12 + $0x7ec] sm:$0xf]  ;;  %v12250_v18 = vor.u32 %v14172_v41, %v12247_v23 }
 0x648   :  { %v12950_v63 = vor.u32 %v14347_v54, %v12947_v51  ;;  %v14455_v26 = vld [vmem:[%s24620_s12 + $0xb80] sm:$0xf0]  ;;  %v12919_v48 = vld [vmem:[%s24620_s12 + $0x804] sm:$0xf0]  ;;  %v14266_v54 = vld [vmem:[%s24620_s12 + $0x598] sm:$0xf0] }
 0x649   :  { %25097 = vst [vmem:[#allocation12_spill] sm:$0xff] %v22050_v22  ;;  %v22072_v32 = vpop.f32.mrf.mxu0  ;;  %9160 = vmatpush.bf16.msrb.mxu2 %v13394_v60  ;;  %9247 = vmatpush.bf16.msra.mxu1 %v12278_v9  ;;  %v13366_v11 = vor.u32 %v14455_v26, %v13365_v58  ;;  %v12922_v60 = vor.u32 %v14340_v52, %v12919_v48  ;;  %v12609_v9 = vld [vmem:[%s24620_s12 + $0x580] sm:$0xf]  ;;  %v13337_v51 = vld [vmem:[%s24620_s12 + $0xb30] sm:$0xf] }
 0x64a   :  { %v22070_v22 = vpop.f32.mrf.mxu1  ;;  %9334 = vmatpush.bf16.msrb.mxu0 %v12950_v63  ;;  %v12610_v26 = vor.u32 %v14266_v54, %v12609_v9  ;;  %v14448_v41 = vld [vmem:[%s24620_s12 + $0xb48] sm:$0xf0]  ;;  %v14165_v23 = vld [vmem:[%s24620_s12 + $0x274] sm:$0xf]  ;;  %v12219_v52 = vld [vmem:[%s24620_s12 + $0x28c] sm:$0xf0] }
 0x64b   :  { %8968 = vmatmul.bf16.gmra.mxu3 %v21425_v30  ;;  %9055 = vmatmul.bf16.gmra.mxu2 %v25069_v16  ;;  %v12891_v9 = vld [vmem:[%s24620_s12 + $0x7cc] sm:$0xf0] }
 0x64c   :  { %9229 = vmatmul.bf16.gmra.mxu0 %v25022_v43  ;;  %9077 = vmatpush.bf16.msra.mxu3 %v12610_v26  ;;  %v14326_v26 = vld [vmem:[%s24620_s12 + $0x77c] sm:$0xf] }
 0x64d   :  { %9142 = vmatmul.bf16.gmra.mxu1 %v20615_v38  ;;  %9161 = vmatpush.bf16.msrb.mxu2 %v13366_v11  ;;  %v14333_v11 = vld [vmem:[%s24620_s12 + $0x7b4] sm:$0xf] }
 0x64e   :  { %v8737_v31 = vpop.f32.mrf.mxu3  ;;  %v8824_v58 = vpop.f32.mrf.mxu2  ;;  %9248 = vmatpush.bf16.msra.mxu1 %v12250_v18  ;;  %9335 = vmatpush.bf16.msrb.mxu0 %v12922_v60  ;;  %v12894_v54 = vor.u32 %v14333_v11, %v12891_v9  ;;  %v14441_v18 = vld [vmem:[%s24620_s12 + $0xb10] sm:$0xf0]  ;;  %v14158_v60 = vld [vmem:[%s24620_s12 + $0x23c] sm:$0xf]  ;;  %v14259_v11 = vld [vmem:[%s24620_s12 + $0x560] sm:$0xf0] }
 0x64f   :  { %v22106_v63 = vadd.f32 %v8737_v31, %v21834_v40  ;;  %v22118_v48 = vadd.f32 %v8824_v58, %v21790_v57  ;;  %v13338_v40 = vor.u32 %v14448_v41, %v13337_v51  ;;  %v12222_v31 = vor.u32 %v14165_v23, %v12219_v52  ;;  %v13309_v57 = vld [vmem:[%s24620_s12 + $0xaf8] sm:$0xf]  ;;  %v13281_v9 = vld [vmem:[%s24620_s12 + $0xac0] sm:$0xf] }
 0x650   :  { %v13310_v51 = vor.u32 %v14441_v18, %v13309_v57  ;;  %v12191_v58 = vld [vmem:[%s24620_s12 + $0x254] sm:$0xf0] }
 0x651   :  { %25098 = vst [vmem:[#allocation51_spill] sm:$0xff] %v22106_v63  ;;  %v22128_v43 = vpop.f32.mrf.mxu0  ;;  %9162 = vmatpush.bf16.msrb.mxu2 %v13338_v40  ;;  %v12863_v41 = vld [vmem:[%s24620_s12 + $0x794] sm:$0xf0]  ;;  %v12194_v52 = vor.u32 %v14158_v60, %v12191_v58  ;;  %v14434_v60 = vld [vmem:[%s24620_s12 + $0xad8] sm:$0xf0] }
 0x652   :  { %v22126_v63 = vpop.f32.mrf.mxu1  ;;  %9249 = vmatpush.bf16.msra.mxu1 %v12222_v31  ;;  %9336 = vmatpush.bf16.msrb.mxu0 %v12894_v54  ;;  %v12866_v40 = vor.u32 %v14326_v26, %v12863_v41  ;;  %v12581_v31 = vld [vmem:[%s24620_s12 + $0x548] sm:$0xf]  ;;  %v14151_v58 = vld [vmem:[%s24620_s12 + $0x204] sm:$0xf]  ;;  %v12163_v26 = vld [vmem:[%s24620_s12 + $0x21c] sm:$0xf0] }
 0x653   :  { %25099 = vst [vmem:[#allocation21_spill] sm:$0xff] %v22126_v63  ;;  %v12582_v18 = vor.u32 %v14259_v11, %v12581_v31  ;;  %v12835_v31 = vld [vmem:[%s24620_s12 + $0x75c] sm:$0xf0] }
 0x655   :  { %9163 = vmatpush.bf16.msrb.mxu2 %v13310_v51  ;;  %v14319_v51 = vld [vmem:[%s24620_s12 + $0x744] sm:$0xf]  ;;  %9078 = vmatpush.bf16.msra.mxu3 %v12582_v18  ;;  %v14312_v18 = vld [vmem:[%s24620_s12 + $0x70c] sm:$0xf] }
 0x656   :  { %v8739_v23 = vpop.f32.mrf.mxu3  ;;  %v8826_v57 = vpop.f32.mrf.mxu2  ;;  %9250 = vmatpush.bf16.msra.mxu1 %v12194_v52  ;;  %9337 = vmatpush.bf16.msrb.mxu0 %v12866_v40  ;;  %v12838_v11 = vor.u32 %v14319_v51, %v12835_v31  ;;  %v14427_v52 = vld [vmem:[%s24620_s12 + $0xaa0] sm:$0xf0]  ;;  %v14144_v40 = vld [vmem:[%s24620_s12 + $0x1cc] sm:$0xf] }
 0x657   :  { %v22158_v54 = vadd.f32 %v8739_v23, %v21892_v42  ;;  %v22170_v41 = vadd.f32 %v8826_v57, %v21845_v28  ;;  %v13282_v42 = vor.u32 %v14434_v60, %v13281_v9  ;;  %v12166_v23 = vor.u32 %v14151_v58, %v12163_v26  ;;  %v13253_v28 = vld [vmem:[%s24620_s12 + $0xa88] sm:$0xf] }
 0x658   :  { %v13254_v9 = vor.u32 %v14427_v52, %v13253_v28  ;;  %v12135_v57 = vld [vmem:[%s24620_s12 + $0x1e4] sm:$0xf0] }
 0x659   :  { %25100 = vst [vmem:[#allocation47_spill] sm:$0xff] %v22158_v54  ;;  %v22180_v63 = vpop.f32.mrf.mxu0  ;;  %9164 = vmatpush.bf16.msrb.mxu2 %v13282_v42  ;;  %v12807_v60 = vld [vmem:[%s24620_s12 + $0x724] sm:$0xf0]  ;;  %v12138_v58 = vor.u32 %v14144_v40, %v12135_v57  ;;  %v13673_v42 = vld [vmem:[%s24620_s12 + $0xdd0] sm:$0xf] }
 0x65a   :  { %v22178_v54 = vpop.f32.mrf.mxu1  ;;  %9251 = vmatpush.bf16.msra.mxu1 %v12166_v23  ;;  %9338 = vmatpush.bf16.msrb.mxu0 %v12838_v11  ;;  %v12810_v26 = vor.u32 %v14312_v18, %v12807_v60  ;;  %v14532_v23 = vld [vmem:[%s24620_s12 + $0xde8] sm:$0xf0]  ;;  %v13645_v18 = vld [vmem:[%s24620_s12 + $0xd98] sm:$0xf] }
 0x65b   :  { %8973 = vmatmul.bf16.gmra.mxu3 %v21441_v39  ;;  %9060 = vmatmul.bf16.gmra.mxu2 %v25072_v3  ;;  %v13674_v31 = vor.u32 %v14532_v23, %v13673_v42 }
 0x65c   :  { %9234 = vmatmul.bf16.gmra.mxu0 %v25074_v53 }
 0x65d   :  { %9147 = vmatmul.bf16.gmra.mxu1 %v25073_v8  ;;  %9165 = vmatpush.bf16.msrb.mxu2 %v13254_v9 }
 0x65e   :  { %v8742_v51 = vpop.f32.mrf.mxu3  ;;  %v8829_v52 = vpop.f32.mrf.mxu2  ;;  %9252 = vmatpush.bf16.msra.mxu1 %v12138_v58  ;;  %9187 = vmatpush.bf16.msrb.mxu3 %v13674_v31 }
 0x65f   :  { %v22211_v28 = vadd.f32 %v8742_v51, %v21929_v0  ;;  %v22214_v11 = vadd.f32 %v8829_v52, %v21898_v2  ;;  %9339 = vmatpush.bf16.msrb.mxu0 %v12810_v26  ;;  %v14525_v0 = vld [vmem:[%s24620_s12 + $0xdb0] sm:$0xf0] }
 0x660   :  { %v13646_v9 = vor.u32 %v14525_v0, %v13645_v18 }
 0x661   :  { %v22218_v57 = vpop.f32.mrf.mxu0 }
 0x662   :  { %v22216_v40 = vpop.f32.mrf.mxu1  ;;  %9188 = vmatpush.bf16.msrb.mxu3 %v13646_v9 }
 0x666   :  { %v8744_v60 = vpop.f32.mrf.mxu3  ;;  %v8831_v58 = vpop.f32.mrf.mxu2 }
 0x667   :  { %v22227_v2 = vadd.f32 %v8744_v60, %v21944_v46  ;;  %v22230_v26 = vadd.f32 %v8831_v58, %v21935_v45  ;;  %v13617_v46 = vld [vmem:[%s24620_s12 + $0xd60] sm:$0xf]  ;;  %v14518_v45 = vld [vmem:[%s24620_s12 + $0xd78] sm:$0xf0]  ;;  %v22257_v58 = vperm.slane %v21695_v37, 2 }
 0x668   :  { %v13618_v31 = vor.u32 %v14518_v45, %v13617_v46 }
 0x669   :  { %v22234_v23 = vpop.f32.mrf.mxu0  ;;  %v8994_v37 = vadd.f32 %v21982_v6, %v22257_v58 }
 0x66a   :  { %v22232_v42 = vpop.f32.mrf.mxu1  ;;  %9189 = vmatpush.bf16.msrb.mxu3 %v13618_v31 }
 0x66b   :  { %8978 = vmatmul.bf16.gmra.mxu3 %v21413_v10  ;;  %9065 = vmatmul.bf16.gmra.mxu2 %v25075_v34 }
 0x66c   :  { %9239 = vmatmul.bf16.gmra.mxu0 %v25034_v13  ;;  %v13589_v13 = vld [vmem:[%s24620_s12 + $0xd28] sm:$0xf] }
 0x66d   :  { %9152 = vmatmul.bf16.gmra.mxu1 %v20595_v1 }
 0x66e   :  { %v8747_v51 = vpop.f32.mrf.mxu3  ;;  %v8834_v18 = vpop.f32.mrf.mxu2 }
 0x66f   :  { %v22247_v52 = vadd.f32 %v8747_v51, %v21963_v19  ;;  %v22250_v0 = vadd.f32 %v8834_v18, %v21948_v24  ;;  %v14511_v19 = vld [vmem:[%s24620_s12 + $0xd40] sm:$0xf0] }
 0x670   :  { %v13590_v45 = vor.u32 %v14511_v19, %v13589_v13  ;;  %v13561_v13 = vld [vmem:[%s24620_s12 + $0xcf0] sm:$0xf]  ;;  %v14249_v19 = vld [vmem:[%s24620_s12 + $0x514] sm:$0xf] }
 0x671   :  { %25101 = vst [vmem:[#allocation46_spill] sm:$0xff] %v22247_v52  ;;  %v22254_v9 = vpop.f32.mrf.mxu0 }
 0x672   :  { %v22252_v60 = vpop.f32.mrf.mxu1  ;;  %9190 = vmatpush.bf16.msrb.mxu3 %v13590_v45  ;;  %v14417_v45 = vld [vmem:[%s24620_s12 + $0xa54] sm:$0xf] }
 0x673   :  { %25102 = vst [vmem:[#allocation48_spill] sm:$0xff] %v22252_v60 }
 0x676   :  { %v8749_v46 = vpop.f32.mrf.mxu3  ;;  %v8836_v51 = vpop.f32.mrf.mxu2 }
 0x677   :  { %v22266_v24 = vadd.f32 %v8749_v46, %v21978_v44  ;;  %v22269_v31 = vadd.f32 %v8836_v51, %v21967_v59  ;;  %v14504_v59 = vld [vmem:[%s24620_s12 + $0xd08] sm:$0xf0]  ;;  %v12555_v46 = vld [vmem:[%s24620_s12 + $0x52c] sm:$0xf0] }
 0x678   :  { %v13562_v6 = vor.u32 %v14504_v59, %v13561_v13  ;;  %v13227_v13 = vld [vmem:[%s24620_s12 + $0xa6c] sm:$0xf0]  ;;  %v12113_v59 = vld [vmem:[%s24620_s12 + $0x198] sm:$0xf] }
 0x679   :  { %25103 = vst [vmem:[#allocation49_spill] sm:$0xff] %v22266_v24  ;;  %v22275_v52 = vpop.f32.mrf.mxu0 }
 0x67a   :  { %v9022_v18 = vpop.f32.mrf.mxu1  ;;  %25104 = vst [vmem:[#allocation50_spill] sm:$0xff] %v22275_v52  ;;  %v14141_v52 = vld [vmem:[%s24620_s12 + $0x1b0] sm:$0xf0]  ;;  %9191 = vmatpush.bf16.msrb.mxu3 %v13562_v6  ;;  %v12085_v6 = vld [vmem:[%s24620_s12 + $0x160] sm:$0xf] }
 0x67b   :  { %v22273_v60 = vadd.f32 %v9022_v18, %v8994_v37  ;;  %9079 = vmatmul.bf16.vlgmr.msra.gmra.mxu3 %v25076_v29  ;;  %9166 = vmatmul.bf16.vlgmr.msrb.gmra.mxu2 %v25077_v49  ;;  %v12558_v18 = vor.u32 %v14249_v19, %v12555_v46 }
 0x67c   :  { %9340 = vmatmul.bf16.vlgmr.msrb.gmra.mxu0 %v25079_v15  ;;  %v13230_v15 = vor.u32 %v14417_v45, %v13227_v13  ;;  %v14134_v45 = vld [vmem:[%s24620_s12 + $0x178] sm:$0xf0] }
 0x67d   :  { %9253 = vmatmul.bf16.vlgmr.msra.gmra.mxu1 %v25078_v25  ;;  %v12114_v25 = vor.u32 %v14141_v52, %v12113_v59  ;;  %9274 = vmatpush.bf16.msra.mxu2 %v12558_v18  ;;  %v14242_v52 = vld [vmem:[%s24620_s12 + $0x4dc] sm:$0xf]  ;;  %v12086_v13 = vor.u32 %v14134_v45, %v12085_v6  ;;  %v13533_v59 = vld [vmem:[%s24620_s12 + $0xcb8] sm:$0xf]  ;;  %v14127_v45 = vld [vmem:[%s24620_s12 + $0x140] sm:$0xf0] }
 0x67e   :  { %v8848_v44 = vpop.f32.mrf.mxu3  ;;  %v22297_v37 = vpop.f32.mrf.mxu2  ;;  %9361 = vmatpush.bf16.msrb.mxu1 %v13230_v15 }
 0x67f   :  { %v8849_v51 = vadd.f32 %v8848_v44, %v22016_v7  ;;  %v8996_v7 = vadd.f32 %v22020_v56, %v22257_v58  ;;  %9448 = vmatpush.bf16.msra.mxu0 %v12114_v25  ;;  %v12527_v56 = vld [vmem:[%s24620_s12 + $0x4f4] sm:$0xf0] }
 0x680   :  { %v12530_v15 = vor.u32 %v14242_v52, %v12527_v56  ;;  %v12499_v52 = vld [vmem:[%s24620_s12 + $0x4bc] sm:$0xf0]  ;;  %v14403_v56 = vld [vmem:[%s24620_s12 + $0x9e4] sm:$0xf] }
 0x681   :  { %v8878_v44 = vadd.f32 %v21704_v35, %v8849_v51  ;;  %v22316_v29 = vpop.f32.mrf.mxu0  ;;  %v14410_v35 = vld [vmem:[%s24620_s12 + $0xa1c] sm:$0xf] }
 0x682   :  { %v9024_v19 = vpop.f32.mrf.mxu1  ;;  %25105 = vst [vmem:[#allocation16_spill] sm:$0xff] %v22316_v29  ;;  %9275 = vmatpush.bf16.msra.mxu2 %v12530_v15  ;;  %v12057_v15 = vld [vmem:[%s24620_s12 + $0x128] sm:$0xf] }
 0x683   :  { %v22312_v46 = vadd.f32 %v21980_v47, %v8878_v44  ;;  %v22314_v49 = vadd.f32 %v9024_v19, %v8996_v7  ;;  %v13199_v47 = vld [vmem:[%s24620_s12 + $0xa34] sm:$0xf0]  ;;  %v14497_v7 = vld [vmem:[%s24620_s12 + $0xcd0] sm:$0xf0]  ;;  %v14235_v44 = vld [vmem:[%s24620_s12 + $0x4a4] sm:$0xf]  ;;  %9449 = vmatpush.bf16.msra.mxu0 %v12086_v13 }
 0x684   :  { %v13202_v18 = vor.u32 %v14410_v35, %v13199_v47  ;;  %v13534_v19 = vor.u32 %v14497_v7, %v13533_v59  ;;  %v13171_v35 = vld [vmem:[%s24620_s12 + $0x9fc] sm:$0xf0]  ;;  %v8999_v47 = vadd.f32 %v22072_v32, %v22257_v58  ;;  %v12502_v6 = vor.u32 %v14235_v44, %v12499_v52  ;;  %v12471_v13 = vld [vmem:[%s24620_s12 + $0x484] sm:$0xf0]  ;;  %v14396_v44 = vld [vmem:[%s24620_s12 + $0x9ac] sm:$0xf] }
 0x685   :  { %v13174_v7 = vor.u32 %v14403_v56, %v13171_v35  ;;  %v12058_v32 = vor.u32 %v14127_v45, %v12057_v15  ;;  %v13143_v56 = vld [vmem:[%s24620_s12 + $0x9c4] sm:$0xf0]  ;;  %v12029_v35 = vld [vmem:[%s24620_s12 + $0xf0] sm:$0xf] }
 0x686   :  { %v22327_v25 = vpop.f32.mrf.mxu3  ;;  %v22338_v51 = vpop.f32.mrf.mxu2  ;;  %9362 = vmatpush.bf16.msrb.mxu1 %v13202_v18  ;;  %9192 = vmatpush.bf16.msrb.mxu3 %v13534_v19  ;;  %v14228_v18 = vld [vmem:[%s24620_s12 + $0x46c] sm:$0xf]  ;;  %v13146_v45 = vor.u32 %v14396_v44, %v13143_v56  ;;  %v13115_v44 = vld [vmem:[%s24620_s12 + $0x98c] sm:$0xf0] }
 0x687   :  { %9276 = vmatpush.bf16.msra.mxu2 %v12502_v6  ;;  %v12474_v52 = vor.u32 %v14228_v18, %v12471_v13  ;;  %9450 = vmatpush.bf16.msra.mxu0 %v12058_v32  ;;  %v14490_v18 = vld [vmem:[%s24620_s12 + $0xc98] sm:$0xf0]  ;;  %v14221_v13 = vld [vmem:[%s24620_s12 + $0x434] sm:$0xf] }
 0x688   :  { %v14389_v32 = vld [vmem:[%s24620_s12 + $0x974] sm:$0xf] }
 0x689   :  { %v22368_v24 = vpop.f32.mrf.mxu0 }
 0x68a   :  { %v9027_v59 = vpop.f32.mrf.mxu1  ;;  %25106 = vst [vmem:[#allocation7_spill] sm:$0xff] %v22368_v24  ;;  %9363 = vmatpush.bf16.msrb.mxu1 %v13174_v7  ;;  %v13505_v7 = vld [vmem:[%s24620_s12 + $0xc80] sm:$0xf] }
 0x68b   :  { %v22366_v29 = vadd.f32 %v9027_v59, %v8999_v47  ;;  %9084 = vmatmul.bf16.gmra.mxu3 %v25081_v36  ;;  %9171 = vmatmul.bf16.gmra.mxu2 %v25082_v61  ;;  %v14120_v47 = vld [vmem:[%s24620_s12 + $0x108] sm:$0xf0]  ;;  %v13506_v24 = vor.u32 %v14490_v18, %v13505_v7  ;;  %v14113_v7 = vld [vmem:[%s24620_s12 + $0xd0] sm:$0xf0] }
 0x68c   :  { %9345 = vmatmul.bf16.gmra.mxu0 %v25084_v12  ;;  %v12030_v59 = vor.u32 %v14120_v47, %v12029_v35  ;;  %9277 = vmatpush.bf16.msra.mxu2 %v12474_v52  ;;  %v12001_v47 = vld [vmem:[%s24620_s12 + $0xb8] sm:$0xf]  ;;  %v13118_v12 = vor.u32 %v14389_v32, %v13115_v44  ;;  %v14106_v32 = vld [vmem:[%s24620_s12 + $0x98] sm:$0xf0] }
 0x68d   :  { %9258 = vmatmul.bf16.gmra.mxu1 %v25083_v55  ;;  %9193 = vmatpush.bf16.msrb.mxu3 %v13506_v24  ;;  %v12002_v52 = vor.u32 %v14113_v7, %v12001_v47  ;;  %v14207_v47 = vld [vmem:[%s24620_s12 + $0x3c4] sm:$0xf] }
 0x68e   :  { %v8853_v19 = vpop.f32.mrf.mxu3  ;;  %v22393_v15 = vpop.f32.mrf.mxu2  ;;  %9364 = vmatpush.bf16.msrb.mxu1 %v13146_v45  ;;  %9451 = vmatpush.bf16.msra.mxu0 %v12030_v59  ;;  %v12415_v45 = vld [vmem:[%s24620_s12 + $0x414] sm:$0xf0] }
 0x68f   :  { %v8854_v6 = vadd.f32 %v8853_v19, %v22118_v48  ;;  %v12443_v48 = vld [vmem:[%s24620_s12 + $0x44c] sm:$0xf0]  ;;  %v9001_v19 = vadd.f32 %v22128_v43, %v22257_v58  ;;  %v13087_v59 = vld [vmem:[%s24620_s12 + $0x954] sm:$0xf0] }
 0x690   :  { %v12446_v35 = vor.u32 %v14221_v13, %v12443_v48  ;;  %v11973_v48 = vld [vmem:[%s24620_s12 + $0x80] sm:$0xf] }
 0x691   :  { %v8883_v56 = vadd.f32 %v21792_v14, %v8854_v6  ;;  %v22427_v14 = vpop.f32.mrf.mxu0  ;;  %v14214_v6 = vld [vmem:[%s24620_s12 + $0x3fc] sm:$0xf] }
 0x692   :  { %v9029_v18 = vpop.f32.mrf.mxu1  ;;  %25107 = vst [vmem:[#allocation38_spill] sm:$0xff] %v22427_v14  ;;  %9278 = vmatpush.bf16.msra.mxu2 %v12446_v35  ;;  %9365 = vmatpush.bf16.msrb.mxu1 %v13118_v12  ;;  %v12418_v13 = vor.u32 %v14214_v6, %v12415_v45  ;;  %v13477_v12 = vld [vmem:[%s24620_s12 + $0xc48] sm:$0xf]  ;;  %v14483_v35 = vld [vmem:[%s24620_s12 + $0xc60] sm:$0xf0]  ;;  %v9004_v45 = vadd.f32 %v22180_v63, %v22257_v58 }
 0x693   :  { %v22423_v55 = vadd.f32 %v22070_v22, %v8883_v56  ;;  %v22425_v43 = vadd.f32 %v9029_v18, %v9001_v19  ;;  %v14382_v22 = vld [vmem:[%s24620_s12 + $0x93c] sm:$0xf]  ;;  %9452 = vmatpush.bf16.msra.mxu0 %v12002_v52  ;;  %v11974_v56 = vor.u32 %v14106_v32, %v11973_v48  ;;  %v13478_v7 = vor.u32 %v14483_v35, %v13477_v12  ;;  %v12387_v18 = vld [vmem:[%s24620_s12 + $0x3dc] sm:$0xf0]  ;;  %v14375_v52 = vld [vmem:[%s24620_s12 + $0x904] sm:$0xf] }
 0x694   :  { %v13090_v19 = vor.u32 %v14382_v22, %v13087_v59  ;;  %v13059_v6 = vld [vmem:[%s24620_s12 + $0x91c] sm:$0xf0]  ;;  %v12390_v22 = vor.u32 %v14207_v47, %v12387_v18  ;;  %v11945_v59 = vld [vmem:[%s24620_s12 + $0x48] sm:$0xf]  ;;  %v14099_v48 = vld [vmem:[%s24620_s12 + $0x60] sm:$0xf0] }
 0x695   :  { %9194 = vmatpush.bf16.msrb.mxu3 %v13478_v7  ;;  %v13062_v12 = vor.u32 %v14375_v52, %v13059_v6  ;;  %v11946_v63 = vor.u32 %v14099_v48, %v11945_v59  ;;  %v13031_v18 = vld [vmem:[%s24620_s12 + $0x8e4] sm:$0xf0]  ;;  %v11917_v52 = vld [vmem:[%s24620_s12 + $0x10] sm:$0xf]  ;;  %v14092_v59 = vld [vmem:[%s24620_s12 + $0x28] sm:$0xf0] }
 0x696   :  { %v22438_v24 = vpop.f32.mrf.mxu3  ;;  %v22449_v44 = vpop.f32.mrf.mxu2  ;;  %9279 = vmatpush.bf16.msra.mxu2 %v12418_v13  ;;  %9366 = vmatpush.bf16.msrb.mxu1 %v13090_v19  ;;  %v14200_v13 = vld [vmem:[%s24620_s12 + $0x38c] sm:$0xf]  ;;  %v12359_v19 = vld [vmem:[%s24620_s12 + $0x3a4] sm:$0xf0]  ;;  %v14305_v48 = vld [vmem:[%s24620_s12 + $0x6d4] sm:$0xf] }
 0x697   :  { %9453 = vmatpush.bf16.msra.mxu0 %v11974_v56  ;;  %v12362_v7 = vor.u32 %v14200_v13, %v12359_v19  ;;  %v14368_v56 = vld [vmem:[%s24620_s12 + $0x8cc] sm:$0xf] }
 0x699   :  { %v22479_v14 = vpop.f32.mrf.mxu0 }
 0x69a   :  { %v9032_v32 = vpop.f32.mrf.mxu1  ;;  %25108 = vst [vmem:[#allocation31_spill] sm:$0xff] %v22479_v14  ;;  %9280 = vmatpush.bf16.msra.mxu2 %v12390_v22  ;;  %9367 = vmatpush.bf16.msrb.mxu1 %v13062_v12  ;;  %v13034_v22 = vor.u32 %v14368_v56, %v13031_v18  ;;  %v11918_v12 = vor.u32 %v14092_v59, %v11917_v52 }
 0x69b   :  { %v22477_v35 = vadd.f32 %v9032_v32, %v9004_v45  ;;  %9089 = vmatmul.bf16.gmra.mxu3 %v25086_v17  ;;  %9176 = vmatmul.bf16.gmra.mxu2 %v25087_v50  ;;  %v12779_v32 = vld [vmem:[%s24620_s12 + $0x6ec] sm:$0xf0] }
 0x69c   :  { %9350 = vmatmul.bf16.gmra.mxu0 %v25089_v21  ;;  %v12782_v13 = vor.u32 %v14305_v48, %v12779_v32 }
 0x69d   :  { %9263 = vmatmul.bf16.gmra.mxu1 %v25088_v5  ;;  %9454 = vmatpush.bf16.msra.mxu0 %v11946_v63 }
 0x69e   :  { %v8858_v47 = vpop.f32.mrf.mxu3  ;;  %v22501_v45 = vpop.f32.mrf.mxu2  ;;  %9281 = vmatpush.bf16.msra.mxu2 %v12362_v7  ;;  %9368 = vmatpush.bf16.msrb.mxu1 %v13034_v22  ;;  %v14298_v7 = vld [vmem:[%s24620_s12 + $0x69c] sm:$0xf] }
 0x69f   :  { %v8859_v6 = vadd.f32 %v8858_v47, %v22214_v11  ;;  %v9006_v11 = vadd.f32 %v22218_v57, %v22257_v58  ;;  %9303 = vmatpush.bf16.msra.mxu3 %v12782_v13  ;;  %v9009_v57 = vadd.f32 %v22234_v23, %v22257_v58  ;;  %v25111_v23 = vld [vmem:[#allocation42_spill] sm:$0xff]  ;;  %v9011_v13 = vadd.f32 %v22254_v9, %v22257_v58 }
 0x6a1   :  { %v8888_v63 = vadd.f32 %v21896_v27, %v8859_v6  ;;  %v22520_v18 = vpop.f32.mrf.mxu0  ;;  %9455 = vmatpush.bf16.msra.mxu0 %v11918_v12 }
 0x6a2   :  { %v9034_v19 = vpop.f32.mrf.mxu1  ;;  %25109 = vst [vmem:[#allocation33_spill] sm:$0xff] %v22520_v18  ;;  %v8856_v18 = vadd.f32 %v22438_v24, %v22170_v41  ;;  %v14190_v41 = vld [vmem:[%s24620_s12 + $0x338] sm:$0xf0]  ;;  %v12981_v24 = vld [vmem:[%s24620_s12 + $0x860] sm:$0xf] }
 0x6a3   :  { %v22516_v47 = vadd.f32 %v22178_v54, %v8888_v63  ;;  %v22518_v56 = vadd.f32 %v9034_v19, %v9006_v11  ;;  %v12751_v54 = vld [vmem:[%s24620_s12 + $0x6b4] sm:$0xf0] }
 0x6a4   :  { %v12754_v59 = vor.u32 %v14298_v7, %v12751_v54  ;;  %v25112_v11 = vld [vmem:[#allocation40_spill] sm:$0xff] }
 0x6a6   :  { %v22522_v14 = vpop.f32.mrf.mxu3  ;;  %v22524_v52 = vpop.f32.mrf.mxu2  ;;  %9304 = vmatpush.bf16.msra.mxu3 %v12754_v59 }
 0x6a9   :  { %v22536_v22 = vpop.f32.mrf.mxu0 }
 0x6aa   :  { %v9037_v27 = vpop.f32.mrf.mxu1  ;;  %25110 = vst [vmem:[#allocation32_spill] sm:$0xff] %v22536_v22 }
 0x6ab   :  { %v22534_v6 = vadd.f32 %v9037_v27, %v9009_v57  ;;  %9094 = vmatmul.bf16.gmra.mxu3 %v25092_v4  ;;  %9181 = vmatmul.bf16.gmra.mxu2 %v25093_v62  ;;  %v14291_v57 = vld [vmem:[%s24620_s12 + $0x664] sm:$0xf]  ;;  %v12723_v27 = vld [vmem:[%s24620_s12 + $0x67c] sm:$0xf0] }
 0x6ac   :  { %9355 = vmatmul.bf16.gmra.mxu0 %v25111_v23  ;;  %v12726_v59 = vor.u32 %v14291_v57, %v12723_v27  ;;  %v25115_v57 = vld [vmem:[#allocation25_spill] sm:$0xff] }
 0x6ad   :  { %9268 = vmatmul.bf16.gmra.mxu1 %v25055_v20  ;;  %v25119_v62 = vld [vmem:[#allocation37_spill] sm:$0xff] }
 0x6ae   :  { %v8863_v48 = vpop.f32.mrf.mxu3  ;;  %v22543_v12 = vpop.f32.mrf.mxu2  ;;  %9305 = vmatpush.bf16.msra.mxu3 %v12726_v59  ;;  %v25117_v59 = vld [vmem:[#allocation9_spill] sm:$0xff]  ;;  %14570 = vtanh.f32 %v25119_v62  ;;  %v14473_v62 = vld [vmem:[%s24620_s12 + $0xc14] sm:$0xf] }
 0x6af   :  { %v8864_v32 = vadd.f32 %v8863_v48, %v22250_v0  ;;  %v8851_v48 = vadd.f32 %v22327_v25, %v22062_v33  ;;  %v8936_v33 = vadd.f32 %v22297_v37, %v22312_v46  ;;  %v25116_v25 = vld [vmem:[#allocation24_spill] sm:$0xff]  ;;  %v14277_v37 = vld [vmem:[%s24620_s12 + $0x5f4] sm:$0xf]  ;;  %v12667_v46 = vld [vmem:[%s24620_s12 + $0x60c] sm:$0xf0] }
 0x6b1   :  { %v8893_v63 = vadd.f32 %v25112_v11, %v8864_v32  ;;  %v22559_v54 = vpop.f32.mrf.mxu0  ;;  %v8880_v27 = vadd.f32 %v25116_v25, %v8851_v48  ;;  %v14197_v48 = vld [vmem:[%s24620_s12 + $0x370] sm:$0xf0]  ;;  %v13009_v25 = vld [vmem:[%s24620_s12 + $0x898] sm:$0xf] }
 0x6b2   :  { %v9039_v19 = vpop.f32.mrf.mxu1  ;;  %25113 = vst [vmem:[#allocation35_spill] sm:$0xff] %v22559_v54  ;;  %v25118_v54 = vld [vmem:[#allocation29_spill] sm:$0xff] }
 0x6b3   :  { %v22555_v7 = vadd.f32 %v22232_v42, %v8893_v63  ;;  %v22557_v0 = vadd.f32 %v9039_v19, %v9011_v13  ;;  %v14284_v42 = vld [vmem:[%s24620_s12 + $0x62c] sm:$0xf]  ;;  %v12695_v13 = vld [vmem:[%s24620_s12 + $0x644] sm:$0xf0]  ;;  %v25114_v63 = vld [vmem:[#allocation11_spill] sm:$0xff] }
 0x6b4   :  { %v12698_v19 = vor.u32 %v14284_v42, %v12695_v13  ;;  %v25120_v42 = vld [vmem:[#allocation41_spill] sm:$0xff] }
 0x6b5   :  { %v8909_v13 = vadd.f32 %v25120_v42, %v8880_v27  ;;  %v14365_v27 = vld [vmem:[%s24620_s12 + $0x8b0] sm:$0xf0] }
 0x6b6   :  { %v22561_v9 = vpop.f32.mrf.mxu3  ;;  %v22563_v58 = vpop.f32.mrf.mxu2  ;;  %9306 = vmatpush.bf16.msra.mxu3 %v12698_v19 }
 0x6b7   :  { %v8938_v42 = vadd.f32 %v22338_v51, %v8909_v13  ;;  %v14466_v13 = vld [vmem:[%s24620_s12 + $0xbdc] sm:$0xf] }
 0x6b9   :  { %v22575_v11 = vpop.f32.mrf.mxu0 }
 0x6ba   :  { %v22567_v32 = vpop.f32.mrf.mxu1 }
 0x6bb   :  { %9195 = vmatmul.bf16.vlgmr.msrb.gmra.mxu3 %v25114_v63  ;;  %9282 = vmatmul.bf16.vlgmr.msra.gmra.mxu2 %v25115_v57 }
 0x6bc   :  { %9456 = vmatmul.bf16.vlgmr.msra.gmra.mxu0 %v25118_v54 }
 0x6bd   :  { %9369 = vmatmul.bf16.vlgmr.msrb.gmra.mxu1 %v25117_v59 }
 0x6be   :  { %v8964_v22 = vpop.f32.mrf.mxu3  ;;  %v9051_v20 = vpop.f32.mrf.mxu2 }
 0x6bf   :  { %v8965_v23 = vadd.f32 %v8964_v22, %v8936_v33  ;;  %v22586_v63 = vadd.f32 %v9051_v20, %v22273_v60  ;;  %v12670_v20 = vor.u32 %v14277_v37, %v12667_v46  ;;  %v13451_v60 = vld [vmem:[%s24620_s12 + $0xc2c] sm:$0xf0]  ;;  %v13010_v37 = vor.u32 %v14365_v27, %v13009_v25  ;;  %v14571_v46 = vpop.eup %14570  ;;  %v14270_v25 = vld [vmem:[%s24620_s12 + $0x5bc] sm:$0xf]  ;;  %v12639_v27 = vld [vmem:[%s24620_s12 + $0x5d4] sm:$0xf0] }
 0x6c0   :  { %v13454_v19 = vor.u32 %v14473_v62, %v13451_v60  ;;  %v25121_v60 = vld [vmem:[#allocation12_spill] sm:$0xff] }
 0x6c1   :  { %14572 = vtanh.f32 %v8965_v23  ;;  %v22600_v22 = vpop.f32.mrf.mxu0  ;;  %v12337_v23 = vld [vmem:[%s24620_s12 + $0x358] sm:$0xf]  ;;  %9307 = vmatpush.bf16.msra.mxu3 %v12670_v20  ;;  %9564 = vmatpush.bf16.msrb.mxu0 %v13010_v37 }
 0x6c2   :  { %v22589_v57 = vpop.f32.mrf.mxu1  ;;  %v12338_v33 = vor.u32 %v14197_v48, %v12337_v23  ;;  %9390 = vmatpush.bf16.msrb.mxu2 %v13454_v19  ;;  %14574 = vtanh.f32 %v25121_v60  ;;  %v12281_v60 = vld [vmem:[%s24620_s12 + $0x2e8] sm:$0xf] }
 0x6c4   :  { %9477 = vmatpush.bf16.msra.mxu1 %v12338_v33  ;;  %v14358_v33 = vld [vmem:[%s24620_s12 + $0x878] sm:$0xf0] }
 0x6c6   :  { %v8966_v54 = vpop.f32.mrf.mxu3  ;;  %v9053_v62 = vpop.f32.mrf.mxu2 }
 0x6c7   :  { %v14573_v59 = vpop.eup %14572  ;;  %v8967_v4 = vadd.f32 %v8966_v54, %v8938_v42  ;;  %v22620_v48 = vadd.f32 %v9053_v62, %v22314_v49  ;;  %v13423_v54 = vld [vmem:[%s24620_s12 + $0xbf4] sm:$0xf0]  ;;  %v13395_v62 = vld [vmem:[%s24620_s12 + $0xbbc] sm:$0xf0] }
 0x6c8   :  { %v10200_v23 = vpack.c.bf16 %v14573_v59, %v14571_v46  ;;  %v13426_v49 = vor.u32 %v14466_v13, %v13423_v54  ;;  %v8941_v59 = vadd.f32 %v22393_v15, %v22423_v55  ;;  %v25122_v42 = vld [vmem:[#allocation36_spill] sm:$0xff]  ;;  %v12982_v55 = vor.u32 %v14358_v33, %v12981_v24  ;;  %v14459_v46 = vld [vmem:[%s24620_s12 + $0xba4] sm:$0xf]  ;;  %v25123_v13 = vld [vmem:[#allocation30_spill] sm:$0xff] }
 0x6c9   :  { %14576 = vtanh.f32 %v8967_v4  ;;  %v22632_v20 = vpop.f32.mrf.mxu0  ;;  %v12309_v4 = vld [vmem:[%s24620_s12 + $0x320] sm:$0xf]  ;;  %v8885_v37 = vadd.f32 %v25122_v42, %v8856_v18  ;;  %v12642_v15 = vor.u32 %v14270_v25, %v12639_v27  ;;  %v13398_v54 = vor.u32 %v14459_v46, %v13395_v62  ;;  %v25124_v42 = vld [vmem:[#allocation51_spill] sm:$0xff] }
 0x6ca   :  { %10232 = vst [vmem:[#allocation2] sm:$0xff] %v10200_v23  ;;  %v22624_v51 = vpop.f32.mrf.mxu1  ;;  %v12310_v19 = vor.u32 %v14190_v41, %v12309_v4  ;;  %9391 = vmatpush.bf16.msrb.mxu2 %v13426_v49  ;;  %v14575_v23 = vpop.eup %14574  ;;  %v14183_v49 = vld [vmem:[%s24620_s12 + $0x300] sm:$0xf0]  ;;  %v12953_v4 = vld [vmem:[%s24620_s12 + $0x828] sm:$0xf]  ;;  %9565 = vmatpush.bf16.msrb.mxu0 %v12982_v55  ;;  %14578 = vtanh.f32 %v25124_v42 }
 0x6cb   :  { %9200 = vmatmul.bf16.gmra.mxu3 %v21425_v30  ;;  %9287 = vmatmul.bf16.gmra.mxu2 %v25069_v16  ;;  %v14351_v41 = vld [vmem:[%s24620_s12 + $0x840] sm:$0xf0]  ;;  %v12282_v27 = vor.u32 %v14183_v49, %v12281_v60  ;;  %v13367_v55 = vld [vmem:[%s24620_s12 + $0xb84] sm:$0xf0]  ;;  %v14176_v60 = vld [vmem:[%s24620_s12 + $0x2c8] sm:$0xf0] }
 0x6cc   :  { %9461 = vmatmul.bf16.gmra.mxu0 %v25123_v13  ;;  %9478 = vmatpush.bf16.msra.mxu1 %v12310_v19  ;;  %v12954_v19 = vor.u32 %v14351_v41, %v12953_v4  ;;  %v25125_v13 = vld [vmem:[#allocation21_spill] sm:$0xff] }
 0x6cd   :  { %9374 = vmatmul.bf16.gmra.mxu1 %v20615_v38  ;;  %9308 = vmatpush.bf16.msra.mxu3 %v12642_v15  ;;  %v8914_v38 = vadd.f32 %v25125_v13, %v8885_v37  ;;  %v12253_v37 = vld [vmem:[%s24620_s12 + $0x2b0] sm:$0xf]  ;;  %v12611_v49 = vld [vmem:[%s24620_s12 + $0x59c] sm:$0xf0] }
 0x6ce   :  { %v8969_v18 = vpop.f32.mrf.mxu3  ;;  %v9056_v25 = vpop.f32.mrf.mxu2  ;;  %9392 = vmatpush.bf16.msrb.mxu2 %v13398_v54  ;;  %9566 = vmatpush.bf16.msrb.mxu0 %v12954_v19  ;;  %v12254_v13 = vor.u32 %v14176_v60, %v12253_v37  ;;  %v14263_v54 = vld [vmem:[%s24620_s12 + $0x584] sm:$0xf] }
 0x6cf   :  { %v14577_v24 = vpop.eup %14576  ;;  %v8970_v33 = vadd.f32 %v8969_v18, %v8941_v59  ;;  %v22679_v62 = vadd.f32 %v9056_v25, %v22366_v29  ;;  %v14452_v59 = vld [vmem:[%s24620_s12 + $0xb6c] sm:$0xf]  ;;  %v8943_v4 = vadd.f32 %v22449_v44, %v8914_v38  ;;  %v13339_v25 = vld [vmem:[%s24620_s12 + $0xb4c] sm:$0xf0]  ;;  %v14169_v38 = vld [vmem:[%s24620_s12 + $0x290] sm:$0xf0] }
 0x6d0   :  { %v10204_v46 = vpack.c.bf16 %v14577_v24, %v14575_v23  ;;  %9479 = vmatpush.bf16.msra.mxu1 %v12282_v27  ;;  %v13370_v29 = vor.u32 %v14452_v59, %v13367_v55  ;;  %v12925_v23 = vld [vmem:[%s24620_s12 + $0x7f0] sm:$0xf]  ;;  %v14344_v18 = vld [vmem:[%s24620_s12 + $0x808] sm:$0xf0]  ;;  %v12614_v24 = vor.u32 %v14263_v54, %v12611_v49  ;;  %v12225_v27 = vld [vmem:[%s24620_s12 + $0x278] sm:$0xf]  ;;  %v14579_v19 = vpop.eup %14578  ;;  %v8861_v49 = vadd.f32 %v22522_v14, %v22230_v26 }
 0x6d1   :  { %14580 = vtanh.f32 %v8970_v33  ;;  %v22690_v15 = vpop.f32.mrf.mxu0  ;;  %v12926_v41 = vor.u32 %v14344_v18, %v12925_v23  ;;  %v14445_v33 = vld [vmem:[%s24620_s12 + $0xb34] sm:$0xf]  ;;  %v12897_v44 = vld [vmem:[%s24620_s12 + $0x7b8] sm:$0xf]  ;;  %v12226_v60 = vor.u32 %v14169_v38, %v12225_v27  ;;  %v14162_v14 = vld [vmem:[%s24620_s12 + $0x258] sm:$0xf0]  ;;  %v8946_v27 = vadd.f32 %v22501_v45, %v22516_v47 }
 0x6d2   :  { %10237 = vst [vmem:[#allocation2 + $0x1c] sm:$0xff] %v10204_v46  ;;  %v22682_v16 = vpop.f32.mrf.mxu1  ;;  %9393 = vmatpush.bf16.msrb.mxu2 %v13370_v29  ;;  %v13342_v46 = vor.u32 %v14445_v33, %v13339_v25  ;;  %v14337_v59 = vld [vmem:[%s24620_s12 + $0x7d0] sm:$0xf0]  ;;  %9309 = vmatpush.bf16.msra.mxu3 %v12614_v24  ;;  %v12869_v25 = vld [vmem:[%s24620_s12 + $0x780] sm:$0xf] }
 0x6d3   :  { %9567 = vmatpush.bf16.msrb.mxu0 %v12926_v41  ;;  %v12898_v23 = vor.u32 %v14337_v59, %v12897_v44  ;;  %v13311_v41 = vld [vmem:[%s24620_s12 + $0xb14] sm:$0xf0]  ;;  %v12583_v38 = vld [vmem:[%s24620_s12 + $0x564] sm:$0xf0]  ;;  %v25127_v44 = vld [vmem:[#allocation5_spill] sm:$0xff] }
 0x6d4   :  { %9480 = vmatpush.bf16.msra.mxu1 %v12254_v13  ;;  %v25126_v13 = vld [vmem:[#allocation47_spill] sm:$0xff]  ;;  %v8890_v59 = vadd.f32 %v25127_v44, %v8861_v49  ;;  %v12841_v49 = vld [vmem:[%s24620_s12 + $0x748] sm:$0xf] }
 0x6d5   :  { %14582 = vtanh.f32 %v25126_v13 }
 0x6d6   :  { %v8971_v42 = vpop.f32.mrf.mxu3  ;;  %v9058_v37 = vpop.f32.mrf.mxu2  ;;  %9394 = vmatpush.bf16.msrb.mxu2 %v13342_v46  ;;  %v14256_v46 = vld [vmem:[%s24620_s12 + $0x54c] sm:$0xf] }
 0x6d7   :  { %v14581_v55 = vpop.eup %14580  ;;  %v8972_v29 = vadd.f32 %v8971_v42, %v8943_v4  ;;  %v22731_v54 = vadd.f32 %v9058_v37, %v22425_v43  ;;  %v14438_v4 = vld [vmem:[%s24620_s12 + $0xafc] sm:$0xf]  ;;  %9568 = vmatpush.bf16.msrb.mxu0 %v12898_v23  ;;  %v12197_v43 = vld [vmem:[%s24620_s12 + $0x240] sm:$0xf]  ;;  %v12586_v47 = vor.u32 %v14256_v46, %v12583_v38  ;;  %v12169_v37 = vld [vmem:[%s24620_s12 + $0x208] sm:$0xf]  ;;  %v8919_v46 = vadd.f32 %v22216_v40, %v8890_v59 }
 0x6d8   :  { %v10208_v18 = vpack.c.bf16 %v14581_v55, %v14579_v19  ;;  %9481 = vmatpush.bf16.msra.mxu1 %v12226_v60  ;;  %v13314_v26 = vor.u32 %v14438_v4, %v13311_v41  ;;  %v12198_v19 = vor.u32 %v14162_v14, %v12197_v43  ;;  %v14330_v42 = vld [vmem:[%s24620_s12 + $0x798] sm:$0xf0]  ;;  %v14431_v55 = vld [vmem:[%s24620_s12 + $0xac4] sm:$0xf]  ;;  %v12141_v40 = vld [vmem:[%s24620_s12 + $0x1d0] sm:$0xf] }
 0x6d9   :  { %14584 = vtanh.f32 %v8972_v29  ;;  %v22743_v24 = vpop.f32.mrf.mxu0  ;;  %v12870_v45 = vor.u32 %v14330_v42, %v12869_v25  ;;  %v13283_v29 = vld [vmem:[%s24620_s12 + $0xadc] sm:$0xf0]  ;;  %v14323_v4 = vld [vmem:[%s24620_s12 + $0x760] sm:$0xf0]  ;;  %9310 = vmatpush.bf16.msra.mxu3 %v12586_v47  ;;  %v14148_v59 = vld [vmem:[%s24620_s12 + $0x1e8] sm:$0xf0] }
 0x6da   :  { %10241 = vst [vmem:[#allocation2 + $0x38] sm:$0xff] %v10208_v18  ;;  %v22735_v33 = vpop.f32.mrf.mxu1  ;;  %9395 = vmatpush.bf16.msrb.mxu2 %v13314_v26  ;;  %v13286_v13 = vor.u32 %v14431_v55, %v13283_v29  ;;  %v14155_v18 = vld [vmem:[%s24620_s12 + $0x220] sm:$0xf0]  ;;  %v12842_v25 = vor.u32 %v14323_v4, %v12841_v49  ;;  %14586 = vtanh.f32 %v22211_v28  ;;  %v13255_v28 = vld [vmem:[%s24620_s12 + $0xaa4] sm:$0xf0]  ;;  %v12142_v47 = vor.u32 %v14148_v59, %v12141_v40  ;;  %v25129_v59 = vld [vmem:[#allocation28_spill] sm:$0xff] }
 0x6db   :  { %9205 = vmatmul.bf16.gmra.mxu3 %v21441_v39  ;;  %9292 = vmatmul.bf16.gmra.mxu2 %v25072_v3  ;;  %v14583_v60 = vpop.eup %14582  ;;  %v12170_v14 = vor.u32 %v14155_v18, %v12169_v37  ;;  %v14316_v55 = vld [vmem:[%s24620_s12 + $0x728] sm:$0xf0]  ;;  %v14529_v29 = vld [vmem:[%s24620_s12 + $0xdd4] sm:$0xf]  ;;  %v13675_v37 = vld [vmem:[%s24620_s12 + $0xdec] sm:$0xf0] }
 0x6dc   :  { %9466 = vmatmul.bf16.gmra.mxu0 %v25074_v53  ;;  %9482 = vmatpush.bf16.msra.mxu1 %v12198_v19  ;;  %v14522_v18 = vld [vmem:[%s24620_s12 + $0xd9c] sm:$0xf]  ;;  %v13647_v49 = vld [vmem:[%s24620_s12 + $0xdb4] sm:$0xf0] }
 0x6dd   :  { %9379 = vmatmul.bf16.gmra.mxu1 %v25073_v8  ;;  %9569 = vmatpush.bf16.msrb.mxu0 %v12870_v45  ;;  %v12813_v45 = vld [vmem:[%s24620_s12 + $0x710] sm:$0xf] }
 0x6de   :  { %v8974_v23 = vpop.f32.mrf.mxu3  ;;  %v9061_v43 = vpop.f32.mrf.mxu2  ;;  %9396 = vmatpush.bf16.msrb.mxu2 %v13286_v13  ;;  %v13678_v13 = vor.u32 %v14529_v29, %v13675_v37 }
 0x6df   :  { %v14585_v41 = vpop.eup %14584  ;;  %v8975_v26 = vadd.f32 %v8974_v23, %v8946_v27  ;;  %v22790_v42 = vadd.f32 %v9061_v43, %v22477_v35  ;;  %v14424_v27 = vld [vmem:[%s24620_s12 + $0xa8c] sm:$0xf]  ;;  %v12814_v23 = vor.u32 %v14316_v55, %v12813_v45 }
 0x6e0   :  { %v10212_v19 = vpack.c.bf16 %v14585_v41, %v14583_v60  ;;  %9483 = vmatpush.bf16.msra.mxu1 %v12170_v14  ;;  %v13258_v35 = vor.u32 %v14424_v27, %v13255_v28  ;;  %v8948_v60 = vadd.f32 %v22524_v52, %v8919_v46  ;;  %v14587_v4 = vpop.eup %14586  ;;  %9419 = vmatpush.bf16.msrb.mxu3 %v13678_v13 }
 0x6e1   :  { %14588 = vtanh.f32 %v8975_v26  ;;  %v22801_v44 = vpop.f32.mrf.mxu0  ;;  %9570 = vmatpush.bf16.msrb.mxu0 %v12842_v25  ;;  %v8866_v46 = vadd.f32 %v22561_v9, %v22269_v31  ;;  %v14515_v31 = vld [vmem:[%s24620_s12 + $0xd64] sm:$0xf]  ;;  %v13619_v9 = vld [vmem:[%s24620_s12 + $0xd7c] sm:$0xf0] }
 0x6e2   :  { %10245 = vst [vmem:[#allocation2 + $0x54] sm:$0xff] %v10212_v19  ;;  %v22793_v38 = vpop.f32.mrf.mxu1  ;;  %9397 = vmatpush.bf16.msrb.mxu2 %v13258_v35  ;;  %14590 = vtanh.f32 %v22227_v2  ;;  %v13650_v19 = vor.u32 %v14522_v18, %v13647_v49  ;;  %v8951_v2 = vadd.f32 %v22543_v12, %v22555_v7  ;;  %v25130_v7 = vld [vmem:[#allocation46_spill] sm:$0xff] }
 0x6e4   :  { %9484 = vmatpush.bf16.msra.mxu1 %v12142_v47  ;;  %9420 = vmatpush.bf16.msrb.mxu3 %v13650_v19  ;;  %v13622_v47 = vor.u32 %v14515_v31, %v13619_v9 }
 0x6e5   :  { %9571 = vmatpush.bf16.msrb.mxu0 %v12814_v23  ;;  %v25131_v23 = vld [vmem:[#allocation48_spill] sm:$0xff] }
 0x6e6   :  { %v8976_v41 = vpop.f32.mrf.mxu3  ;;  %v9063_v14 = vpop.f32.mrf.mxu2 }
 0x6e7   :  { %v14589_v26 = vpop.eup %14588  ;;  %v8977_v43 = vadd.f32 %v8976_v41, %v8948_v60  ;;  %v22830_v25 = vadd.f32 %v9063_v14, %v22518_v56  ;;  %v25128_v56 = vld [vmem:[#allocation10_spill] sm:$0xff]  ;;  %v22864_v41 = vld [vmem:[%s24621_s13] sm:$0x7f] }
 0x6e8   :  { %v10216_v52 = vpack.c.bf16 %v14589_v26, %v14587_v4  ;;  %v8895_v35 = vadd.f32 %v25128_v56, %v8866_v46  ;;  %v14591_v40 = vpop.eup %14590  ;;  %9421 = vmatpush.bf16.msrb.mxu3 %v13622_v47  ;;  %v22867_v26 = vperm.slane %v22864_v41, 3  ;;  %v25132_v56 = vld [vmem:[#allocation49_spill] sm:$0xff] }
 0x6e9   :  { %14592 = vtanh.f32 %v8977_v43  ;;  %v22836_v28 = vpop.f32.mrf.mxu0  ;;  %v13591_v43 = vld [vmem:[%s24620_s12 + $0xd44] sm:$0xf0] }
 0x6ea   :  { %10249 = vst [vmem:[#allocation2 + $0x70] sm:$0xff] %v10216_v52  ;;  %v22834_v27 = vpop.f32.mrf.mxu1  ;;  %14594 = vtanh.f32 %v25130_v7  ;;  %v8924_v13 = vadd.f32 %v25131_v23, %v8895_v35  ;;  %v9226_v9 = vadd.f32 %v22575_v11, %v22867_v26  ;;  %v13563_v11 = vld [vmem:[%s24620_s12 + $0xd0c] sm:$0xf0] }
 0x6eb   :  { %9210 = vmatmul.bf16.gmra.mxu3 %v21413_v10  ;;  %9297 = vmatmul.bf16.gmra.mxu2 %v25075_v34 }
 0x6ec   :  { %9471 = vmatmul.bf16.gmra.mxu0 %v25129_v59  ;;  %v8953_v4 = vadd.f32 %v22563_v58, %v8924_v13 }
 0x6ed   :  { %9384 = vmatmul.bf16.gmra.mxu1 %v20595_v1 }
 0x6ee   :  { %v8979_v45 = vpop.f32.mrf.mxu3  ;;  %v9066_v12 = vpop.f32.mrf.mxu2 }
 0x6ef   :  { %v14593_v55 = vpop.eup %14592  ;;  %v8980_v29 = vadd.f32 %v8979_v45, %v8951_v2  ;;  %v22853_v60 = vadd.f32 %v9066_v12, %v22534_v6  ;;  %v14508_v6 = vld [vmem:[%s24620_s12 + $0xd2c] sm:$0xf]  ;;  %v25136_v12 = vld [vmem:[#allocation27_spill] sm:$0xff] }
 0x6f0   :  { %v10220_v37 = vpack.c.bf16 %v14593_v55, %v14591_v40  ;;  %v14595_v14 = vpop.eup %14594  ;;  %v13594_v19 = vor.u32 %v14508_v6, %v13591_v43  ;;  %v25134_v55 = vld [vmem:[#allocation18_spill] sm:$0xff]  ;;  %v14253_v6 = vld [vmem:[%s24620_s12 + $0x530] sm:$0xf0]  ;;  %v13233_v43 = vld [vmem:[%s24620_s12 + $0xa58] sm:$0xf] }
 0x6f1   :  { %14596 = vtanh.f32 %v8980_v29  ;;  %v22858_v49 = vpop.f32.mrf.mxu0  ;;  %v25135_v29 = vld [vmem:[#allocation39_spill] sm:$0xff] }
 0x6f2   :  { %10253 = vst [vmem:[#allocation2 + $0x8c] sm:$0xff] %v10220_v37  ;;  %v22856_v18 = vpop.f32.mrf.mxu1  ;;  %14598 = vtanh.f32 %v25132_v56  ;;  %9422 = vmatpush.bf16.msrb.mxu3 %v13594_v19  ;;  %v25137_v37 = vld [vmem:[#allocation43_spill] sm:$0xff]  ;;  %v12115_v56 = vld [vmem:[%s24620_s12 + $0x1b4] sm:$0xf0] }
 0x6f6   :  { %v8981_v52 = vpop.f32.mrf.mxu3  ;;  %v9068_v2 = vpop.f32.mrf.mxu2 }
 0x6f7   :  { %v14597_v58 = vpop.eup %14596  ;;  %v8982_v46 = vadd.f32 %v8981_v52, %v8953_v4  ;;  %v22877_v31 = vadd.f32 %v9068_v2, %v22557_v0  ;;  %v14501_v0 = vld [vmem:[%s24620_s12 + $0xcf4] sm:$0xf]  ;;  %v12561_v4 = vld [vmem:[%s24620_s12 + $0x518] sm:$0xf]  ;;  %v14138_v2 = vld [vmem:[%s24620_s12 + $0x19c] sm:$0xf] }
 0x6f8   :  { %v10224_v35 = vpack.c.bf16 %v14597_v58, %v14595_v14  ;;  %v14599_v7 = vpop.eup %14598  ;;  %v13566_v13 = vor.u32 %v14501_v0, %v13563_v11  ;;  %v12562_v58 = vor.u32 %v14253_v6, %v12561_v4  ;;  %v25138_v0 = vld [vmem:[#allocation50_spill] sm:$0xff] }
 0x6f9   :  { %14600 = vtanh.f32 %v8982_v46  ;;  %v22883_v47 = vpop.f32.mrf.mxu0  ;;  %v14421_v46 = vld [vmem:[%s24620_s12 + $0xa70] sm:$0xf0] }
 0x6fa   :  { %10257 = vst [vmem:[#allocation2 + $0xa8] sm:$0xff] %v10224_v35  ;;  %v9254_v40 = vpop.f32.mrf.mxu1  ;;  %9423 = vmatpush.bf16.msrb.mxu3 %v13566_v13  ;;  %9506 = vmatpush.bf16.msra.mxu2 %v12562_v58  ;;  %v12533_v13 = vld [vmem:[%s24620_s12 + $0x4e0] sm:$0xf] }
 0x6fb   :  { %v22881_v45 = vadd.f32 %v9254_v40, %v9226_v9  ;;  %25133 = vst [vmem:[#allocation40_spill] sm:$0xff] %v22883_v47  ;;  %9311 = vmatmul.bf16.vlgmr.msra.gmra.mxu3 %v25134_v55  ;;  %9398 = vmatmul.bf16.vlgmr.msrb.gmra.mxu2 %v25135_v29  ;;  %v13234_v9 = vor.u32 %v14421_v46, %v13233_v43  ;;  %v13205_v43 = vld [vmem:[%s24620_s12 + $0xa20] sm:$0xf] }
 0x6fc   :  { %9572 = vmatmul.bf16.vlgmr.msrb.gmra.mxu0 %v25137_v37  ;;  %v12118_v40 = vor.u32 %v14138_v2, %v12115_v56  ;;  %v12087_v58 = vld [vmem:[%s24620_s12 + $0x17c] sm:$0xf0] }
 0x6fd   :  { %9485 = vmatmul.bf16.vlgmr.msra.gmra.mxu1 %v25136_v12 }
 0x6fe   :  { %v9080_v23 = vpop.f32.mrf.mxu3  ;;  %v9167_v19 = vpop.f32.mrf.mxu2  ;;  %9593 = vmatpush.bf16.msrb.mxu1 %v13234_v9  ;;  %9680 = vmatpush.bf16.msra.mxu0 %v12118_v40  ;;  %v14494_v9 = vld [vmem:[%s24620_s12 + $0xcbc] sm:$0xf]  ;;  %v13535_v40 = vld [vmem:[%s24620_s12 + $0xcd4] sm:$0xf0] }
 0x6ff   :  { %v14601_v14 = vpop.eup %14600  ;;  %v9081_v52 = vadd.f32 %v9080_v23, %v22586_v63  ;;  %v9228_v63 = vadd.f32 %v22600_v22, %v22867_v26  ;;  %v14246_v22 = vld [vmem:[%s24620_s12 + $0x4f8] sm:$0xf0] }
 0x700   :  { %v10228_v35 = vpack.c.bf16 %v14601_v14, %v14599_v7 }
 0x701   :  { %v9110_v11 = vadd.f32 %v25138_v0, %v9081_v52  ;;  %v22920_v47 = vpop.f32.mrf.mxu0  ;;  %v14414_v52 = vld [vmem:[%s24620_s12 + $0xa38] sm:$0xf0]  ;;  %v13538_v0 = vor.u32 %v14494_v9, %v13535_v40  ;;  %v12477_v40 = vld [vmem:[%s24620_s12 + $0x470] sm:$0xf] }
 0x702   :  { %10261 = vst [vmem:[#allocation2 + $0xc4] sm:$0xff] %v10228_v35  ;;  %v9256_v23 = vpop.f32.mrf.mxu1  ;;  %v13206_v56 = vor.u32 %v14414_v52, %v13205_v43 }
 0x703   :  { %v9139_v4 = vadd.f32 %v22567_v32, %v9110_v11  ;;  %v22918_v6 = vadd.f32 %v9256_v23, %v9228_v63  ;;  %25139 = vst [vmem:[#allocation24_spill] sm:$0xff] %v22920_v47  ;;  %v12534_v32 = vor.u32 %v14246_v22, %v12533_v13  ;;  %v12505_v63 = vld [vmem:[%s24620_s12 + $0x4a8] sm:$0xf]  ;;  %v14407_v23 = vld [vmem:[%s24620_s12 + $0xa00] sm:$0xf0]  ;;  %v25140_v13 = vld [vmem:[#allocation16_spill] sm:$0xff]  ;;  %9424 = vmatpush.bf16.msrb.mxu3 %v13538_v0 }
 0x704   :  { %v13177_v11 = vld [vmem:[%s24620_s12 + $0x9e8] sm:$0xf]  ;;  %9594 = vmatpush.bf16.msrb.mxu1 %v13206_v56  ;;  %v25143_v0 = vld [vmem:[#allocation44_spill] sm:$0xff] }
 0x705   :  { %v22922_v7 = vadd.f32 %v9167_v19, %v9139_v4  ;;  %v14131_v19 = vld [vmem:[%s24620_s12 + $0x164] sm:$0xf]  ;;  %9507 = vmatpush.bf16.msra.mxu2 %v12534_v32  ;;  %v9231_v4 = vadd.f32 %v22632_v20, %v22867_v26  ;;  %v12059_v32 = vld [vmem:[%s24620_s12 + $0x144] sm:$0xf0] }
 0x706   :  { %v9082_v14 = vpop.f32.mrf.mxu3  ;;  %v9169_v2 = vpop.f32.mrf.mxu2  ;;  %v12090_v35 = vor.u32 %v14131_v19, %v12087_v58  ;;  %v13178_v19 = vor.u32 %v14407_v23, %v13177_v11  ;;  %v14400_v11 = vld [vmem:[%s24620_s12 + $0x9c8] sm:$0xf0]  ;;  %v14117_v23 = vld [vmem:[%s24620_s12 + $0xf4] sm:$0xf] }
 0x707   :  { %v9083_v46 = vadd.f32 %v9082_v14, %v22620_v48  ;;  %v14239_v48 = vld [vmem:[%s24620_s12 + $0x4c0] sm:$0xf0]  ;;  %v14124_v14 = vld [vmem:[%s24620_s12 + $0x12c] sm:$0xf] }
 0x708   :  { %9681 = vmatpush.bf16.msra.mxu0 %v12090_v35  ;;  %v12506_v43 = vor.u32 %v14239_v48, %v12505_v63  ;;  %v12062_v20 = vor.u32 %v14124_v14, %v12059_v32  ;;  %v25142_v35 = vld [vmem:[#allocation34_spill] sm:$0xff]  ;;  %v13149_v63 = vld [vmem:[%s24620_s12 + $0x9b0] sm:$0xf]  ;;  %9595 = vmatpush.bf16.msrb.mxu1 %v13178_v19  ;;  %v14487_v32 = vld [vmem:[%s24620_s12 + $0xc84] sm:$0xf] }
 0x709   :  { %v9112_v22 = vadd.f32 %v25140_v13, %v9083_v46  ;;  %v22974_v46 = vpop.f32.mrf.mxu0  ;;  %v12449_v19 = vld [vmem:[%s24620_s12 + $0x438] sm:$0xf] }
 0x70a   :  { %v9259_v52 = vpop.f32.mrf.mxu1  ;;  %25141 = vst [vmem:[#allocation37_spill] sm:$0xff] %v22974_v46  ;;  %9508 = vmatpush.bf16.msra.mxu2 %v12506_v43  ;;  %v13150_v43 = vor.u32 %v14400_v11, %v13149_v63  ;;  %v25144_v63 = vld [vmem:[#allocation7_spill] sm:$0xff] }
 0x70b   :  { %v9141_v58 = vadd.f32 %v22589_v57, %v9112_v22  ;;  %v22971_v9 = vadd.f32 %v9259_v52, %v9231_v4  ;;  %9316 = vmatmul.bf16.gmra.mxu3 %v25081_v36  ;;  %9403 = vmatmul.bf16.gmra.mxu2 %v25082_v61  ;;  %v14232_v57 = vld [vmem:[%s24620_s12 + $0x488] sm:$0xf0]  ;;  %v12031_v4 = vld [vmem:[%s24620_s12 + $0x10c] sm:$0xf0]  ;;  %v13507_v52 = vld [vmem:[%s24620_s12 + $0xc9c] sm:$0xf0] }
 0x70c   :  { %9577 = vmatmul.bf16.gmra.mxu0 %v25143_v0  ;;  %v12034_v14 = vor.u32 %v14117_v23, %v12031_v4  ;;  %v14110_v23 = vld [vmem:[%s24620_s12 + $0xbc] sm:$0xf]  ;;  %v12003_v4 = vld [vmem:[%s24620_s12 + $0xd4] sm:$0xf0]  ;;  %9596 = vmatpush.bf16.msrb.mxu1 %v13150_v43  ;;  %v13093_v43 = vld [vmem:[%s24620_s12 + $0x940] sm:$0xf] }
 0x70d   :  { %v22977_v56 = vadd.f32 %v9169_v2, %v9141_v58  ;;  %9490 = vmatmul.bf16.gmra.mxu1 %v25142_v35  ;;  %v12478_v2 = vor.u32 %v14232_v57, %v12477_v40  ;;  %9682 = vmatpush.bf16.msra.mxu0 %v12062_v20  ;;  %v13510_v58 = vor.u32 %v14487_v32, %v13507_v52  ;;  %v13121_v20 = vld [vmem:[%s24620_s12 + $0x978] sm:$0xf]  ;;  %v14393_v40 = vld [vmem:[%s24620_s12 + $0x990] sm:$0xf0] }
 0x70e   :  { %v9085_v48 = vpop.f32.mrf.mxu3  ;;  %v9172_v22 = vpop.f32.mrf.mxu2  ;;  %v9233_v57 = vadd.f32 %v22690_v15, %v22867_v26  ;;  %v13122_v52 = vor.u32 %v14393_v40, %v13121_v20  ;;  %v12006_v15 = vor.u32 %v14110_v23, %v12003_v4  ;;  %v12393_v23 = vld [vmem:[%s24620_s12 + $0x3c8] sm:$0xf] }
 0x70f   :  { %v9086_v13 = vadd.f32 %v9085_v48, %v22679_v62  ;;  %v14225_v62 = vld [vmem:[%s24620_s12 + $0x450] sm:$0xf0]  ;;  %9509 = vmatpush.bf16.msra.mxu2 %v12478_v2  ;;  %9425 = vmatpush.bf16.msrb.mxu3 %v13510_v58 }
 0x710   :  { %v12450_v11 = vor.u32 %v14225_v62, %v12449_v19  ;;  %v14218_v19 = vld [vmem:[%s24620_s12 + $0x418] sm:$0xf0]  ;;  %9597 = vmatpush.bf16.msrb.mxu1 %v13122_v52  ;;  %v11975_v62 = vld [vmem:[%s24620_s12 + $0x9c] sm:$0xf0]  ;;  %v14379_v52 = vld [vmem:[%s24620_s12 + $0x920] sm:$0xf0] }
 0x711   :  { %v9115_v48 = vadd.f32 %v25144_v63, %v9086_v13  ;;  %9683 = vmatpush.bf16.msra.mxu0 %v12034_v14  ;;  %v12421_v13 = vld [vmem:[%s24620_s12 + $0x400] sm:$0xf] }
 0x712   :  { %v9261_v32 = vpop.f32.mrf.mxu1  ;;  %v12422_v14 = vor.u32 %v14218_v19, %v12421_v13  ;;  %v25146_v13 = vld [vmem:[#allocation38_spill] sm:$0xff] }
 0x713   :  { %v9144_v47 = vadd.f32 %v22624_v51, %v9115_v48  ;;  %v23028_v46 = vadd.f32 %v9261_v32, %v9233_v57  ;;  %9510 = vmatpush.bf16.msra.mxu2 %v12450_v11  ;;  %v23041_v51 = vpop.f32.mrf.mxu0  ;;  %v14480_v48 = vld [vmem:[%s24620_s12 + $0xc4c] sm:$0xf]  ;;  %v13479_v11 = vld [vmem:[%s24620_s12 + $0xc64] sm:$0xf0] }
 0x714   :  { %25145 = vst [vmem:[#allocation41_spill] sm:$0xff] %v23041_v51  ;;  %v13482_v4 = vor.u32 %v14480_v48, %v13479_v11  ;;  %v13065_v32 = vld [vmem:[%s24620_s12 + $0x908] sm:$0xf] }
 0x715   :  { %v23030_v2 = vadd.f32 %v9172_v22, %v9144_v47  ;;  %v14386_v47 = vld [vmem:[%s24620_s12 + $0x958] sm:$0xf0]  ;;  %v14103_v22 = vld [vmem:[%s24620_s12 + $0x84] sm:$0xf]  ;;  %9684 = vmatpush.bf16.msra.mxu0 %v12006_v15  ;;  %v9236_v15 = vadd.f32 %v22743_v24, %v22867_v26 }
 0x716   :  { %v9087_v58 = vpop.f32.mrf.mxu3  ;;  %v9174_v40 = vpop.f32.mrf.mxu2  ;;  %v13094_v57 = vor.u32 %v14386_v47, %v13093_v43  ;;  %v11978_v63 = vor.u32 %v14103_v22, %v11975_v62  ;;  %v11947_v47 = vld [vmem:[%s24620_s12 + $0x64] sm:$0xf0]  ;;  %9426 = vmatpush.bf16.msrb.mxu3 %v13482_v4  ;;  %v13066_v62 = vor.u32 %v14379_v52, %v13065_v32  ;;  %v14089_v4 = vld [vmem:[%s24620_s12 + $0x14] sm:$0xf] }
 0x717   :  { %v9088_v20 = vadd.f32 %v9087_v58, %v22731_v54  ;;  %v14211_v54 = vld [vmem:[%s24620_s12 + $0x3e0] sm:$0xf0]  ;;  %9511 = vmatpush.bf16.msra.mxu2 %v12422_v14  ;;  %v14096_v58 = vld [vmem:[%s24620_s12 + $0x4c] sm:$0xf] }
 0x718   :  { %v12394_v43 = vor.u32 %v14211_v54, %v12393_v23  ;;  %9598 = vmatpush.bf16.msrb.mxu1 %v13094_v57  ;;  %v11950_v24 = vor.u32 %v14096_v58, %v11947_v47  ;;  %v14372_v23 = vld [vmem:[%s24620_s12 + $0x8e8] sm:$0xf0] }
 0x719   :  { %v9117_v19 = vadd.f32 %v25146_v13, %v9088_v20  ;;  %9685 = vmatpush.bf16.msra.mxu0 %v11978_v63  ;;  %v12365_v20 = vld [vmem:[%s24620_s12 + $0x390] sm:$0xf]  ;;  %v12785_v13 = vld [vmem:[%s24620_s12 + $0x6d8] sm:$0xf] }
 0x71a   :  { %v9264_v22 = vpop.f32.mrf.mxu1 }
 0x71b   :  { %v9146_v48 = vadd.f32 %v22682_v16, %v9117_v19  ;;  %v23081_v11 = vadd.f32 %v9264_v22, %v9236_v15  ;;  %9321 = vmatmul.bf16.gmra.mxu3 %v25086_v17  ;;  %9408 = vmatmul.bf16.gmra.mxu2 %v25087_v50  ;;  %v14204_v16 = vld [vmem:[%s24620_s12 + $0x3a8] sm:$0xf0]  ;;  %v11919_v15 = vld [vmem:[%s24620_s12 + $0x2c] sm:$0xf0]  ;;  %v14309_v19 = vld [vmem:[%s24620_s12 + $0x6f0] sm:$0xf0] }
 0x71c   :  { %9512 = vmatpush.bf16.msra.mxu2 %v12394_v43  ;;  %9582 = vmatmul.bf16.gmra.mxu0 %v25089_v21  ;;  %v12366_v63 = vor.u32 %v14204_v16, %v12365_v20  ;;  %v23114_v43 = vpop.f32.mrf.mxu0  ;;  %v11922_v58 = vor.u32 %v14089_v4, %v11919_v15  ;;  %v12786_v47 = vor.u32 %v14309_v19, %v12785_v13  ;;  %v25147_v22 = vld [vmem:[#allocation31_spill] sm:$0xff]  ;;  %v12757_v16 = vld [vmem:[%s24620_s12 + $0x6a0] sm:$0xf] }
 0x71d   :  { %v23085_v14 = vadd.f32 %v9174_v40, %v9146_v48  ;;  %9495 = vmatmul.bf16.gmra.mxu1 %v25088_v5  ;;  %v13037_v40 = vld [vmem:[%s24620_s12 + $0x8d0] sm:$0xf]  ;;  %9686 = vmatpush.bf16.msra.mxu0 %v11950_v24 }
 0x71e   :  { %v9090_v57 = vpop.f32.mrf.mxu3  ;;  %9599 = vmatpush.bf16.msrb.mxu1 %v13066_v62  ;;  %v9177_v32 = vpop.f32.mrf.mxu2  ;;  %v13038_v52 = vor.u32 %v14372_v23, %v13037_v40  ;;  %9535 = vmatpush.bf16.msra.mxu3 %v12786_v47  ;;  %v25151_v47 = vld [vmem:[#allocation14_spill] sm:$0xff] }
 0x71f   :  { %v9091_v54 = vadd.f32 %v9090_v57, %v22790_v42  ;;  %v9238_v42 = vadd.f32 %v22801_v44, %v22867_v26  ;;  %v14302_v57 = vld [vmem:[%s24620_s12 + $0x6b8] sm:$0xf0] }
 0x720   :  { %9513 = vmatpush.bf16.msra.mxu2 %v12366_v63  ;;  %v12758_v40 = vor.u32 %v14302_v57, %v12757_v16  ;;  %v9243_v57 = vadd.f32 %v22858_v49, %v22867_v26 }
 0x721   :  { %v9120_v62 = vadd.f32 %v25147_v22, %v9091_v54  ;;  %9687 = vmatpush.bf16.msra.mxu0 %v11922_v58  ;;  %v25148_v54 = vld [vmem:[#allocation33_spill] sm:$0xff]  ;;  %v25152_v22 = vld [vmem:[#allocation23_spill] sm:$0xff] }
 0x722   :  { %v9266_v48 = vpop.f32.mrf.mxu1  ;;  %9600 = vmatpush.bf16.msrb.mxu1 %v13038_v52  ;;  %9536 = vmatpush.bf16.msra.mxu3 %v12758_v40  ;;  %v25154_v40 = vld [vmem:[#allocation32_spill] sm:$0xff] }
 0x723   :  { %v9149_v24 = vadd.f32 %v22735_v33, %v9120_v62  ;;  %v23120_v20 = vadd.f32 %v9266_v48, %v9238_v42  ;;  %v9241_v33 = vadd.f32 %v22836_v28, %v22867_v26  ;;  %v14295_v28 = vld [vmem:[%s24620_s12 + $0x680] sm:$0xf0] }
 0x724   :  { %v23134_v15 = vpop.f32.mrf.mxu0 }
 0x725   :  { %v23128_v44 = vadd.f32 %v9177_v32, %v9149_v24  ;;  %25149 = vst [vmem:[#allocation12_spill] sm:$0xff] %v23134_v15  ;;  %v25150_v32 = vld [vmem:[#allocation26_spill] sm:$0xff] }
 0x726   :  { %v9092_v63 = vpop.f32.mrf.mxu3  ;;  %v9179_v4 = vpop.f32.mrf.mxu2 }
 0x727   :  { %v9093_v23 = vadd.f32 %v9092_v63, %v22830_v25  ;;  %v12729_v25 = vld [vmem:[%s24620_s12 + $0x668] sm:$0xf] }
 0x728   :  { %v12730_v62 = vor.u32 %v14295_v28, %v12729_v25 }
 0x729   :  { %v9122_v52 = vadd.f32 %v25148_v54, %v9093_v23 }
 0x72a   :  { %v9269_v13 = vpop.f32.mrf.mxu1  ;;  %9537 = vmatpush.bf16.msra.mxu3 %v12730_v62 }
 0x72b   :  { %v9151_v19 = vadd.f32 %v22793_v38, %v9122_v52  ;;  %v23137_v58 = vadd.f32 %v9269_v13, %v9241_v33  ;;  %9326 = vmatmul.bf16.gmra.mxu3 %v25150_v32  ;;  %9413 = vmatmul.bf16.gmra.mxu2 %v25151_v47  ;;  %v25153_v38 = vld [vmem:[#allocation42_spill] sm:$0xff]  ;;  %v12701_v52 = vld [vmem:[%s24620_s12 + $0x630] sm:$0xf] }
 0x72c   :  { %9587 = vmatmul.bf16.gmra.mxu0 %v25153_v38  ;;  %v23158_v54 = vpop.f32.mrf.mxu0 }
 0x72d   :  { %v23147_v42 = vadd.f32 %v9179_v4, %v9151_v19  ;;  %9500 = vmatmul.bf16.gmra.mxu1 %v25152_v22 }
 0x72e   :  { %v9095_v48 = vpop.f32.mrf.mxu3  ;;  %v9182_v16 = vpop.f32.mrf.mxu2 }
 0x72f   :  { %v9096_v24 = vadd.f32 %v9095_v48, %v22853_v60  ;;  %v14288_v60 = vld [vmem:[%s24620_s12 + $0x648] sm:$0xf0] }
 0x730   :  { %v12702_v49 = vor.u32 %v14288_v60, %v12701_v52  ;;  %v13457_v60 = vld [vmem:[%s24620_s12 + $0xc18] sm:$0xf] }
 0x731   :  { %v9125_v63 = vadd.f32 %v25154_v40, %v9096_v24  ;;  %v25156_v24 = vld [vmem:[#allocation11_spill] sm:$0xff] }
 0x732   :  { %v9271_v23 = vpop.f32.mrf.mxu1  ;;  %9538 = vmatpush.bf16.msra.mxu3 %v12702_v49  ;;  %v14477_v49 = vld [vmem:[%s24620_s12 + $0xc30] sm:$0xf0] }
 0x733   :  { %v9154_v33 = vadd.f32 %v22834_v27, %v9125_v63  ;;  %v23156_v4 = vadd.f32 %v9271_v23, %v9243_v57  ;;  %v25155_v27 = vld [vmem:[#allocation35_spill] sm:$0xff]  ;;  %v25157_v57 = vld [vmem:[#allocation25_spill] sm:$0xff] }
 0x734   :  { %v25158_v63 = vld [vmem:[#allocation9_spill] sm:$0xff] }
 0x735   :  { %v23166_v13 = vadd.f32 %v9182_v16, %v9154_v33  ;;  %v12673_v16 = vld [vmem:[%s24620_s12 + $0x5f8] sm:$0xf]  ;;  %v23184_v33 = vpop.f32.mrf.mxu0 }
 0x736   :  { %v9097_v26 = vpop.f32.mrf.mxu3  ;;  %v9184_v25 = vpop.f32.mrf.mxu2  ;;  %25159 = vst [vmem:[#allocation36_spill] sm:$0xff] %v23184_v33 }
 0x737   :  { %v9098_v19 = vadd.f32 %v9097_v26, %v22877_v31  ;;  %v14281_v31 = vld [vmem:[%s24620_s12 + $0x610] sm:$0xf0]  ;;  %v14194_v26 = vld [vmem:[%s24620_s12 + $0x35c] sm:$0xf] }
 0x738   :  { %v12674_v23 = vor.u32 %v14281_v31, %v12673_v16  ;;  %v13011_v16 = vld [vmem:[%s24620_s12 + $0x8b4] sm:$0xf0] }
 0x739   :  { %v9127_v28 = vadd.f32 %v25155_v27, %v9098_v19  ;;  %v13458_v27 = vor.u32 %v14477_v49, %v13457_v60  ;;  %v13429_v60 = vld [vmem:[%s24620_s12 + $0xbe0] sm:$0xf]  ;;  %v14470_v49 = vld [vmem:[%s24620_s12 + $0xbf8] sm:$0xf0] }
 0x73a   :  { %v23170_v62 = vpop.f32.mrf.mxu1  ;;  %9539 = vmatpush.bf16.msra.mxu3 %v12674_v23 }
 0x73b   :  { %v9156_v48 = vadd.f32 %v22856_v18, %v9127_v28  ;;  %9427 = vmatmul.bf16.vlgmr.msrb.gmra.mxu3 %v25156_v24  ;;  %9514 = vmatmul.bf16.vlgmr.msra.gmra.mxu2 %v25157_v57  ;;  %v25160_v18 = vld [vmem:[#allocation29_spill] sm:$0xff]  ;;  %v12339_v28 = vld [vmem:[%s24620_s12 + $0x374] sm:$0xf0] }
 0x73c   :  { %9688 = vmatmul.bf16.vlgmr.msra.gmra.mxu0 %v25160_v18  ;;  %9622 = vmatpush.bf16.msrb.mxu2 %v13458_v27  ;;  %v14355_v27 = vld [vmem:[%s24620_s12 + $0x864] sm:$0xf] }
 0x73d   :  { %v23181_v40 = vadd.f32 %v9184_v25, %v9156_v48  ;;  %9601 = vmatmul.bf16.vlgmr.msrb.gmra.mxu1 %v25158_v63  ;;  %v14362_v48 = vld [vmem:[%s24620_s12 + $0x89c] sm:$0xf] }
 0x73e   :  { %v9196_v52 = vpop.f32.mrf.mxu3  ;;  %v9283_v25 = vpop.f32.mrf.mxu2 }
 0x73f   :  { %v23197_v19 = vadd.f32 %v9196_v52, %v22922_v7  ;;  %v23209_v31 = vadd.f32 %v9283_v25, %v22881_v45  ;;  %v12342_v7 = vor.u32 %v14194_v26, %v12339_v28  ;;  %v13014_v52 = vor.u32 %v14362_v48, %v13011_v16  ;;  %v14187_v45 = vld [vmem:[%s24620_s12 + $0x324] sm:$0xf]  ;;  %v12311_v26 = vld [vmem:[%s24620_s12 + $0x33c] sm:$0xf0] }
 0x740   :  { %v13430_v25 = vor.u32 %v14470_v49, %v13429_v60  ;;  %v12983_v28 = vld [vmem:[%s24620_s12 + $0x87c] sm:$0xf0]  ;;  %v12314_v16 = vor.u32 %v14187_v45, %v12311_v26  ;;  %v14274_v60 = vld [vmem:[%s24620_s12 + $0x5d8] sm:$0xf0]  ;;  %v13401_v49 = vld [vmem:[%s24620_s12 + $0xba8] sm:$0xf] }
 0x741   :  { %9709 = vmatpush.bf16.msra.mxu1 %v12342_v7  ;;  %9796 = vmatpush.bf16.msrb.mxu0 %v13014_v52  ;;  %v12986_v7 = vor.u32 %v14355_v27, %v12983_v28  ;;  %v12645_v52 = vld [vmem:[%s24620_s12 + $0x5c0] sm:$0xf]  ;;  %v14463_v45 = vld [vmem:[%s24620_s12 + $0xbc0] sm:$0xf0]  ;;  %v14180_v26 = vld [vmem:[%s24620_s12 + $0x2ec] sm:$0xf]  ;;  %v23252_v28 = vpop.f32.mrf.mxu0  ;;  %14602 = vtanh.f32 %v23197_v19 }
 0x742   :  { %v23211_v23 = vpop.f32.mrf.mxu1  ;;  %9623 = vmatpush.bf16.msrb.mxu2 %v13430_v25  ;;  %v12646_v51 = vor.u32 %v14274_v60, %v12645_v52  ;;  %v12283_v27 = vld [vmem:[%s24620_s12 + $0x304] sm:$0xf0]  ;;  %v13402_v25 = vor.u32 %v14463_v45, %v13401_v49  ;;  %v14348_v52 = vld [vmem:[%s24620_s12 + $0x82c] sm:$0xf]  ;;  %v12255_v45 = vld [vmem:[%s24620_s12 + $0x2cc] sm:$0xf0] }
 0x743   :  { %25161 = vst [vmem:[#allocation51_spill] sm:$0xff] %v23211_v23  ;;  %v12955_v60 = vld [vmem:[%s24620_s12 + $0x844] sm:$0xf0]  ;;  %v14474_v19 = vld [vmem:[%s24620_s12 + $0xc1c] sm:$0xf] }
 0x744   :  { %9540 = vmatpush.bf16.msra.mxu3 %v12646_v51  ;;  %v14173_v51 = vld [vmem:[%s24620_s12 + $0x2b4] sm:$0xf] }
 0x745   :  { %9710 = vmatpush.bf16.msra.mxu1 %v12314_v16  ;;  %9797 = vmatpush.bf16.msrb.mxu0 %v12986_v7  ;;  %v14456_v16 = vld [vmem:[%s24620_s12 + $0xb88] sm:$0xf0]  ;;  %v25164_v7 = vld [vmem:[#allocation15_spill] sm:$0xff] }
 0x746   :  { %v9198_v48 = vpop.f32.mrf.mxu3  ;;  %v9285_v15 = vpop.f32.mrf.mxu2  ;;  %9624 = vmatpush.bf16.msrb.mxu2 %v13402_v25  ;;  %v25165_v25 = vld [vmem:[#allocation30_spill] sm:$0xff] }
 0x747   :  { %v23241_v33 = vadd.f32 %v9198_v48, %v22977_v56  ;;  %v23255_v56 = vadd.f32 %v9285_v15, %v22918_v6  ;;  %v12286_v48 = vor.u32 %v14180_v26, %v12283_v27  ;;  %v25163_v6 = vld [vmem:[#allocation6_spill] sm:$0xff]  ;;  %v13373_v15 = vld [vmem:[%s24620_s12 + $0xb70] sm:$0xf]  ;;  %v14341_v26 = vld [vmem:[%s24620_s12 + $0x7f4] sm:$0xf] }
 0x748   :  { %v13374_v49 = vor.u32 %v14456_v16, %v13373_v15  ;;  %v12927_v27 = vld [vmem:[%s24620_s12 + $0x80c] sm:$0xf0]  ;;  %v14267_v15 = vld [vmem:[%s24620_s12 + $0x5a0] sm:$0xf0]  ;;  %v13345_v16 = vld [vmem:[%s24620_s12 + $0xb38] sm:$0xf] }
 0x749   :  { %25162 = vst [vmem:[#allocation21_spill] sm:$0xff] %v23241_v33  ;;  %v12958_v33 = vor.u32 %v14348_v52, %v12955_v60  ;;  %9711 = vmatpush.bf16.msra.mxu1 %v12286_v48  ;;  %v12258_v52 = vor.u32 %v14173_v51, %v12255_v45  ;;  %v12930_v60 = vor.u32 %v14341_v26, %v12927_v27  ;;  %v14449_v51 = vld [vmem:[%s24620_s12 + $0xb50] sm:$0xf0]  ;;  %v14166_v45 = vld [vmem:[%s24620_s12 + $0x27c] sm:$0xf] }
 0x74a   :  { %v23263_v23 = vpop.f32.mrf.mxu1  ;;  %9625 = vmatpush.bf16.msrb.mxu2 %v13374_v49  ;;  %v12227_v26 = vld [vmem:[%s24620_s12 + $0x294] sm:$0xf0]  ;;  %v14334_v49 = vld [vmem:[%s24620_s12 + $0x7bc] sm:$0xf] }
 0x74b   :  { %9432 = vmatmul.bf16.gmra.mxu3 %v21425_v30  ;;  %9519 = vmatmul.bf16.gmra.mxu2 %v25163_v6 }
 0x74c   :  { %9798 = vmatpush.bf16.msrb.mxu0 %v12958_v33  ;;  %v12617_v33 = vld [vmem:[%s24620_s12 + $0x588] sm:$0xf] }
 0x74d   :  { %9606 = vmatmul.bf16.gmra.mxu1 %v25164_v7  ;;  %9693 = vmatmul.bf16.gmra.mxu0 %v25165_v25  ;;  %v12618_v25 = vor.u32 %v14267_v15, %v12617_v33  ;;  %v12899_v33 = vld [vmem:[%s24620_s12 + $0x7d4] sm:$0xf0] }
 0x74e   :  { %v9201_v48 = vpop.f32.mrf.mxu3  ;;  %v9288_v6 = vpop.f32.mrf.mxu2  ;;  %9712 = vmatpush.bf16.msra.mxu1 %v12258_v52  ;;  %v12902_v15 = vor.u32 %v14334_v49, %v12899_v33  ;;  %v14159_v52 = vld [vmem:[%s24620_s12 + $0x244] sm:$0xf]  ;;  %v14260_v49 = vld [vmem:[%s24620_s12 + $0x568] sm:$0xf0]  ;;  %v13289_v33 = vld [vmem:[%s24620_s12 + $0xac8] sm:$0xf] }
 0x74f   :  { %v23297_v7 = vadd.f32 %v9201_v48, %v23030_v2  ;;  %v23309_v27 = vadd.f32 %v9288_v6, %v22971_v9  ;;  %v13346_v2 = vor.u32 %v14449_v51, %v13345_v16  ;;  %v12230_v48 = vor.u32 %v14166_v45, %v12227_v26  ;;  %9541 = vmatpush.bf16.msra.mxu3 %v12618_v25  ;;  %v13317_v9 = vld [vmem:[%s24620_s12 + $0xb00] sm:$0xf]  ;;  %v14442_v6 = vld [vmem:[%s24620_s12 + $0xb18] sm:$0xf0]  ;;  %v14327_v16 = vld [vmem:[%s24620_s12 + $0x784] sm:$0xf] }
 0x750   :  { %9799 = vmatpush.bf16.msrb.mxu0 %v12930_v60  ;;  %v13318_v25 = vor.u32 %v14442_v6, %v13317_v9  ;;  %v12199_v60 = vld [vmem:[%s24620_s12 + $0x25c] sm:$0xf0] }
 0x751   :  { %25166 = vst [vmem:[#allocation47_spill] sm:$0xff] %v23297_v7  ;;  %v23317_v7 = vpop.f32.mrf.mxu0  ;;  %9626 = vmatpush.bf16.msrb.mxu2 %v13346_v2  ;;  %v12871_v51 = vld [vmem:[%s24620_s12 + $0x79c] sm:$0xf0]  ;;  %v12202_v26 = vor.u32 %v14159_v52, %v12199_v60  ;;  %v14435_v52 = vld [vmem:[%s24620_s12 + $0xae0] sm:$0xf0] }
 0x752   :  { %v23319_v30 = vpop.f32.mrf.mxu1  ;;  %9713 = vmatpush.bf16.msra.mxu1 %v12230_v48  ;;  %v12874_v2 = vor.u32 %v14327_v16, %v12871_v51  ;;  %v12589_v48 = vld [vmem:[%s24620_s12 + $0x550] sm:$0xf]  ;;  %v14152_v60 = vld [vmem:[%s24620_s12 + $0x20c] sm:$0xf]  ;;  %v12171_v16 = vld [vmem:[%s24620_s12 + $0x224] sm:$0xf0] }
 0x753   :  { %v12590_v6 = vor.u32 %v14260_v49, %v12589_v48  ;;  %v12843_v48 = vld [vmem:[%s24620_s12 + $0x764] sm:$0xf0] }
 0x754   :  { %9800 = vmatpush.bf16.msrb.mxu0 %v12902_v15 }
 0x755   :  { %9627 = vmatpush.bf16.msrb.mxu2 %v13318_v25  ;;  %v14320_v25 = vld [vmem:[%s24620_s12 + $0x74c] sm:$0xf]  ;;  %9542 = vmatpush.bf16.msra.mxu3 %v12590_v6  ;;  %v12143_v6 = vld [vmem:[%s24620_s12 + $0x1ec] sm:$0xf0] }
 0x756   :  { %v9203_v45 = vpop.f32.mrf.mxu3  ;;  %v9290_v9 = vpop.f32.mrf.mxu2  ;;  %9714 = vmatpush.bf16.msra.mxu1 %v12202_v26  ;;  %v12846_v49 = vor.u32 %v14320_v25, %v12843_v48  ;;  %v14428_v26 = vld [vmem:[%s24620_s12 + $0xaa8] sm:$0xf0]  ;;  %v14533_v25 = vld [vmem:[%s24620_s12 + $0xdf0] sm:$0xf0] }
 0x757   :  { %v23349_v15 = vadd.f32 %v9203_v45, %v23085_v14  ;;  %v23361_v51 = vadd.f32 %v9290_v9, %v23028_v46  ;;  %v13290_v14 = vor.u32 %v14435_v52, %v13289_v33  ;;  %v12174_v45 = vor.u32 %v14152_v60, %v12171_v16  ;;  %v13261_v46 = vld [vmem:[%s24620_s12 + $0xa90] sm:$0xf]  ;;  %v14145_v33 = vld [vmem:[%s24620_s12 + $0x1d4] sm:$0xf] }
 0x758   :  { %9801 = vmatpush.bf16.msrb.mxu0 %v12874_v2  ;;  %v13262_v9 = vor.u32 %v14428_v26, %v13261_v46  ;;  %v14313_v52 = vld [vmem:[%s24620_s12 + $0x714] sm:$0xf]  ;;  %v12815_v60 = vld [vmem:[%s24620_s12 + $0x72c] sm:$0xf0]  ;;  %v12146_v16 = vor.u32 %v14145_v33, %v12143_v6  ;;  %v13653_v6 = vld [vmem:[%s24620_s12 + $0xda0] sm:$0xf] }
 0x759   :  { %25167 = vst [vmem:[#allocation5_spill] sm:$0xff] %v23349_v15  ;;  %9628 = vmatpush.bf16.msrb.mxu2 %v13290_v14  ;;  %v23381_v2 = vpop.f32.mrf.mxu0  ;;  %v12818_v14 = vor.u32 %v14313_v52, %v12815_v60  ;;  %v14526_v52 = vld [vmem:[%s24620_s12 + $0xdb8] sm:$0xf0] }
 0x75a   :  { %v23369_v15 = vpop.f32.mrf.mxu1  ;;  %9715 = vmatpush.bf16.msra.mxu1 %v12174_v45  ;;  %v13681_v45 = vld [vmem:[%s24620_s12 + $0xdd8] sm:$0xf] }
 0x75b   :  { %9437 = vmatmul.bf16.gmra.mxu3 %v21441_v39  ;;  %9524 = vmatmul.bf16.gmra.mxu2 %v25072_v3  ;;  %v13682_v46 = vor.u32 %v14533_v25, %v13681_v45  ;;  %v13625_v45 = vld [vmem:[%s24620_s12 + $0xd68] sm:$0xf] }
 0x75c   :  { %9802 = vmatpush.bf16.msrb.mxu0 %v12846_v49 }
 0x75d   :  { %9611 = vmatmul.bf16.gmra.mxu1 %v25073_v8  ;;  %9698 = vmatmul.bf16.gmra.mxu0 %v25074_v53 }
 0x75e   :  { %v9206_v48 = vpop.f32.mrf.mxu3  ;;  %v9293_v3 = vpop.f32.mrf.mxu2  ;;  %9629 = vmatpush.bf16.msrb.mxu2 %v13262_v9  ;;  %9716 = vmatpush.bf16.msra.mxu1 %v12146_v16  ;;  %v13654_v9 = vor.u32 %v14526_v52, %v13653_v6 }
 0x75f   :  { %v23402_v26 = vadd.f32 %v9206_v48, %v23128_v44  ;;  %v23405_v49 = vadd.f32 %v9293_v3, %v23081_v11  ;;  %9651 = vmatpush.bf16.msrb.mxu3 %v13682_v46 }
 0x760   :  { %9803 = vmatpush.bf16.msrb.mxu0 %v12818_v14 }
 0x761   :  { %v23415_v44 = vpop.f32.mrf.mxu0 }
 0x762   :  { %v23407_v33 = vpop.f32.mrf.mxu1 }
 0x763   :  { %9652 = vmatpush.bf16.msrb.mxu3 %v13654_v9  ;;  %v23446_v9 = vperm.slane %v22864_v41, 4 }
 0x765   :  { %v9458_v41 = vadd.f32 %v23252_v28, %v23446_v9 }
 0x766   :  { %v9208_v60 = vpop.f32.mrf.mxu3  ;;  %v9295_v11 = vpop.f32.mrf.mxu2 }
 0x767   :  { %v23418_v3 = vadd.f32 %v9208_v60, %v23147_v42  ;;  %v23421_v16 = vadd.f32 %v9295_v11, %v23120_v20  ;;  %v14519_v42 = vld [vmem:[%s24620_s12 + $0xd80] sm:$0xf0]  ;;  %v13597_v11 = vld [vmem:[%s24620_s12 + $0xd30] sm:$0xf] }
 0x768   :  { %v13626_v25 = vor.u32 %v14519_v42, %v13625_v45 }
 0x769   :  { %v23438_v6 = vpop.f32.mrf.mxu0 }
 0x76a   :  { %v23423_v14 = vpop.f32.mrf.mxu1  ;;  %9653 = vmatpush.bf16.msrb.mxu3 %v13626_v25 }
 0x76b   :  { %9442 = vmatmul.bf16.gmra.mxu3 %v21413_v10  ;;  %9529 = vmatmul.bf16.gmra.mxu2 %v25075_v34 }
 0x76d   :  { %9616 = vmatmul.bf16.gmra.mxu1 %v20595_v1  ;;  %9703 = vmatmul.bf16.gmra.mxu0 %v25129_v59 }
 0x76e   :  { %v9211_v20 = vpop.f32.mrf.mxu3  ;;  %v9298_v46 = vpop.f32.mrf.mxu2 }
 0x76f   :  { %v23436_v48 = vadd.f32 %v9211_v20, %v23166_v13  ;;  %v23441_v52 = vadd.f32 %v9298_v46, %v23137_v58  ;;  %v14512_v13 = vld [vmem:[%s24620_s12 + $0xd48] sm:$0xf0] }
 0x770   :  { %v13598_v42 = vor.u32 %v14512_v13, %v13597_v11  ;;  %v12563_v13 = vld [vmem:[%s24620_s12 + $0x534] sm:$0xf0] }
 0x771   :  { %25168 = vst [vmem:[#allocation10_spill] sm:$0xff] %v23436_v48  ;;  %v23462_v46 = vpop.f32.mrf.mxu0 }
 0x772   :  { %v23443_v60 = vpop.f32.mrf.mxu1  ;;  %9654 = vmatpush.bf16.msrb.mxu3 %v13598_v42 }
 0x773   :  { %25169 = vst [vmem:[#allocation46_spill] sm:$0xff] %v23443_v60 }
 0x776   :  { %v9213_v45 = vpop.f32.mrf.mxu3  ;;  %v9300_v58 = vpop.f32.mrf.mxu2 }
 0x777   :  { %v23455_v20 = vadd.f32 %v9213_v45, %v23181_v40  ;;  %v23458_v25 = vadd.f32 %v9300_v58, %v23156_v4  ;;  %v13569_v4 = vld [vmem:[%s24620_s12 + $0xcf8] sm:$0xf]  ;;  %v14505_v40 = vld [vmem:[%s24620_s12 + $0xd10] sm:$0xf0]  ;;  %v14418_v45 = vld [vmem:[%s24620_s12 + $0xa5c] sm:$0xf] }
 0x778   :  { %v13570_v11 = vor.u32 %v14505_v40, %v13569_v4  ;;  %v13235_v4 = vld [vmem:[%s24620_s12 + $0xa74] sm:$0xf0]  ;;  %v12121_v40 = vld [vmem:[%s24620_s12 + $0x1a0] sm:$0xf] }
 0x779   :  { %25170 = vst [vmem:[#allocation48_spill] sm:$0xff] %v23455_v20  ;;  %v23505_v59 = vpop.f32.mrf.mxu0 }
 0x77a   :  { %v9486_v60 = vpop.f32.mrf.mxu1  ;;  %9655 = vmatpush.bf16.msrb.mxu3 %v13570_v11  ;;  %v13207_v11 = vld [vmem:[%s24620_s12 + $0xa3c] sm:$0xf0] }
 0x77b   :  { %v23464_v48 = vadd.f32 %v9486_v60, %v9458_v41  ;;  %9543 = vmatmul.bf16.vlgmr.msra.gmra.mxu3 %v25134_v55  ;;  %9630 = vmatmul.bf16.vlgmr.msrb.gmra.mxu2 %v25135_v29  ;;  %v14250_v60 = vld [vmem:[%s24620_s12 + $0x51c] sm:$0xf] }
 0x77c   :  { %v12566_v41 = vor.u32 %v14250_v60, %v12563_v13 }
 0x77d   :  { %9717 = vmatmul.bf16.vlgmr.msra.gmra.mxu1 %v25136_v12  ;;  %9804 = vmatmul.bf16.vlgmr.msrb.gmra.mxu0 %v25137_v37  ;;  %v14142_v37 = vld [vmem:[%s24620_s12 + $0x1b8] sm:$0xf0]  ;;  %v13238_v12 = vor.u32 %v14418_v45, %v13235_v4  ;;  %v12093_v45 = vld [vmem:[%s24620_s12 + $0x168] sm:$0xf] }
 0x77e   :  { %v9312_v28 = vpop.f32.mrf.mxu3  ;;  %v23486_v58 = vpop.f32.mrf.mxu2  ;;  %v12122_v29 = vor.u32 %v14142_v37, %v12121_v40  ;;  %9738 = vmatpush.bf16.msra.mxu2 %v12566_v41  ;;  %v14243_v37 = vld [vmem:[%s24620_s12 + $0x4e4] sm:$0xf] }
 0x77f   :  { %v9313_v42 = vadd.f32 %v9312_v28, %v23209_v31  ;;  %v9460_v31 = vadd.f32 %v23317_v7, %v23446_v9  ;;  %v25171_v28 = vld [vmem:[#allocation40_spill] sm:$0xff]  ;;  %9825 = vmatpush.bf16.msrb.mxu1 %v13238_v12  ;;  %v12535_v7 = vld [vmem:[%s24620_s12 + $0x4fc] sm:$0xf0]  ;;  %v14411_v12 = vld [vmem:[%s24620_s12 + $0xa24] sm:$0xf] }
 0x780   :  { %9912 = vmatpush.bf16.msra.mxu0 %v12122_v29  ;;  %v13210_v4 = vor.u32 %v14411_v12, %v13207_v11  ;;  %v13179_v12 = vld [vmem:[%s24620_s12 + $0xa04] sm:$0xf0]  ;;  %v9463_v11 = vadd.f32 %v23381_v2, %v23446_v9  ;;  %v14229_v2 = vld [vmem:[%s24620_s12 + $0x474] sm:$0xf] }
 0x781   :  { %v9342_v60 = vadd.f32 %v25171_v28, %v9313_v42  ;;  %v14135_v42 = vld [vmem:[%s24620_s12 + $0x180] sm:$0xf0]  ;;  %v14498_v28 = vld [vmem:[%s24620_s12 + $0xcd8] sm:$0xf0] }
 0x782   :  { %v9488_v13 = vpop.f32.mrf.mxu1  ;;  %v12094_v40 = vor.u32 %v14135_v42, %v12093_v45  ;;  %v14128_v42 = vld [vmem:[%s24620_s12 + $0x148] sm:$0xf0] }
 0x783   :  { %v23501_v55 = vadd.f32 %v23170_v62, %v9342_v60  ;;  %v23503_v20 = vadd.f32 %v9488_v13, %v9460_v31  ;;  %v12538_v62 = vor.u32 %v14243_v37, %v12535_v7  ;;  %v13541_v31 = vld [vmem:[%s24620_s12 + $0xcc0] sm:$0xf]  ;;  %v14236_v60 = vld [vmem:[%s24620_s12 + $0x4ac] sm:$0xf]  ;;  %v12507_v37 = vld [vmem:[%s24620_s12 + $0x4c4] sm:$0xf0]  ;;  %9826 = vmatpush.bf16.msrb.mxu1 %v13210_v4 }
 0x784   :  { %v13542_v13 = vor.u32 %v14498_v28, %v13541_v31  ;;  %v14404_v7 = vld [vmem:[%s24620_s12 + $0x9ec] sm:$0xf]  ;;  %9913 = vmatpush.bf16.msra.mxu0 %v12094_v40  ;;  %v12510_v45 = vor.u32 %v14236_v60, %v12507_v37  ;;  %v12479_v4 = vld [vmem:[%s24620_s12 + $0x48c] sm:$0xf0]  ;;  %v14397_v40 = vld [vmem:[%s24620_s12 + $0x9b4] sm:$0xf]  ;;  %v23569_v60 = vpop.f32.mrf.mxu0 }
 0x785   :  { %9739 = vmatpush.bf16.msra.mxu2 %v12538_v62  ;;  %v12065_v62 = vld [vmem:[%s24620_s12 + $0x130] sm:$0xf]  ;;  %v13182_v28 = vor.u32 %v14404_v7, %v13179_v12  ;;  %v12482_v37 = vor.u32 %v14229_v2, %v12479_v4  ;;  %v12037_v12 = vld [vmem:[%s24620_s12 + $0xf8] sm:$0xf]  ;;  %v14491_v2 = vld [vmem:[%s24620_s12 + $0xca0] sm:$0xf0] }
 0x786   :  { %v23516_v29 = vpop.f32.mrf.mxu3  ;;  %v23527_v41 = vpop.f32.mrf.mxu2  ;;  %9656 = vmatpush.bf16.msrb.mxu3 %v13542_v13  ;;  %v12066_v34 = vor.u32 %v14128_v42, %v12065_v62  ;;  %v13151_v7 = vld [vmem:[%s24620_s12 + $0x9cc] sm:$0xf0]  ;;  %v14222_v4 = vld [vmem:[%s24620_s12 + $0x43c] sm:$0xf] }
 0x787   :  { %9827 = vmatpush.bf16.msrb.mxu1 %v13182_v28  ;;  %v13154_v42 = vor.u32 %v14397_v40, %v13151_v7  ;;  %v13513_v28 = vld [vmem:[%s24620_s12 + $0xc88] sm:$0xf]  ;;  %v13123_v40 = vld [vmem:[%s24620_s12 + $0x994] sm:$0xf0]  ;;  %v25172_v7 = vld [vmem:[#allocation37_spill] sm:$0xff] }
 0x788   :  { %9914 = vmatpush.bf16.msra.mxu0 %v12066_v34  ;;  %v14390_v34 = vld [vmem:[%s24620_s12 + $0x97c] sm:$0xf] }
 0x789   :  { %9740 = vmatpush.bf16.msra.mxu2 %v12510_v45 }
 0x78a   :  { %v9491_v31 = vpop.f32.mrf.mxu1 }
 0x78b   :  { %v23555_v1 = vadd.f32 %v9491_v31, %v9463_v11  ;;  %9548 = vmatmul.bf16.gmra.mxu3 %v25081_v36  ;;  %9635 = vmatmul.bf16.gmra.mxu2 %v25082_v61  ;;  %v14121_v11 = vld [vmem:[%s24620_s12 + $0x110] sm:$0xf0]  ;;  %v13126_v61 = vor.u32 %v14390_v34, %v13123_v40 }
 0x78c   :  { %v12038_v31 = vor.u32 %v14121_v11, %v12037_v12  ;;  %9828 = vmatpush.bf16.msrb.mxu1 %v13154_v42 }
 0x78d   :  { %9722 = vmatmul.bf16.gmra.mxu1 %v25142_v35  ;;  %9809 = vmatmul.bf16.gmra.mxu0 %v25143_v0  ;;  %v13514_v0 = vor.u32 %v14491_v2, %v13513_v28  ;;  %v12009_v28 = vld [vmem:[%s24620_s12 + $0xc0] sm:$0xf]  ;;  %v14114_v2 = vld [vmem:[%s24620_s12 + $0xd8] sm:$0xf0] }
 0x78e   :  { %v9317_v13 = vpop.f32.mrf.mxu3  ;;  %v23582_v62 = vpop.f32.mrf.mxu2  ;;  %9741 = vmatpush.bf16.msra.mxu2 %v12482_v37  ;;  %9915 = vmatpush.bf16.msra.mxu0 %v12038_v31  ;;  %v12010_v37 = vor.u32 %v14114_v2, %v12009_v28  ;;  %v11981_v31 = vld [vmem:[%s24620_s12 + $0x88] sm:$0xf] }
 0x78f   :  { %v9318_v45 = vadd.f32 %v9317_v13, %v23309_v27  ;;  %v12451_v27 = vld [vmem:[%s24620_s12 + $0x454] sm:$0xf0]  ;;  %v9465_v13 = vadd.f32 %v23415_v44, %v23446_v9  ;;  %9657 = vmatpush.bf16.msrb.mxu3 %v13514_v0  ;;  %v14383_v0 = vld [vmem:[%s24620_s12 + $0x944] sm:$0xf]  ;;  %v12395_v2 = vld [vmem:[%s24620_s12 + $0x3e4] sm:$0xf0] }
 0x790   :  { %v12454_v11 = vor.u32 %v14222_v4, %v12451_v27  ;;  %v12423_v4 = vld [vmem:[%s24620_s12 + $0x41c] sm:$0xf0]  ;;  %9829 = vmatpush.bf16.msrb.mxu1 %v13126_v61  ;;  %v14107_v27 = vld [vmem:[%s24620_s12 + $0xa0] sm:$0xf0]  ;;  %v13485_v61 = vld [vmem:[%s24620_s12 + $0xc50] sm:$0xf] }
 0x791   :  { %v9347_v12 = vadd.f32 %v25172_v7, %v9318_v45  ;;  %v14215_v45 = vld [vmem:[%s24620_s12 + $0x404] sm:$0xf]  ;;  %v14484_v7 = vld [vmem:[%s24620_s12 + $0xc68] sm:$0xf0] }
 0x792   :  { %v9493_v35 = vpop.f32.mrf.mxu1  ;;  %9742 = vmatpush.bf16.msra.mxu2 %v12454_v11  ;;  %9916 = vmatpush.bf16.msra.mxu0 %v12010_v37  ;;  %v23647_v11 = vpop.f32.mrf.mxu0  ;;  %v13486_v28 = vor.u32 %v14484_v7, %v13485_v61  ;;  %v14376_v37 = vld [vmem:[%s24620_s12 + $0x90c] sm:$0xf] }
 0x793   :  { %v23612_v36 = vadd.f32 %v23263_v23, %v9347_v12  ;;  %v23614_v44 = vadd.f32 %v9493_v35, %v9465_v13  ;;  %v12426_v35 = vor.u32 %v14215_v45, %v12423_v4  ;;  %v13095_v23 = vld [vmem:[%s24620_s12 + $0x95c] sm:$0xf0]  ;;  %v11982_v13 = vor.u32 %v14107_v27, %v11981_v31  ;;  %v14208_v12 = vld [vmem:[%s24620_s12 + $0x3cc] sm:$0xf]  ;;  %v13067_v45 = vld [vmem:[%s24620_s12 + $0x924] sm:$0xf0] }
 0x794   :  { %v13098_v40 = vor.u32 %v14383_v0, %v13095_v23  ;;  %v9468_v4 = vadd.f32 %v23438_v6, %v23446_v9  ;;  %v12398_v0 = vor.u32 %v14208_v12, %v12395_v2  ;;  %v11953_v23 = vld [vmem:[%s24620_s12 + $0x50] sm:$0xf]  ;;  %v14100_v31 = vld [vmem:[%s24620_s12 + $0x68] sm:$0xf0]  ;;  %9658 = vmatpush.bf16.msrb.mxu3 %v13486_v28  ;;  %v13070_v61 = vor.u32 %v14376_v37, %v13067_v45  ;;  %v11925_v37 = vld [vmem:[%s24620_s12 + $0x18] sm:$0xf] }
 0x795   :  { %v11954_v6 = vor.u32 %v14100_v31, %v11953_v23  ;;  %v13039_v2 = vld [vmem:[%s24620_s12 + $0x8ec] sm:$0xf0]  ;;  %v14093_v23 = vld [vmem:[%s24620_s12 + $0x30] sm:$0xf0]  ;;  %v14306_v31 = vld [vmem:[%s24620_s12 + $0x6dc] sm:$0xf] }
 0x796   :  { %v23625_v42 = vpop.f32.mrf.mxu3  ;;  %v23636_v34 = vpop.f32.mrf.mxu2  ;;  %9743 = vmatpush.bf16.msra.mxu2 %v12426_v35  ;;  %9830 = vmatpush.bf16.msrb.mxu1 %v13098_v40  ;;  %v14201_v35 = vld [vmem:[%s24620_s12 + $0x394] sm:$0xf]  ;;  %v12367_v40 = vld [vmem:[%s24620_s12 + $0x3ac] sm:$0xf0] }
 0x797   :  { %9917 = vmatpush.bf16.msra.mxu0 %v11982_v13  ;;  %v12370_v28 = vor.u32 %v14201_v35, %v12367_v40  ;;  %v14369_v13 = vld [vmem:[%s24620_s12 + $0x8d4] sm:$0xf] }
 0x79a   :  { %v9496_v27 = vpop.f32.mrf.mxu1  ;;  %9744 = vmatpush.bf16.msra.mxu2 %v12398_v0  ;;  %9831 = vmatpush.bf16.msrb.mxu1 %v13070_v61  ;;  %v13042_v0 = vor.u32 %v14369_v13, %v13039_v2  ;;  %v11926_v61 = vor.u32 %v14093_v23, %v11925_v37  ;;  %v23702_v40 = vpop.f32.mrf.mxu0 }
 0x79b   :  { %v23666_v7 = vadd.f32 %v9496_v27, %v9468_v4  ;;  %9553 = vmatmul.bf16.gmra.mxu3 %v25086_v17  ;;  %9640 = vmatmul.bf16.gmra.mxu2 %v25087_v50  ;;  %v12787_v27 = vld [vmem:[%s24620_s12 + $0x6f4] sm:$0xf0] }
 0x79c   :  { %9918 = vmatpush.bf16.msra.mxu0 %v11954_v6  ;;  %v12790_v35 = vor.u32 %v14306_v31, %v12787_v27 }
 0x79d   :  { %9727 = vmatmul.bf16.gmra.mxu1 %v25088_v5  ;;  %9814 = vmatmul.bf16.gmra.mxu0 %v25089_v21 }
 0x79e   :  { %v9322_v12 = vpop.f32.mrf.mxu3  ;;  %v23688_v4 = vpop.f32.mrf.mxu2  ;;  %9745 = vmatpush.bf16.msra.mxu2 %v12370_v28  ;;  %9832 = vmatpush.bf16.msrb.mxu1 %v13042_v0  ;;  %v14299_v28 = vld [vmem:[%s24620_s12 + $0x6a4] sm:$0xf] }
 0x79f   :  { %v9323_v45 = vadd.f32 %v9322_v12, %v23405_v49  ;;  %v9470_v49 = vadd.f32 %v23462_v46, %v23446_v9  ;;  %9767 = vmatpush.bf16.msra.mxu3 %v12790_v35  ;;  %v9473_v46 = vadd.f32 %v23505_v59, %v23446_v9 }
 0x7a0   :  { %9919 = vmatpush.bf16.msra.mxu0 %v11926_v61  ;;  %v9475_v61 = vadd.f32 %v23569_v60, %v23446_v9  ;;  %v9315_v60 = vadd.f32 %v23516_v29, %v23255_v56 }
 0x7a1   :  { %v9352_v6 = vadd.f32 %v23114_v43, %v9323_v45 }
 0x7a2   :  { %v9498_v12 = vpop.f32.mrf.mxu1  ;;  %v23724_v23 = vpop.f32.mrf.mxu0 }
 0x7a3   :  { %v23705_v13 = vadd.f32 %v23369_v15, %v9352_v6  ;;  %v23707_v2 = vadd.f32 %v9498_v12, %v9470_v49  ;;  %v12759_v15 = vld [vmem:[%s24620_s12 + $0x6bc] sm:$0xf0]  ;;  %v14292_v6 = vld [vmem:[%s24620_s12 + $0x66c] sm:$0xf]  ;;  %v12731_v12 = vld [vmem:[%s24620_s12 + $0x684] sm:$0xf0] }
 0x7a4   :  { %v12762_v0 = vor.u32 %v14299_v28, %v12759_v15 }
 0x7a6   :  { %v23709_v21 = vpop.f32.mrf.mxu3  ;;  %v23711_v37 = vpop.f32.mrf.mxu2  ;;  %9768 = vmatpush.bf16.msra.mxu3 %v12762_v0  ;;  %v12703_v0 = vld [vmem:[%s24620_s12 + $0x64c] sm:$0xf0] }
 0x7aa   :  { %v9501_v43 = vpop.f32.mrf.mxu1  ;;  %v23746_v28 = vpop.f32.mrf.mxu0 }
 0x7ab   :  { %v23721_v45 = vadd.f32 %v9501_v43, %v9473_v46  ;;  %9558 = vmatmul.bf16.gmra.mxu3 %v25150_v32  ;;  %9645 = vmatmul.bf16.gmra.mxu2 %v25151_v47  ;;  %v12734_v43 = vor.u32 %v14292_v6, %v12731_v12 }
 0x7ad   :  { %9732 = vmatmul.bf16.gmra.mxu1 %v25152_v22  ;;  %9819 = vmatmul.bf16.gmra.mxu0 %v25153_v38 }
 0x7ae   :  { %v9327_v59 = vpop.f32.mrf.mxu3  ;;  %v23730_v27 = vpop.f32.mrf.mxu2  ;;  %9769 = vmatpush.bf16.msra.mxu3 %v12734_v43  ;;  %v25174_v43 = vld [vmem:[#allocation51_spill] sm:$0xff] }
 0x7af   :  { %v9328_v31 = vadd.f32 %v9327_v59, %v23441_v52 }
 0x7b1   :  { %v9357_v35 = vadd.f32 %v23158_v54, %v9328_v31  ;;  %v9400_v31 = vadd.f32 %v23486_v58, %v23501_v55  ;;  %v14278_v58 = vld [vmem:[%s24620_s12 + $0x5fc] sm:$0xf] }
 0x7b2   :  { %v9503_v49 = vpop.f32.mrf.mxu1  ;;  %v23770_v6 = vpop.f32.mrf.mxu0 }
 0x7b3   :  { %v23742_v46 = vadd.f32 %v23423_v14, %v9357_v35  ;;  %v23744_v52 = vadd.f32 %v9503_v49, %v9475_v61  ;;  %v14285_v14 = vld [vmem:[%s24620_s12 + $0x634] sm:$0xf]  ;;  %v25173_v61 = vld [vmem:[#allocation24_spill] sm:$0xff] }
 0x7b4   :  { %v12706_v59 = vor.u32 %v14285_v14, %v12703_v0  ;;  %v9344_v56 = vadd.f32 %v25173_v61, %v9315_v60  ;;  %v12345_v0 = vld [vmem:[%s24620_s12 + $0x360] sm:$0xf] }
 0x7b6   :  { %v23748_v9 = vpop.f32.mrf.mxu3  ;;  %v23750_v54 = vpop.f32.mrf.mxu2  ;;  %9770 = vmatpush.bf16.msra.mxu3 %v12706_v59  ;;  %v9373_v14 = vadd.f32 %v25174_v43, %v9344_v56  ;;  %v14198_v59 = vld [vmem:[%s24620_s12 + $0x378] sm:$0xf0]  ;;  %v13017_v56 = vld [vmem:[%s24620_s12 + $0x8a0] sm:$0xf] }
 0x7b7   :  { %v12346_v61 = vor.u32 %v14198_v59, %v12345_v0  ;;  %v14603_v43 = vpop.eup %14602 }
 0x7b9   :  { %9941 = vmatpush.bf16.msra.mxu1 %v12346_v61  ;;  %v25176_v61 = vld [vmem:[#allocation20_spill] sm:$0xff] }
 0x7ba   :  { %v23754_v15 = vpop.f32.mrf.mxu1 }
 0x7bb   :  { %9659 = vmatmul.bf16.vlgmr.msrb.gmra.mxu3 %v25156_v24  ;;  %9746 = vmatmul.bf16.vlgmr.msra.gmra.mxu2 %v25157_v57  ;;  %v9320_v57 = vadd.f32 %v23625_v42, %v23361_v51  ;;  %v14191_v51 = vld [vmem:[%s24620_s12 + $0x340] sm:$0xf0]  ;;  %v12989_v42 = vld [vmem:[%s24620_s12 + $0x868] sm:$0xf] }
 0x7bd   :  { %9833 = vmatmul.bf16.vlgmr.msrb.gmra.mxu1 %v25158_v63  ;;  %9920 = vmatmul.bf16.vlgmr.msra.gmra.mxu0 %v25160_v18  ;;  %v12675_v18 = vld [vmem:[%s24620_s12 + $0x614] sm:$0xf0] }
 0x7be   :  { %v9428_v29 = vpop.f32.mrf.mxu3  ;;  %v9515_v49 = vpop.f32.mrf.mxu2  ;;  %v12678_v60 = vor.u32 %v14278_v58, %v12675_v18 }
 0x7bf   :  { %v9429_v35 = vadd.f32 %v9428_v29, %v9400_v31  ;;  %v23773_v12 = vadd.f32 %v9515_v49, %v23464_v48  ;;  %v13459_v48 = vld [vmem:[%s24620_s12 + $0xc34] sm:$0xf0]  ;;  %v14366_v29 = vld [vmem:[%s24620_s12 + $0x8b8] sm:$0xf0] }
 0x7c0   :  { %v13462_v31 = vor.u32 %v14474_v19, %v13459_v48  ;;  %9771 = vmatpush.bf16.msra.mxu3 %v12678_v60  ;;  %v13018_v49 = vor.u32 %v14366_v29, %v13017_v56  ;;  %v25175_v48 = vld [vmem:[#allocation21_spill] sm:$0xff]  ;;  %v9405_v56 = vadd.f32 %v23582_v62, %v23612_v36  ;;  %v25177_v29 = vld [vmem:[#allocation6_spill] sm:$0xff] }
 0x7c1   :  { %14604 = vtanh.f32 %v9429_v35  ;;  %v9402_v35 = vadd.f32 %v23527_v41, %v9373_v14  ;;  %v23809_v41 = vpop.f32.mrf.mxu0  ;;  %v14467_v60 = vld [vmem:[%s24620_s12 + $0xbe4] sm:$0xf] }
 0x7c2   :  { %v23776_v55 = vpop.f32.mrf.mxu1  ;;  %9854 = vmatpush.bf16.msrb.mxu2 %v13462_v31  ;;  %10028 = vmatpush.bf16.msrb.mxu0 %v13018_v49  ;;  %14606 = vtanh.f32 %v25175_v48  ;;  %v13431_v31 = vld [vmem:[%s24620_s12 + $0xbfc] sm:$0xf0]  ;;  %v14359_v49 = vld [vmem:[%s24620_s12 + $0x880] sm:$0xf0]  ;;  %v25179_v48 = vld [vmem:[#allocation15_spill] sm:$0xff] }
 0x7c3   :  { %v12990_v36 = vor.u32 %v14359_v49, %v12989_v42  ;;  %v14184_v42 = vld [vmem:[%s24620_s12 + $0x308] sm:$0xf0]  ;;  %v12961_v49 = vld [vmem:[%s24620_s12 + $0x830] sm:$0xf] }
 0x7c6   :  { %v9430_v58 = vpop.f32.mrf.mxu3  ;;  %v9517_v19 = vpop.f32.mrf.mxu2  ;;  %10029 = vmatpush.bf16.msrb.mxu0 %v12990_v36  ;;  %v13375_v36 = vld [vmem:[%s24620_s12 + $0xb8c] sm:$0xf0] }
 0x7c7   :  { %v14605_v18 = vpop.eup %14604  ;;  %v9431_v63 = vadd.f32 %v9430_v58, %v9402_v35  ;;  %v23805_v59 = vadd.f32 %v9517_v19, %v23503_v20  ;;  %v13434_v20 = vor.u32 %v14467_v60, %v13431_v31  ;;  %v12647_v58 = vld [vmem:[%s24620_s12 + $0x5dc] sm:$0xf0]  ;;  %v13403_v60 = vld [vmem:[%s24620_s12 + $0xbc4] sm:$0xf0]  ;;  %v12289_v31 = vld [vmem:[%s24620_s12 + $0x2f0] sm:$0xf] }
 0x7c8   :  { %v10201_v0 = vpack.c.bf16 %v14605_v18, %v14603_v43  ;;  %v14271_v43 = vld [vmem:[%s24620_s12 + $0x5c4] sm:$0xf] }
 0x7c9   :  { %14608 = vtanh.f32 %v9431_v63  ;;  %v12317_v63 = vld [vmem:[%s24620_s12 + $0x328] sm:$0xf]  ;;  %v25178_v18 = vld [vmem:[#allocation41_spill] sm:$0xff]  ;;  %9855 = vmatpush.bf16.msrb.mxu2 %v13434_v20  ;;  %v12650_v62 = vor.u32 %v14271_v43, %v12647_v58  ;;  %v14352_v43 = vld [vmem:[%s24620_s12 + $0x848] sm:$0xf0] }
 0x7ca   :  { %10233 = vst [vmem:[#allocation2 + $0x8] sm:$0xff] %v10201_v0  ;;  %v23811_v14 = vpop.f32.mrf.mxu1  ;;  %v12318_v35 = vor.u32 %v14191_v51, %v12317_v63  ;;  %v9349_v19 = vadd.f32 %v25178_v18, %v9320_v57  ;;  %v14460_v0 = vld [vmem:[%s24620_s12 + $0xbac] sm:$0xf]  ;;  %v14607_v63 = vpop.eup %14606 }
 0x7cb   :  { %9664 = vmatmul.bf16.gmra.mxu3 %v25176_v61  ;;  %9751 = vmatmul.bf16.gmra.mxu2 %v25177_v29  ;;  %v25180_v51 = vld [vmem:[#allocation30_spill] sm:$0xff]  ;;  %v13406_v20 = vor.u32 %v14460_v0, %v13403_v60  ;;  %v25181_v0 = vld [vmem:[#allocation47_spill] sm:$0xff] }
 0x7cc   :  { %9942 = vmatpush.bf16.msra.mxu1 %v12318_v35  ;;  %9772 = vmatpush.bf16.msra.mxu3 %v12650_v62  ;;  %v12962_v35 = vor.u32 %v14352_v43, %v12961_v49  ;;  %14610 = vtanh.f32 %v25181_v0  ;;  %v9378_v61 = vadd.f32 %v23319_v30, %v9349_v19  ;;  %v14177_v30 = vld [vmem:[%s24620_s12 + $0x2d0] sm:$0xf0]  ;;  %v12933_v19 = vld [vmem:[%s24620_s12 + $0x7f8] sm:$0xf] }
 0x7cd   :  { %9838 = vmatmul.bf16.gmra.mxu1 %v25179_v48  ;;  %9925 = vmatmul.bf16.gmra.mxu0 %v25180_v51  ;;  %v12290_v51 = vor.u32 %v14184_v42, %v12289_v31 }
 0x7ce   :  { %v9433_v57 = vpop.f32.mrf.mxu3  ;;  %v9520_v48 = vpop.f32.mrf.mxu2  ;;  %9856 = vmatpush.bf16.msrb.mxu2 %v13406_v20  ;;  %10030 = vmatpush.bf16.msrb.mxu0 %v12962_v35  ;;  %v12619_v20 = vld [vmem:[%s24620_s12 + $0x5a4] sm:$0xf0]  ;;  %v9407_v42 = vadd.f32 %v23636_v34, %v9378_v61  ;;  %v14170_v34 = vld [vmem:[%s24620_s12 + $0x298] sm:$0xf0]  ;;  %v12905_v61 = vld [vmem:[%s24620_s12 + $0x7c0] sm:$0xf] }
 0x7cf   :  { %v14609_v58 = vpop.eup %14608  ;;  %v9434_v18 = vadd.f32 %v9433_v57, %v9405_v56  ;;  %v23864_v29 = vadd.f32 %v9520_v48, %v23555_v1  ;;  %v14453_v56 = vld [vmem:[%s24620_s12 + $0xb74] sm:$0xf]  ;;  %v12261_v1 = vld [vmem:[%s24620_s12 + $0x2b8] sm:$0xf]  ;;  %v23884_v48 = vpop.f32.mrf.mxu0  ;;  %v14264_v57 = vld [vmem:[%s24620_s12 + $0x58c] sm:$0xf] }
 0x7d0   :  { %v10205_v60 = vpack.c.bf16 %v14609_v58, %v14607_v63  ;;  %9943 = vmatpush.bf16.msra.mxu1 %v12290_v51  ;;  %v13378_v62 = vor.u32 %v14453_v56, %v13375_v36  ;;  %v12262_v31 = vor.u32 %v14177_v30, %v12261_v1  ;;  %v14345_v63 = vld [vmem:[%s24620_s12 + $0x810] sm:$0xf0]  ;;  %v12622_v43 = vor.u32 %v14264_v57, %v12619_v20  ;;  %v14446_v58 = vld [vmem:[%s24620_s12 + $0xb3c] sm:$0xf]  ;;  %v12233_v51 = vld [vmem:[%s24620_s12 + $0x280] sm:$0xf] }
 0x7d1   :  { %14612 = vtanh.f32 %v9434_v18  ;;  %v12934_v49 = vor.u32 %v14345_v63, %v12933_v19  ;;  %v13347_v18 = vld [vmem:[%s24620_s12 + $0xb54] sm:$0xf0]  ;;  %v14338_v56 = vld [vmem:[%s24620_s12 + $0x7d8] sm:$0xf0]  ;;  %v12234_v30 = vor.u32 %v14170_v34, %v12233_v51  ;;  %v9325_v20 = vadd.f32 %v23709_v21, %v23421_v16  ;;  %v12205_v21 = vld [vmem:[%s24620_s12 + $0x248] sm:$0xf] }
 0x7d2   :  { %10238 = vst [vmem:[#allocation2 + $0x24] sm:$0xff] %v10205_v60  ;;  %v23867_v24 = vpop.f32.mrf.mxu1  ;;  %9857 = vmatpush.bf16.msrb.mxu2 %v13378_v62  ;;  %v14611_v35 = vpop.eup %14610  ;;  %v13350_v60 = vor.u32 %v14446_v58, %v13347_v18  ;;  %9773 = vmatpush.bf16.msra.mxu3 %v12622_v43  ;;  %v12906_v19 = vor.u32 %v14338_v56, %v12905_v61  ;;  %v14163_v16 = vld [vmem:[%s24620_s12 + $0x260] sm:$0xf0]  ;;  %v12877_v43 = vld [vmem:[%s24620_s12 + $0x788] sm:$0xf]  ;;  %v25183_v51 = vld [vmem:[#allocation19_spill] sm:$0xff] }
 0x7d3   :  { %10031 = vmatpush.bf16.msrb.mxu0 %v12934_v49  ;;  %v13319_v49 = vld [vmem:[%s24620_s12 + $0xb1c] sm:$0xf0]  ;;  %v9410_v18 = vadd.f32 %v23688_v4, %v23705_v13  ;;  %v12591_v34 = vld [vmem:[%s24620_s12 + $0x56c] sm:$0xf0]  ;;  %v25184_v61 = vld [vmem:[#allocation12_spill] sm:$0xff] }
 0x7d4   :  { %9944 = vmatpush.bf16.msra.mxu1 %v12262_v31  ;;  %v25182_v31 = vld [vmem:[#allocation5_spill] sm:$0xff]  ;;  %v9354_v56 = vadd.f32 %v25184_v61, %v9325_v20  ;;  %v14156_v20 = vld [vmem:[%s24620_s12 + $0x228] sm:$0xf0] }
 0x7d5   :  { %14614 = vtanh.f32 %v25182_v31 }
 0x7d6   :  { %v9435_v0 = vpop.f32.mrf.mxu3  ;;  %v9522_v1 = vpop.f32.mrf.mxu2  ;;  %9858 = vmatpush.bf16.msrb.mxu2 %v13350_v60  ;;  %v14257_v60 = vld [vmem:[%s24620_s12 + $0x554] sm:$0xf] }
 0x7d7   :  { %v14613_v36 = vpop.eup %14612  ;;  %v9436_v62 = vadd.f32 %v9435_v0, %v9407_v42  ;;  %v23916_v57 = vadd.f32 %v9522_v1, %v23614_v44  ;;  %v14439_v42 = vld [vmem:[%s24620_s12 + $0xb04] sm:$0xf]  ;;  %10032 = vmatpush.bf16.msrb.mxu0 %v12906_v19  ;;  %v12594_v13 = vor.u32 %v14257_v60, %v12591_v34  ;;  %v12177_v1 = vld [vmem:[%s24620_s12 + $0x210] sm:$0xf]  ;;  %v23961_v19 = vpop.f32.mrf.mxu0  ;;  %v9383_v60 = vadd.f32 %v23407_v33, %v9354_v56  ;;  %v12149_v33 = vld [vmem:[%s24620_s12 + $0x1d8] sm:$0xf] }
 0x7d8   :  { %v10209_v63 = vpack.c.bf16 %v14613_v36, %v14611_v35  ;;  %9945 = vmatpush.bf16.msra.mxu1 %v12234_v30  ;;  %v13322_v44 = vor.u32 %v14439_v42, %v13319_v49  ;;  %v12206_v35 = vor.u32 %v14163_v16, %v12205_v21  ;;  %v14331_v0 = vld [vmem:[%s24620_s12 + $0x7a0] sm:$0xf0]  ;;  %v14432_v36 = vld [vmem:[%s24620_s12 + $0xacc] sm:$0xf]  ;;  %v12849_v42 = vld [vmem:[%s24620_s12 + $0x750] sm:$0xf] }
 0x7d9   :  { %14616 = vtanh.f32 %v9436_v62  ;;  %v12878_v4 = vor.u32 %v14331_v0, %v12877_v43  ;;  %v13291_v62 = vld [vmem:[%s24620_s12 + $0xae4] sm:$0xf0]  ;;  %v14324_v49 = vld [vmem:[%s24620_s12 + $0x768] sm:$0xf0]  ;;  %9774 = vmatpush.bf16.msra.mxu3 %v12594_v13  ;;  %v12821_v56 = vld [vmem:[%s24620_s12 + $0x718] sm:$0xf] }
 0x7da   :  { %10242 = vst [vmem:[#allocation2 + $0x40] sm:$0xff] %v10209_v63  ;;  %v23920_v58 = vpop.f32.mrf.mxu1  ;;  %9859 = vmatpush.bf16.msrb.mxu2 %v13322_v44  ;;  %v13294_v63 = vor.u32 %v14432_v36, %v13291_v62  ;;  %v12850_v43 = vor.u32 %v14324_v49, %v12849_v42  ;;  %14618 = vtanh.f32 %v23402_v26  ;;  %v13263_v26 = vld [vmem:[%s24620_s12 + $0xaac] sm:$0xf0]  ;;  %v14317_v13 = vld [vmem:[%s24620_s12 + $0x730] sm:$0xf0] }
 0x7db   :  { %9669 = vmatmul.bf16.gmra.mxu3 %v21441_v39  ;;  %9756 = vmatmul.bf16.gmra.mxu2 %v25183_v51  ;;  %v14615_v30 = vpop.eup %14614  ;;  %v14530_v36 = vld [vmem:[%s24620_s12 + $0xddc] sm:$0xf]  ;;  %v13683_v62 = vld [vmem:[%s24620_s12 + $0xdf4] sm:$0xf0] }
 0x7dc   :  { %9946 = vmatpush.bf16.msra.mxu1 %v12206_v35  ;;  %10033 = vmatpush.bf16.msrb.mxu0 %v12878_v4 }
 0x7dd   :  { %9843 = vmatmul.bf16.gmra.mxu1 %v25073_v8  ;;  %9930 = vmatmul.bf16.gmra.mxu0 %v25074_v53  ;;  %v12178_v53 = vor.u32 %v14156_v20, %v12177_v1  ;;  %v9412_v1 = vadd.f32 %v23711_v37, %v9383_v60  ;;  %v13655_v20 = vld [vmem:[%s24620_s12 + $0xdbc] sm:$0xf0]  ;;  %v9330_v60 = vadd.f32 %v23748_v9, %v23458_v25  ;;  %v14516_v25 = vld [vmem:[%s24620_s12 + $0xd6c] sm:$0xf]  ;;  %v13627_v9 = vld [vmem:[%s24620_s12 + $0xd84] sm:$0xf0] }
 0x7de   :  { %v9438_v31 = vpop.f32.mrf.mxu3  ;;  %v9525_v16 = vpop.f32.mrf.mxu2  ;;  %9860 = vmatpush.bf16.msrb.mxu2 %v13294_v63  ;;  %v14523_v63 = vld [vmem:[%s24620_s12 + $0xda4] sm:$0xf] }
 0x7df   :  { %v14617_v44 = vpop.eup %14616  ;;  %v9439_v21 = vadd.f32 %v9438_v31, %v9410_v18  ;;  %v23975_v0 = vadd.f32 %v9525_v16, %v23666_v7  ;;  %v14425_v18 = vld [vmem:[%s24620_s12 + $0xa94] sm:$0xf]  ;;  %v13686_v31 = vor.u32 %v14530_v36, %v13683_v62  ;;  %v9689_v37 = vpop.f32.mrf.mxu0 }
 0x7e0   :  { %v10213_v35 = vpack.c.bf16 %v14617_v44, %v14615_v30  ;;  %9947 = vmatpush.bf16.msra.mxu1 %v12178_v53  ;;  %10034 = vmatpush.bf16.msrb.mxu0 %v12850_v43  ;;  %v13266_v61 = vor.u32 %v14425_v18, %v13263_v26  ;;  %v14149_v7 = vld [vmem:[%s24620_s12 + $0x1f0] sm:$0xf0]  ;;  %v12822_v30 = vor.u32 %v14317_v13, %v12821_v56  ;;  %v14619_v42 = vpop.eup %14618  ;;  %v25185_v26 = vld [vmem:[#allocation8_spill] sm:$0xff] }
 0x7e1   :  { %14620 = vtanh.f32 %v9439_v21  ;;  %v12150_v4 = vor.u32 %v14149_v7, %v12149_v33  ;;  %9883 = vmatpush.bf16.msrb.mxu3 %v13686_v31  ;;  %v25188_v56 = vld [vmem:[#allocation28_spill] sm:$0xff]  ;;  %v13630_v13 = vor.u32 %v14516_v25, %v13627_v9  ;;  %v25190_v31 = vld [vmem:[#allocation46_spill] sm:$0xff] }
 0x7e2   :  { %10246 = vst [vmem:[#allocation2 + $0x5c] sm:$0xff] %v10213_v35  ;;  %v23978_v34 = vpop.f32.mrf.mxu1  ;;  %9861 = vmatpush.bf16.msrb.mxu2 %v13266_v61  ;;  %14622 = vtanh.f32 %v23418_v3  ;;  %v13658_v35 = vor.u32 %v14523_v63, %v13655_v20  ;;  %v9415_v3 = vadd.f32 %v23730_v27, %v23742_v46  ;;  %v25186_v61 = vld [vmem:[#allocation36_spill] sm:$0xff]  ;;  %v25189_v46 = vld [vmem:[#allocation10_spill] sm:$0xff] }
 0x7e3   :  { %v9359_v33 = vadd.f32 %v25186_v61, %v9330_v60 }
 0x7e4   :  { %9948 = vmatpush.bf16.msra.mxu1 %v12150_v4  ;;  %10035 = vmatpush.bf16.msrb.mxu0 %v12822_v30 }
 0x7e5   :  { %9884 = vmatpush.bf16.msrb.mxu3 %v13658_v35  ;;  %v9388_v63 = vadd.f32 %v25190_v31, %v9359_v33  ;;  %v25191_v33 = vld [vmem:[#allocation48_spill] sm:$0xff] }
 0x7e6   :  { %v9440_v49 = vpop.f32.mrf.mxu3  ;;  %v9527_v16 = vpop.f32.mrf.mxu2 }
 0x7e7   :  { %v14621_v44 = vpop.eup %14620  ;;  %v9441_v21 = vadd.f32 %v9440_v49, %v9412_v1  ;;  %v24013_v43 = vadd.f32 %v9527_v16, %v23707_v2  ;;  %v25187_v2 = vld [vmem:[#allocation17_spill] sm:$0xff]  ;;  %v9691_v20 = vpop.f32.mrf.mxu0  ;;  %v9417_v49 = vadd.f32 %v23750_v54, %v9388_v63  ;;  %v13599_v16 = vld [vmem:[%s24620_s12 + $0xd4c] sm:$0xf0] }
 0x7e8   :  { %v10217_v53 = vpack.c.bf16 %v14621_v44, %v14619_v42  ;;  %v14623_v7 = vpop.eup %14622  ;;  %v24043_v44 = vld [vmem:[%s24621_s13] sm:$0x7f] }
 0x7e9   :  { %14624 = vtanh.f32 %v9441_v21  ;;  %9885 = vmatpush.bf16.msrb.mxu3 %v13630_v13  ;;  %v24046_v21 = vperm.slane %v24043_v44, 5  ;;  %v25192_v13 = vld [vmem:[#allocation18_spill] sm:$0xff] }
 0x7ea   :  { %10250 = vst [vmem:[#allocation2 + $0x78] sm:$0xff] %v10217_v53  ;;  %v24017_v18 = vpop.f32.mrf.mxu1  ;;  %14626 = vtanh.f32 %v25189_v46 }
 0x7eb   :  { %9674 = vmatmul.bf16.gmra.mxu3 %v21413_v10  ;;  %9761 = vmatmul.bf16.gmra.mxu2 %v25185_v26 }
 0x7ed   :  { %9848 = vmatmul.bf16.gmra.mxu1 %v25187_v2  ;;  %9935 = vmatmul.bf16.gmra.mxu0 %v25188_v56 }
 0x7ee   :  { %v9443_v4 = vpop.f32.mrf.mxu3  ;;  %v9530_v27 = vpop.f32.mrf.mxu2 }
 0x7ef   :  { %v14625_v36 = vpop.eup %14624  ;;  %v9444_v62 = vadd.f32 %v9443_v4, %v9415_v3  ;;  %v24034_v30 = vadd.f32 %v9530_v27, %v23721_v45  ;;  %v14509_v45 = vld [vmem:[%s24620_s12 + $0xd34] sm:$0xf] }
 0x7f0   :  { %v10221_v1 = vpack.c.bf16 %v14625_v36, %v14623_v7  ;;  %v14627_v53 = vpop.eup %14626  ;;  %v13602_v60 = vor.u32 %v14509_v45, %v13599_v16  ;;  %v9690_v7 = vadd.f32 %v9689_v37, %v24046_v21  ;;  %v9694_v36 = vpop.f32.mrf.mxu0  ;;  %v25194_v27 = vld [vmem:[#allocation27_spill] sm:$0xff]  ;;  %v13571_v37 = vld [vmem:[%s24620_s12 + $0xd14] sm:$0xf0]  ;;  %v14254_v45 = vld [vmem:[%s24620_s12 + $0x538] sm:$0xf0] }
 0x7f1   :  { %14628 = vtanh.f32 %v9444_v62  ;;  %v25193_v62 = vld [vmem:[#allocation39_spill] sm:$0xff]  ;;  %v13241_v16 = vld [vmem:[%s24620_s12 + $0xa60] sm:$0xf] }
 0x7f2   :  { %10254 = vst [vmem:[#allocation2 + $0x94] sm:$0xff] %v10221_v1  ;;  %v24037_v42 = vpop.f32.mrf.mxu1  ;;  %14630 = vtanh.f32 %v25191_v33  ;;  %9886 = vmatpush.bf16.msrb.mxu3 %v13602_v60  ;;  %v25195_v1 = vld [vmem:[#allocation43_spill] sm:$0xff] }
 0x7f6   :  { %v9445_v35 = vpop.f32.mrf.mxu3  ;;  %v9532_v61 = vpop.f32.mrf.mxu2 }
 0x7f7   :  { %v14629_v54 = vpop.eup %14628  ;;  %v9446_v3 = vadd.f32 %v9445_v35, %v9417_v49  ;;  %v24056_v9 = vadd.f32 %v9532_v61, %v23744_v52  ;;  %v14502_v52 = vld [vmem:[%s24620_s12 + $0xcfc] sm:$0xf]  ;;  %v12569_v49 = vld [vmem:[%s24620_s12 + $0x520] sm:$0xf] }
 0x7f8   :  { %v10225_v25 = vpack.c.bf16 %v14629_v54, %v14627_v53  ;;  %v14631_v46 = vpop.eup %14630  ;;  %v13574_v63 = vor.u32 %v14502_v52, %v13571_v37  ;;  %v12570_v54 = vor.u32 %v14254_v45, %v12569_v49  ;;  %v12541_v37 = vld [vmem:[%s24620_s12 + $0x4e8] sm:$0xf]  ;;  %v13543_v49 = vld [vmem:[%s24620_s12 + $0xcdc] sm:$0xf0] }
 0x7f9   :  { %14632 = vtanh.f32 %v9446_v3  ;;  %v14422_v3 = vld [vmem:[%s24620_s12 + $0xa78] sm:$0xf0] }
 0x7fa   :  { %10258 = vst [vmem:[#allocation2 + $0xb0] sm:$0xff] %v10225_v25  ;;  %v9718_v56 = vpop.f32.mrf.mxu1  ;;  %9887 = vmatpush.bf16.msrb.mxu3 %v13574_v63  ;;  %v13242_v33 = vor.u32 %v14422_v3, %v13241_v16  ;;  %v9692_v25 = vadd.f32 %v9691_v20, %v24046_v21  ;;  %9970 = vmatpush.bf16.msra.mxu2 %v12570_v54  ;;  %v14247_v20 = vld [vmem:[%s24620_s12 + $0x500] sm:$0xf0]  ;;  %v14240_v54 = vld [vmem:[%s24620_s12 + $0x4c8] sm:$0xf0] }
 0x7fb   :  { %v24059_v4 = vadd.f32 %v9718_v56, %v9690_v7  ;;  %9775 = vmatmul.bf16.vlgmr.msra.gmra.mxu3 %v25192_v13  ;;  %9862 = vmatmul.bf16.vlgmr.msrb.gmra.mxu2 %v25193_v62  ;;  %v14495_v63 = vld [vmem:[%s24620_s12 + $0xcc4] sm:$0xf]  ;;  %v13185_v3 = vld [vmem:[%s24620_s12 + $0x9f0] sm:$0xf] }
 0x7fc   :  { %10057 = vmatpush.bf16.msrb.mxu1 %v13242_v33 }
 0x7fd   :  { %9949 = vmatmul.bf16.vlgmr.msra.gmra.mxu1 %v25194_v27  ;;  %10036 = vmatmul.bf16.vlgmr.msrb.gmra.mxu0 %v25195_v1 }
 0x7fe   :  { %v9544_v31 = vpop.f32.mrf.mxu3  ;;  %v9631_v60 = vpop.f32.mrf.mxu2 }
 0x7ff   :  { %v14633_v53 = vpop.eup %14632  ;;  %v9545_v35 = vadd.f32 %v9544_v31, %v23773_v12  ;;  %v12542_v31 = vor.u32 %v14247_v20, %v12541_v37  ;;  %v25196_v20 = vld [vmem:[#allocation22_spill] sm:$0xff] }
 0x800   :  { %v10229_v61 = vpack.c.bf16 %v14633_v53, %v14631_v46  ;;  %v9696_v46 = vpop.f32.mrf.mxu0 }
 0x801   :  { %v9574_v7 = vadd.f32 %v23647_v11, %v9545_v35  ;;  %v13213_v11 = vld [vmem:[%s24620_s12 + $0xa28] sm:$0xf]  ;;  %v13546_v35 = vor.u32 %v14495_v63, %v13543_v49  ;;  %9971 = vmatpush.bf16.msra.mxu2 %v12542_v31 }
 0x802   :  { %10262 = vst [vmem:[#allocation2 + $0xcc] sm:$0xff] %v10229_v61  ;;  %v9720_v56 = vpop.f32.mrf.mxu1  ;;  %v9695_v61 = vadd.f32 %v9694_v36, %v24046_v21  ;;  %v25198_v31 = vld [vmem:[#allocation34_spill] sm:$0xff]  ;;  %v14233_v36 = vld [vmem:[%s24620_s12 + $0x490] sm:$0xf0] }
 0x803   :  { %v9603_v27 = vadd.f32 %v23754_v15, %v9574_v7  ;;  %v24087_v12 = vadd.f32 %v9720_v56, %v9692_v25  ;;  %v14415_v15 = vld [vmem:[%s24620_s12 + $0xa40] sm:$0xf0]  ;;  %9888 = vmatpush.bf16.msrb.mxu3 %v13546_v35 }
 0x804   :  { %v13214_v53 = vor.u32 %v14415_v15, %v13213_v11  ;;  %v25197_v11 = vld [vmem:[#allocation13_spill] sm:$0xff]  ;;  %v25199_v15 = vld [vmem:[#allocation44_spill] sm:$0xff] }
 0x805   :  { %v24089_v52 = vadd.f32 %v9631_v60, %v9603_v27  ;;  %v12513_v60 = vld [vmem:[%s24620_s12 + $0x4b0] sm:$0xf] }
 0x806   :  { %v9546_v1 = vpop.f32.mrf.mxu3  ;;  %v9633_v16 = vpop.f32.mrf.mxu2  ;;  %10058 = vmatpush.bf16.msrb.mxu1 %v13214_v53  ;;  %v12514_v25 = vor.u32 %v14240_v54, %v12513_v60  ;;  %v13515_v53 = vld [vmem:[%s24620_s12 + $0xca4] sm:$0xf0] }
 0x807   :  { %v9547_v45 = vadd.f32 %v9546_v1, %v23805_v59  ;;  %v14408_v59 = vld [vmem:[%s24620_s12 + $0xa08] sm:$0xf0] }
 0x808   :  { %v13186_v56 = vor.u32 %v14408_v59, %v13185_v3  ;;  %9972 = vmatpush.bf16.msra.mxu2 %v12514_v25  ;;  %v12457_v59 = vld [vmem:[%s24620_s12 + $0x440] sm:$0xf]  ;;  %v9699_v25 = vpop.f32.mrf.mxu0 }
 0x809   :  { %v9576_v33 = vadd.f32 %v23702_v40, %v9547_v45  ;;  %v12485_v40 = vld [vmem:[%s24620_s12 + $0x478] sm:$0xf]  ;;  %v14401_v45 = vld [vmem:[%s24620_s12 + $0x9d0] sm:$0xf0] }
 0x80a   :  { %v9723_v7 = vpop.f32.mrf.mxu1  ;;  %10059 = vmatpush.bf16.msrb.mxu1 %v13186_v56  ;;  %v12486_v49 = vor.u32 %v14233_v36, %v12485_v40 }
 0x80b   :  { %v9605_v27 = vadd.f32 %v23776_v55, %v9576_v33  ;;  %v24125_v37 = vadd.f32 %v9723_v7, %v9695_v61  ;;  %9780 = vmatmul.bf16.gmra.mxu3 %v25196_v20  ;;  %9867 = vmatmul.bf16.gmra.mxu2 %v25197_v11  ;;  %v13157_v55 = vld [vmem:[%s24620_s12 + $0x9b8] sm:$0xf]  ;;  %v14226_v61 = vld [vmem:[%s24620_s12 + $0x458] sm:$0xf0]  ;;  %v13129_v33 = vld [vmem:[%s24620_s12 + $0x980] sm:$0xf]  ;;  %v9697_v7 = vadd.f32 %v9696_v46, %v24046_v21 }
 0x80c   :  { %v13158_v54 = vor.u32 %v14401_v45, %v13157_v55  ;;  %9973 = vmatpush.bf16.msra.mxu2 %v12486_v49  ;;  %v13101_v46 = vld [vmem:[%s24620_s12 + $0x948] sm:$0xf]  ;;  %v14387_v45 = vld [vmem:[%s24620_s12 + $0x960] sm:$0xf0] }
 0x80d   :  { %v24129_v1 = vadd.f32 %v9633_v16, %v9605_v27  ;;  %9954 = vmatmul.bf16.gmra.mxu1 %v25198_v31  ;;  %10041 = vmatmul.bf16.gmra.mxu0 %v25199_v15  ;;  %v14488_v16 = vld [vmem:[%s24620_s12 + $0xc8c] sm:$0xf]  ;;  %v12458_v27 = vor.u32 %v14226_v61, %v12457_v59  ;;  %v12401_v59 = vld [vmem:[%s24620_s12 + $0x3d0] sm:$0xf] }
 0x80e   :  { %v9549_v63 = vpop.f32.mrf.mxu3  ;;  %v9636_v60 = vpop.f32.mrf.mxu2  ;;  %v13518_v3 = vor.u32 %v14488_v16, %v13515_v53  ;;  %10060 = vmatpush.bf16.msrb.mxu1 %v13158_v54  ;;  %v14481_v16 = vld [vmem:[%s24620_s12 + $0xc54] sm:$0xf]  ;;  %v13487_v53 = vld [vmem:[%s24620_s12 + $0xc6c] sm:$0xf0]  ;;  %v13102_v54 = vor.u32 %v14387_v45, %v13101_v46  ;;  %v14212_v61 = vld [vmem:[%s24620_s12 + $0x3e8] sm:$0xf0] }
 0x80f   :  { %v9550_v35 = vadd.f32 %v9549_v63, %v23864_v29  ;;  %v14394_v29 = vld [vmem:[%s24620_s12 + $0x998] sm:$0xf0]  ;;  %v12429_v63 = vld [vmem:[%s24620_s12 + $0x408] sm:$0xf]  ;;  %v12793_v45 = vld [vmem:[%s24620_s12 + $0x6e0] sm:$0xf] }
 0x810   :  { %9889 = vmatpush.bf16.msrb.mxu3 %v13518_v3  ;;  %v13130_v40 = vor.u32 %v14394_v29, %v13129_v33  ;;  %9974 = vmatpush.bf16.msra.mxu2 %v12458_v27  ;;  %v13490_v3 = vor.u32 %v14481_v16, %v13487_v53  ;;  %v13073_v33 = vld [vmem:[%s24620_s12 + $0x910] sm:$0xf]  ;;  %v14380_v29 = vld [vmem:[%s24620_s12 + $0x928] sm:$0xf0]  ;;  %v9701_v27 = vpop.f32.mrf.mxu0 }
 0x811   :  { %v9579_v56 = vadd.f32 %v23724_v23, %v9550_v35  ;;  %v14219_v23 = vld [vmem:[%s24620_s12 + $0x420] sm:$0xf0] }
 0x812   :  { %v9725_v31 = vpop.f32.mrf.mxu1  ;;  %10061 = vmatpush.bf16.msrb.mxu1 %v13130_v40  ;;  %v13074_v40 = vor.u32 %v14380_v29, %v13073_v33 }
 0x813   :  { %v9608_v36 = vadd.f32 %v23811_v14, %v9579_v56  ;;  %v24167_v55 = vadd.f32 %v9725_v31, %v9697_v7  ;;  %v12430_v14 = vor.u32 %v14219_v23, %v12429_v63  ;;  %v12402_v56 = vor.u32 %v14212_v61, %v12401_v59 }
 0x814   :  { %9890 = vmatpush.bf16.msrb.mxu3 %v13490_v3  ;;  %v9702_v3 = vadd.f32 %v9701_v27, %v24046_v21 }
 0x815   :  { %v24169_v15 = vadd.f32 %v9636_v60, %v9608_v36  ;;  %9975 = vmatpush.bf16.msra.mxu2 %v12430_v14  ;;  %v13045_v14 = vld [vmem:[%s24620_s12 + $0x8d8] sm:$0xf] }
 0x816   :  { %v9551_v49 = vpop.f32.mrf.mxu3  ;;  %v9638_v60 = vpop.f32.mrf.mxu2  ;;  %10062 = vmatpush.bf16.msrb.mxu1 %v13102_v54 }
 0x817   :  { %v9552_v35 = vadd.f32 %v9551_v49, %v23916_v57  ;;  %v9700_v57 = vadd.f32 %v9699_v25, %v24046_v21  ;;  %v14205_v25 = vld [vmem:[%s24620_s12 + $0x3b0] sm:$0xf0] }
 0x819   :  { %v9581_v7 = vadd.f32 %v23746_v28, %v9552_v35  ;;  %9976 = vmatpush.bf16.msra.mxu2 %v12402_v56  ;;  %v12373_v28 = vld [vmem:[%s24620_s12 + $0x398] sm:$0xf] }
 0x81a   :  { %v9728_v31 = vpop.f32.mrf.mxu1  ;;  %10063 = vmatpush.bf16.msrb.mxu1 %v13074_v40  ;;  %v12374_v49 = vor.u32 %v14205_v25, %v12373_v28 }
 0x81b   :  { %v9610_v36 = vadd.f32 %v23867_v24, %v9581_v7  ;;  %v24205_v63 = vadd.f32 %v9728_v31, %v9700_v57  ;;  %9785 = vmatmul.bf16.gmra.mxu3 %v25086_v17  ;;  %9872 = vmatmul.bf16.gmra.mxu2 %v25087_v50  ;;  %v25200_v24 = vld [vmem:[#allocation45_spill] sm:$0xff]  ;;  %v12765_v57 = vld [vmem:[%s24620_s12 + $0x6a8] sm:$0xf] }
 0x81c   :  { %v14303_v7 = vld [vmem:[%s24620_s12 + $0x6c0] sm:$0xf0] }
 0x81d   :  { %v24209_v23 = vadd.f32 %v9638_v60, %v9610_v36  ;;  %9959 = vmatmul.bf16.gmra.mxu1 %v25088_v5  ;;  %10046 = vmatmul.bf16.gmra.mxu0 %v25200_v24  ;;  %v14373_v5 = vld [vmem:[%s24620_s12 + $0x8f0] sm:$0xf0]  ;;  %v14310_v60 = vld [vmem:[%s24620_s12 + $0x6f8] sm:$0xf0] }
 0x81e   :  { %v9554_v46 = vpop.f32.mrf.mxu3  ;;  %v9641_v53 = vpop.f32.mrf.mxu2  ;;  %v13046_v35 = vor.u32 %v14373_v5, %v13045_v14  ;;  %v12794_v54 = vor.u32 %v14310_v60, %v12793_v45  ;;  %9977 = vmatpush.bf16.msra.mxu2 %v12374_v49 }
 0x81f   :  { %v9555_v16 = vadd.f32 %v9554_v46, %v23975_v0  ;;  %v9704_v0 = vpop.f32.mrf.mxu0  ;;  %v12737_v46 = vld [vmem:[%s24620_s12 + $0x670] sm:$0xf] }
 0x820   :  { %10064 = vmatpush.bf16.msrb.mxu1 %v13046_v35  ;;  %9999 = vmatpush.bf16.msra.mxu3 %v12794_v54 }
 0x821   :  { %v9584_v59 = vadd.f32 %v23770_v6, %v9555_v16  ;;  %v12766_v6 = vor.u32 %v14303_v7, %v12765_v57  ;;  %v12681_v57 = vld [vmem:[%s24620_s12 + $0x600] sm:$0xf]  ;;  %v14282_v7 = vld [vmem:[%s24620_s12 + $0x618] sm:$0xf0] }
 0x822   :  { %v9730_v61 = vpop.f32.mrf.mxu1 }
 0x823   :  { %v9613_v33 = vadd.f32 %v23920_v58, %v9584_v59  ;;  %v24235_v29 = vadd.f32 %v9730_v61, %v9702_v3  ;;  %v9705_v58 = vadd.f32 %v9704_v0, %v24046_v21  ;;  %v25202_v0 = vld [vmem:[#allocation25_spill] sm:$0xff] }
 0x824   :  { %10000 = vmatpush.bf16.msra.mxu3 %v12766_v6 }
 0x825   :  { %v24243_v56 = vadd.f32 %v9641_v53, %v9613_v33  ;;  %v25201_v33 = vld [vmem:[#allocation11_spill] sm:$0xff] }
 0x826   :  { %v9556_v27 = vpop.f32.mrf.mxu3  ;;  %v9643_v40 = vpop.f32.mrf.mxu2 }
 0x827   :  { %v9557_v31 = vadd.f32 %v9556_v27, %v24013_v43  ;;  %v14296_v43 = vld [vmem:[%s24620_s12 + $0x688] sm:$0xf0]  ;;  %v12682_v27 = vor.u32 %v14282_v7, %v12681_v57 }
 0x829   :  { %v9586_v36 = vadd.f32 %v23809_v41, %v9557_v31  ;;  %v12738_v41 = vor.u32 %v14296_v43, %v12737_v46  ;;  %v14471_v46 = vld [vmem:[%s24620_s12 + $0xc00] sm:$0xf0]  ;;  %v12653_v43 = vld [vmem:[%s24620_s12 + $0x5c8] sm:$0xf] }
 0x82a   :  { %v9733_v28 = vpop.f32.mrf.mxu1 }
 0x82b   :  { %v9615_v25 = vadd.f32 %v23978_v34, %v9586_v36  ;;  %v24249_v24 = vadd.f32 %v9733_v28, %v9705_v58  ;;  %9790 = vmatmul.bf16.gmra.mxu3 %v25150_v32  ;;  %9877 = vmatmul.bf16.gmra.mxu2 %v25151_v47  ;;  %v9706_v34 = vpop.f32.mrf.mxu0 }
 0x82c   :  { %10001 = vmatpush.bf16.msra.mxu3 %v12738_v41  ;;  %v9707_v16 = vadd.f32 %v9706_v34, %v24046_v21  ;;  %v14275_v41 = vld [vmem:[%s24620_s12 + $0x5e0] sm:$0xf0]  ;;  %v14464_v34 = vld [vmem:[%s24620_s12 + $0xbc8] sm:$0xf0] }
 0x82d   :  { %v24259_v49 = vadd.f32 %v9643_v40, %v9615_v25  ;;  %9964 = vmatmul.bf16.gmra.mxu1 %v25152_v22  ;;  %10051 = vmatmul.bf16.gmra.mxu0 %v25153_v38  ;;  %v12709_v22 = vld [vmem:[%s24620_s12 + $0x638] sm:$0xf]  ;;  %v14289_v38 = vld [vmem:[%s24620_s12 + $0x650] sm:$0xf0]  ;;  %v13437_v25 = vld [vmem:[%s24620_s12 + $0xbe8] sm:$0xf] }
 0x82e   :  { %v9559_v14 = vpop.f32.mrf.mxu3  ;;  %v9646_v45 = vpop.f32.mrf.mxu2  ;;  %v12710_v3 = vor.u32 %v14289_v38, %v12709_v22  ;;  %v25205_v22 = vld [vmem:[#allocation6_spill] sm:$0xff]  ;;  %v13381_v38 = vld [vmem:[%s24620_s12 + $0xb78] sm:$0xf] }
 0x82f   :  { %v9560_v5 = vadd.f32 %v9559_v14, %v24034_v30 }
 0x830   :  { %10002 = vmatpush.bf16.msra.mxu3 %v12710_v3  ;;  %v12625_v3 = vld [vmem:[%s24620_s12 + $0x590] sm:$0xf] }
 0x831   :  { %v9589_v53 = vadd.f32 %v23884_v48, %v9560_v5  ;;  %v12654_v5 = vor.u32 %v14275_v41, %v12653_v43 }
 0x832   :  { %v9735_v35 = vpop.f32.mrf.mxu1 }
 0x833   :  { %v9618_v60 = vadd.f32 %v24017_v18, %v9589_v53  ;;  %v24267_v54 = vadd.f32 %v9735_v35, %v9707_v16 }
 0x834   :  { %10003 = vmatpush.bf16.msra.mxu3 %v12682_v27 }
 0x835   :  { %v24275_v30 = vadd.f32 %v9646_v45, %v9618_v60  ;;  %v25204_v60 = vld [vmem:[#allocation20_spill] sm:$0xff] }
 0x836   :  { %v9561_v59 = vpop.f32.mrf.mxu3  ;;  %v9648_v48 = vpop.f32.mrf.mxu2 }
 0x837   :  { %v9562_v21 = vadd.f32 %v9561_v59, %v24056_v9  ;;  %v25203_v9 = vld [vmem:[#allocation9_spill] sm:$0xff] }
 0x838   :  { %10004 = vmatpush.bf16.msra.mxu3 %v12654_v5  ;;  %v14534_v5 = vld [vmem:[%s24620_s12 + $0xdf8] sm:$0xf0] }
 0x839   :  { %v9591_v18 = vadd.f32 %v23961_v19, %v9562_v21  ;;  %v13465_v19 = vld [vmem:[%s24620_s12 + $0xc20] sm:$0xf]  ;;  %v14268_v21 = vld [vmem:[%s24620_s12 + $0x5a8] sm:$0xf0] }
 0x83b   :  { %v9620_v61 = vadd.f32 %v24037_v42, %v9591_v18  ;;  %9891 = vmatmul.bf16.vlgmr.msrb.gmra.mxu3 %v25201_v33  ;;  %9978 = vmatmul.bf16.vlgmr.msra.gmra.mxu2 %v25202_v0  ;;  %v14478_v42 = vld [vmem:[%s24620_s12 + $0xc38] sm:$0xf0]  ;;  %v12626_v0 = vor.u32 %v14268_v21, %v12625_v3  ;;  %v14527_v3 = vld [vmem:[%s24620_s12 + $0xdc0] sm:$0xf0] }
 0x83c   :  { %v13466_v40 = vor.u32 %v14478_v42, %v13465_v19  ;;  %v14450_v18 = vld [vmem:[%s24620_s12 + $0xb58] sm:$0xf0]  ;;  %v13325_v19 = vld [vmem:[%s24620_s12 + $0xb08] sm:$0xf]  ;;  %v14443_v42 = vld [vmem:[%s24620_s12 + $0xb20] sm:$0xf0] }
 0x83d   :  { %v24288_v6 = vadd.f32 %v9648_v48, %v9620_v61  ;;  %10065 = vmatmul.bf16.vlgmr.msrb.gmra.mxu1 %v25203_v9  ;;  %v13353_v48 = vld [vmem:[%s24620_s12 + $0xb40] sm:$0xf]  ;;  %10005 = vmatpush.bf16.msra.mxu3 %v12626_v0 }
 0x83e   :  { %v9660_v31 = vpop.f32.mrf.mxu3  ;;  %v9747_v36 = vpop.f32.mrf.mxu2  ;;  %10086 = vmatpush.bf16.msrb.mxu2 %v13466_v40  ;;  %v13354_v9 = vor.u32 %v14450_v18, %v13353_v48  ;;  %v13297_v40 = vld [vmem:[%s24620_s12 + $0xad0] sm:$0xf] }
 0x83f   :  { %v24298_v58 = vadd.f32 %v9660_v31, %v24089_v52  ;;  %v24301_v28 = vadd.f32 %v9747_v36, %v24059_v4  ;;  %v13438_v52 = vor.u32 %v14471_v46, %v13437_v25  ;;  %v13409_v4 = vld [vmem:[%s24620_s12 + $0xbb0] sm:$0xf]  ;;  %v13326_v31 = vor.u32 %v14443_v42, %v13325_v19  ;;  %v14436_v36 = vld [vmem:[%s24620_s12 + $0xae8] sm:$0xf0] }
 0x840   :  { %v13410_v53 = vor.u32 %v14464_v34, %v13409_v4  ;;  %v13298_v41 = vor.u32 %v14436_v36, %v13297_v40  ;;  %v13269_v34 = vld [vmem:[%s24620_s12 + $0xa98] sm:$0xf]  ;;  %v9834_v36 = vpop.f32.mrf.mxu1 }
 0x841   :  { %14634 = vtanh.f32 %v24298_v58 }
 0x842   :  { %10087 = vmatpush.bf16.msrb.mxu2 %v13438_v52 }
 0x846   :  { %v9662_v14 = vpop.f32.mrf.mxu3  ;;  %v9749_v16 = vpop.f32.mrf.mxu2  ;;  %10088 = vmatpush.bf16.msrb.mxu2 %v13410_v53 }
 0x847   :  { %v24322_v45 = vadd.f32 %v9662_v14, %v24129_v1  ;;  %v24325_v35 = vadd.f32 %v9749_v16, %v24087_v12  ;;  %v14457_v1 = vld [vmem:[%s24620_s12 + $0xb90] sm:$0xf0] }
 0x848   :  { %v25206_v12 = vld [vmem:[#allocation15_spill] sm:$0xff]  ;;  %v13382_v59 = vor.u32 %v14457_v1, %v13381_v38  ;;  %v13661_v1 = vld [vmem:[%s24620_s12 + $0xda8] sm:$0xf] }
 0x849   :  { %v14429_v14 = vld [vmem:[%s24620_s12 + $0xab0] sm:$0xf0] }
 0x84a   :  { %10089 = vmatpush.bf16.msrb.mxu2 %v13382_v59 }
 0x84b   :  { %9896 = vmatmul.bf16.gmra.mxu3 %v25204_v60  ;;  %9983 = vmatmul.bf16.gmra.mxu2 %v25205_v22 }
 0x84d   :  { %10070 = vmatmul.bf16.gmra.mxu1 %v25206_v12  ;;  %v13662_v12 = vor.u32 %v14527_v3, %v13661_v1 }
 0x84e   :  { %v9665_v61 = vpop.f32.mrf.mxu3  ;;  %v9752_v7 = vpop.f32.mrf.mxu2  ;;  %10090 = vmatpush.bf16.msrb.mxu2 %v13354_v9 }
 0x84f   :  { %v24349_v57 = vadd.f32 %v9665_v61, %v24169_v15  ;;  %v24352_v27 = vadd.f32 %v9752_v7, %v24125_v37  ;;  %v12597_v15 = vld [vmem:[%s24620_s12 + $0x558] sm:$0xf]  ;;  %v14261_v37 = vld [vmem:[%s24620_s12 + $0x570] sm:$0xf0] }
 0x850   :  { %v12598_v46 = vor.u32 %v14261_v37, %v12597_v15  ;;  %v14506_v15 = vld [vmem:[%s24620_s12 + $0xd18] sm:$0xf0] }
 0x852   :  { %10091 = vmatpush.bf16.msrb.mxu2 %v13326_v31  ;;  %10006 = vmatpush.bf16.msra.mxu3 %v12598_v46  ;;  %v14492_v46 = vld [vmem:[%s24620_s12 + $0xca8] sm:$0xf0] }
 0x856   :  { %v9667_v25 = vpop.f32.mrf.mxu3  ;;  %v9754_v52 = vpop.f32.mrf.mxu2  ;;  %10092 = vmatpush.bf16.msrb.mxu2 %v13298_v41 }
 0x857   :  { %v24373_v43 = vadd.f32 %v9667_v25, %v24209_v23  ;;  %v24376_v4 = vadd.f32 %v9754_v52, %v24167_v55  ;;  %v13270_v23 = vor.u32 %v14429_v14, %v13269_v34  ;;  %v13689_v55 = vld [vmem:[%s24620_s12 + $0xde0] sm:$0xf]  ;;  %v13521_v25 = vld [vmem:[%s24620_s12 + $0xc90] sm:$0xf] }
 0x858   :  { %v13690_v16 = vor.u32 %v14534_v5, %v13689_v55  ;;  %v13522_v34 = vor.u32 %v14492_v46, %v13521_v25 }
 0x85a   :  { %10093 = vmatpush.bf16.msrb.mxu2 %v13270_v23  ;;  %10115 = vmatpush.bf16.msrb.mxu3 %v13690_v16  ;;  %v9836_v23 = vpop.f32.mrf.mxu1 }
 0x85b   :  { %9901 = vmatmul.bf16.gmra.mxu3 %v21441_v39  ;;  %9988 = vmatmul.bf16.gmra.mxu2 %v25183_v51 }
 0x85d   :  { %10075 = vmatmul.bf16.gmra.mxu1 %v25073_v8 }
 0x85e   :  { %v9670_v53 = vpop.f32.mrf.mxu3  ;;  %v9757_v38 = vpop.f32.mrf.mxu2  ;;  %10116 = vmatpush.bf16.msrb.mxu3 %v13662_v12 }
 0x85f   :  { %v24394_v22 = vadd.f32 %v9670_v53, %v24243_v56  ;;  %v24397_v51 = vadd.f32 %v9757_v38, %v24205_v63  ;;  %v13633_v63 = vld [vmem:[%s24620_s12 + $0xd70] sm:$0xf] }
 0x862   :  { %v9839_v38 = vpop.f32.mrf.mxu1 }
 0x866   :  { %v9672_v8 = vpop.f32.mrf.mxu3  ;;  %v9759_v56 = vpop.f32.mrf.mxu2 }
 0x867   :  { %v24406_v59 = vadd.f32 %v9672_v8, %v24259_v49  ;;  %v24409_v21 = vadd.f32 %v9759_v56, %v24235_v29  ;;  %v14520_v49 = vld [vmem:[%s24620_s12 + $0xd88] sm:$0xf0] }
 0x868   :  { %v13634_v18 = vor.u32 %v14520_v49, %v13633_v63 }
 0x86a   :  { %10117 = vmatpush.bf16.msrb.mxu3 %v13634_v18  ;;  %v9841_v56 = vpop.f32.mrf.mxu1 }
 0x86b   :  { %9906 = vmatmul.bf16.gmra.mxu3 %v21413_v10  ;;  %9993 = vmatmul.bf16.gmra.mxu2 %v25185_v26  ;;  %v13605_v26 = vld [vmem:[%s24620_s12 + $0xd38] sm:$0xf] }
 0x86d   :  { %10080 = vmatmul.bf16.gmra.mxu1 %v25187_v2  ;;  %v14513_v2 = vld [vmem:[%s24620_s12 + $0xd50] sm:$0xf0] }
 0x86e   :  { %v9675_v48 = vpop.f32.mrf.mxu3  ;;  %v9762_v61 = vpop.f32.mrf.mxu2  ;;  %v13606_v9 = vor.u32 %v14513_v2, %v13605_v26 }
 0x86f   :  { %v24421_v29 = vadd.f32 %v9675_v48, %v24275_v30  ;;  %v24424_v0 = vadd.f32 %v9762_v61, %v24249_v24  ;;  %v13577_v24 = vld [vmem:[%s24620_s12 + $0xd00] sm:$0xf] }
 0x870   :  { %10118 = vmatpush.bf16.msrb.mxu3 %v13606_v9 }
 0x876   :  { %v9677_v7 = vpop.f32.mrf.mxu3  ;;  %v9764_v30 = vpop.f32.mrf.mxu2 }
 0x877   :  { %v24433_v19 = vadd.f32 %v9677_v7, %v24288_v6  ;;  %v24436_v42 = vadd.f32 %v9764_v30, %v24267_v54  ;;  %v13578_v6 = vor.u32 %v14506_v15, %v13577_v24  ;;  %v13549_v54 = vld [vmem:[%s24620_s12 + $0xcc8] sm:$0xf] }
 0x879   :  { %10119 = vmatpush.bf16.msrb.mxu3 %v13578_v6 }
 0x87b   :  { %10007 = vmatmul.bf16.vlgmr.msra.gmra.mxu3 %v25192_v13  ;;  %10094 = vmatmul.bf16.vlgmr.msrb.gmra.mxu2 %v25193_v62  ;;  %v14499_v13 = vld [vmem:[%s24620_s12 + $0xce0] sm:$0xf0]  ;;  %v9805_v62 = vpop.f32.mrf.mxu0 }
 0x87c   :  { %v13550_v40 = vor.u32 %v14499_v13, %v13549_v54 }
 0x87e   :  { %v9776_v31 = vpop.f32.mrf.mxu3  ;;  %10120 = vmatpush.bf16.msrb.mxu3 %v13550_v40  ;;  %v9863_v52 = vpop.f32.mrf.mxu2 }
 0x87f   :  { %v9777_v18 = vadd.f32 %v9776_v31, %v24301_v28 }
 0x881   :  { %v9806_v61 = vadd.f32 %v9805_v62, %v9777_v18 }
 0x882   :  { %10121 = vmatpush.bf16.msrb.mxu3 %v13522_v34 }
 0x883   :  { %v9807_v14 = vpop.f32.mrf.mxu0  ;;  %v9835_v7 = vadd.f32 %v9834_v36, %v9806_v61 }
 0x885   :  { %v9864_v30 = vadd.f32 %v9863_v52, %v9835_v7 }
 0x886   :  { %v9778_v37 = vpop.f32.mrf.mxu3  ;;  %v9865_v16 = vpop.f32.mrf.mxu2 }
 0x887   :  { %v9779_v9 = vadd.f32 %v9778_v37, %v24325_v35  ;;  %v14635_v35 = vpop.eup %14634 }
 0x88b   :  { %10012 = vmatmul.bf16.gmra.mxu3 %v25196_v20  ;;  %10099 = vmatmul.bf16.gmra.mxu2 %v25197_v11  ;;  %v13493_v20 = vld [vmem:[%s24620_s12 + $0xc58] sm:$0xf]  ;;  %v14485_v11 = vld [vmem:[%s24620_s12 + $0xc70] sm:$0xf0]  ;;  %v9810_v53 = vpop.f32.mrf.mxu0  ;;  %s14718_s12 = smov [#allocation2]  }
 0x88c   :  { %v13494_v5 = vor.u32 %v14485_v11, %v13493_v20  ;;  %s10269_s2 = sshll.u32 %s14718_s12, 4  ;;  %s10270_s2 = int_to_ptr.vmem [resolvable:$true] %s10269_s2 }
 0x88e   :  { %v9781_v41 = vpop.f32.mrf.mxu3  ;;  %10122 = vmatpush.bf16.msrb.mxu3 %v13494_v5  ;;  %v9868_v3 = vpop.f32.mrf.mxu2 }
 0x88f   :  { %v9782_v6 = vadd.f32 %v9781_v41, %v24352_v27 }
 0x891   :  { %v9811_v62 = vadd.f32 %v9810_v53, %v9782_v6 }
 0x893   :  { %v9812_v8 = vpop.f32.mrf.mxu0  ;;  %v9840_v46 = vadd.f32 %v9839_v38, %v9811_v62 }
 0x895   :  { %v9869_v41 = vadd.f32 %v9868_v3, %v9840_v46 }
 0x896   :  { %v9783_v55 = vpop.f32.mrf.mxu3  ;;  %v9870_v63 = vpop.f32.mrf.mxu2 }
 0x897   :  { %v9784_v58 = vadd.f32 %v9783_v55, %v24376_v4 }
 0x899   :  { %v9813_v34 = vadd.f32 %v9812_v8, %v9784_v58 }
 0x89b   :  { %10017 = vmatmul.bf16.gmra.mxu3 %v25086_v17  ;;  %10104 = vmatmul.bf16.gmra.mxu2 %v25087_v50  ;;  %v9815_v49 = vpop.f32.mrf.mxu0  ;;  %v9844_v17 = vpop.f32.mrf.mxu1 }
 0x89e   :  { %v9786_v1 = vpop.f32.mrf.mxu3  ;;  %v9873_v50 = vpop.f32.mrf.mxu2 }
 0x89f   :  { %v9787_v4 = vadd.f32 %v9786_v1, %v24397_v51 }
 0x8a1   :  { %v9816_v38 = vadd.f32 %v9815_v49, %v9787_v4 }
 0x8a3   :  { %v9817_v2 = vpop.f32.mrf.mxu0 }
 0x8a6   :  { %v24468_v12 = vpop.f32.mrf.mxu3  ;;  %v24482_v28 = vpop.f32.mrf.mxu2 }
 0x8ab   :  { %10022 = vmatmul.bf16.gmra.mxu3 %v25150_v32  ;;  %10109 = vmatmul.bf16.gmra.mxu2 %v25151_v47  ;;  %v24479_v32 = vpop.f32.mrf.mxu1  ;;  %v9808_v47 = vadd.f32 %v9807_v14, %v9779_v9  ;;  %v9820_v54 = vpop.f32.mrf.mxu0 }
 0x8ad   :  { %v9837_v31 = vadd.f32 %v9836_v23, %v9808_v47 }
 0x8ae   :  { %v24472_v48 = vpop.f32.mrf.mxu3  ;;  %v24489_v52 = vpop.f32.mrf.mxu2 }
 0x8af   :  { %v9866_v13 = vadd.f32 %v9865_v16, %v9837_v31  ;;  %v9842_v16 = vadd.f32 %v9841_v56, %v9813_v34  ;;  %v9789_v56 = vadd.f32 %v24468_v12, %v24409_v21  ;;  %v9792_v12 = vadd.f32 %v24472_v48, %v24424_v0 }
 0x8b1   :  { %v9871_v53 = vadd.f32 %v9870_v63, %v9842_v16  ;;  %v9818_v63 = vadd.f32 %v9817_v2, %v9789_v56  ;;  %v9821_v2 = vadd.f32 %v9820_v54, %v9792_v12 }
 0x8b3   :  { %v24485_v37 = vpop.f32.mrf.mxu1  ;;  %v9822_v27 = vpop.f32.mrf.mxu0  ;;  %v9847_v21 = vadd.f32 %v24479_v32, %v9818_v63 }
 0x8b4   :  { %v9850_v32 = vadd.f32 %v24485_v37, %v9821_v2 }
 0x8b6   :  { %v24475_v26 = vpop.f32.mrf.mxu3  ;;  %v9880_v55 = vpop.f32.mrf.mxu2 }
 0x8b7   :  { %v9794_v0 = vadd.f32 %v24475_v26, %v24436_v42 }
 0x8b9   :  { %v9823_v54 = vadd.f32 %v9822_v27, %v9794_v0 }
 0x8bb   :  { %10123 = vmatmul.bf16.vlgmr.msrb.gmra.mxu3 %v25201_v33  ;;  %v24494_v18 = vpop.f32.mrf.mxu0 }
 0x8be   :  { %v9892_v24 = vpop.f32.mrf.mxu3  ;;  %v24502_v9 = vpop.f32.mrf.mxu2 }
 0x8bf   :  { %v9893_v15 = vadd.f32 %v9892_v24, %v9864_v30 }
 0x8c1   :  { %14636 = vtanh.f32 %v9893_v15 }
 0x8c2   :  { %14638 = vtanh.f32 %v24322_v45  ;;  %v9851_v45 = vpop.f32.mrf.mxu1 }
 0x8c6   :  { %v9894_v33 = vpop.f32.mrf.mxu3 }
 0x8c7   :  { %v14637_v40 = vpop.eup %14636  ;;  %v9895_v36 = vadd.f32 %v9894_v33, %v9866_v13 }
 0x8c8   :  { %v10202_v25 = vpack.c.bf16 %v14637_v40, %v14635_v35  ;;  %v14639_v14 = vpop.eup %14638 }
 0x8c9   :  { %14640 = vtanh.f32 %v9895_v36 }
 0x8ca   :  { %10234 = vst [vmem:[#allocation2 + $0x10] sm:$0xff] %v10202_v25  ;;  %14642 = vtanh.f32 %v24349_v57  ;;  %v9845_v57 = vadd.f32 %v9844_v17, %v9816_v38  ;;  %v24499_v51 = vpop.f32.mrf.mxu1  ;;  %v9852_v25 = vadd.f32 %v9851_v45, %v9823_v54 }
 0x8cb   :  { %10128 = vmatmul.bf16.gmra.mxu3 %v25204_v60 }
 0x8cc   :  { %v9874_v1 = vadd.f32 %v9873_v50, %v9845_v57  ;;  %v9876_v50 = vadd.f32 %v24482_v28, %v9847_v21  ;;  %v9879_v28 = vadd.f32 %v24489_v52, %v9850_v32  ;;  %v9881_v46 = vadd.f32 %v9880_v55, %v9852_v25 }
 0x8ce   :  { %v9897_v23 = vpop.f32.mrf.mxu3 }
 0x8cf   :  { %v14641_v20 = vpop.eup %14640  ;;  %v9898_v11 = vadd.f32 %v9897_v23, %v9869_v41 }
 0x8d0   :  { %v10206_v5 = vpack.c.bf16 %v14641_v20, %v14639_v14  ;;  %v14643_v60 = vpop.eup %14642 }
 0x8d1   :  { %14644 = vtanh.f32 %v9898_v11 }
 0x8d2   :  { %10239 = vst [vmem:[#allocation2 + $0x2c] sm:$0xff] %v10206_v5  ;;  %14646 = vtanh.f32 %v24373_v43  ;;  %v24504_v43 = vpop.f32.mrf.mxu0 }
 0x8d6   :  { %v9899_v3 = vpop.f32.mrf.mxu3 }
 0x8d7   :  { %v14645_v8 = vpop.eup %14644  ;;  %v9900_v61 = vadd.f32 %v9899_v3, %v9871_v53 }
 0x8d8   :  { %v10210_v7 = vpack.c.bf16 %v14645_v8, %v14643_v60  ;;  %v14647_v49 = vpop.eup %14646 }
 0x8d9   :  { %14648 = vtanh.f32 %v9900_v61 }
 0x8da   :  { %10243 = vst [vmem:[#allocation2 + $0x48] sm:$0xff] %v10210_v7  ;;  %14650 = vtanh.f32 %v24394_v22  ;;  %v24514_v22 = vpop.f32.mrf.mxu2  ;;  %v24519_v48 = vpop.f32.mrf.mxu0 }
 0x8db   :  { %10133 = vmatmul.bf16.gmra.mxu3 %v21441_v39  ;;  %v24510_v39 = vpop.f32.mrf.mxu1 }
 0x8de   :  { %v9902_v30 = vpop.f32.mrf.mxu3 }
 0x8df   :  { %v14649_v47 = vpop.eup %14648  ;;  %v9903_v24 = vadd.f32 %v9902_v30, %v9874_v1  ;;  %v24558_v30 = vperm.slane %v24043_v44, 6 }
 0x8e0   :  { %v10214_v17 = vpack.c.bf16 %v14649_v47, %v14647_v49  ;;  %v14651_v15 = vpop.eup %14650 }
 0x8e1   :  { %14652 = vtanh.f32 %v9903_v24  ;;  %v9922_v24 = vadd.f32 %v24494_v18, %v24558_v30 }
 0x8e2   :  { %10247 = vst [vmem:[#allocation2 + $0x64] sm:$0xff] %v10214_v17  ;;  %14654 = vtanh.f32 %v24406_v59  ;;  %v9984_v42 = vpop.f32.mrf.mxu2  ;;  %v24526_v26 = vpop.f32.mrf.mxu0 }
 0x8e3   :  { %v24523_v33 = vpop.f32.mrf.mxu1  ;;  %v9951_v17 = vadd.f32 %v24499_v51, %v9922_v24 }
 0x8e6   :  { %v9904_v31 = vpop.f32.mrf.mxu3 }
 0x8e7   :  { %v14653_v6 = vpop.eup %14652  ;;  %v9905_v13 = vadd.f32 %v9904_v31, %v9876_v50  ;;  %v9980_v50 = vadd.f32 %v24502_v9, %v9951_v17  ;;  %v9924_v31 = vadd.f32 %v24504_v43, %v24558_v30  ;;  %v9927_v9 = vadd.f32 %v24519_v48, %v24558_v30 }
 0x8e8   :  { %v10218_v62 = vpack.c.bf16 %v14653_v6, %v14651_v15  ;;  %v14655_v35 = vpop.eup %14654 }
 0x8e9   :  { %14656 = vtanh.f32 %v9905_v13  ;;  %v9953_v44 = vadd.f32 %v24510_v39, %v9924_v31  ;;  %v9956_v54 = vadd.f32 %v24523_v33, %v9927_v9 }
 0x8ea   :  { %10251 = vst [vmem:[#allocation2 + $0x80] sm:$0xff] %v10218_v62  ;;  %14658 = vtanh.f32 %v24421_v29  ;;  %v9986_v14 = vpop.f32.mrf.mxu2  ;;  %v24529_v23 = vpop.f32.mrf.mxu0 }
 0x8eb   :  { %10138 = vmatmul.bf16.gmra.mxu3 %v21413_v10  ;;  %v9957_v41 = vpop.f32.mrf.mxu1  ;;  %v9982_v18 = vadd.f32 %v24514_v22, %v9953_v44  ;;  %v9929_v22 = vadd.f32 %v24526_v26, %v24558_v30 }
 0x8ee   :  { %v9907_v59 = vpop.f32.mrf.mxu3 }
 0x8ef   :  { %v14657_v40 = vpop.eup %14656  ;;  %v9908_v36 = vadd.f32 %v9907_v59, %v9879_v28 }
 0x8f0   :  { %v10222_v37 = vpack.c.bf16 %v14657_v40, %v14655_v35  ;;  %v14659_v10 = vpop.eup %14658 }
 0x8f1   :  { %14660 = vtanh.f32 %v9908_v36  ;;  %v9985_v36 = vadd.f32 %v9984_v42, %v9956_v54 }
 0x8f2   :  { %10255 = vst [vmem:[#allocation2 + $0x9c] sm:$0xff] %v10222_v37  ;;  %14662 = vtanh.f32 %v24433_v19  ;;  %v24533_v16 = vpop.f32.mrf.mxu2  ;;  %v24535_v55 = vpop.f32.mrf.mxu0 }
 0x8f3   :  { %v24531_v5 = vpop.f32.mrf.mxu1 }
 0x8f6   :  { %v9909_v58 = vpop.f32.mrf.mxu3 }
 0x8f7   :  { %v14661_v52 = vpop.eup %14660  ;;  %v9910_v27 = vadd.f32 %v9909_v58, %v9881_v46  ;;  %v9958_v58 = vadd.f32 %v9957_v41, %v9929_v22 }
 0x8f8   :  { %v10226_v34 = vpack.c.bf16 %v14661_v52, %v14659_v10  ;;  %v14663_v29 = vpop.eup %14662 }
 0x8f9   :  { %14664 = vtanh.f32 %v9910_v27  ;;  %v9987_v33 = vadd.f32 %v9986_v14, %v9958_v58 }
 0x8fa   :  { %10259 = vst [vmem:[#allocation2 + $0xb8] sm:$0xff] %v10226_v34  ;;  %v24539_v38 = vpop.f32.mrf.mxu2  ;;  %v24541_v60 = vpop.f32.mrf.mxu0 }
 0x8fb   :  { %v24537_v19 = vpop.f32.mrf.mxu1 }
 0x8fe   :  { %v10008_v20 = vpop.f32.mrf.mxu3 }
 0x8ff   :  { %v14665_v11 = vpop.eup %14664  ;;  %v10009_v15 = vadd.f32 %v10008_v20, %v9980_v50 }
 0x900   :  { %v10230_v45 = vpack.c.bf16 %v14665_v11, %v14663_v29 }
 0x902   :  { %10263 = vst [vmem:[#allocation2 + $0xd4] sm:$0xff] %v10230_v45  ;;  %v24545_v61 = vpop.f32.mrf.mxu2  ;;  %v24547_v7 = vpop.f32.mrf.mxu0 }
 0x903   :  { %v24543_v3 = vpop.f32.mrf.mxu1 }
 0x906   :  { %v10010_v4 = vpop.f32.mrf.mxu3 }
 0x907   :  { %v10011_v0 = vadd.f32 %v10010_v4, %v9982_v18  ;;  %v9932_v4 = vadd.f32 %v24529_v23, %v24558_v30  ;;  %v9934_v23 = vadd.f32 %v24535_v55, %v24558_v30  ;;  %v9937_v55 = vadd.f32 %v24541_v60, %v24558_v30 }
 0x908   :  { %v9939_v60 = vadd.f32 %v24547_v7, %v24558_v30 }
 0x909   :  { %v9961_v41 = vadd.f32 %v24531_v5, %v9932_v4  ;;  %v9963_v5 = vadd.f32 %v24537_v19, %v9934_v23  ;;  %v9966_v9 = vadd.f32 %v24543_v3, %v9937_v55 }
 0x90a   :  { %v24553_v1 = vpop.f32.mrf.mxu2  ;;  %v10037_v63 = vpop.f32.mrf.mxu0 }
 0x90b   :  { %v24551_v56 = vpop.f32.mrf.mxu1  ;;  %v10038_v13 = vadd.f32 %v10037_v63, %v10009_v15  ;;  %v9990_v17 = vadd.f32 %v24533_v16, %v9961_v41  ;;  %v9992_v16 = vadd.f32 %v24539_v38, %v9963_v5  ;;  %v9995_v38 = vadd.f32 %v24545_v61, %v9966_v9 }
 0x90c   :  { %v9968_v3 = vadd.f32 %v24551_v56, %v9939_v60 }
 0x90e   :  { %v10013_v53 = vpop.f32.mrf.mxu3 }
 0x90f   :  { %v10014_v25 = vadd.f32 %v10013_v53, %v9985_v36 }
 0x912   :  { %v10095_v21 = vpop.f32.mrf.mxu2  ;;  %v10039_v2 = vpop.f32.mrf.mxu0 }
 0x913   :  { %v10066_v47 = vpop.f32.mrf.mxu1  ;;  %v10040_v59 = vadd.f32 %v10039_v2, %v10011_v0 }
 0x914   :  { %v10067_v51 = vadd.f32 %v10066_v47, %v10038_v13 }
 0x916   :  { %v10015_v8 = vpop.f32.mrf.mxu3  ;;  %v10096_v35 = vadd.f32 %v10095_v21, %v10067_v51 }
 0x917   :  { %v10016_v45 = vadd.f32 %v10015_v8, %v9987_v33 }
 0x91a   :  { %v10097_v32 = vpop.f32.mrf.mxu2  ;;  %v10042_v28 = vpop.f32.mrf.mxu0 }
 0x91b   :  { %v10068_v6 = vpop.f32.mrf.mxu1  ;;  %v10043_v27 = vadd.f32 %v10042_v28, %v10014_v25 }
 0x91c   :  { %v10069_v37 = vadd.f32 %v10068_v6, %v10040_v59 }
 0x91e   :  { %v24549_v57 = vpop.f32.mrf.mxu3  ;;  %v10098_v52 = vadd.f32 %v10097_v32, %v10069_v37 }
 0x91f   :  { %v10019_v8 = vadd.f32 %v24549_v57, %v9990_v17 }
 0x922   :  { %v10100_v46 = vpop.f32.mrf.mxu2  ;;  %v10044_v10 = vpop.f32.mrf.mxu0 }
 0x923   :  { %v10071_v43 = vpop.f32.mrf.mxu1  ;;  %v10045_v63 = vadd.f32 %v10044_v10, %v10016_v45 }
 0x924   :  { %v10072_v42 = vadd.f32 %v10071_v43, %v10043_v27 }
 0x926   :  { %v24555_v49 = vpop.f32.mrf.mxu3  ;;  %v10101_v53 = vadd.f32 %v10100_v46, %v10072_v42 }
 0x927   :  { %v10021_v28 = vadd.f32 %v24555_v49, %v9992_v16 }
 0x92a   :  { %v10102_v26 = vpop.f32.mrf.mxu2  ;;  %v10047_v47 = vpop.f32.mrf.mxu0 }
 0x92b   :  { %v10073_v20 = vpop.f32.mrf.mxu1  ;;  %v10048_v6 = vadd.f32 %v10047_v47, %v10019_v8 }
 0x92c   :  { %v10074_v2 = vadd.f32 %v10073_v20, %v10045_v63 }
 0x92e   :  { %v24563_v12 = vpop.f32.mrf.mxu3  ;;  %v10103_v31 = vadd.f32 %v10102_v26, %v10074_v2 }
 0x92f   :  { %v10024_v49 = vadd.f32 %v24563_v12, %v9995_v38 }
 0x932   :  { %v10105_v44 = vpop.f32.mrf.mxu2  ;;  %v10049_v51 = vpop.f32.mrf.mxu0 }
 0x933   :  { %v10076_v15 = vpop.f32.mrf.mxu1 }
 0x934   :  { %v10077_v57 = vadd.f32 %v10076_v15, %v10048_v6 }
 0x936   :  { %v24569_v62 = vpop.f32.mrf.mxu3  ;;  %v10106_v54 = vadd.f32 %v10105_v44, %v10077_v57 }
 0x93a   :  { %v10107_v36 = vpop.f32.mrf.mxu2  ;;  %v10052_v25 = vpop.f32.mrf.mxu0 }
 0x93b   :  { %v10078_v19 = vpop.f32.mrf.mxu1  ;;  %v10053_v22 = vadd.f32 %v10052_v25, %v10024_v49 }
 0x93e   :  { %v10124_v40 = vpop.f32.mrf.mxu3 }
 0x93f   :  { %v10125_v39 = vadd.f32 %v10124_v40, %v10096_v35  ;;  %v10050_v35 = vadd.f32 %v10049_v51, %v10021_v28 }
 0x941   :  { %14666 = vtanh.f32 %v10125_v39  ;;  %v10079_v37 = vadd.f32 %v10078_v19, %v10050_v35 }
 0x942   :  { %v10110_v33 = vpop.f32.mrf.mxu2 }
 0x943   :  { %v10108_v46 = vadd.f32 %v10107_v36, %v10079_v37  ;;  %v10081_v10 = vpop.f32.mrf.mxu1 }
 0x946   :  { %v10126_v48 = vpop.f32.mrf.mxu3 }
 0x947   :  { %v14667_v34 = vpop.eup %14666  ;;  %v10127_v29 = vadd.f32 %v10126_v48, %v10098_v52  ;;  %v9997_v52 = vadd.f32 %v24553_v1, %v9968_v3 }
 0x948   :  { %v10203_v11 = vpack.c.bf16 %v14667_v34, %v14667_v34  ;;  %v10082_v34 = vadd.f32 %v10081_v10, %v10053_v22 }
 0x949   :  { %14668 = vtanh.f32 %v10127_v29  ;;  %v10026_v12 = vadd.f32 %v24569_v62, %v9997_v52  ;;  %v10054_v29 = vpop.f32.mrf.mxu0 }
 0x94a   :  { %10236 = vst.msk [vmem:[#allocation2 + $0x18] sm:$0xf] %vm10235_vm3, %v10203_v11  ;;  %v10111_v7 = vadd.f32 %v10110_v33, %v10082_v34  ;;  %v10112_v1 = vpop.f32.mrf.mxu2 }
 0x94b   :  { %v10055_v30 = vadd.f32 %v10054_v29, %v10026_v12  ;;  %v10083_v42 = vpop.f32.mrf.mxu1 }
 0x94d   :  { %v10084_v4 = vadd.f32 %v10083_v42, %v10055_v30 }
 0x94e   :  { %v10129_v24 = vpop.f32.mrf.mxu3 }
 0x94f   :  { %v14669_v14 = vpop.eup %14668  ;;  %v10130_v21 = vadd.f32 %v10129_v24, %v10101_v53  ;;  %v10113_v26 = vadd.f32 %v10112_v1, %v10084_v4 }
 0x950   :  { %v10207_v50 = vpack.c.bf16 %v14669_v14, %v14669_v14 }
 0x951   :  { %14670 = vtanh.f32 %v10130_v21 }
 0x952   :  { %10240 = vst.msk [vmem:[#allocation2 + $0x34] sm:$0xf] %vm10235_vm3, %v10207_v50 }
 0x956   :  { %v10131_v13 = vpop.f32.mrf.mxu3 }
 0x957   :  { %v14671_v18 = vpop.eup %14670  ;;  %v10132_v32 = vadd.f32 %v10131_v13, %v10103_v31 }
 0x958   :  { %v10211_v0 = vpack.c.bf16 %v14671_v18, %v14671_v18 }
 0x959   :  { %14672 = vtanh.f32 %v10132_v32 }
 0x95a   :  { %10244 = vst.msk [vmem:[#allocation2 + $0x50] sm:$0xf] %vm10235_vm3, %v10211_v0 }
 0x95e   :  { %v10134_v59 = vpop.f32.mrf.mxu3 }
 0x95f   :  { %v14673_v43 = vpop.eup %14672  ;;  %v10135_v40 = vadd.f32 %v10134_v59, %v10106_v54 }
 0x960   :  { %v10215_v39 = vpack.c.bf16 %v14673_v43, %v14673_v43 }
 0x961   :  { %14674 = vtanh.f32 %v10135_v40 }
 0x962   :  { %10248 = vst.msk [vmem:[#allocation2 + $0x6c] sm:$0xf] %vm10235_vm3, %v10215_v39 }
 0x966   :  { %v10136_v58 = vpop.f32.mrf.mxu3 }
 0x967   :  { %v14675_v61 = vpop.eup %14674  ;;  %v10137_v27 = vadd.f32 %v10136_v58, %v10108_v46 }
 0x968   :  { %v10219_v48 = vpack.c.bf16 %v14675_v61, %v14675_v61 }
 0x969   :  { %14676 = vtanh.f32 %v10137_v27 }
 0x96a   :  { %10252 = vst.msk [vmem:[#allocation2 + $0x88] sm:$0xf] %vm10235_vm3, %v10219_v48 }
 0x96e   :  { %v10139_v56 = vpop.f32.mrf.mxu3 }
 0x96f   :  { %v14677_v20 = vpop.eup %14676  ;;  %v10140_v11 = vadd.f32 %v10139_v56, %v10111_v7 }
 0x970   :  { %v10223_v45 = vpack.c.bf16 %v14677_v20, %v14677_v20 }
 0x971   :  { %14678 = vtanh.f32 %v10140_v11 }
 0x972   :  { %10256 = vst.msk [vmem:[#allocation2 + $0xa4] sm:$0xf] %vm10235_vm3, %v10223_v45 }
 0x976   :  { %v10141_v41 = vpop.f32.mrf.mxu3 }
 0x977   :  { %v14679_v62 = vpop.eup %14678  ;;  %v10142_v53 = vadd.f32 %v10141_v41, %v10113_v26 }
 0x978   :  { %v10227_v63 = vpack.c.bf16 %v14679_v62, %v14679_v62 }
 0x979   :  { %14680 = vtanh.f32 %v10142_v53 }
 0x97a   :  { %10260 = vst.msk [vmem:[#allocation2 + $0xc0] sm:$0xf] %vm10235_vm3, %v10227_v63 }
 0x97f   :  { %v14681_v47 = vpop.eup %14680 }
 0x980   :  { %v10231_v24 = vpack.c.bf16 %v14681_v47, %v14681_v47 }
 0x982   :  { %10264 = vst.msk [vmem:[#allocation2 + $0xdc] sm:$0xf] %vm10235_vm3, %v10231_v24 }
 0x983   :  { %10277 = dma.vmem_to_hbm [thread:$0]  %s10270_s2, 3584, %s10272_s20, [#allocation3], %s14719_s3, %s14719_s3, %s14720_s8  }
 0x984   :  { %14716 = dma.done.wait [#allocation3], 3584  }
 0x985   :  { %14717 = vsyncadd [#allocation3], 4294963712 }
 0x986   :  { %10282 = vsyncpa [#allocation3], 1 }

</bundles_post_ra>
